<compile_context>
chip_gen: v7x
topology: tpu7x:2x2x1
jax: 0.10.0
libtpu: 0.0.40
codegen_flags: <defaults>
</compile_context>

<pallas_src>
import functools

import jax
import jax.numpy as jnp
from jax import lax
from jax.experimental import pallas as pl
from jax.experimental.pallas import tpu as pltpu

BT = 8  # images per grid step (multiple of 8 -> sublane-aligned output block)


# ----------------------------------------------------------------------------
# Fused LeNet kernel: one grid step = BT images
# ----------------------------------------------------------------------------
def _lenet_kernel(x_ref,
                  w1_ref, b1_ref, ce1_ref, co1_ref, re1_ref, ro1_ref,
                  w2_ref, b2_ref, ce2_ref, co2_ref, re2_ref, ro2_ref,
                  wf1_ref, bf1_ref, wf2_ref, bf2_ref, wf3_ref, bf3_ref,
                  o_ref, flat_ref):
    dot = functools.partial(jnp.dot, preferred_element_type=jnp.float32)
    bt = x_ref.shape[0]

    for i in range(bt):                                   # static unroll over tile
        x = x_ref[i]                                      # (28, 28)

        # --- conv1 (5x5, 1->6) + bias, dj-folded taps: 5 matmuls, 2 accumulators
        acc_e = dot(x[0:24, :], w1_ref[0])
        acc_o = dot(x[1:25, :], w1_ref[1])
        acc_e = acc_e + dot(x[2:26, :], w1_ref[2])
        acc_o = acc_o + dot(x[3:27, :], w1_ref[3])
        acc_e = acc_e + dot(x[4:28, :], w1_ref[4])
        a1 = jnp.maximum(acc_e + acc_o + b1_ref[...], 0.0)            # (24, 144)

        # --- maxpool1 2x2/2 via exact 0/1 selection matmuls -> p1[pi, c*12+pj]
        cm1 = jnp.maximum(dot(a1, ce1_ref[...]), dot(a1, co1_ref[...]))   # (24, 72)
        p1 = jnp.maximum(dot(re1_ref[...], cm1), dot(ro1_ref[...], cm1))  # (12, 72)

        # --- conv2 (5x5, 6->16) + bias, dj-folded taps
        acc_e = dot(p1[0:8, :], w2_ref[0])
        acc_o = dot(p1[1:9, :], w2_ref[1])
        acc_e = acc_e + dot(p1[2:10, :], w2_ref[2])
        acc_o = acc_o + dot(p1[3:11, :], w2_ref[3])
        acc_e = acc_e + dot(p1[4:12, :], w2_ref[4])
        a2 = jnp.maximum(acc_e + acc_o + b2_ref[...], 0.0)            # (8, 128)

        # --- maxpool2 -> p2[pi, c2*4+pj]
        cm2 = jnp.maximum(dot(a2, ce2_ref[...]), dot(a2, co2_ref[...]))   # (8, 64)
        p2 = jnp.maximum(dot(re2_ref[...], cm2), dot(ro2_ref[...], cm2))  # (4, 64)

        # --- stage flattened activations (layout pi*64 + c2*4 + pj) in scratch
        for pi in range(4):
            flat_ref[i:i + 1, 64 * pi:64 * (pi + 1)] = p2[pi:pi + 1, :]

    # --- batched FC stack on the whole tile ----------------------------------
    flat = flat_ref[...]                                               # (bt, 256)
    y = jnp.maximum(dot(flat, wf1_ref[...]) + bf1_ref[...], 0.0)       # (bt, 120)
    y = jnp.maximum(dot(y, wf2_ref[...]) + bf2_ref[...], 0.0)          # (bt, 84)
    y = dot(y, wf3_ref[...]) + bf3_ref[...]                            # (bt, 128)
    o_ref[...] = y.astype(o_ref.dtype)


# ----------------------------------------------------------------------------
# Host-side, one-time weight packing (folded / pre-transposed / padded layouts)
# ----------------------------------------------------------------------------
def pack_params(raw):
    w1, b1, w2, b2, wf1, bf1, wf2, bf2, wf3, bf3 = raw
    f32 = jnp.float32

    # conv1 folded tap matrices: w1f[di][j, c*24+oj] = sum_dj w1[c,0,di,dj]*[j==oj+dj]
    s1 = (jnp.arange(28)[None, :, None]
          == (jnp.arange(24)[None, None, :] + jnp.arange(5)[:, None, None])
          ).astype(f32)                                            # (dj, j, oj)
    w1f = jnp.einsum("cde,ejo->djco", w1[:, 0], s1).reshape(5, 28, 144)
    b1r = jnp.repeat(b1, 24)[None, :]                              # (1, 144)

    # pool1 selection matrices (exact 0/1)
    c_idx = jnp.repeat(jnp.arange(6), 12)
    p_idx = jnp.tile(jnp.arange(12), 6)
    cols = c_idx * 12 + p_idx
    ce1 = jnp.zeros((144, 72), f32).at[c_idx * 24 + 2 * p_idx, cols].set(1.0)
    co1 = jnp.zeros((144, 72), f32).at[c_idx * 24 + 2 * p_idx + 1, cols].set(1.0)
    re1 = jnp.zeros((12, 24), f32).at[jnp.arange(12), 2 * jnp.arange(12)].set(1.0)
    ro1 = jnp.zeros((12, 24), f32).at[jnp.arange(12), 2 * jnp.arange(12) + 1].set(1.0)

    # conv2 folded tap matrices: w2f[di][c*12+j, c2*8+oj] = sum_dj w2[c2,c,di,dj]*[j==oj+dj]
    s2 = (jnp.arange(12)[None, :, None]
          == (jnp.arange(8)[None, None, :] + jnp.arange(5)[:, None, None])
          ).astype(f32)                                            # (dj, j, oj)
    w2f = jnp.einsum("xcde,ejo->dcjxo", w2, s2).reshape(5, 72, 128)
    b2r = jnp.repeat(b2, 8)[None, :]                               # (1, 128)

    # pool2 selection matrices
    c2_idx = jnp.repeat(jnp.arange(16), 4)
    q_idx = jnp.tile(jnp.arange(4), 16)
    cols2 = c2_idx * 4 + q_idx
    ce2 = jnp.zeros((128, 64), f32).at[c2_idx * 8 + 2 * q_idx, cols2].set(1.0)
    co2 = jnp.zeros((128, 64), f32).at[c2_idx * 8 + 2 * q_idx + 1, cols2].set(1.0)
    re2 = jnp.zeros((4, 8), f32).at[jnp.arange(4), 2 * jnp.arange(4)].set(1.0)
    ro2 = jnp.zeros((4, 8), f32).at[jnp.arange(4), 2 * jnp.arange(4) + 1].set(1.0)

    # fc1 flattened to scratch layout: row pi*64 + c2*4 + pj <- wf1[:, c2*16+pi*4+pj]
    wf1f = wf1.reshape(120, 16, 4, 4).transpose(2, 1, 3, 0).reshape(256, 120)

    # fc3 padded to 128 output lanes (lane-dense final store)
    wf3p = jnp.zeros((84, 128), f32).at[:, :10].set(wf3.T)
    bf3p = jnp.zeros((1, 128), f32).at[:, :10].set(bf3)

    return (w1f, b1r, ce1, co1, re1, ro1,
            w2f, b2r, ce2, co2, re2, ro2,
            wf1f, bf1[None, :], wf2.T, bf2[None, :], wf3p, bf3p)


# ----------------------------------------------------------------------------
# Forward wrapper: one pallas_call, grid over batch tiles
# ----------------------------------------------------------------------------
def lenet_forward(packed, x, bt=BT):
    """x: (B, 1, 28, 28) float32 -> logits (B, 10) float32."""
    B = x.shape[0]
    assert x.shape[1:] == (1, 28, 28), x.shape
    x3 = x.reshape(B, 28, 28).astype(jnp.float32)

    Bp = ((B + bt - 1) // bt) * bt
    if Bp != B:
        x3 = jnp.pad(x3, ((0, Bp - B), (0, 0), (0, 0)))

    in_specs = [pl.BlockSpec((bt, 28, 28), lambda b: (b, 0, 0))]
    for w in packed:
        in_specs.append(pl.BlockSpec(w.shape, lambda b, _nd=w.ndim: (0,) * _nd))

    out = pl.pallas_call(
        _lenet_kernel,
        out_shape=jax.ShapeDtypeStruct((Bp, 128), jnp.float32),
        grid=(Bp // bt,),
        in_specs=in_specs,
        out_specs=pl.BlockSpec((bt, 128), lambda b: (b, 0)),
        scratch_shapes=[pltpu.VMEM((bt, 256), jnp.float32)],
        compiler_params=pltpu.CompilerParams(dimension_semantics=("parallel",)),
    )(x3, *packed)
    return out[:B, :10]


# ----------------------------------------------------------------------------
# Pure-JAX reference (matches the PyTorch module) for correctness check
# ----------------------------------------------------------------------------
def lenet_reference(raw, x):
    w1, b1, w2, b2, wf1, bf1, wf2, bf2, wf3, bf3 = raw
    dn = ("NCHW", "OIHW", "NCHW")
    hi = lax.Precision.HIGHEST
    y = lax.conv_general_dilated(x, w1, (1, 1), "VALID",
                                 dimension_numbers=dn, precision=hi)
    y = jnp.maximum(y + b1[None, :, None, None], 0.0)
    y = y.reshape(y.shape[0], y.shape[1], 12, 2, 12, 2).max(axis=(3, 5))
    y = lax.conv_general_dilated(y, w2, (1, 1), "VALID",
                                 dimension_numbers=dn, precision=hi)
    y = jnp.maximum(y + b2[None, :, None, None], 0.0)
    y = y.reshape(y.shape[0], y.shape[1], 4, 2, 4, 2).max(axis=(3, 5))
    y = y.reshape(y.shape[0], -1)
    y = jnp.maximum(jnp.dot(y, wf1.T, precision=hi) + bf1, 0.0)
    y = jnp.maximum(jnp.dot(y, wf2.T, precision=hi) + bf2, 0.0)
    return jnp.dot(y, wf3.T, precision=hi) + bf3


def init_raw_params(key):
    ks = jax.random.split(key, 10)
    f32 = jnp.float32

    def w(k, shape, fan_in):
        return jax.random.normal(k, shape, f32) / (float(fan_in) ** 0.5)

    def b(k, shape):
        return 0.05 * jax.random.normal(k, shape, f32)

    return (w(ks[0], (6, 1, 5, 5), 25), b(ks[1], (6,)),
            w(ks[2], (16, 6, 5, 5), 150), b(ks[3], (16,)),
            w(ks[4], (120, 256), 256), b(ks[5], (120,)),
            w(ks[6], (84, 120), 120), b(ks[7], (84,)),
            w(ks[8], (10, 84), 84), b(ks[9], (10,)))


if __name__ == "__main__":
    key = jax.random.PRNGKey(0)
    k_par, k_x = jax.random.split(key)
    raw = init_raw_params(k_par)
    packed = pack_params(raw)          # host-side, once (not per forward)

    B = 16                             # -> grid of 2 batch tiles of BT=8
    x = jax.random.normal(k_x, (B, 1, 28, 28), jnp.float32)

    fwd = jax.jit(lenet_forward)
    out = jax.block_until_ready(fwd(packed, x))
    assert out.shape == (B, 10), out.shape
    assert bool(jnp.all(jnp.isfinite(out)))

    ref = lenet_reference(raw, x)
    err = float(jnp.max(jnp.abs(out - ref)))
    assert err < 2e-2, f"max abs err vs reference: {err}"
    print("KERNEL_OK")
</pallas_src>

<mosaic_0001>
module attributes {stable_mosaic.version = 11 : i64} {
  func.func @_lenet_kernel(%arg0: i32, %arg1: memref<8x28x28xf32, #tpu.memory_space<vmem>>, %arg2: memref<5x28x144xf32, #tpu.memory_space<vmem>>, %arg3: memref<1x144xf32, #tpu.memory_space<vmem>>, %arg4: memref<144x72xf32, #tpu.memory_space<vmem>>, %arg5: memref<144x72xf32, #tpu.memory_space<vmem>>, %arg6: memref<12x24xf32, #tpu.memory_space<vmem>>, %arg7: memref<12x24xf32, #tpu.memory_space<vmem>>, %arg8: memref<5x72x128xf32, #tpu.memory_space<vmem>>, %arg9: memref<1x128xf32, #tpu.memory_space<vmem>>, %arg10: memref<128x64xf32, #tpu.memory_space<vmem>>, %arg11: memref<128x64xf32, #tpu.memory_space<vmem>>, %arg12: memref<4x8xf32, #tpu.memory_space<vmem>>, %arg13: memref<4x8xf32, #tpu.memory_space<vmem>>, %arg14: memref<256x120xf32, #tpu.memory_space<vmem>>, %arg15: memref<1x120xf32, #tpu.memory_space<vmem>>, %arg16: memref<120x84xf32, #tpu.memory_space<vmem>>, %arg17: memref<1x84xf32, #tpu.memory_space<vmem>>, %arg18: memref<84x128xf32, #tpu.memory_space<vmem>>, %arg19: memref<1x128xf32, #tpu.memory_space<vmem>>, %arg20: memref<8x128xf32, #tpu.memory_space<vmem>>, %arg21: memref<8x256xf32, #tpu.memory_space<vmem>>) attributes {dimension_semantics = [#tpu.dimension_semantics<parallel>], iteration_bounds = array<i64: 2>, scalar_prefetch = 0 : i64, scratch_operands = 1 : i64, tpu.core_type = #tpu.core_type<tc>, window_params = [{transform_indices = @transform_0, window_bounds = array<i64: 8, 28, 28>}, {pipeline_mode = #tpu.pipeline_mode<synchronous>, transform_indices = @transform_1, window_bounds = array<i64: 5, 28, 144>}, {pipeline_mode = #tpu.pipeline_mode<synchronous>, transform_indices = @transform_2, window_bounds = array<i64: 1, 144>}, {pipeline_mode = #tpu.pipeline_mode<synchronous>, transform_indices = @transform_3, window_bounds = array<i64: 144, 72>}, {pipeline_mode = #tpu.pipeline_mode<synchronous>, transform_indices = @transform_4, window_bounds = array<i64: 144, 72>}, {pipeline_mode = #tpu.pipeline_mode<synchronous>, transform_indices = @transform_5, window_bounds = array<i64: 12, 24>}, {pipeline_mode = #tpu.pipeline_mode<synchronous>, transform_indices = @transform_6, window_bounds = array<i64: 12, 24>}, {pipeline_mode = #tpu.pipeline_mode<synchronous>, transform_indices = @transform_7, window_bounds = array<i64: 5, 72, 128>}, {pipeline_mode = #tpu.pipeline_mode<synchronous>, transform_indices = @transform_8, window_bounds = array<i64: 1, 128>}, {pipeline_mode = #tpu.pipeline_mode<synchronous>, transform_indices = @transform_9, window_bounds = array<i64: 128, 64>}, {pipeline_mode = #tpu.pipeline_mode<synchronous>, transform_indices = @transform_10, window_bounds = array<i64: 128, 64>}, {pipeline_mode = #tpu.pipeline_mode<synchronous>, transform_indices = @transform_11, window_bounds = array<i64: 4, 8>}, {pipeline_mode = #tpu.pipeline_mode<synchronous>, transform_indices = @transform_12, window_bounds = array<i64: 4, 8>}, {pipeline_mode = #tpu.pipeline_mode<synchronous>, transform_indices = @transform_13, window_bounds = array<i64: 256, 120>}, {pipeline_mode = #tpu.pipeline_mode<synchronous>, transform_indices = @transform_14, window_bounds = array<i64: 1, 120>}, {pipeline_mode = #tpu.pipeline_mode<synchronous>, transform_indices = @transform_15, window_bounds = array<i64: 120, 84>}, {pipeline_mode = #tpu.pipeline_mode<synchronous>, transform_indices = @transform_16, window_bounds = array<i64: 1, 84>}, {pipeline_mode = #tpu.pipeline_mode<synchronous>, transform_indices = @transform_17, window_bounds = array<i64: 84, 128>}, {pipeline_mode = #tpu.pipeline_mode<synchronous>, transform_indices = @transform_18, window_bounds = array<i64: 1, 128>}, {transform_indices = @transform_19, window_bounds = array<i64: 8, 128>}]} {
    %c0 = arith.constant 0 : index
    %c0_0 = arith.constant 0 : index
    %c0_1 = arith.constant 0 : index
    %0 = vector.load %arg1[%c0, %c0_0, %c0_1] : memref<8x28x28xf32, #tpu.memory_space<vmem>>, vector<1x28x28xf32>
    %1 = vector.shape_cast %0 : vector<1x28x28xf32> to vector<28x28xf32>
    %2 = vector.extract_strided_slice %1 {offsets = [0, 0], sizes = [24, 28], strides = [1, 1]} : vector<28x28xf32> to vector<24x28xf32>
    %c0_2 = arith.constant 0 : index
    %c0_3 = arith.constant 0 : index
    %c0_4 = arith.constant 0 : index
    %3 = vector.load %arg2[%c0_2, %c0_3, %c0_4] : memref<5x28x144xf32, #tpu.memory_space<vmem>>, vector<1x28x144xf32>
    %4 = vector.shape_cast %3 : vector<1x28x144xf32> to vector<28x144xf32>
    %cst = arith.constant dense<0.000000e+00> : vector<24x144xf32>
    %5 = tpu.matmul %2, %4, %cst {dimension_numbers = #tpu.dot_dimension_numbers<[1], [0], [0], [1], [0, 0, 1, 1], [], []>} : vector<24x28xf32>, vector<28x144xf32>, vector<24x144xf32> -> vector<24x144xf32>
    %6 = vector.extract_strided_slice %1 {offsets = [1, 0], sizes = [24, 28], strides = [1, 1]} : vector<28x28xf32> to vector<24x28xf32>
    %c1 = arith.constant 1 : index
    %c0_5 = arith.constant 0 : index
    %c0_6 = arith.constant 0 : index
    %7 = vector.load %arg2[%c1, %c0_5, %c0_6] : memref<5x28x144xf32, #tpu.memory_space<vmem>>, vector<1x28x144xf32>
    %8 = vector.shape_cast %7 : vector<1x28x144xf32> to vector<28x144xf32>
    %cst_7 = arith.constant dense<0.000000e+00> : vector<24x144xf32>
    %9 = tpu.matmul %6, %8, %cst_7 {dimension_numbers = #tpu.dot_dimension_numbers<[1], [0], [0], [1], [0, 0, 1, 1], [], []>} : vector<24x28xf32>, vector<28x144xf32>, vector<24x144xf32> -> vector<24x144xf32>
    %10 = vector.extract_strided_slice %1 {offsets = [2, 0], sizes = [24, 28], strides = [1, 1]} : vector<28x28xf32> to vector<24x28xf32>
    %c2 = arith.constant 2 : index
    %c0_8 = arith.constant 0 : index
    %c0_9 = arith.constant 0 : index
    %11 = vector.load %arg2[%c2, %c0_8, %c0_9] : memref<5x28x144xf32, #tpu.memory_space<vmem>>, vector<1x28x144xf32>
    %12 = vector.shape_cast %11 : vector<1x28x144xf32> to vector<28x144xf32>
    %cst_10 = arith.constant dense<0.000000e+00> : vector<24x144xf32>
    %13 = tpu.matmul %10, %12, %cst_10 {dimension_numbers = #tpu.dot_dimension_numbers<[1], [0], [0], [1], [0, 0, 1, 1], [], []>} : vector<24x28xf32>, vector<28x144xf32>, vector<24x144xf32> -> vector<24x144xf32>
    %14 = arith.addf %5, %13 : vector<24x144xf32>
    %15 = vector.extract_strided_slice %1 {offsets = [3, 0], sizes = [24, 28], strides = [1, 1]} : vector<28x28xf32> to vector<24x28xf32>
    %c3 = arith.constant 3 : index
    %c0_11 = arith.constant 0 : index
    %c0_12 = arith.constant 0 : index
    %16 = vector.load %arg2[%c3, %c0_11, %c0_12] : memref<5x28x144xf32, #tpu.memory_space<vmem>>, vector<1x28x144xf32>
    %17 = vector.shape_cast %16 : vector<1x28x144xf32> to vector<28x144xf32>
    %cst_13 = arith.constant dense<0.000000e+00> : vector<24x144xf32>
    %18 = tpu.matmul %15, %17, %cst_13 {dimension_numbers = #tpu.dot_dimension_numbers<[1], [0], [0], [1], [0, 0, 1, 1], [], []>} : vector<24x28xf32>, vector<28x144xf32>, vector<24x144xf32> -> vector<24x144xf32>
    %19 = arith.addf %9, %18 : vector<24x144xf32>
    %20 = vector.extract_strided_slice %1 {offsets = [4, 0], sizes = [24, 28], strides = [1, 1]} : vector<28x28xf32> to vector<24x28xf32>
    %c4 = arith.constant 4 : index
    %c0_14 = arith.constant 0 : index
    %c0_15 = arith.constant 0 : index
    %21 = vector.load %arg2[%c4, %c0_14, %c0_15] : memref<5x28x144xf32, #tpu.memory_space<vmem>>, vector<1x28x144xf32>
    %22 = vector.shape_cast %21 : vector<1x28x144xf32> to vector<28x144xf32>
    %cst_16 = arith.constant dense<0.000000e+00> : vector<24x144xf32>
    %23 = tpu.matmul %20, %22, %cst_16 {dimension_numbers = #tpu.dot_dimension_numbers<[1], [0], [0], [1], [0, 0, 1, 1], [], []>} : vector<24x28xf32>, vector<28x144xf32>, vector<24x144xf32> -> vector<24x144xf32>
    %24 = arith.addf %14, %23 : vector<24x144xf32>
    %25 = arith.addf %24, %19 : vector<24x144xf32>
    %c0_17 = arith.constant 0 : index
    %c0_18 = arith.constant 0 : index
    %26 = vector.load %arg3[%c0_17, %c0_18] : memref<1x144xf32, #tpu.memory_space<vmem>>, vector<1x144xf32>
    %27 = vector.broadcast %26 : vector<1x144xf32> to vector<24x144xf32>
    %28 = arith.addf %25, %27 : vector<24x144xf32>
    %cst_19 = arith.constant 0.000000e+00 : f32
    %29 = vector.broadcast %cst_19 : f32 to vector<24x144xf32>
    %30 = arith.maximumf %28, %29 : vector<24x144xf32>
    %c0_20 = arith.constant 0 : index
    %c0_21 = arith.constant 0 : index
    %31 = vector.load %arg4[%c0_20, %c0_21] : memref<144x72xf32, #tpu.memory_space<vmem>>, vector<144x72xf32>
    %cst_22 = arith.constant dense<0.000000e+00> : vector<24x72xf32>
    %32 = tpu.matmul %30, %31, %cst_22 {dimension_numbers = #tpu.dot_dimension_numbers<[1], [0], [0], [1], [0, 0, 1, 1], [], []>} : vector<24x144xf32>, vector<144x72xf32>, vector<24x72xf32> -> vector<24x72xf32>
    %c0_23 = arith.constant 0 : index
    %c0_24 = arith.constant 0 : index
    %33 = vector.load %arg5[%c0_23, %c0_24] : memref<144x72xf32, #tpu.memory_space<vmem>>, vector<144x72xf32>
    %cst_25 = arith.constant dense<0.000000e+00> : vector<24x72xf32>
    %34 = tpu.matmul %30, %33, %cst_25 {dimension_numbers = #tpu.dot_dimension_numbers<[1], [0], [0], [1], [0, 0, 1, 1], [], []>} : vector<24x144xf32>, vector<144x72xf32>, vector<24x72xf32> -> vector<24x72xf32>
    %35 = arith.maximumf %32, %34 : vector<24x72xf32>
    %c0_26 = arith.constant 0 : index
    %c0_27 = arith.constant 0 : index
    %36 = vector.load %arg6[%c0_26, %c0_27] : memref<12x24xf32, #tpu.memory_space<vmem>>, vector<12x24xf32>
    %cst_28 = arith.constant dense<0.000000e+00> : vector<12x72xf32>
    %37 = tpu.matmul %36, %35, %cst_28 {dimension_numbers = #tpu.dot_dimension_numbers<[1], [0], [0], [1], [0, 0, 1, 1], [], []>} : vector<12x24xf32>, vector<24x72xf32>, vector<12x72xf32> -> vector<12x72xf32>
    %c0_29 = arith.constant 0 : index
    %c0_30 = arith.constant 0 : index
    %38 = vector.load %arg7[%c0_29, %c0_30] : memref<12x24xf32, #tpu.memory_space<vmem>>, vector<12x24xf32>
    %cst_31 = arith.constant dense<0.000000e+00> : vector<12x72xf32>
    %39 = tpu.matmul %38, %35, %cst_31 {dimension_numbers = #tpu.dot_dimension_numbers<[1], [0], [0], [1], [0, 0, 1, 1], [], []>} : vector<12x24xf32>, vector<24x72xf32>, vector<12x72xf32> -> vector<12x72xf32>
    %40 = arith.maximumf %37, %39 : vector<12x72xf32>
    %41 = vector.extract_strided_slice %40 {offsets = [0, 0], sizes = [8, 72], strides = [1, 1]} : vector<12x72xf32> to vector<8x72xf32>
    %c0_32 = arith.constant 0 : index
    %c0_33 = arith.constant 0 : index
    %c0_34 = arith.constant 0 : index
    %42 = vector.load %arg8[%c0_32, %c0_33, %c0_34] : memref<5x72x128xf32, #tpu.memory_space<vmem>>, vector<1x72x128xf32>
    %43 = vector.shape_cast %42 : vector<1x72x128xf32> to vector<72x128xf32>
    %cst_35 = arith.constant dense<0.000000e+00> : vector<8x128xf32>
    %44 = tpu.matmul %41, %43, %cst_35 {dimension_numbers = #tpu.dot_dimension_numbers<[1], [0], [0], [1], [0, 0, 1, 1], [], []>} : vector<8x72xf32>, vector<72x128xf32>, vector<8x128xf32> -> vector<8x128xf32>
    %45 = vector.extract_strided_slice %40 {offsets = [1, 0], sizes = [8, 72], strides = [1, 1]} : vector<12x72xf32> to vector<8x72xf32>
    %c1_36 = arith.constant 1 : index
    %c0_37 = arith.constant 0 : index
    %c0_38 = arith.constant 0 : index
    %46 = vector.load %arg8[%c1_36, %c0_37, %c0_38] : memref<5x72x128xf32, #tpu.memory_space<vmem>>, vector<1x72x128xf32>
    %47 = vector.shape_cast %46 : vector<1x72x128xf32> to vector<72x128xf32>
    %cst_39 = arith.constant dense<0.000000e+00> : vector<8x128xf32>
    %48 = tpu.matmul %45, %47, %cst_39 {dimension_numbers = #tpu.dot_dimension_numbers<[1], [0], [0], [1], [0, 0, 1, 1], [], []>} : vector<8x72xf32>, vector<72x128xf32>, vector<8x128xf32> -> vector<8x128xf32>
    %49 = vector.extract_strided_slice %40 {offsets = [2, 0], sizes = [8, 72], strides = [1, 1]} : vector<12x72xf32> to vector<8x72xf32>
    %c2_40 = arith.constant 2 : index
    %c0_41 = arith.constant 0 : index
    %c0_42 = arith.constant 0 : index
    %50 = vector.load %arg8[%c2_40, %c0_41, %c0_42] : memref<5x72x128xf32, #tpu.memory_space<vmem>>, vector<1x72x128xf32>
    %51 = vector.shape_cast %50 : vector<1x72x128xf32> to vector<72x128xf32>
    %cst_43 = arith.constant dense<0.000000e+00> : vector<8x128xf32>
    %52 = tpu.matmul %49, %51, %cst_43 {dimension_numbers = #tpu.dot_dimension_numbers<[1], [0], [0], [1], [0, 0, 1, 1], [], []>} : vector<8x72xf32>, vector<72x128xf32>, vector<8x128xf32> -> vector<8x128xf32>
    %53 = arith.addf %44, %52 : vector<8x128xf32>
    %54 = vector.extract_strided_slice %40 {offsets = [3, 0], sizes = [8, 72], strides = [1, 1]} : vector<12x72xf32> to vector<8x72xf32>
    %c3_44 = arith.constant 3 : index
    %c0_45 = arith.constant 0 : index
    %c0_46 = arith.constant 0 : index
    %55 = vector.load %arg8[%c3_44, %c0_45, %c0_46] : memref<5x72x128xf32, #tpu.memory_space<vmem>>, vector<1x72x128xf32>
    %56 = vector.shape_cast %55 : vector<1x72x128xf32> to vector<72x128xf32>
    %cst_47 = arith.constant dense<0.000000e+00> : vector<8x128xf32>
    %57 = tpu.matmul %54, %56, %cst_47 {dimension_numbers = #tpu.dot_dimension_numbers<[1], [0], [0], [1], [0, 0, 1, 1], [], []>} : vector<8x72xf32>, vector<72x128xf32>, vector<8x128xf32> -> vector<8x128xf32>
    %58 = arith.addf %48, %57 : vector<8x128xf32>
    %59 = vector.extract_strided_slice %40 {offsets = [4, 0], sizes = [8, 72], strides = [1, 1]} : vector<12x72xf32> to vector<8x72xf32>
    %c4_48 = arith.constant 4 : index
    %c0_49 = arith.constant 0 : index
    %c0_50 = arith.constant 0 : index
    %60 = vector.load %arg8[%c4_48, %c0_49, %c0_50] : memref<5x72x128xf32, #tpu.memory_space<vmem>>, vector<1x72x128xf32>
    %61 = vector.shape_cast %60 : vector<1x72x128xf32> to vector<72x128xf32>
    %cst_51 = arith.constant dense<0.000000e+00> : vector<8x128xf32>
    %62 = tpu.matmul %59, %61, %cst_51 {dimension_numbers = #tpu.dot_dimension_numbers<[1], [0], [0], [1], [0, 0, 1, 1], [], []>} : vector<8x72xf32>, vector<72x128xf32>, vector<8x128xf32> -> vector<8x128xf32>
    %63 = arith.addf %53, %62 : vector<8x128xf32>
    %64 = arith.addf %63, %58 : vector<8x128xf32>
    %c0_52 = arith.constant 0 : index
    %c0_53 = arith.constant 0 : index
    %65 = vector.load %arg9[%c0_52, %c0_53] : memref<1x128xf32, #tpu.memory_space<vmem>>, vector<1x128xf32>
    %66 = vector.broadcast %65 : vector<1x128xf32> to vector<8x128xf32>
    %67 = arith.addf %64, %66 : vector<8x128xf32>
    %cst_54 = arith.constant 0.000000e+00 : f32
    %68 = vector.broadcast %cst_54 : f32 to vector<8x128xf32>
    %69 = arith.maximumf %67, %68 : vector<8x128xf32>
    %c0_55 = arith.constant 0 : index
    %c0_56 = arith.constant 0 : index
    %70 = vector.load %arg10[%c0_55, %c0_56] : memref<128x64xf32, #tpu.memory_space<vmem>>, vector<128x64xf32>
    %cst_57 = arith.constant dense<0.000000e+00> : vector<8x64xf32>
    %71 = tpu.matmul %69, %70, %cst_57 {dimension_numbers = #tpu.dot_dimension_numbers<[1], [0], [0], [1], [0, 0, 1, 1], [], []>} : vector<8x128xf32>, vector<128x64xf32>, vector<8x64xf32> -> vector<8x64xf32>
    %c0_58 = arith.constant 0 : index
    %c0_59 = arith.constant 0 : index
    %72 = vector.load %arg11[%c0_58, %c0_59] : memref<128x64xf32, #tpu.memory_space<vmem>>, vector<128x64xf32>
    %cst_60 = arith.constant dense<0.000000e+00> : vector<8x64xf32>
    %73 = tpu.matmul %69, %72, %cst_60 {dimension_numbers = #tpu.dot_dimension_numbers<[1], [0], [0], [1], [0, 0, 1, 1], [], []>} : vector<8x128xf32>, vector<128x64xf32>, vector<8x64xf32> -> vector<8x64xf32>
    %74 = arith.maximumf %71, %73 : vector<8x64xf32>
    %c0_61 = arith.constant 0 : index
    %c0_62 = arith.constant 0 : index
    %75 = vector.load %arg12[%c0_61, %c0_62] : memref<4x8xf32, #tpu.memory_space<vmem>>, vector<4x8xf32>
    %cst_63 = arith.constant dense<0.000000e+00> : vector<4x64xf32>
    %76 = tpu.matmul %75, %74, %cst_63 {dimension_numbers = #tpu.dot_dimension_numbers<[1], [0], [0], [1], [0, 0, 1, 1], [], []>} : vector<4x8xf32>, vector<8x64xf32>, vector<4x64xf32> -> vector<4x64xf32>
    %c0_64 = arith.constant 0 : index
    %c0_65 = arith.constant 0 : index
    %77 = vector.load %arg13[%c0_64, %c0_65] : memref<4x8xf32, #tpu.memory_space<vmem>>, vector<4x8xf32>
    %cst_66 = arith.constant dense<0.000000e+00> : vector<4x64xf32>
    %78 = tpu.matmul %77, %74, %cst_66 {dimension_numbers = #tpu.dot_dimension_numbers<[1], [0], [0], [1], [0, 0, 1, 1], [], []>} : vector<4x8xf32>, vector<8x64xf32>, vector<4x64xf32> -> vector<4x64xf32>
    %79 = arith.maximumf %76, %78 : vector<4x64xf32>
    %80 = vector.extract_strided_slice %79 {offsets = [0, 0], sizes = [1, 64], strides = [1, 1]} : vector<4x64xf32> to vector<1x64xf32>
    %c0_67 = arith.constant 0 : index
    %c0_68 = arith.constant 0 : index
    %81 = vector.load %arg21[%c0_67, %c0_68] : memref<8x256xf32, #tpu.memory_space<vmem>>, vector<1x64xf32>
    tpu.vector_store %arg21[%c0_67, %c0_68], %80 {strides = array<i32>} : memref<8x256xf32, #tpu.memory_space<vmem>>, vector<1x64xf32>,
    %82 = vector.extract_strided_slice %79 {offsets = [1, 0], sizes = [1, 64], strides = [1, 1]} : vector<4x64xf32> to vector<1x64xf32>
    %c0_69 = arith.constant 0 : index
    %c64 = arith.constant 64 : index
    %83 = vector.load %arg21[%c0_69, %c64] : memref<8x256xf32, #tpu.memory_space<vmem>>, vector<1x64xf32>
    tpu.vector_store %arg21[%c0_69, %c64], %82 {strides = array<i32>} : memref<8x256xf32, #tpu.memory_space<vmem>>, vector<1x64xf32>,
    %84 = vector.extract_strided_slice %79 {offsets = [2, 0], sizes = [1, 64], strides = [1, 1]} : vector<4x64xf32> to vector<1x64xf32>
    %c0_70 = arith.constant 0 : index
    %c128 = arith.constant 128 : index
    %85 = vector.load %arg21[%c0_70, %c128] : memref<8x256xf32, #tpu.memory_space<vmem>>, vector<1x64xf32>
    tpu.vector_store %arg21[%c0_70, %c128], %84 {strides = array<i32>} : memref<8x256xf32, #tpu.memory_space<vmem>>, vector<1x64xf32>,
    %86 = vector.extract_strided_slice %79 {offsets = [3, 0], sizes = [1, 64], strides = [1, 1]} : vector<4x64xf32> to vector<1x64xf32>
    %c0_71 = arith.constant 0 : index
    %c192 = arith.constant 192 : index
    %87 = vector.load %arg21[%c0_71, %c192] : memref<8x256xf32, #tpu.memory_space<vmem>>, vector<1x64xf32>
    tpu.vector_store %arg21[%c0_71, %c192], %86 {strides = array<i32>} : memref<8x256xf32, #tpu.memory_space<vmem>>, vector<1x64xf32>,
    %c1_72 = arith.constant 1 : index
    %c0_73 = arith.constant 0 : index
    %c0_74 = arith.constant 0 : index
    %88 = vector.load %arg1[%c1_72, %c0_73, %c0_74] : memref<8x28x28xf32, #tpu.memory_space<vmem>>, vector<1x28x28xf32>
    %89 = vector.shape_cast %88 : vector<1x28x28xf32> to vector<28x28xf32>
    %90 = vector.extract_strided_slice %89 {offsets = [0, 0], sizes = [24, 28], strides = [1, 1]} : vector<28x28xf32> to vector<24x28xf32>
    %c0_75 = arith.constant 0 : index
    %c0_76 = arith.constant 0 : index
    %c0_77 = arith.constant 0 : index
    %91 = vector.load %arg2[%c0_75, %c0_76, %c0_77] : memref<5x28x144xf32, #tpu.memory_space<vmem>>, vector<1x28x144xf32>
    %92 = vector.shape_cast %91 : vector<1x28x144xf32> to vector<28x144xf32>
    %cst_78 = arith.constant dense<0.000000e+00> : vector<24x144xf32>
    %93 = tpu.matmul %90, %92, %cst_78 {dimension_numbers = #tpu.dot_dimension_numbers<[1], [0], [0], [1], [0, 0, 1, 1], [], []>} : vector<24x28xf32>, vector<28x144xf32>, vector<24x144xf32> -> vector<24x144xf32>
    %94 = vector.extract_strided_slice %89 {offsets = [1, 0], sizes = [24, 28], strides = [1, 1]} : vector<28x28xf32> to vector<24x28xf32>
    %c1_79 = arith.constant 1 : index
    %c0_80 = arith.constant 0 : index
    %c0_81 = arith.constant 0 : index
    %95 = vector.load %arg2[%c1_79, %c0_80, %c0_81] : memref<5x28x144xf32, #tpu.memory_space<vmem>>, vector<1x28x144xf32>
    %96 = vector.shape_cast %95 : vector<1x28x144xf32> to vector<28x144xf32>
    %cst_82 = arith.constant dense<0.000000e+00> : vector<24x144xf32>
    %97 = tpu.matmul %94, %96, %cst_82 {dimension_numbers = #tpu.dot_dimension_numbers<[1], [0], [0], [1], [0, 0, 1, 1], [], []>} : vector<24x28xf32>, vector<28x144xf32>, vector<24x144xf32> -> vector<24x144xf32>
    %98 = vector.extract_strided_slice %89 {offsets = [2, 0], sizes = [24, 28], strides = [1, 1]} : vector<28x28xf32> to vector<24x28xf32>
    %c2_83 = arith.constant 2 : index
    %c0_84 = arith.constant 0 : index
    %c0_85 = arith.constant 0 : index
    %99 = vector.load %arg2[%c2_83, %c0_84, %c0_85] : memref<5x28x144xf32, #tpu.memory_space<vmem>>, vector<1x28x144xf32>
    %100 = vector.shape_cast %99 : vector<1x28x144xf32> to vector<28x144xf32>
    %cst_86 = arith.constant dense<0.000000e+00> : vector<24x144xf32>
    %101 = tpu.matmul %98, %100, %cst_86 {dimension_numbers = #tpu.dot_dimension_numbers<[1], [0], [0], [1], [0, 0, 1, 1], [], []>} : vector<24x28xf32>, vector<28x144xf32>, vector<24x144xf32> -> vector<24x144xf32>
    %102 = arith.addf %93, %101 : vector<24x144xf32>
    %103 = vector.extract_strided_slice %89 {offsets = [3, 0], sizes = [24, 28], strides = [1, 1]} : vector<28x28xf32> to vector<24x28xf32>
    %c3_87 = arith.constant 3 : index
    %c0_88 = arith.constant 0 : index
    %c0_89 = arith.constant 0 : index
    %104 = vector.load %arg2[%c3_87, %c0_88, %c0_89] : memref<5x28x144xf32, #tpu.memory_space<vmem>>, vector<1x28x144xf32>
    %105 = vector.shape_cast %104 : vector<1x28x144xf32> to vector<28x144xf32>
    %cst_90 = arith.constant dense<0.000000e+00> : vector<24x144xf32>
    %106 = tpu.matmul %103, %105, %cst_90 {dimension_numbers = #tpu.dot_dimension_numbers<[1], [0], [0], [1], [0, 0, 1, 1], [], []>} : vector<24x28xf32>, vector<28x144xf32>, vector<24x144xf32> -> vector<24x144xf32>
    %107 = arith.addf %97, %106 : vector<24x144xf32>
    %108 = vector.extract_strided_slice %89 {offsets = [4, 0], sizes = [24, 28], strides = [1, 1]} : vector<28x28xf32> to vector<24x28xf32>
    %c4_91 = arith.constant 4 : index
    %c0_92 = arith.constant 0 : index
    %c0_93 = arith.constant 0 : index
    %109 = vector.load %arg2[%c4_91, %c0_92, %c0_93] : memref<5x28x144xf32, #tpu.memory_space<vmem>>, vector<1x28x144xf32>
    %110 = vector.shape_cast %109 : vector<1x28x144xf32> to vector<28x144xf32>
    %cst_94 = arith.constant dense<0.000000e+00> : vector<24x144xf32>
    %111 = tpu.matmul %108, %110, %cst_94 {dimension_numbers = #tpu.dot_dimension_numbers<[1], [0], [0], [1], [0, 0, 1, 1], [], []>} : vector<24x28xf32>, vector<28x144xf32>, vector<24x144xf32> -> vector<24x144xf32>
    %112 = arith.addf %102, %111 : vector<24x144xf32>
    %113 = arith.addf %112, %107 : vector<24x144xf32>
    %c0_95 = arith.constant 0 : index
    %c0_96 = arith.constant 0 : index
    %114 = vector.load %arg3[%c0_95, %c0_96] : memref<1x144xf32, #tpu.memory_space<vmem>>, vector<1x144xf32>
    %115 = vector.broadcast %114 : vector<1x144xf32> to vector<24x144xf32>
    %116 = arith.addf %113, %115 : vector<24x144xf32>
    %cst_97 = arith.constant 0.000000e+00 : f32
    %117 = vector.broadcast %cst_97 : f32 to vector<24x144xf32>
    %118 = arith.maximumf %116, %117 : vector<24x144xf32>
    %c0_98 = arith.constant 0 : index
    %c0_99 = arith.constant 0 : index
    %119 = vector.load %arg4[%c0_98, %c0_99] : memref<144x72xf32, #tpu.memory_space<vmem>>, vector<144x72xf32>
    %cst_100 = arith.constant dense<0.000000e+00> : vector<24x72xf32>
    %120 = tpu.matmul %118, %119, %cst_100 {dimension_numbers = #tpu.dot_dimension_numbers<[1], [0], [0], [1], [0, 0, 1, 1], [], []>} : vector<24x144xf32>, vector<144x72xf32>, vector<24x72xf32> -> vector<24x72xf32>
    %c0_101 = arith.constant 0 : index
    %c0_102 = arith.constant 0 : index
    %121 = vector.load %arg5[%c0_101, %c0_102] : memref<144x72xf32, #tpu.memory_space<vmem>>, vector<144x72xf32>
    %cst_103 = arith.constant dense<0.000000e+00> : vector<24x72xf32>
    %122 = tpu.matmul %118, %121, %cst_103 {dimension_numbers = #tpu.dot_dimension_numbers<[1], [0], [0], [1], [0, 0, 1, 1], [], []>} : vector<24x144xf32>, vector<144x72xf32>, vector<24x72xf32> -> vector<24x72xf32>
    %123 = arith.maximumf %120, %122 : vector<24x72xf32>
    %c0_104 = arith.constant 0 : index
    %c0_105 = arith.constant 0 : index
    %124 = vector.load %arg6[%c0_104, %c0_105] : memref<12x24xf32, #tpu.memory_space<vmem>>, vector<12x24xf32>
    %cst_106 = arith.constant dense<0.000000e+00> : vector<12x72xf32>
    %125 = tpu.matmul %124, %123, %cst_106 {dimension_numbers = #tpu.dot_dimension_numbers<[1], [0], [0], [1], [0, 0, 1, 1], [], []>} : vector<12x24xf32>, vector<24x72xf32>, vector<12x72xf32> -> vector<12x72xf32>
    %c0_107 = arith.constant 0 : index
    %c0_108 = arith.constant 0 : index
    %126 = vector.load %arg7[%c0_107, %c0_108] : memref<12x24xf32, #tpu.memory_space<vmem>>, vector<12x24xf32>
    %cst_109 = arith.constant dense<0.000000e+00> : vector<12x72xf32>
    %127 = tpu.matmul %126, %123, %cst_109 {dimension_numbers = #tpu.dot_dimension_numbers<[1], [0], [0], [1], [0, 0, 1, 1], [], []>} : vector<12x24xf32>, vector<24x72xf32>, vector<12x72xf32> -> vector<12x72xf32>
    %128 = arith.maximumf %125, %127 : vector<12x72xf32>
    %129 = vector.extract_strided_slice %128 {offsets = [0, 0], sizes = [8, 72], strides = [1, 1]} : vector<12x72xf32> to vector<8x72xf32>
    %c0_110 = arith.constant 0 : index
    %c0_111 = arith.constant 0 : index
    %c0_112 = arith.constant 0 : index
    %130 = vector.load %arg8[%c0_110, %c0_111, %c0_112] : memref<5x72x128xf32, #tpu.memory_space<vmem>>, vector<1x72x128xf32>
    %131 = vector.shape_cast %130 : vector<1x72x128xf32> to vector<72x128xf32>
    %cst_113 = arith.constant dense<0.000000e+00> : vector<8x128xf32>
    %132 = tpu.matmul %129, %131, %cst_113 {dimension_numbers = #tpu.dot_dimension_numbers<[1], [0], [0], [1], [0, 0, 1, 1], [], []>} : vector<8x72xf32>, vector<72x128xf32>, vector<8x128xf32> -> vector<8x128xf32>
    %133 = vector.extract_strided_slice %128 {offsets = [1, 0], sizes = [8, 72], strides = [1, 1]} : vector<12x72xf32> to vector<8x72xf32>
    %c1_114 = arith.constant 1 : index
    %c0_115 = arith.constant 0 : index
    %c0_116 = arith.constant 0 : index
    %134 = vector.load %arg8[%c1_114, %c0_115, %c0_116] : memref<5x72x128xf32, #tpu.memory_space<vmem>>, vector<1x72x128xf32>
    %135 = vector.shape_cast %134 : vector<1x72x128xf32> to vector<72x128xf32>
    %cst_117 = arith.constant dense<0.000000e+00> : vector<8x128xf32>
    %136 = tpu.matmul %133, %135, %cst_117 {dimension_numbers = #tpu.dot_dimension_numbers<[1], [0], [0], [1], [0, 0, 1, 1], [], []>} : vector<8x72xf32>, vector<72x128xf32>, vector<8x128xf32> -> vector<8x128xf32>
    %137 = vector.extract_strided_slice %128 {offsets = [2, 0], sizes = [8, 72], strides = [1, 1]} : vector<12x72xf32> to vector<8x72xf32>
    %c2_118 = arith.constant 2 : index
    %c0_119 = arith.constant 0 : index
    %c0_120 = arith.constant 0 : index
    %138 = vector.load %arg8[%c2_118, %c0_119, %c0_120] : memref<5x72x128xf32, #tpu.memory_space<vmem>>, vector<1x72x128xf32>
    %139 = vector.shape_cast %138 : vector<1x72x128xf32> to vector<72x128xf32>
    %cst_121 = arith.constant dense<0.000000e+00> : vector<8x128xf32>
    %140 = tpu.matmul %137, %139, %cst_121 {dimension_numbers = #tpu.dot_dimension_numbers<[1], [0], [0], [1], [0, 0, 1, 1], [], []>} : vector<8x72xf32>, vector<72x128xf32>, vector<8x128xf32> -> vector<8x128xf32>
    %141 = arith.addf %132, %140 : vector<8x128xf32>
    %142 = vector.extract_strided_slice %128 {offsets = [3, 0], sizes = [8, 72], strides = [1, 1]} : vector<12x72xf32> to vector<8x72xf32>
    %c3_122 = arith.constant 3 : index
    %c0_123 = arith.constant 0 : index
    %c0_124 = arith.constant 0 : index
    %143 = vector.load %arg8[%c3_122, %c0_123, %c0_124] : memref<5x72x128xf32, #tpu.memory_space<vmem>>, vector<1x72x128xf32>
    %144 = vector.shape_cast %143 : vector<1x72x128xf32> to vector<72x128xf32>
    %cst_125 = arith.constant dense<0.000000e+00> : vector<8x128xf32>
    %145 = tpu.matmul %142, %144, %cst_125 {dimension_numbers = #tpu.dot_dimension_numbers<[1], [0], [0], [1], [0, 0, 1, 1], [], []>} : vector<8x72xf32>, vector<72x128xf32>, vector<8x128xf32> -> vector<8x128xf32>
    %146 = arith.addf %136, %145 : vector<8x128xf32>
    %147 = vector.extract_strided_slice %128 {offsets = [4, 0], sizes = [8, 72], strides = [1, 1]} : vector<12x72xf32> to vector<8x72xf32>
    %c4_126 = arith.constant 4 : index
    %c0_127 = arith.constant 0 : index
    %c0_128 = arith.constant 0 : index
    %148 = vector.load %arg8[%c4_126, %c0_127, %c0_128] : memref<5x72x128xf32, #tpu.memory_space<vmem>>, vector<1x72x128xf32>
    %149 = vector.shape_cast %148 : vector<1x72x128xf32> to vector<72x128xf32>
    %cst_129 = arith.constant dense<0.000000e+00> : vector<8x128xf32>
    %150 = tpu.matmul %147, %149, %cst_129 {dimension_numbers = #tpu.dot_dimension_numbers<[1], [0], [0], [1], [0, 0, 1, 1], [], []>} : vector<8x72xf32>, vector<72x128xf32>, vector<8x128xf32> -> vector<8x128xf32>
    %151 = arith.addf %141, %150 : vector<8x128xf32>
    %152 = arith.addf %151, %146 : vector<8x128xf32>
    %c0_130 = arith.constant 0 : index
    %c0_131 = arith.constant 0 : index
    %153 = vector.load %arg9[%c0_130, %c0_131] : memref<1x128xf32, #tpu.memory_space<vmem>>, vector<1x128xf32>
    %154 = vector.broadcast %153 : vector<1x128xf32> to vector<8x128xf32>
    %155 = arith.addf %152, %154 : vector<8x128xf32>
    %cst_132 = arith.constant 0.000000e+00 : f32
    %156 = vector.broadcast %cst_132 : f32 to vector<8x128xf32>
    %157 = arith.maximumf %155, %156 : vector<8x128xf32>
    %c0_133 = arith.constant 0 : index
    %c0_134 = arith.constant 0 : index
    %158 = vector.load %arg10[%c0_133, %c0_134] : memref<128x64xf32, #tpu.memory_space<vmem>>, vector<128x64xf32>
    %cst_135 = arith.constant dense<0.000000e+00> : vector<8x64xf32>
    %159 = tpu.matmul %157, %158, %cst_135 {dimension_numbers = #tpu.dot_dimension_numbers<[1], [0], [0], [1], [0, 0, 1, 1], [], []>} : vector<8x128xf32>, vector<128x64xf32>, vector<8x64xf32> -> vector<8x64xf32>
    %c0_136 = arith.constant 0 : index
    %c0_137 = arith.constant 0 : index
    %160 = vector.load %arg11[%c0_136, %c0_137] : memref<128x64xf32, #tpu.memory_space<vmem>>, vector<128x64xf32>
    %cst_138 = arith.constant dense<0.000000e+00> : vector<8x64xf32>
    %161 = tpu.matmul %157, %160, %cst_138 {dimension_numbers = #tpu.dot_dimension_numbers<[1], [0], [0], [1], [0, 0, 1, 1], [], []>} : vector<8x128xf32>, vector<128x64xf32>, vector<8x64xf32> -> vector<8x64xf32>
    %162 = arith.maximumf %159, %161 : vector<8x64xf32>
    %c0_139 = arith.constant 0 : index
    %c0_140 = arith.constant 0 : index
    %163 = vector.load %arg12[%c0_139, %c0_140] : memref<4x8xf32, #tpu.memory_space<vmem>>, vector<4x8xf32>
    %cst_141 = arith.constant dense<0.000000e+00> : vector<4x64xf32>
    %164 = tpu.matmul %163, %162, %cst_141 {dimension_numbers = #tpu.dot_dimension_numbers<[1], [0], [0], [1], [0, 0, 1, 1], [], []>} : vector<4x8xf32>, vector<8x64xf32>, vector<4x64xf32> -> vector<4x64xf32>
    %c0_142 = arith.constant 0 : index
    %c0_143 = arith.constant 0 : index
    %165 = vector.load %arg13[%c0_142, %c0_143] : memref<4x8xf32, #tpu.memory_space<vmem>>, vector<4x8xf32>
    %cst_144 = arith.constant dense<0.000000e+00> : vector<4x64xf32>
    %166 = tpu.matmul %165, %162, %cst_144 {dimension_numbers = #tpu.dot_dimension_numbers<[1], [0], [0], [1], [0, 0, 1, 1], [], []>} : vector<4x8xf32>, vector<8x64xf32>, vector<4x64xf32> -> vector<4x64xf32>
    %167 = arith.maximumf %164, %166 : vector<4x64xf32>
    %168 = vector.extract_strided_slice %167 {offsets = [0, 0], sizes = [1, 64], strides = [1, 1]} : vector<4x64xf32> to vector<1x64xf32>
    %c1_145 = arith.constant 1 : index
    %c0_146 = arith.constant 0 : index
    %169 = vector.load %arg21[%c1_145, %c0_146] : memref<8x256xf32, #tpu.memory_space<vmem>>, vector<1x64xf32>
    tpu.vector_store %arg21[%c1_145, %c0_146], %168 {strides = array<i32>} : memref<8x256xf32, #tpu.memory_space<vmem>>, vector<1x64xf32>,
    %170 = vector.extract_strided_slice %167 {offsets = [1, 0], sizes = [1, 64], strides = [1, 1]} : vector<4x64xf32> to vector<1x64xf32>
    %c1_147 = arith.constant 1 : index
    %c64_148 = arith.constant 64 : index
    %171 = vector.load %arg21[%c1_147, %c64_148] : memref<8x256xf32, #tpu.memory_space<vmem>>, vector<1x64xf32>
    tpu.vector_store %arg21[%c1_147, %c64_148], %170 {strides = array<i32>} : memref<8x256xf32, #tpu.memory_space<vmem>>, vector<1x64xf32>,
    %172 = vector.extract_strided_slice %167 {offsets = [2, 0], sizes = [1, 64], strides = [1, 1]} : vector<4x64xf32> to vector<1x64xf32>
    %c1_149 = arith.constant 1 : index
    %c128_150 = arith.constant 128 : index
    %173 = vector.load %arg21[%c1_149, %c128_150] : memref<8x256xf32, #tpu.memory_space<vmem>>, vector<1x64xf32>
    tpu.vector_store %arg21[%c1_149, %c128_150], %172 {strides = array<i32>} : memref<8x256xf32, #tpu.memory_space<vmem>>, vector<1x64xf32>,
    %174 = vector.extract_strided_slice %167 {offsets = [3, 0], sizes = [1, 64], strides = [1, 1]} : vector<4x64xf32> to vector<1x64xf32>
    %c1_151 = arith.constant 1 : index
    %c192_152 = arith.constant 192 : index
    %175 = vector.load %arg21[%c1_151, %c192_152] : memref<8x256xf32, #tpu.memory_space<vmem>>, vector<1x64xf32>
    tpu.vector_store %arg21[%c1_151, %c192_152], %174 {strides = array<i32>} : memref<8x256xf32, #tpu.memory_space<vmem>>, vector<1x64xf32>,
    %c2_153 = arith.constant 2 : index
    %c0_154 = arith.constant 0 : index
    %c0_155 = arith.constant 0 : index
    %176 = vector.load %arg1[%c2_153, %c0_154, %c0_155] : memref<8x28x28xf32, #tpu.memory_space<vmem>>, vector<1x28x28xf32>
    %177 = vector.shape_cast %176 : vector<1x28x28xf32> to vector<28x28xf32>
    %178 = vector.extract_strided_slice %177 {offsets = [0, 0], sizes = [24, 28], strides = [1, 1]} : vector<28x28xf32> to vector<24x28xf32>
    %c0_156 = arith.constant 0 : index
    %c0_157 = arith.constant 0 : index
    %c0_158 = arith.constant 0 : index
    %179 = vector.load %arg2[%c0_156, %c0_157, %c0_158] : memref<5x28x144xf32, #tpu.memory_space<vmem>>, vector<1x28x144xf32>
    %180 = vector.shape_cast %179 : vector<1x28x144xf32> to vector<28x144xf32>
    %cst_159 = arith.constant dense<0.000000e+00> : vector<24x144xf32>
    %181 = tpu.matmul %178, %180, %cst_159 {dimension_numbers = #tpu.dot_dimension_numbers<[1], [0], [0], [1], [0, 0, 1, 1], [], []>} : vector<24x28xf32>, vector<28x144xf32>, vector<24x144xf32> -> vector<24x144xf32>
    %182 = vector.extract_strided_slice %177 {offsets = [1, 0], sizes = [24, 28], strides = [1, 1]} : vector<28x28xf32> to vector<24x28xf32>
    %c1_160 = arith.constant 1 : index
    %c0_161 = arith.constant 0 : index
    %c0_162 = arith.constant 0 : index
    %183 = vector.load %arg2[%c1_160, %c0_161, %c0_162] : memref<5x28x144xf32, #tpu.memory_space<vmem>>, vector<1x28x144xf32>
    %184 = vector.shape_cast %183 : vector<1x28x144xf32> to vector<28x144xf32>
    %cst_163 = arith.constant dense<0.000000e+00> : vector<24x144xf32>
    %185 = tpu.matmul %182, %184, %cst_163 {dimension_numbers = #tpu.dot_dimension_numbers<[1], [0], [0], [1], [0, 0, 1, 1], [], []>} : vector<24x28xf32>, vector<28x144xf32>, vector<24x144xf32> -> vector<24x144xf32>
    %186 = vector.extract_strided_slice %177 {offsets = [2, 0], sizes = [24, 28], strides = [1, 1]} : vector<28x28xf32> to vector<24x28xf32>
    %c2_164 = arith.constant 2 : index
    %c0_165 = arith.constant 0 : index
    %c0_166 = arith.constant 0 : index
    %187 = vector.load %arg2[%c2_164, %c0_165, %c0_166] : memref<5x28x144xf32, #tpu.memory_space<vmem>>, vector<1x28x144xf32>
    %188 = vector.shape_cast %187 : vector<1x28x144xf32> to vector<28x144xf32>
    %cst_167 = arith.constant dense<0.000000e+00> : vector<24x144xf32>
    %189 = tpu.matmul %186, %188, %cst_167 {dimension_numbers = #tpu.dot_dimension_numbers<[1], [0], [0], [1], [0, 0, 1, 1], [], []>} : vector<24x28xf32>, vector<28x144xf32>, vector<24x144xf32> -> vector<24x144xf32>
    %190 = arith.addf %181, %189 : vector<24x144xf32>
    %191 = vector.extract_strided_slice %177 {offsets = [3, 0], sizes = [24, 28], strides = [1, 1]} : vector<28x28xf32> to vector<24x28xf32>
    %c3_168 = arith.constant 3 : index
    %c0_169 = arith.constant 0 : index
    %c0_170 = arith.constant 0 : index
    %192 = vector.load %arg2[%c3_168, %c0_169, %c0_170] : memref<5x28x144xf32, #tpu.memory_space<vmem>>, vector<1x28x144xf32>
    %193 = vector.shape_cast %192 : vector<1x28x144xf32> to vector<28x144xf32>
    %cst_171 = arith.constant dense<0.000000e+00> : vector<24x144xf32>
    %194 = tpu.matmul %191, %193, %cst_171 {dimension_numbers = #tpu.dot_dimension_numbers<[1], [0], [0], [1], [0, 0, 1, 1], [], []>} : vector<24x28xf32>, vector<28x144xf32>, vector<24x144xf32> -> vector<24x144xf32>
    %195 = arith.addf %185, %194 : vector<24x144xf32>
    %196 = vector.extract_strided_slice %177 {offsets = [4, 0], sizes = [24, 28], strides = [1, 1]} : vector<28x28xf32> to vector<24x28xf32>
    %c4_172 = arith.constant 4 : index
    %c0_173 = arith.constant 0 : index
    %c0_174 = arith.constant 0 : index
    %197 = vector.load %arg2[%c4_172, %c0_173, %c0_174] : memref<5x28x144xf32, #tpu.memory_space<vmem>>, vector<1x28x144xf32>
    %198 = vector.shape_cast %197 : vector<1x28x144xf32> to vector<28x144xf32>
    %cst_175 = arith.constant dense<0.000000e+00> : vector<24x144xf32>
    %199 = tpu.matmul %196, %198, %cst_175 {dimension_numbers = #tpu.dot_dimension_numbers<[1], [0], [0], [1], [0, 0, 1, 1], [], []>} : vector<24x28xf32>, vector<28x144xf32>, vector<24x144xf32> -> vector<24x144xf32>
    %200 = arith.addf %190, %199 : vector<24x144xf32>
    %201 = arith.addf %200, %195 : vector<24x144xf32>
    %c0_176 = arith.constant 0 : index
    %c0_177 = arith.constant 0 : index
    %202 = vector.load %arg3[%c0_176, %c0_177] : memref<1x144xf32, #tpu.memory_space<vmem>>, vector<1x144xf32>
    %203 = vector.broadcast %202 : vector<1x144xf32> to vector<24x144xf32>
    %204 = arith.addf %201, %203 : vector<24x144xf32>
    %cst_178 = arith.constant 0.000000e+00 : f32
    %205 = vector.broadcast %cst_178 : f32 to vector<24x144xf32>
    %206 = arith.maximumf %204, %205 : vector<24x144xf32>
    %c0_179 = arith.constant 0 : index
    %c0_180 = arith.constant 0 : index
    %207 = vector.load %arg4[%c0_179, %c0_180] : memref<144x72xf32, #tpu.memory_space<vmem>>, vector<144x72xf32>
    %cst_181 = arith.constant dense<0.000000e+00> : vector<24x72xf32>
    %208 = tpu.matmul %206, %207, %cst_181 {dimension_numbers = #tpu.dot_dimension_numbers<[1], [0], [0], [1], [0, 0, 1, 1], [], []>} : vector<24x144xf32>, vector<144x72xf32>, vector<24x72xf32> -> vector<24x72xf32>
    %c0_182 = arith.constant 0 : index
    %c0_183 = arith.constant 0 : index
    %209 = vector.load %arg5[%c0_182, %c0_183] : memref<144x72xf32, #tpu.memory_space<vmem>>, vector<144x72xf32>
    %cst_184 = arith.constant dense<0.000000e+00> : vector<24x72xf32>
    %210 = tpu.matmul %206, %209, %cst_184 {dimension_numbers = #tpu.dot_dimension_numbers<[1], [0], [0], [1], [0, 0, 1, 1], [], []>} : vector<24x144xf32>, vector<144x72xf32>, vector<24x72xf32> -> vector<24x72xf32>
    %211 = arith.maximumf %208, %210 : vector<24x72xf32>
    %c0_185 = arith.constant 0 : index
    %c0_186 = arith.constant 0 : index
    %212 = vector.load %arg6[%c0_185, %c0_186] : memref<12x24xf32, #tpu.memory_space<vmem>>, vector<12x24xf32>
    %cst_187 = arith.constant dense<0.000000e+00> : vector<12x72xf32>
    %213 = tpu.matmul %212, %211, %cst_187 {dimension_numbers = #tpu.dot_dimension_numbers<[1], [0], [0], [1], [0, 0, 1, 1], [], []>} : vector<12x24xf32>, vector<24x72xf32>, vector<12x72xf32> -> vector<12x72xf32>
    %c0_188 = arith.constant 0 : index
    %c0_189 = arith.constant 0 : index
    %214 = vector.load %arg7[%c0_188, %c0_189] : memref<12x24xf32, #tpu.memory_space<vmem>>, vector<12x24xf32>
    %cst_190 = arith.constant dense<0.000000e+00> : vector<12x72xf32>
    %215 = tpu.matmul %214, %211, %cst_190 {dimension_numbers = #tpu.dot_dimension_numbers<[1], [0], [0], [1], [0, 0, 1, 1], [], []>} : vector<12x24xf32>, vector<24x72xf32>, vector<12x72xf32> -> vector<12x72xf32>
    %216 = arith.maximumf %213, %215 : vector<12x72xf32>
    %217 = vector.extract_strided_slice %216 {offsets = [0, 0], sizes = [8, 72], strides = [1, 1]} : vector<12x72xf32> to vector<8x72xf32>
    %c0_191 = arith.constant 0 : index
    %c0_192 = arith.constant 0 : index
    %c0_193 = arith.constant 0 : index
    %218 = vector.load %arg8[%c0_191, %c0_192, %c0_193] : memref<5x72x128xf32, #tpu.memory_space<vmem>>, vector<1x72x128xf32>
    %219 = vector.shape_cast %218 : vector<1x72x128xf32> to vector<72x128xf32>
    %cst_194 = arith.constant dense<0.000000e+00> : vector<8x128xf32>
    %220 = tpu.matmul %217, %219, %cst_194 {dimension_numbers = #tpu.dot_dimension_numbers<[1], [0], [0], [1], [0, 0, 1, 1], [], []>} : vector<8x72xf32>, vector<72x128xf32>, vector<8x128xf32> -> vector<8x128xf32>
    %221 = vector.extract_strided_slice %216 {offsets = [1, 0], sizes = [8, 72], strides = [1, 1]} : vector<12x72xf32> to vector<8x72xf32>
    %c1_195 = arith.constant 1 : index
    %c0_196 = arith.constant 0 : index
    %c0_197 = arith.constant 0 : index
    %222 = vector.load %arg8[%c1_195, %c0_196, %c0_197] : memref<5x72x128xf32, #tpu.memory_space<vmem>>, vector<1x72x128xf32>
    %223 = vector.shape_cast %222 : vector<1x72x128xf32> to vector<72x128xf32>
    %cst_198 = arith.constant dense<0.000000e+00> : vector<8x128xf32>
    %224 = tpu.matmul %221, %223, %cst_198 {dimension_numbers = #tpu.dot_dimension_numbers<[1], [0], [0], [1], [0, 0, 1, 1], [], []>} : vector<8x72xf32>, vector<72x128xf32>, vector<8x128xf32> -> vector<8x128xf32>
    %225 = vector.extract_strided_slice %216 {offsets = [2, 0], sizes = [8, 72], strides = [1, 1]} : vector<12x72xf32> to vector<8x72xf32>
    %c2_199 = arith.constant 2 : index
    %c0_200 = arith.constant 0 : index
    %c0_201 = arith.constant 0 : index
    %226 = vector.load %arg8[%c2_199, %c0_200, %c0_201] : memref<5x72x128xf32, #tpu.memory_space<vmem>>, vector<1x72x128xf32>
    %227 = vector.shape_cast %226 : vector<1x72x128xf32> to vector<72x128xf32>
    %cst_202 = arith.constant dense<0.000000e+00> : vector<8x128xf32>
    %228 = tpu.matmul %225, %227, %cst_202 {dimension_numbers = #tpu.dot_dimension_numbers<[1], [0], [0], [1], [0, 0, 1, 1], [], []>} : vector<8x72xf32>, vector<72x128xf32>, vector<8x128xf32> -> vector<8x128xf32>
    %229 = arith.addf %220, %228 : vector<8x128xf32>
    %230 = vector.extract_strided_slice %216 {offsets = [3, 0], sizes = [8, 72], strides = [1, 1]} : vector<12x72xf32> to vector<8x72xf32>
    %c3_203 = arith.constant 3 : index
    %c0_204 = arith.constant 0 : index
    %c0_205 = arith.constant 0 : index
    %231 = vector.load %arg8[%c3_203, %c0_204, %c0_205] : memref<5x72x128xf32, #tpu.memory_space<vmem>>, vector<1x72x128xf32>
    %232 = vector.shape_cast %231 : vector<1x72x128xf32> to vector<72x128xf32>
    %cst_206 = arith.constant dense<0.000000e+00> : vector<8x128xf32>
    %233 = tpu.matmul %230, %232, %cst_206 {dimension_numbers = #tpu.dot_dimension_numbers<[1], [0], [0], [1], [0, 0, 1, 1], [], []>} : vector<8x72xf32>, vector<72x128xf32>, vector<8x128xf32> -> vector<8x128xf32>
    %234 = arith.addf %224, %233 : vector<8x128xf32>
    %235 = vector.extract_strided_slice %216 {offsets = [4, 0], sizes = [8, 72], strides = [1, 1]} : vector<12x72xf32> to vector<8x72xf32>
    %c4_207 = arith.constant 4 : index
    %c0_208 = arith.constant 0 : index
    %c0_209 = arith.constant 0 : index
    %236 = vector.load %arg8[%c4_207, %c0_208, %c0_209] : memref<5x72x128xf32, #tpu.memory_space<vmem>>, vector<1x72x128xf32>
    %237 = vector.shape_cast %236 : vector<1x72x128xf32> to vector<72x128xf32>
    %cst_210 = arith.constant dense<0.000000e+00> : vector<8x128xf32>
    %238 = tpu.matmul %235, %237, %cst_210 {dimension_numbers = #tpu.dot_dimension_numbers<[1], [0], [0], [1], [0, 0, 1, 1], [], []>} : vector<8x72xf32>, vector<72x128xf32>, vector<8x128xf32> -> vector<8x128xf32>
    %239 = arith.addf %229, %238 : vector<8x128xf32>
    %240 = arith.addf %239, %234 : vector<8x128xf32>
    %c0_211 = arith.constant 0 : index
    %c0_212 = arith.constant 0 : index
    %241 = vector.load %arg9[%c0_211, %c0_212] : memref<1x128xf32, #tpu.memory_space<vmem>>, vector<1x128xf32>
    %242 = vector.broadcast %241 : vector<1x128xf32> to vector<8x128xf32>
    %243 = arith.addf %240, %242 : vector<8x128xf32>
    %cst_213 = arith.constant 0.000000e+00 : f32
    %244 = vector.broadcast %cst_213 : f32 to vector<8x128xf32>
    %245 = arith.maximumf %243, %244 : vector<8x128xf32>
    %c0_214 = arith.constant 0 : index
    %c0_215 = arith.constant 0 : index
    %246 = vector.load %arg10[%c0_214, %c0_215] : memref<128x64xf32, #tpu.memory_space<vmem>>, vector<128x64xf32>
    %cst_216 = arith.constant dense<0.000000e+00> : vector<8x64xf32>
    %247 = tpu.matmul %245, %246, %cst_216 {dimension_numbers = #tpu.dot_dimension_numbers<[1], [0], [0], [1], [0, 0, 1, 1], [], []>} : vector<8x128xf32>, vector<128x64xf32>, vector<8x64xf32> -> vector<8x64xf32>
    %c0_217 = arith.constant 0 : index
    %c0_218 = arith.constant 0 : index
    %248 = vector.load %arg11[%c0_217, %c0_218] : memref<128x64xf32, #tpu.memory_space<vmem>>, vector<128x64xf32>
    %cst_219 = arith.constant dense<0.000000e+00> : vector<8x64xf32>
    %249 = tpu.matmul %245, %248, %cst_219 {dimension_numbers = #tpu.dot_dimension_numbers<[1], [0], [0], [1], [0, 0, 1, 1], [], []>} : vector<8x128xf32>, vector<128x64xf32>, vector<8x64xf32> -> vector<8x64xf32>
    %250 = arith.maximumf %247, %249 : vector<8x64xf32>
    %c0_220 = arith.constant 0 : index
    %c0_221 = arith.constant 0 : index
    %251 = vector.load %arg12[%c0_220, %c0_221] : memref<4x8xf32, #tpu.memory_space<vmem>>, vector<4x8xf32>
    %cst_222 = arith.constant dense<0.000000e+00> : vector<4x64xf32>
    %252 = tpu.matmul %251, %250, %cst_222 {dimension_numbers = #tpu.dot_dimension_numbers<[1], [0], [0], [1], [0, 0, 1, 1], [], []>} : vector<4x8xf32>, vector<8x64xf32>, vector<4x64xf32> -> vector<4x64xf32>
    %c0_223 = arith.constant 0 : index
    %c0_224 = arith.constant 0 : index
    %253 = vector.load %arg13[%c0_223, %c0_224] : memref<4x8xf32, #tpu.memory_space<vmem>>, vector<4x8xf32>
    %cst_225 = arith.constant dense<0.000000e+00> : vector<4x64xf32>
    %254 = tpu.matmul %253, %250, %cst_225 {dimension_numbers = #tpu.dot_dimension_numbers<[1], [0], [0], [1], [0, 0, 1, 1], [], []>} : vector<4x8xf32>, vector<8x64xf32>, vector<4x64xf32> -> vector<4x64xf32>
    %255 = arith.maximumf %252, %254 : vector<4x64xf32>
    %256 = vector.extract_strided_slice %255 {offsets = [0, 0], sizes = [1, 64], strides = [1, 1]} : vector<4x64xf32> to vector<1x64xf32>
    %c2_226 = arith.constant 2 : index
    %c0_227 = arith.constant 0 : index
    %257 = vector.load %arg21[%c2_226, %c0_227] : memref<8x256xf32, #tpu.memory_space<vmem>>, vector<1x64xf32>
    tpu.vector_store %arg21[%c2_226, %c0_227], %256 {strides = array<i32>} : memref<8x256xf32, #tpu.memory_space<vmem>>, vector<1x64xf32>,
    %258 = vector.extract_strided_slice %255 {offsets = [1, 0], sizes = [1, 64], strides = [1, 1]} : vector<4x64xf32> to vector<1x64xf32>
    %c2_228 = arith.constant 2 : index
    %c64_229 = arith.constant 64 : index
    %259 = vector.load %arg21[%c2_228, %c64_229] : memref<8x256xf32, #tpu.memory_space<vmem>>, vector<1x64xf32>
    tpu.vector_store %arg21[%c2_228, %c64_229], %258 {strides = array<i32>} : memref<8x256xf32, #tpu.memory_space<vmem>>, vector<1x64xf32>,
    %260 = vector.extract_strided_slice %255 {offsets = [2, 0], sizes = [1, 64], strides = [1, 1]} : vector<4x64xf32> to vector<1x64xf32>
    %c2_230 = arith.constant 2 : index
    %c128_231 = arith.constant 128 : index
    %261 = vector.load %arg21[%c2_230, %c128_231] : memref<8x256xf32, #tpu.memory_space<vmem>>, vector<1x64xf32>
    tpu.vector_store %arg21[%c2_230, %c128_231], %260 {strides = array<i32>} : memref<8x256xf32, #tpu.memory_space<vmem>>, vector<1x64xf32>,
    %262 = vector.extract_strided_slice %255 {offsets = [3, 0], sizes = [1, 64], strides = [1, 1]} : vector<4x64xf32> to vector<1x64xf32>
    %c2_232 = arith.constant 2 : index
    %c192_233 = arith.constant 192 : index
    %263 = vector.load %arg21[%c2_232, %c192_233] : memref<8x256xf32, #tpu.memory_space<vmem>>, vector<1x64xf32>
    tpu.vector_store %arg21[%c2_232, %c192_233], %262 {strides = array<i32>} : memref<8x256xf32, #tpu.memory_space<vmem>>, vector<1x64xf32>,
    %c3_234 = arith.constant 3 : index
    %c0_235 = arith.constant 0 : index
    %c0_236 = arith.constant 0 : index
    %264 = vector.load %arg1[%c3_234, %c0_235, %c0_236] : memref<8x28x28xf32, #tpu.memory_space<vmem>>, vector<1x28x28xf32>
    %265 = vector.shape_cast %264 : vector<1x28x28xf32> to vector<28x28xf32>
    %266 = vector.extract_strided_slice %265 {offsets = [0, 0], sizes = [24, 28], strides = [1, 1]} : vector<28x28xf32> to vector<24x28xf32>
    %c0_237 = arith.constant 0 : index
    %c0_238 = arith.constant 0 : index
    %c0_239 = arith.constant 0 : index
    %267 = vector.load %arg2[%c0_237, %c0_238, %c0_239] : memref<5x28x144xf32, #tpu.memory_space<vmem>>, vector<1x28x144xf32>
    %268 = vector.shape_cast %267 : vector<1x28x144xf32> to vector<28x144xf32>
    %cst_240 = arith.constant dense<0.000000e+00> : vector<24x144xf32>
    %269 = tpu.matmul %266, %268, %cst_240 {dimension_numbers = #tpu.dot_dimension_numbers<[1], [0], [0], [1], [0, 0, 1, 1], [], []>} : vector<24x28xf32>, vector<28x144xf32>, vector<24x144xf32> -> vector<24x144xf32>
    %270 = vector.extract_strided_slice %265 {offsets = [1, 0], sizes = [24, 28], strides = [1, 1]} : vector<28x28xf32> to vector<24x28xf32>
    %c1_241 = arith.constant 1 : index
    %c0_242 = arith.constant 0 : index
    %c0_243 = arith.constant 0 : index
    %271 = vector.load %arg2[%c1_241, %c0_242, %c0_243] : memref<5x28x144xf32, #tpu.memory_space<vmem>>, vector<1x28x144xf32>
    %272 = vector.shape_cast %271 : vector<1x28x144xf32> to vector<28x144xf32>
    %cst_244 = arith.constant dense<0.000000e+00> : vector<24x144xf32>
    %273 = tpu.matmul %270, %272, %cst_244 {dimension_numbers = #tpu.dot_dimension_numbers<[1], [0], [0], [1], [0, 0, 1, 1], [], []>} : vector<24x28xf32>, vector<28x144xf32>, vector<24x144xf32> -> vector<24x144xf32>
    %274 = vector.extract_strided_slice %265 {offsets = [2, 0], sizes = [24, 28], strides = [1, 1]} : vector<28x28xf32> to vector<24x28xf32>
    %c2_245 = arith.constant 2 : index
    %c0_246 = arith.constant 0 : index
    %c0_247 = arith.constant 0 : index
    %275 = vector.load %arg2[%c2_245, %c0_246, %c0_247] : memref<5x28x144xf32, #tpu.memory_space<vmem>>, vector<1x28x144xf32>
    %276 = vector.shape_cast %275 : vector<1x28x144xf32> to vector<28x144xf32>
    %cst_248 = arith.constant dense<0.000000e+00> : vector<24x144xf32>
    %277 = tpu.matmul %274, %276, %cst_248 {dimension_numbers = #tpu.dot_dimension_numbers<[1], [0], [0], [1], [0, 0, 1, 1], [], []>} : vector<24x28xf32>, vector<28x144xf32>, vector<24x144xf32> -> vector<24x144xf32>
    %278 = arith.addf %269, %277 : vector<24x144xf32>
    %279 = vector.extract_strided_slice %265 {offsets = [3, 0], sizes = [24, 28], strides = [1, 1]} : vector<28x28xf32> to vector<24x28xf32>
    %c3_249 = arith.constant 3 : index
    %c0_250 = arith.constant 0 : index
    %c0_251 = arith.constant 0 : index
    %280 = vector.load %arg2[%c3_249, %c0_250, %c0_251] : memref<5x28x144xf32, #tpu.memory_space<vmem>>, vector<1x28x144xf32>
    %281 = vector.shape_cast %280 : vector<1x28x144xf32> to vector<28x144xf32>
    %cst_252 = arith.constant dense<0.000000e+00> : vector<24x144xf32>
    %282 = tpu.matmul %279, %281, %cst_252 {dimension_numbers = #tpu.dot_dimension_numbers<[1], [0], [0], [1], [0, 0, 1, 1], [], []>} : vector<24x28xf32>, vector<28x144xf32>, vector<24x144xf32> -> vector<24x144xf32>
    %283 = arith.addf %273, %282 : vector<24x144xf32>
    %284 = vector.extract_strided_slice %265 {offsets = [4, 0], sizes = [24, 28], strides = [1, 1]} : vector<28x28xf32> to vector<24x28xf32>
    %c4_253 = arith.constant 4 : index
    %c0_254 = arith.constant 0 : index
    %c0_255 = arith.constant 0 : index
    %285 = vector.load %arg2[%c4_253, %c0_254, %c0_255] : memref<5x28x144xf32, #tpu.memory_space<vmem>>, vector<1x28x144xf32>
    %286 = vector.shape_cast %285 : vector<1x28x144xf32> to vector<28x144xf32>
    %cst_256 = arith.constant dense<0.000000e+00> : vector<24x144xf32>
    %287 = tpu.matmul %284, %286, %cst_256 {dimension_numbers = #tpu.dot_dimension_numbers<[1], [0], [0], [1], [0, 0, 1, 1], [], []>} : vector<24x28xf32>, vector<28x144xf32>, vector<24x144xf32> -> vector<24x144xf32>
    %288 = arith.addf %278, %287 : vector<24x144xf32>
    %289 = arith.addf %288, %283 : vector<24x144xf32>
    %c0_257 = arith.constant 0 : index
    %c0_258 = arith.constant 0 : index
    %290 = vector.load %arg3[%c0_257, %c0_258] : memref<1x144xf32, #tpu.memory_space<vmem>>, vector<1x144xf32>
    %291 = vector.broadcast %290 : vector<1x144xf32> to vector<24x144xf32>
    %292 = arith.addf %289, %291 : vector<24x144xf32>
    %cst_259 = arith.constant 0.000000e+00 : f32
    %293 = vector.broadcast %cst_259 : f32 to vector<24x144xf32>
    %294 = arith.maximumf %292, %293 : vector<24x144xf32>
    %c0_260 = arith.constant 0 : index
    %c0_261 = arith.constant 0 : index
    %295 = vector.load %arg4[%c0_260, %c0_261] : memref<144x72xf32, #tpu.memory_space<vmem>>, vector<144x72xf32>
    %cst_262 = arith.constant dense<0.000000e+00> : vector<24x72xf32>
    %296 = tpu.matmul %294, %295, %cst_262 {dimension_numbers = #tpu.dot_dimension_numbers<[1], [0], [0], [1], [0, 0, 1, 1], [], []>} : vector<24x144xf32>, vector<144x72xf32>, vector<24x72xf32> -> vector<24x72xf32>
    %c0_263 = arith.constant 0 : index
    %c0_264 = arith.constant 0 : index
    %297 = vector.load %arg5[%c0_263, %c0_264] : memref<144x72xf32, #tpu.memory_space<vmem>>, vector<144x72xf32>
    %cst_265 = arith.constant dense<0.000000e+00> : vector<24x72xf32>
    %298 = tpu.matmul %294, %297, %cst_265 {dimension_numbers = #tpu.dot_dimension_numbers<[1], [0], [0], [1], [0, 0, 1, 1], [], []>} : vector<24x144xf32>, vector<144x72xf32>, vector<24x72xf32> -> vector<24x72xf32>
    %299 = arith.maximumf %296, %298 : vector<24x72xf32>
    %c0_266 = arith.constant 0 : index
    %c0_267 = arith.constant 0 : index
    %300 = vector.load %arg6[%c0_266, %c0_267] : memref<12x24xf32, #tpu.memory_space<vmem>>, vector<12x24xf32>
    %cst_268 = arith.constant dense<0.000000e+00> : vector<12x72xf32>
    %301 = tpu.matmul %300, %299, %cst_268 {dimension_numbers = #tpu.dot_dimension_numbers<[1], [0], [0], [1], [0, 0, 1, 1], [], []>} : vector<12x24xf32>, vector<24x72xf32>, vector<12x72xf32> -> vector<12x72xf32>
    %c0_269 = arith.constant 0 : index
    %c0_270 = arith.constant 0 : index
    %302 = vector.load %arg7[%c0_269, %c0_270] : memref<12x24xf32, #tpu.memory_space<vmem>>, vector<12x24xf32>
    %cst_271 = arith.constant dense<0.000000e+00> : vector<12x72xf32>
    %303 = tpu.matmul %302, %299, %cst_271 {dimension_numbers = #tpu.dot_dimension_numbers<[1], [0], [0], [1], [0, 0, 1, 1], [], []>} : vector<12x24xf32>, vector<24x72xf32>, vector<12x72xf32> -> vector<12x72xf32>
    %304 = arith.maximumf %301, %303 : vector<12x72xf32>
    %305 = vector.extract_strided_slice %304 {offsets = [0, 0], sizes = [8, 72], strides = [1, 1]} : vector<12x72xf32> to vector<8x72xf32>
    %c0_272 = arith.constant 0 : index
    %c0_273 = arith.constant 0 : index
    %c0_274 = arith.constant 0 : index
    %306 = vector.load %arg8[%c0_272, %c0_273, %c0_274] : memref<5x72x128xf32, #tpu.memory_space<vmem>>, vector<1x72x128xf32>
    %307 = vector.shape_cast %306 : vector<1x72x128xf32> to vector<72x128xf32>
    %cst_275 = arith.constant dense<0.000000e+00> : vector<8x128xf32>
    %308 = tpu.matmul %305, %307, %cst_275 {dimension_numbers = #tpu.dot_dimension_numbers<[1], [0], [0], [1], [0, 0, 1, 1], [], []>} : vector<8x72xf32>, vector<72x128xf32>, vector<8x128xf32> -> vector<8x128xf32>
    %309 = vector.extract_strided_slice %304 {offsets = [1, 0], sizes = [8, 72], strides = [1, 1]} : vector<12x72xf32> to vector<8x72xf32>
    %c1_276 = arith.constant 1 : index
    %c0_277 = arith.constant 0 : index
    %c0_278 = arith.constant 0 : index
    %310 = vector.load %arg8[%c1_276, %c0_277, %c0_278] : memref<5x72x128xf32, #tpu.memory_space<vmem>>, vector<1x72x128xf32>
    %311 = vector.shape_cast %310 : vector<1x72x128xf32> to vector<72x128xf32>
    %cst_279 = arith.constant dense<0.000000e+00> : vector<8x128xf32>
    %312 = tpu.matmul %309, %311, %cst_279 {dimension_numbers = #tpu.dot_dimension_numbers<[1], [0], [0], [1], [0, 0, 1, 1], [], []>} : vector<8x72xf32>, vector<72x128xf32>, vector<8x128xf32> -> vector<8x128xf32>
    %313 = vector.extract_strided_slice %304 {offsets = [2, 0], sizes = [8, 72], strides = [1, 1]} : vector<12x72xf32> to vector<8x72xf32>
    %c2_280 = arith.constant 2 : index
    %c0_281 = arith.constant 0 : index
    %c0_282 = arith.constant 0 : index
    %314 = vector.load %arg8[%c2_280, %c0_281, %c0_282] : memref<5x72x128xf32, #tpu.memory_space<vmem>>, vector<1x72x128xf32>
    %315 = vector.shape_cast %314 : vector<1x72x128xf32> to vector<72x128xf32>
    %cst_283 = arith.constant dense<0.000000e+00> : vector<8x128xf32>
    %316 = tpu.matmul %313, %315, %cst_283 {dimension_numbers = #tpu.dot_dimension_numbers<[1], [0], [0], [1], [0, 0, 1, 1], [], []>} : vector<8x72xf32>, vector<72x128xf32>, vector<8x128xf32> -> vector<8x128xf32>
    %317 = arith.addf %308, %316 : vector<8x128xf32>
    %318 = vector.extract_strided_slice %304 {offsets = [3, 0], sizes = [8, 72], strides = [1, 1]} : vector<12x72xf32> to vector<8x72xf32>
    %c3_284 = arith.constant 3 : index
    %c0_285 = arith.constant 0 : index
    %c0_286 = arith.constant 0 : index
    %319 = vector.load %arg8[%c3_284, %c0_285, %c0_286] : memref<5x72x128xf32, #tpu.memory_space<vmem>>, vector<1x72x128xf32>
    %320 = vector.shape_cast %319 : vector<1x72x128xf32> to vector<72x128xf32>
    %cst_287 = arith.constant dense<0.000000e+00> : vector<8x128xf32>
    %321 = tpu.matmul %318, %320, %cst_287 {dimension_numbers = #tpu.dot_dimension_numbers<[1], [0], [0], [1], [0, 0, 1, 1], [], []>} : vector<8x72xf32>, vector<72x128xf32>, vector<8x128xf32> -> vector<8x128xf32>
    %322 = arith.addf %312, %321 : vector<8x128xf32>
    %323 = vector.extract_strided_slice %304 {offsets = [4, 0], sizes = [8, 72], strides = [1, 1]} : vector<12x72xf32> to vector<8x72xf32>
    %c4_288 = arith.constant 4 : index
    %c0_289 = arith.constant 0 : index
    %c0_290 = arith.constant 0 : index
    %324 = vector.load %arg8[%c4_288, %c0_289, %c0_290] : memref<5x72x128xf32, #tpu.memory_space<vmem>>, vector<1x72x128xf32>
    %325 = vector.shape_cast %324 : vector<1x72x128xf32> to vector<72x128xf32>
    %cst_291 = arith.constant dense<0.000000e+00> : vector<8x128xf32>
    %326 = tpu.matmul %323, %325, %cst_291 {dimension_numbers = #tpu.dot_dimension_numbers<[1], [0], [0], [1], [0, 0, 1, 1], [], []>} : vector<8x72xf32>, vector<72x128xf32>, vector<8x128xf32> -> vector<8x128xf32>
    %327 = arith.addf %317, %326 : vector<8x128xf32>
    %328 = arith.addf %327, %322 : vector<8x128xf32>
    %c0_292 = arith.constant 0 : index
    %c0_293 = arith.constant 0 : index
    %329 = vector.load %arg9[%c0_292, %c0_293] : memref<1x128xf32, #tpu.memory_space<vmem>>, vector<1x128xf32>
    %330 = vector.broadcast %329 : vector<1x128xf32> to vector<8x128xf32>
    %331 = arith.addf %328, %330 : vector<8x128xf32>
    %cst_294 = arith.constant 0.000000e+00 : f32
    %332 = vector.broadcast %cst_294 : f32 to vector<8x128xf32>
    %333 = arith.maximumf %331, %332 : vector<8x128xf32>
    %c0_295 = arith.constant 0 : index
    %c0_296 = arith.constant 0 : index
    %334 = vector.load %arg10[%c0_295, %c0_296] : memref<128x64xf32, #tpu.memory_space<vmem>>, vector<128x64xf32>
    %cst_297 = arith.constant dense<0.000000e+00> : vector<8x64xf32>
    %335 = tpu.matmul %333, %334, %cst_297 {dimension_numbers = #tpu.dot_dimension_numbers<[1], [0], [0], [1], [0, 0, 1, 1], [], []>} : vector<8x128xf32>, vector<128x64xf32>, vector<8x64xf32> -> vector<8x64xf32>
    %c0_298 = arith.constant 0 : index
    %c0_299 = arith.constant 0 : index
    %336 = vector.load %arg11[%c0_298, %c0_299] : memref<128x64xf32, #tpu.memory_space<vmem>>, vector<128x64xf32>
    %cst_300 = arith.constant dense<0.000000e+00> : vector<8x64xf32>
    %337 = tpu.matmul %333, %336, %cst_300 {dimension_numbers = #tpu.dot_dimension_numbers<[1], [0], [0], [1], [0, 0, 1, 1], [], []>} : vector<8x128xf32>, vector<128x64xf32>, vector<8x64xf32> -> vector<8x64xf32>
    %338 = arith.maximumf %335, %337 : vector<8x64xf32>
    %c0_301 = arith.constant 0 : index
    %c0_302 = arith.constant 0 : index
    %339 = vector.load %arg12[%c0_301, %c0_302] : memref<4x8xf32, #tpu.memory_space<vmem>>, vector<4x8xf32>
    %cst_303 = arith.constant dense<0.000000e+00> : vector<4x64xf32>
    %340 = tpu.matmul %339, %338, %cst_303 {dimension_numbers = #tpu.dot_dimension_numbers<[1], [0], [0], [1], [0, 0, 1, 1], [], []>} : vector<4x8xf32>, vector<8x64xf32>, vector<4x64xf32> -> vector<4x64xf32>
    %c0_304 = arith.constant 0 : index
    %c0_305 = arith.constant 0 : index
    %341 = vector.load %arg13[%c0_304, %c0_305] : memref<4x8xf32, #tpu.memory_space<vmem>>, vector<4x8xf32>
    %cst_306 = arith.constant dense<0.000000e+00> : vector<4x64xf32>
    %342 = tpu.matmul %341, %338, %cst_306 {dimension_numbers = #tpu.dot_dimension_numbers<[1], [0], [0], [1], [0, 0, 1, 1], [], []>} : vector<4x8xf32>, vector<8x64xf32>, vector<4x64xf32> -> vector<4x64xf32>
    %343 = arith.maximumf %340, %342 : vector<4x64xf32>
    %344 = vector.extract_strided_slice %343 {offsets = [0, 0], sizes = [1, 64], strides = [1, 1]} : vector<4x64xf32> to vector<1x64xf32>
    %c3_307 = arith.constant 3 : index
    %c0_308 = arith.constant 0 : index
    %345 = vector.load %arg21[%c3_307, %c0_308] : memref<8x256xf32, #tpu.memory_space<vmem>>, vector<1x64xf32>
    tpu.vector_store %arg21[%c3_307, %c0_308], %344 {strides = array<i32>} : memref<8x256xf32, #tpu.memory_space<vmem>>, vector<1x64xf32>,
    %346 = vector.extract_strided_slice %343 {offsets = [1, 0], sizes = [1, 64], strides = [1, 1]} : vector<4x64xf32> to vector<1x64xf32>
    %c3_309 = arith.constant 3 : index
    %c64_310 = arith.constant 64 : index
    %347 = vector.load %arg21[%c3_309, %c64_310] : memref<8x256xf32, #tpu.memory_space<vmem>>, vector<1x64xf32>
    tpu.vector_store %arg21[%c3_309, %c64_310], %346 {strides = array<i32>} : memref<8x256xf32, #tpu.memory_space<vmem>>, vector<1x64xf32>,
    %348 = vector.extract_strided_slice %343 {offsets = [2, 0], sizes = [1, 64], strides = [1, 1]} : vector<4x64xf32> to vector<1x64xf32>
    %c3_311 = arith.constant 3 : index
    %c128_312 = arith.constant 128 : index
    %349 = vector.load %arg21[%c3_311, %c128_312] : memref<8x256xf32, #tpu.memory_space<vmem>>, vector<1x64xf32>
    tpu.vector_store %arg21[%c3_311, %c128_312], %348 {strides = array<i32>} : memref<8x256xf32, #tpu.memory_space<vmem>>, vector<1x64xf32>,
    %350 = vector.extract_strided_slice %343 {offsets = [3, 0], sizes = [1, 64], strides = [1, 1]} : vector<4x64xf32> to vector<1x64xf32>
    %c3_313 = arith.constant 3 : index
    %c192_314 = arith.constant 192 : index
    %351 = vector.load %arg21[%c3_313, %c192_314] : memref<8x256xf32, #tpu.memory_space<vmem>>, vector<1x64xf32>
    tpu.vector_store %arg21[%c3_313, %c192_314], %350 {strides = array<i32>} : memref<8x256xf32, #tpu.memory_space<vmem>>, vector<1x64xf32>,
    %c4_315 = arith.constant 4 : index
    %c0_316 = arith.constant 0 : index
    %c0_317 = arith.constant 0 : index
    %352 = vector.load %arg1[%c4_315, %c0_316, %c0_317] : memref<8x28x28xf32, #tpu.memory_space<vmem>>, vector<1x28x28xf32>
    %353 = vector.shape_cast %352 : vector<1x28x28xf32> to vector<28x28xf32>
    %354 = vector.extract_strided_slice %353 {offsets = [0, 0], sizes = [24, 28], strides = [1, 1]} : vector<28x28xf32> to vector<24x28xf32>
    %c0_318 = arith.constant 0 : index
    %c0_319 = arith.constant 0 : index
    %c0_320 = arith.constant 0 : index
    %355 = vector.load %arg2[%c0_318, %c0_319, %c0_320] : memref<5x28x144xf32, #tpu.memory_space<vmem>>, vector<1x28x144xf32>
    %356 = vector.shape_cast %355 : vector<1x28x144xf32> to vector<28x144xf32>
    %cst_321 = arith.constant dense<0.000000e+00> : vector<24x144xf32>
    %357 = tpu.matmul %354, %356, %cst_321 {dimension_numbers = #tpu.dot_dimension_numbers<[1], [0], [0], [1], [0, 0, 1, 1], [], []>} : vector<24x28xf32>, vector<28x144xf32>, vector<24x144xf32> -> vector<24x144xf32>
    %358 = vector.extract_strided_slice %353 {offsets = [1, 0], sizes = [24, 28], strides = [1, 1]} : vector<28x28xf32> to vector<24x28xf32>
    %c1_322 = arith.constant 1 : index
    %c0_323 = arith.constant 0 : index
    %c0_324 = arith.constant 0 : index
    %359 = vector.load %arg2[%c1_322, %c0_323, %c0_324] : memref<5x28x144xf32, #tpu.memory_space<vmem>>, vector<1x28x144xf32>
    %360 = vector.shape_cast %359 : vector<1x28x144xf32> to vector<28x144xf32>
    %cst_325 = arith.constant dense<0.000000e+00> : vector<24x144xf32>
    %361 = tpu.matmul %358, %360, %cst_325 {dimension_numbers = #tpu.dot_dimension_numbers<[1], [0], [0], [1], [0, 0, 1, 1], [], []>} : vector<24x28xf32>, vector<28x144xf32>, vector<24x144xf32> -> vector<24x144xf32>
    %362 = vector.extract_strided_slice %353 {offsets = [2, 0], sizes = [24, 28], strides = [1, 1]} : vector<28x28xf32> to vector<24x28xf32>
    %c2_326 = arith.constant 2 : index
    %c0_327 = arith.constant 0 : index
    %c0_328 = arith.constant 0 : index
    %363 = vector.load %arg2[%c2_326, %c0_327, %c0_328] : memref<5x28x144xf32, #tpu.memory_space<vmem>>, vector<1x28x144xf32>
    %364 = vector.shape_cast %363 : vector<1x28x144xf32> to vector<28x144xf32>
    %cst_329 = arith.constant dense<0.000000e+00> : vector<24x144xf32>
    %365 = tpu.matmul %362, %364, %cst_329 {dimension_numbers = #tpu.dot_dimension_numbers<[1], [0], [0], [1], [0, 0, 1, 1], [], []>} : vector<24x28xf32>, vector<28x144xf32>, vector<24x144xf32> -> vector<24x144xf32>
    %366 = arith.addf %357, %365 : vector<24x144xf32>
    %367 = vector.extract_strided_slice %353 {offsets = [3, 0], sizes = [24, 28], strides = [1, 1]} : vector<28x28xf32> to vector<24x28xf32>
    %c3_330 = arith.constant 3 : index
    %c0_331 = arith.constant 0 : index
    %c0_332 = arith.constant 0 : index
    %368 = vector.load %arg2[%c3_330, %c0_331, %c0_332] : memref<5x28x144xf32, #tpu.memory_space<vmem>>, vector<1x28x144xf32>
    %369 = vector.shape_cast %368 : vector<1x28x144xf32> to vector<28x144xf32>
    %cst_333 = arith.constant dense<0.000000e+00> : vector<24x144xf32>
    %370 = tpu.matmul %367, %369, %cst_333 {dimension_numbers = #tpu.dot_dimension_numbers<[1], [0], [0], [1], [0, 0, 1, 1], [], []>} : vector<24x28xf32>, vector<28x144xf32>, vector<24x144xf32> -> vector<24x144xf32>
    %371 = arith.addf %361, %370 : vector<24x144xf32>
    %372 = vector.extract_strided_slice %353 {offsets = [4, 0], sizes = [24, 28], strides = [1, 1]} : vector<28x28xf32> to vector<24x28xf32>
    %c4_334 = arith.constant 4 : index
    %c0_335 = arith.constant 0 : index
    %c0_336 = arith.constant 0 : index
    %373 = vector.load %arg2[%c4_334, %c0_335, %c0_336] : memref<5x28x144xf32, #tpu.memory_space<vmem>>, vector<1x28x144xf32>
    %374 = vector.shape_cast %373 : vector<1x28x144xf32> to vector<28x144xf32>
    %cst_337 = arith.constant dense<0.000000e+00> : vector<24x144xf32>
    %375 = tpu.matmul %372, %374, %cst_337 {dimension_numbers = #tpu.dot_dimension_numbers<[1], [0], [0], [1], [0, 0, 1, 1], [], []>} : vector<24x28xf32>, vector<28x144xf32>, vector<24x144xf32> -> vector<24x144xf32>
    %376 = arith.addf %366, %375 : vector<24x144xf32>
    %377 = arith.addf %376, %371 : vector<24x144xf32>
    %c0_338 = arith.constant 0 : index
    %c0_339 = arith.constant 0 : index
    %378 = vector.load %arg3[%c0_338, %c0_339] : memref<1x144xf32, #tpu.memory_space<vmem>>, vector<1x144xf32>
    %379 = vector.broadcast %378 : vector<1x144xf32> to vector<24x144xf32>
    %380 = arith.addf %377, %379 : vector<24x144xf32>
    %cst_340 = arith.constant 0.000000e+00 : f32
    %381 = vector.broadcast %cst_340 : f32 to vector<24x144xf32>
    %382 = arith.maximumf %380, %381 : vector<24x144xf32>
    %c0_341 = arith.constant 0 : index
    %c0_342 = arith.constant 0 : index
    %383 = vector.load %arg4[%c0_341, %c0_342] : memref<144x72xf32, #tpu.memory_space<vmem>>, vector<144x72xf32>
    %cst_343 = arith.constant dense<0.000000e+00> : vector<24x72xf32>
    %384 = tpu.matmul %382, %383, %cst_343 {dimension_numbers = #tpu.dot_dimension_numbers<[1], [0], [0], [1], [0, 0, 1, 1], [], []>} : vector<24x144xf32>, vector<144x72xf32>, vector<24x72xf32> -> vector<24x72xf32>
    %c0_344 = arith.constant 0 : index
    %c0_345 = arith.constant 0 : index
    %385 = vector.load %arg5[%c0_344, %c0_345] : memref<144x72xf32, #tpu.memory_space<vmem>>, vector<144x72xf32>
    %cst_346 = arith.constant dense<0.000000e+00> : vector<24x72xf32>
    %386 = tpu.matmul %382, %385, %cst_346 {dimension_numbers = #tpu.dot_dimension_numbers<[1], [0], [0], [1], [0, 0, 1, 1], [], []>} : vector<24x144xf32>, vector<144x72xf32>, vector<24x72xf32> -> vector<24x72xf32>
    %387 = arith.maximumf %384, %386 : vector<24x72xf32>
    %c0_347 = arith.constant 0 : index
    %c0_348 = arith.constant 0 : index
    %388 = vector.load %arg6[%c0_347, %c0_348] : memref<12x24xf32, #tpu.memory_space<vmem>>, vector<12x24xf32>
    %cst_349 = arith.constant dense<0.000000e+00> : vector<12x72xf32>
    %389 = tpu.matmul %388, %387, %cst_349 {dimension_numbers = #tpu.dot_dimension_numbers<[1], [0], [0], [1], [0, 0, 1, 1], [], []>} : vector<12x24xf32>, vector<24x72xf32>, vector<12x72xf32> -> vector<12x72xf32>
    %c0_350 = arith.constant 0 : index
    %c0_351 = arith.constant 0 : index
    %390 = vector.load %arg7[%c0_350, %c0_351] : memref<12x24xf32, #tpu.memory_space<vmem>>, vector<12x24xf32>
    %cst_352 = arith.constant dense<0.000000e+00> : vector<12x72xf32>
    %391 = tpu.matmul %390, %387, %cst_352 {dimension_numbers = #tpu.dot_dimension_numbers<[1], [0], [0], [1], [0, 0, 1, 1], [], []>} : vector<12x24xf32>, vector<24x72xf32>, vector<12x72xf32> -> vector<12x72xf32>
    %392 = arith.maximumf %389, %391 : vector<12x72xf32>
    %393 = vector.extract_strided_slice %392 {offsets = [0, 0], sizes = [8, 72], strides = [1, 1]} : vector<12x72xf32> to vector<8x72xf32>
    %c0_353 = arith.constant 0 : index
    %c0_354 = arith.constant 0 : index
    %c0_355 = arith.constant 0 : index
    %394 = vector.load %arg8[%c0_353, %c0_354, %c0_355] : memref<5x72x128xf32, #tpu.memory_space<vmem>>, vector<1x72x128xf32>
    %395 = vector.shape_cast %394 : vector<1x72x128xf32> to vector<72x128xf32>
    %cst_356 = arith.constant dense<0.000000e+00> : vector<8x128xf32>
    %396 = tpu.matmul %393, %395, %cst_356 {dimension_numbers = #tpu.dot_dimension_numbers<[1], [0], [0], [1], [0, 0, 1, 1], [], []>} : vector<8x72xf32>, vector<72x128xf32>, vector<8x128xf32> -> vector<8x128xf32>
    %397 = vector.extract_strided_slice %392 {offsets = [1, 0], sizes = [8, 72], strides = [1, 1]} : vector<12x72xf32> to vector<8x72xf32>
    %c1_357 = arith.constant 1 : index
    %c0_358 = arith.constant 0 : index
    %c0_359 = arith.constant 0 : index
    %398 = vector.load %arg8[%c1_357, %c0_358, %c0_359] : memref<5x72x128xf32, #tpu.memory_space<vmem>>, vector<1x72x128xf32>
    %399 = vector.shape_cast %398 : vector<1x72x128xf32> to vector<72x128xf32>
    %cst_360 = arith.constant dense<0.000000e+00> : vector<8x128xf32>
    %400 = tpu.matmul %397, %399, %cst_360 {dimension_numbers = #tpu.dot_dimension_numbers<[1], [0], [0], [1], [0, 0, 1, 1], [], []>} : vector<8x72xf32>, vector<72x128xf32>, vector<8x128xf32> -> vector<8x128xf32>
    %401 = vector.extract_strided_slice %392 {offsets = [2, 0], sizes = [8, 72], strides = [1, 1]} : vector<12x72xf32> to vector<8x72xf32>
    %c2_361 = arith.constant 2 : index
    %c0_362 = arith.constant 0 : index
    %c0_363 = arith.constant 0 : index
    %402 = vector.load %arg8[%c2_361, %c0_362, %c0_363] : memref<5x72x128xf32, #tpu.memory_space<vmem>>, vector<1x72x128xf32>
    %403 = vector.shape_cast %402 : vector<1x72x128xf32> to vector<72x128xf32>
    %cst_364 = arith.constant dense<0.000000e+00> : vector<8x128xf32>
    %404 = tpu.matmul %401, %403, %cst_364 {dimension_numbers = #tpu.dot_dimension_numbers<[1], [0], [0], [1], [0, 0, 1, 1], [], []>} : vector<8x72xf32>, vector<72x128xf32>, vector<8x128xf32> -> vector<8x128xf32>
    %405 = arith.addf %396, %404 : vector<8x128xf32>
    %406 = vector.extract_strided_slice %392 {offsets = [3, 0], sizes = [8, 72], strides = [1, 1]} : vector<12x72xf32> to vector<8x72xf32>
    %c3_365 = arith.constant 3 : index
    %c0_366 = arith.constant 0 : index
    %c0_367 = arith.constant 0 : index
    %407 = vector.load %arg8[%c3_365, %c0_366, %c0_367] : memref<5x72x128xf32, #tpu.memory_space<vmem>>, vector<1x72x128xf32>
    %408 = vector.shape_cast %407 : vector<1x72x128xf32> to vector<72x128xf32>
    %cst_368 = arith.constant dense<0.000000e+00> : vector<8x128xf32>
    %409 = tpu.matmul %406, %408, %cst_368 {dimension_numbers = #tpu.dot_dimension_numbers<[1], [0], [0], [1], [0, 0, 1, 1], [], []>} : vector<8x72xf32>, vector<72x128xf32>, vector<8x128xf32> -> vector<8x128xf32>
    %410 = arith.addf %400, %409 : vector<8x128xf32>
    %411 = vector.extract_strided_slice %392 {offsets = [4, 0], sizes = [8, 72], strides = [1, 1]} : vector<12x72xf32> to vector<8x72xf32>
    %c4_369 = arith.constant 4 : index
    %c0_370 = arith.constant 0 : index
    %c0_371 = arith.constant 0 : index
    %412 = vector.load %arg8[%c4_369, %c0_370, %c0_371] : memref<5x72x128xf32, #tpu.memory_space<vmem>>, vector<1x72x128xf32>
    %413 = vector.shape_cast %412 : vector<1x72x128xf32> to vector<72x128xf32>
    %cst_372 = arith.constant dense<0.000000e+00> : vector<8x128xf32>
    %414 = tpu.matmul %411, %413, %cst_372 {dimension_numbers = #tpu.dot_dimension_numbers<[1], [0], [0], [1], [0, 0, 1, 1], [], []>} : vector<8x72xf32>, vector<72x128xf32>, vector<8x128xf32> -> vector<8x128xf32>
    %415 = arith.addf %405, %414 : vector<8x128xf32>
    %416 = arith.addf %415, %410 : vector<8x128xf32>
    %c0_373 = arith.constant 0 : index
    %c0_374 = arith.constant 0 : index
    %417 = vector.load %arg9[%c0_373, %c0_374] : memref<1x128xf32, #tpu.memory_space<vmem>>, vector<1x128xf32>
    %418 = vector.broadcast %417 : vector<1x128xf32> to vector<8x128xf32>
    %419 = arith.addf %416, %418 : vector<8x128xf32>
    %cst_375 = arith.constant 0.000000e+00 : f32
    %420 = vector.broadcast %cst_375 : f32 to vector<8x128xf32>
    %421 = arith.maximumf %419, %420 : vector<8x128xf32>
    %c0_376 = arith.constant 0 : index
    %c0_377 = arith.constant 0 : index
    %422 = vector.load %arg10[%c0_376, %c0_377] : memref<128x64xf32, #tpu.memory_space<vmem>>, vector<128x64xf32>
    %cst_378 = arith.constant dense<0.000000e+00> : vector<8x64xf32>
    %423 = tpu.matmul %421, %422, %cst_378 {dimension_numbers = #tpu.dot_dimension_numbers<[1], [0], [0], [1], [0, 0, 1, 1], [], []>} : vector<8x128xf32>, vector<128x64xf32>, vector<8x64xf32> -> vector<8x64xf32>
    %c0_379 = arith.constant 0 : index
    %c0_380 = arith.constant 0 : index
    %424 = vector.load %arg11[%c0_379, %c0_380] : memref<128x64xf32, #tpu.memory_space<vmem>>, vector<128x64xf32>
    %cst_381 = arith.constant dense<0.000000e+00> : vector<8x64xf32>
    %425 = tpu.matmul %421, %424, %cst_381 {dimension_numbers = #tpu.dot_dimension_numbers<[1], [0], [0], [1], [0, 0, 1, 1], [], []>} : vector<8x128xf32>, vector<128x64xf32>, vector<8x64xf32> -> vector<8x64xf32>
    %426 = arith.maximumf %423, %425 : vector<8x64xf32>
    %c0_382 = arith.constant 0 : index
    %c0_383 = arith.constant 0 : index
    %427 = vector.load %arg12[%c0_382, %c0_383] : memref<4x8xf32, #tpu.memory_space<vmem>>, vector<4x8xf32>
    %cst_384 = arith.constant dense<0.000000e+00> : vector<4x64xf32>
    %428 = tpu.matmul %427, %426, %cst_384 {dimension_numbers = #tpu.dot_dimension_numbers<[1], [0], [0], [1], [0, 0, 1, 1], [], []>} : vector<4x8xf32>, vector<8x64xf32>, vector<4x64xf32> -> vector<4x64xf32>
    %c0_385 = arith.constant 0 : index
    %c0_386 = arith.constant 0 : index
    %429 = vector.load %arg13[%c0_385, %c0_386] : memref<4x8xf32, #tpu.memory_space<vmem>>, vector<4x8xf32>
    %cst_387 = arith.constant dense<0.000000e+00> : vector<4x64xf32>
    %430 = tpu.matmul %429, %426, %cst_387 {dimension_numbers = #tpu.dot_dimension_numbers<[1], [0], [0], [1], [0, 0, 1, 1], [], []>} : vector<4x8xf32>, vector<8x64xf32>, vector<4x64xf32> -> vector<4x64xf32>
    %431 = arith.maximumf %428, %430 : vector<4x64xf32>
    %432 = vector.extract_strided_slice %431 {offsets = [0, 0], sizes = [1, 64], strides = [1, 1]} : vector<4x64xf32> to vector<1x64xf32>
    %c4_388 = arith.constant 4 : index
    %c0_389 = arith.constant 0 : index
    %433 = vector.load %arg21[%c4_388, %c0_389] : memref<8x256xf32, #tpu.memory_space<vmem>>, vector<1x64xf32>
    tpu.vector_store %arg21[%c4_388, %c0_389], %432 {strides = array<i32>} : memref<8x256xf32, #tpu.memory_space<vmem>>, vector<1x64xf32>,
    %434 = vector.extract_strided_slice %431 {offsets = [1, 0], sizes = [1, 64], strides = [1, 1]} : vector<4x64xf32> to vector<1x64xf32>
    %c4_390 = arith.constant 4 : index
    %c64_391 = arith.constant 64 : index
    %435 = vector.load %arg21[%c4_390, %c64_391] : memref<8x256xf32, #tpu.memory_space<vmem>>, vector<1x64xf32>
    tpu.vector_store %arg21[%c4_390, %c64_391], %434 {strides = array<i32>} : memref<8x256xf32, #tpu.memory_space<vmem>>, vector<1x64xf32>,
    %436 = vector.extract_strided_slice %431 {offsets = [2, 0], sizes = [1, 64], strides = [1, 1]} : vector<4x64xf32> to vector<1x64xf32>
    %c4_392 = arith.constant 4 : index
    %c128_393 = arith.constant 128 : index
    %437 = vector.load %arg21[%c4_392, %c128_393] : memref<8x256xf32, #tpu.memory_space<vmem>>, vector<1x64xf32>
    tpu.vector_store %arg21[%c4_392, %c128_393], %436 {strides = array<i32>} : memref<8x256xf32, #tpu.memory_space<vmem>>, vector<1x64xf32>,
    %438 = vector.extract_strided_slice %431 {offsets = [3, 0], sizes = [1, 64], strides = [1, 1]} : vector<4x64xf32> to vector<1x64xf32>
    %c4_394 = arith.constant 4 : index
    %c192_395 = arith.constant 192 : index
    %439 = vector.load %arg21[%c4_394, %c192_395] : memref<8x256xf32, #tpu.memory_space<vmem>>, vector<1x64xf32>
    tpu.vector_store %arg21[%c4_394, %c192_395], %438 {strides = array<i32>} : memref<8x256xf32, #tpu.memory_space<vmem>>, vector<1x64xf32>,
    %c5 = arith.constant 5 : index
    %c0_396 = arith.constant 0 : index
    %c0_397 = arith.constant 0 : index
    %440 = vector.load %arg1[%c5, %c0_396, %c0_397] : memref<8x28x28xf32, #tpu.memory_space<vmem>>, vector<1x28x28xf32>
    %441 = vector.shape_cast %440 : vector<1x28x28xf32> to vector<28x28xf32>
    %442 = vector.extract_strided_slice %441 {offsets = [0, 0], sizes = [24, 28], strides = [1, 1]} : vector<28x28xf32> to vector<24x28xf32>
    %c0_398 = arith.constant 0 : index
    %c0_399 = arith.constant 0 : index
    %c0_400 = arith.constant 0 : index
    %443 = vector.load %arg2[%c0_398, %c0_399, %c0_400] : memref<5x28x144xf32, #tpu.memory_space<vmem>>, vector<1x28x144xf32>
    %444 = vector.shape_cast %443 : vector<1x28x144xf32> to vector<28x144xf32>
    %cst_401 = arith.constant dense<0.000000e+00> : vector<24x144xf32>
    %445 = tpu.matmul %442, %444, %cst_401 {dimension_numbers = #tpu.dot_dimension_numbers<[1], [0], [0], [1], [0, 0, 1, 1], [], []>} : vector<24x28xf32>, vector<28x144xf32>, vector<24x144xf32> -> vector<24x144xf32>
    %446 = vector.extract_strided_slice %441 {offsets = [1, 0], sizes = [24, 28], strides = [1, 1]} : vector<28x28xf32> to vector<24x28xf32>
    %c1_402 = arith.constant 1 : index
    %c0_403 = arith.constant 0 : index
    %c0_404 = arith.constant 0 : index
    %447 = vector.load %arg2[%c1_402, %c0_403, %c0_404] : memref<5x28x144xf32, #tpu.memory_space<vmem>>, vector<1x28x144xf32>
    %448 = vector.shape_cast %447 : vector<1x28x144xf32> to vector<28x144xf32>
    %cst_405 = arith.constant dense<0.000000e+00> : vector<24x144xf32>
    %449 = tpu.matmul %446, %448, %cst_405 {dimension_numbers = #tpu.dot_dimension_numbers<[1], [0], [0], [1], [0, 0, 1, 1], [], []>} : vector<24x28xf32>, vector<28x144xf32>, vector<24x144xf32> -> vector<24x144xf32>
    %450 = vector.extract_strided_slice %441 {offsets = [2, 0], sizes = [24, 28], strides = [1, 1]} : vector<28x28xf32> to vector<24x28xf32>
    %c2_406 = arith.constant 2 : index
    %c0_407 = arith.constant 0 : index
    %c0_408 = arith.constant 0 : index
    %451 = vector.load %arg2[%c2_406, %c0_407, %c0_408] : memref<5x28x144xf32, #tpu.memory_space<vmem>>, vector<1x28x144xf32>
    %452 = vector.shape_cast %451 : vector<1x28x144xf32> to vector<28x144xf32>
    %cst_409 = arith.constant dense<0.000000e+00> : vector<24x144xf32>
    %453 = tpu.matmul %450, %452, %cst_409 {dimension_numbers = #tpu.dot_dimension_numbers<[1], [0], [0], [1], [0, 0, 1, 1], [], []>} : vector<24x28xf32>, vector<28x144xf32>, vector<24x144xf32> -> vector<24x144xf32>
    %454 = arith.addf %445, %453 : vector<24x144xf32>
    %455 = vector.extract_strided_slice %441 {offsets = [3, 0], sizes = [24, 28], strides = [1, 1]} : vector<28x28xf32> to vector<24x28xf32>
    %c3_410 = arith.constant 3 : index
    %c0_411 = arith.constant 0 : index
    %c0_412 = arith.constant 0 : index
    %456 = vector.load %arg2[%c3_410, %c0_411, %c0_412] : memref<5x28x144xf32, #tpu.memory_space<vmem>>, vector<1x28x144xf32>
    %457 = vector.shape_cast %456 : vector<1x28x144xf32> to vector<28x144xf32>
    %cst_413 = arith.constant dense<0.000000e+00> : vector<24x144xf32>
    %458 = tpu.matmul %455, %457, %cst_413 {dimension_numbers = #tpu.dot_dimension_numbers<[1], [0], [0], [1], [0, 0, 1, 1], [], []>} : vector<24x28xf32>, vector<28x144xf32>, vector<24x144xf32> -> vector<24x144xf32>
    %459 = arith.addf %449, %458 : vector<24x144xf32>
    %460 = vector.extract_strided_slice %441 {offsets = [4, 0], sizes = [24, 28], strides = [1, 1]} : vector<28x28xf32> to vector<24x28xf32>
    %c4_414 = arith.constant 4 : index
    %c0_415 = arith.constant 0 : index
    %c0_416 = arith.constant 0 : index
    %461 = vector.load %arg2[%c4_414, %c0_415, %c0_416] : memref<5x28x144xf32, #tpu.memory_space<vmem>>, vector<1x28x144xf32>
    %462 = vector.shape_cast %461 : vector<1x28x144xf32> to vector<28x144xf32>
    %cst_417 = arith.constant dense<0.000000e+00> : vector<24x144xf32>
    %463 = tpu.matmul %460, %462, %cst_417 {dimension_numbers = #tpu.dot_dimension_numbers<[1], [0], [0], [1], [0, 0, 1, 1], [], []>} : vector<24x28xf32>, vector<28x144xf32>, vector<24x144xf32> -> vector<24x144xf32>
    %464 = arith.addf %454, %463 : vector<24x144xf32>
    %465 = arith.addf %464, %459 : vector<24x144xf32>
    %c0_418 = arith.constant 0 : index
    %c0_419 = arith.constant 0 : index
    %466 = vector.load %arg3[%c0_418, %c0_419] : memref<1x144xf32, #tpu.memory_space<vmem>>, vector<1x144xf32>
    %467 = vector.broadcast %466 : vector<1x144xf32> to vector<24x144xf32>
    %468 = arith.addf %465, %467 : vector<24x144xf32>
    %cst_420 = arith.constant 0.000000e+00 : f32
    %469 = vector.broadcast %cst_420 : f32 to vector<24x144xf32>
    %470 = arith.maximumf %468, %469 : vector<24x144xf32>
    %c0_421 = arith.constant 0 : index
    %c0_422 = arith.constant 0 : index
    %471 = vector.load %arg4[%c0_421, %c0_422] : memref<144x72xf32, #tpu.memory_space<vmem>>, vector<144x72xf32>
    %cst_423 = arith.constant dense<0.000000e+00> : vector<24x72xf32>
    %472 = tpu.matmul %470, %471, %cst_423 {dimension_numbers = #tpu.dot_dimension_numbers<[1], [0], [0], [1], [0, 0, 1, 1], [], []>} : vector<24x144xf32>, vector<144x72xf32>, vector<24x72xf32> -> vector<24x72xf32>
    %c0_424 = arith.constant 0 : index
    %c0_425 = arith.constant 0 : index
    %473 = vector.load %arg5[%c0_424, %c0_425] : memref<144x72xf32, #tpu.memory_space<vmem>>, vector<144x72xf32>
    %cst_426 = arith.constant dense<0.000000e+00> : vector<24x72xf32>
    %474 = tpu.matmul %470, %473, %cst_426 {dimension_numbers = #tpu.dot_dimension_numbers<[1], [0], [0], [1], [0, 0, 1, 1], [], []>} : vector<24x144xf32>, vector<144x72xf32>, vector<24x72xf32> -> vector<24x72xf32>
    %475 = arith.maximumf %472, %474 : vector<24x72xf32>
    %c0_427 = arith.constant 0 : index
    %c0_428 = arith.constant 0 : index
    %476 = vector.load %arg6[%c0_427, %c0_428] : memref<12x24xf32, #tpu.memory_space<vmem>>, vector<12x24xf32>
    %cst_429 = arith.constant dense<0.000000e+00> : vector<12x72xf32>
    %477 = tpu.matmul %476, %475, %cst_429 {dimension_numbers = #tpu.dot_dimension_numbers<[1], [0], [0], [1], [0, 0, 1, 1], [], []>} : vector<12x24xf32>, vector<24x72xf32>, vector<12x72xf32> -> vector<12x72xf32>
    %c0_430 = arith.constant 0 : index
    %c0_431 = arith.constant 0 : index
    %478 = vector.load %arg7[%c0_430, %c0_431] : memref<12x24xf32, #tpu.memory_space<vmem>>, vector<12x24xf32>
    %cst_432 = arith.constant dense<0.000000e+00> : vector<12x72xf32>
    %479 = tpu.matmul %478, %475, %cst_432 {dimension_numbers = #tpu.dot_dimension_numbers<[1], [0], [0], [1], [0, 0, 1, 1], [], []>} : vector<12x24xf32>, vector<24x72xf32>, vector<12x72xf32> -> vector<12x72xf32>
    %480 = arith.maximumf %477, %479 : vector<12x72xf32>
    %481 = vector.extract_strided_slice %480 {offsets = [0, 0], sizes = [8, 72], strides = [1, 1]} : vector<12x72xf32> to vector<8x72xf32>
    %c0_433 = arith.constant 0 : index
    %c0_434 = arith.constant 0 : index
    %c0_435 = arith.constant 0 : index
    %482 = vector.load %arg8[%c0_433, %c0_434, %c0_435] : memref<5x72x128xf32, #tpu.memory_space<vmem>>, vector<1x72x128xf32>
    %483 = vector.shape_cast %482 : vector<1x72x128xf32> to vector<72x128xf32>
    %cst_436 = arith.constant dense<0.000000e+00> : vector<8x128xf32>
    %484 = tpu.matmul %481, %483, %cst_436 {dimension_numbers = #tpu.dot_dimension_numbers<[1], [0], [0], [1], [0, 0, 1, 1], [], []>} : vector<8x72xf32>, vector<72x128xf32>, vector<8x128xf32> -> vector<8x128xf32>
    %485 = vector.extract_strided_slice %480 {offsets = [1, 0], sizes = [8, 72], strides = [1, 1]} : vector<12x72xf32> to vector<8x72xf32>
    %c1_437 = arith.constant 1 : index
    %c0_438 = arith.constant 0 : index
    %c0_439 = arith.constant 0 : index
    %486 = vector.load %arg8[%c1_437, %c0_438, %c0_439] : memref<5x72x128xf32, #tpu.memory_space<vmem>>, vector<1x72x128xf32>
    %487 = vector.shape_cast %486 : vector<1x72x128xf32> to vector<72x128xf32>
    %cst_440 = arith.constant dense<0.000000e+00> : vector<8x128xf32>
    %488 = tpu.matmul %485, %487, %cst_440 {dimension_numbers = #tpu.dot_dimension_numbers<[1], [0], [0], [1], [0, 0, 1, 1], [], []>} : vector<8x72xf32>, vector<72x128xf32>, vector<8x128xf32> -> vector<8x128xf32>
    %489 = vector.extract_strided_slice %480 {offsets = [2, 0], sizes = [8, 72], strides = [1, 1]} : vector<12x72xf32> to vector<8x72xf32>
    %c2_441 = arith.constant 2 : index
    %c0_442 = arith.constant 0 : index
    %c0_443 = arith.constant 0 : index
    %490 = vector.load %arg8[%c2_441, %c0_442, %c0_443] : memref<5x72x128xf32, #tpu.memory_space<vmem>>, vector<1x72x128xf32>
    %491 = vector.shape_cast %490 : vector<1x72x128xf32> to vector<72x128xf32>
    %cst_444 = arith.constant dense<0.000000e+00> : vector<8x128xf32>
    %492 = tpu.matmul %489, %491, %cst_444 {dimension_numbers = #tpu.dot_dimension_numbers<[1], [0], [0], [1], [0, 0, 1, 1], [], []>} : vector<8x72xf32>, vector<72x128xf32>, vector<8x128xf32> -> vector<8x128xf32>
    %493 = arith.addf %484, %492 : vector<8x128xf32>
    %494 = vector.extract_strided_slice %480 {offsets = [3, 0], sizes = [8, 72], strides = [1, 1]} : vector<12x72xf32> to vector<8x72xf32>
    %c3_445 = arith.constant 3 : index
    %c0_446 = arith.constant 0 : index
    %c0_447 = arith.constant 0 : index
    %495 = vector.load %arg8[%c3_445, %c0_446, %c0_447] : memref<5x72x128xf32, #tpu.memory_space<vmem>>, vector<1x72x128xf32>
    %496 = vector.shape_cast %495 : vector<1x72x128xf32> to vector<72x128xf32>
    %cst_448 = arith.constant dense<0.000000e+00> : vector<8x128xf32>
    %497 = tpu.matmul %494, %496, %cst_448 {dimension_numbers = #tpu.dot_dimension_numbers<[1], [0], [0], [1], [0, 0, 1, 1], [], []>} : vector<8x72xf32>, vector<72x128xf32>, vector<8x128xf32> -> vector<8x128xf32>
    %498 = arith.addf %488, %497 : vector<8x128xf32>
    %499 = vector.extract_strided_slice %480 {offsets = [4, 0], sizes = [8, 72], strides = [1, 1]} : vector<12x72xf32> to vector<8x72xf32>
    %c4_449 = arith.constant 4 : index
    %c0_450 = arith.constant 0 : index
    %c0_451 = arith.constant 0 : index
    %500 = vector.load %arg8[%c4_449, %c0_450, %c0_451] : memref<5x72x128xf32, #tpu.memory_space<vmem>>, vector<1x72x128xf32>
    %501 = vector.shape_cast %500 : vector<1x72x128xf32> to vector<72x128xf32>
    %cst_452 = arith.constant dense<0.000000e+00> : vector<8x128xf32>
    %502 = tpu.matmul %499, %501, %cst_452 {dimension_numbers = #tpu.dot_dimension_numbers<[1], [0], [0], [1], [0, 0, 1, 1], [], []>} : vector<8x72xf32>, vector<72x128xf32>, vector<8x128xf32> -> vector<8x128xf32>
    %503 = arith.addf %493, %502 : vector<8x128xf32>
    %504 = arith.addf %503, %498 : vector<8x128xf32>
    %c0_453 = arith.constant 0 : index
    %c0_454 = arith.constant 0 : index
    %505 = vector.load %arg9[%c0_453, %c0_454] : memref<1x128xf32, #tpu.memory_space<vmem>>, vector<1x128xf32>
    %506 = vector.broadcast %505 : vector<1x128xf32> to vector<8x128xf32>
    %507 = arith.addf %504, %506 : vector<8x128xf32>
    %cst_455 = arith.constant 0.000000e+00 : f32
    %508 = vector.broadcast %cst_455 : f32 to vector<8x128xf32>
    %509 = arith.maximumf %507, %508 : vector<8x128xf32>
    %c0_456 = arith.constant 0 : index
    %c0_457 = arith.constant 0 : index
    %510 = vector.load %arg10[%c0_456, %c0_457] : memref<128x64xf32, #tpu.memory_space<vmem>>, vector<128x64xf32>
    %cst_458 = arith.constant dense<0.000000e+00> : vector<8x64xf32>
    %511 = tpu.matmul %509, %510, %cst_458 {dimension_numbers = #tpu.dot_dimension_numbers<[1], [0], [0], [1], [0, 0, 1, 1], [], []>} : vector<8x128xf32>, vector<128x64xf32>, vector<8x64xf32> -> vector<8x64xf32>
    %c0_459 = arith.constant 0 : index
    %c0_460 = arith.constant 0 : index
    %512 = vector.load %arg11[%c0_459, %c0_460] : memref<128x64xf32, #tpu.memory_space<vmem>>, vector<128x64xf32>
    %cst_461 = arith.constant dense<0.000000e+00> : vector<8x64xf32>
    %513 = tpu.matmul %509, %512, %cst_461 {dimension_numbers = #tpu.dot_dimension_numbers<[1], [0], [0], [1], [0, 0, 1, 1], [], []>} : vector<8x128xf32>, vector<128x64xf32>, vector<8x64xf32> -> vector<8x64xf32>
    %514 = arith.maximumf %511, %513 : vector<8x64xf32>
    %c0_462 = arith.constant 0 : index
    %c0_463 = arith.constant 0 : index
    %515 = vector.load %arg12[%c0_462, %c0_463] : memref<4x8xf32, #tpu.memory_space<vmem>>, vector<4x8xf32>
    %cst_464 = arith.constant dense<0.000000e+00> : vector<4x64xf32>
    %516 = tpu.matmul %515, %514, %cst_464 {dimension_numbers = #tpu.dot_dimension_numbers<[1], [0], [0], [1], [0, 0, 1, 1], [], []>} : vector<4x8xf32>, vector<8x64xf32>, vector<4x64xf32> -> vector<4x64xf32>
    %c0_465 = arith.constant 0 : index
    %c0_466 = arith.constant 0 : index
    %517 = vector.load %arg13[%c0_465, %c0_466] : memref<4x8xf32, #tpu.memory_space<vmem>>, vector<4x8xf32>
    %cst_467 = arith.constant dense<0.000000e+00> : vector<4x64xf32>
    %518 = tpu.matmul %517, %514, %cst_467 {dimension_numbers = #tpu.dot_dimension_numbers<[1], [0], [0], [1], [0, 0, 1, 1], [], []>} : vector<4x8xf32>, vector<8x64xf32>, vector<4x64xf32> -> vector<4x64xf32>
    %519 = arith.maximumf %516, %518 : vector<4x64xf32>
    %520 = vector.extract_strided_slice %519 {offsets = [0, 0], sizes = [1, 64], strides = [1, 1]} : vector<4x64xf32> to vector<1x64xf32>
    %c5_468 = arith.constant 5 : index
    %c0_469 = arith.constant 0 : index
    %521 = vector.load %arg21[%c5_468, %c0_469] : memref<8x256xf32, #tpu.memory_space<vmem>>, vector<1x64xf32>
    tpu.vector_store %arg21[%c5_468, %c0_469], %520 {strides = array<i32>} : memref<8x256xf32, #tpu.memory_space<vmem>>, vector<1x64xf32>,
    %522 = vector.extract_strided_slice %519 {offsets = [1, 0], sizes = [1, 64], strides = [1, 1]} : vector<4x64xf32> to vector<1x64xf32>
    %c5_470 = arith.constant 5 : index
    %c64_471 = arith.constant 64 : index
    %523 = vector.load %arg21[%c5_470, %c64_471] : memref<8x256xf32, #tpu.memory_space<vmem>>, vector<1x64xf32>
    tpu.vector_store %arg21[%c5_470, %c64_471], %522 {strides = array<i32>} : memref<8x256xf32, #tpu.memory_space<vmem>>, vector<1x64xf32>,
    %524 = vector.extract_strided_slice %519 {offsets = [2, 0], sizes = [1, 64], strides = [1, 1]} : vector<4x64xf32> to vector<1x64xf32>
    %c5_472 = arith.constant 5 : index
    %c128_473 = arith.constant 128 : index
    %525 = vector.load %arg21[%c5_472, %c128_473] : memref<8x256xf32, #tpu.memory_space<vmem>>, vector<1x64xf32>
    tpu.vector_store %arg21[%c5_472, %c128_473], %524 {strides = array<i32>} : memref<8x256xf32, #tpu.memory_space<vmem>>, vector<1x64xf32>,
    %526 = vector.extract_strided_slice %519 {offsets = [3, 0], sizes = [1, 64], strides = [1, 1]} : vector<4x64xf32> to vector<1x64xf32>
    %c5_474 = arith.constant 5 : index
    %c192_475 = arith.constant 192 : index
    %527 = vector.load %arg21[%c5_474, %c192_475] : memref<8x256xf32, #tpu.memory_space<vmem>>, vector<1x64xf32>
    tpu.vector_store %arg21[%c5_474, %c192_475], %526 {strides = array<i32>} : memref<8x256xf32, #tpu.memory_space<vmem>>, vector<1x64xf32>,
    %c6 = arith.constant 6 : index
    %c0_476 = arith.constant 0 : index
    %c0_477 = arith.constant 0 : index
    %528 = vector.load %arg1[%c6, %c0_476, %c0_477] : memref<8x28x28xf32, #tpu.memory_space<vmem>>, vector<1x28x28xf32>
    %529 = vector.shape_cast %528 : vector<1x28x28xf32> to vector<28x28xf32>
    %530 = vector.extract_strided_slice %529 {offsets = [0, 0], sizes = [24, 28], strides = [1, 1]} : vector<28x28xf32> to vector<24x28xf32>
    %c0_478 = arith.constant 0 : index
    %c0_479 = arith.constant 0 : index
    %c0_480 = arith.constant 0 : index
    %531 = vector.load %arg2[%c0_478, %c0_479, %c0_480] : memref<5x28x144xf32, #tpu.memory_space<vmem>>, vector<1x28x144xf32>
    %532 = vector.shape_cast %531 : vector<1x28x144xf32> to vector<28x144xf32>
    %cst_481 = arith.constant dense<0.000000e+00> : vector<24x144xf32>
    %533 = tpu.matmul %530, %532, %cst_481 {dimension_numbers = #tpu.dot_dimension_numbers<[1], [0], [0], [1], [0, 0, 1, 1], [], []>} : vector<24x28xf32>, vector<28x144xf32>, vector<24x144xf32> -> vector<24x144xf32>
    %534 = vector.extract_strided_slice %529 {offsets = [1, 0], sizes = [24, 28], strides = [1, 1]} : vector<28x28xf32> to vector<24x28xf32>
    %c1_482 = arith.constant 1 : index
    %c0_483 = arith.constant 0 : index
    %c0_484 = arith.constant 0 : index
    %535 = vector.load %arg2[%c1_482, %c0_483, %c0_484] : memref<5x28x144xf32, #tpu.memory_space<vmem>>, vector<1x28x144xf32>
    %536 = vector.shape_cast %535 : vector<1x28x144xf32> to vector<28x144xf32>
    %cst_485 = arith.constant dense<0.000000e+00> : vector<24x144xf32>
    %537 = tpu.matmul %534, %536, %cst_485 {dimension_numbers = #tpu.dot_dimension_numbers<[1], [0], [0], [1], [0, 0, 1, 1], [], []>} : vector<24x28xf32>, vector<28x144xf32>, vector<24x144xf32> -> vector<24x144xf32>
    %538 = vector.extract_strided_slice %529 {offsets = [2, 0], sizes = [24, 28], strides = [1, 1]} : vector<28x28xf32> to vector<24x28xf32>
    %c2_486 = arith.constant 2 : index
    %c0_487 = arith.constant 0 : index
    %c0_488 = arith.constant 0 : index
    %539 = vector.load %arg2[%c2_486, %c0_487, %c0_488] : memref<5x28x144xf32, #tpu.memory_space<vmem>>, vector<1x28x144xf32>
    %540 = vector.shape_cast %539 : vector<1x28x144xf32> to vector<28x144xf32>
    %cst_489 = arith.constant dense<0.000000e+00> : vector<24x144xf32>
    %541 = tpu.matmul %538, %540, %cst_489 {dimension_numbers = #tpu.dot_dimension_numbers<[1], [0], [0], [1], [0, 0, 1, 1], [], []>} : vector<24x28xf32>, vector<28x144xf32>, vector<24x144xf32> -> vector<24x144xf32>
    %542 = arith.addf %533, %541 : vector<24x144xf32>
    %543 = vector.extract_strided_slice %529 {offsets = [3, 0], sizes = [24, 28], strides = [1, 1]} : vector<28x28xf32> to vector<24x28xf32>
    %c3_490 = arith.constant 3 : index
    %c0_491 = arith.constant 0 : index
    %c0_492 = arith.constant 0 : index
    %544 = vector.load %arg2[%c3_490, %c0_491, %c0_492] : memref<5x28x144xf32, #tpu.memory_space<vmem>>, vector<1x28x144xf32>
    %545 = vector.shape_cast %544 : vector<1x28x144xf32> to vector<28x144xf32>
    %cst_493 = arith.constant dense<0.000000e+00> : vector<24x144xf32>
    %546 = tpu.matmul %543, %545, %cst_493 {dimension_numbers = #tpu.dot_dimension_numbers<[1], [0], [0], [1], [0, 0, 1, 1], [], []>} : vector<24x28xf32>, vector<28x144xf32>, vector<24x144xf32> -> vector<24x144xf32>
    %547 = arith.addf %537, %546 : vector<24x144xf32>
    %548 = vector.extract_strided_slice %529 {offsets = [4, 0], sizes = [24, 28], strides = [1, 1]} : vector<28x28xf32> to vector<24x28xf32>
    %c4_494 = arith.constant 4 : index
    %c0_495 = arith.constant 0 : index
    %c0_496 = arith.constant 0 : index
    %549 = vector.load %arg2[%c4_494, %c0_495, %c0_496] : memref<5x28x144xf32, #tpu.memory_space<vmem>>, vector<1x28x144xf32>
    %550 = vector.shape_cast %549 : vector<1x28x144xf32> to vector<28x144xf32>
    %cst_497 = arith.constant dense<0.000000e+00> : vector<24x144xf32>
    %551 = tpu.matmul %548, %550, %cst_497 {dimension_numbers = #tpu.dot_dimension_numbers<[1], [0], [0], [1], [0, 0, 1, 1], [], []>} : vector<24x28xf32>, vector<28x144xf32>, vector<24x144xf32> -> vector<24x144xf32>
    %552 = arith.addf %542, %551 : vector<24x144xf32>
    %553 = arith.addf %552, %547 : vector<24x144xf32>
    %c0_498 = arith.constant 0 : index
    %c0_499 = arith.constant 0 : index
    %554 = vector.load %arg3[%c0_498, %c0_499] : memref<1x144xf32, #tpu.memory_space<vmem>>, vector<1x144xf32>
    %555 = vector.broadcast %554 : vector<1x144xf32> to vector<24x144xf32>
    %556 = arith.addf %553, %555 : vector<24x144xf32>
    %cst_500 = arith.constant 0.000000e+00 : f32
    %557 = vector.broadcast %cst_500 : f32 to vector<24x144xf32>
    %558 = arith.maximumf %556, %557 : vector<24x144xf32>
    %c0_501 = arith.constant 0 : index
    %c0_502 = arith.constant 0 : index
    %559 = vector.load %arg4[%c0_501, %c0_502] : memref<144x72xf32, #tpu.memory_space<vmem>>, vector<144x72xf32>
    %cst_503 = arith.constant dense<0.000000e+00> : vector<24x72xf32>
    %560 = tpu.matmul %558, %559, %cst_503 {dimension_numbers = #tpu.dot_dimension_numbers<[1], [0], [0], [1], [0, 0, 1, 1], [], []>} : vector<24x144xf32>, vector<144x72xf32>, vector<24x72xf32> -> vector<24x72xf32>
    %c0_504 = arith.constant 0 : index
    %c0_505 = arith.constant 0 : index
    %561 = vector.load %arg5[%c0_504, %c0_505] : memref<144x72xf32, #tpu.memory_space<vmem>>, vector<144x72xf32>
    %cst_506 = arith.constant dense<0.000000e+00> : vector<24x72xf32>
    %562 = tpu.matmul %558, %561, %cst_506 {dimension_numbers = #tpu.dot_dimension_numbers<[1], [0], [0], [1], [0, 0, 1, 1], [], []>} : vector<24x144xf32>, vector<144x72xf32>, vector<24x72xf32> -> vector<24x72xf32>
    %563 = arith.maximumf %560, %562 : vector<24x72xf32>
    %c0_507 = arith.constant 0 : index
    %c0_508 = arith.constant 0 : index
    %564 = vector.load %arg6[%c0_507, %c0_508] : memref<12x24xf32, #tpu.memory_space<vmem>>, vector<12x24xf32>
    %cst_509 = arith.constant dense<0.000000e+00> : vector<12x72xf32>
    %565 = tpu.matmul %564, %563, %cst_509 {dimension_numbers = #tpu.dot_dimension_numbers<[1], [0], [0], [1], [0, 0, 1, 1], [], []>} : vector<12x24xf32>, vector<24x72xf32>, vector<12x72xf32> -> vector<12x72xf32>
    %c0_510 = arith.constant 0 : index
    %c0_511 = arith.constant 0 : index
    %566 = vector.load %arg7[%c0_510, %c0_511] : memref<12x24xf32, #tpu.memory_space<vmem>>, vector<12x24xf32>
    %cst_512 = arith.constant dense<0.000000e+00> : vector<12x72xf32>
    %567 = tpu.matmul %566, %563, %cst_512 {dimension_numbers = #tpu.dot_dimension_numbers<[1], [0], [0], [1], [0, 0, 1, 1], [], []>} : vector<12x24xf32>, vector<24x72xf32>, vector<12x72xf32> -> vector<12x72xf32>
    %568 = arith.maximumf %565, %567 : vector<12x72xf32>
    %569 = vector.extract_strided_slice %568 {offsets = [0, 0], sizes = [8, 72], strides = [1, 1]} : vector<12x72xf32> to vector<8x72xf32>
    %c0_513 = arith.constant 0 : index
    %c0_514 = arith.constant 0 : index
    %c0_515 = arith.constant 0 : index
    %570 = vector.load %arg8[%c0_513, %c0_514, %c0_515] : memref<5x72x128xf32, #tpu.memory_space<vmem>>, vector<1x72x128xf32>
    %571 = vector.shape_cast %570 : vector<1x72x128xf32> to vector<72x128xf32>
    %cst_516 = arith.constant dense<0.000000e+00> : vector<8x128xf32>
    %572 = tpu.matmul %569, %571, %cst_516 {dimension_numbers = #tpu.dot_dimension_numbers<[1], [0], [0], [1], [0, 0, 1, 1], [], []>} : vector<8x72xf32>, vector<72x128xf32>, vector<8x128xf32> -> vector<8x128xf32>
    %573 = vector.extract_strided_slice %568 {offsets = [1, 0], sizes = [8, 72], strides = [1, 1]} : vector<12x72xf32> to vector<8x72xf32>
    %c1_517 = arith.constant 1 : index
    %c0_518 = arith.constant 0 : index
    %c0_519 = arith.constant 0 : index
    %574 = vector.load %arg8[%c1_517, %c0_518, %c0_519] : memref<5x72x128xf32, #tpu.memory_space<vmem>>, vector<1x72x128xf32>
    %575 = vector.shape_cast %574 : vector<1x72x128xf32> to vector<72x128xf32>
    %cst_520 = arith.constant dense<0.000000e+00> : vector<8x128xf32>
    %576 = tpu.matmul %573, %575, %cst_520 {dimension_numbers = #tpu.dot_dimension_numbers<[1], [0], [0], [1], [0, 0, 1, 1], [], []>} : vector<8x72xf32>, vector<72x128xf32>, vector<8x128xf32> -> vector<8x128xf32>
    %577 = vector.extract_strided_slice %568 {offsets = [2, 0], sizes = [8, 72], strides = [1, 1]} : vector<12x72xf32> to vector<8x72xf32>
    %c2_521 = arith.constant 2 : index
    %c0_522 = arith.constant 0 : index
    %c0_523 = arith.constant 0 : index
    %578 = vector.load %arg8[%c2_521, %c0_522, %c0_523] : memref<5x72x128xf32, #tpu.memory_space<vmem>>, vector<1x72x128xf32>
    %579 = vector.shape_cast %578 : vector<1x72x128xf32> to vector<72x128xf32>
    %cst_524 = arith.constant dense<0.000000e+00> : vector<8x128xf32>
    %580 = tpu.matmul %577, %579, %cst_524 {dimension_numbers = #tpu.dot_dimension_numbers<[1], [0], [0], [1], [0, 0, 1, 1], [], []>} : vector<8x72xf32>, vector<72x128xf32>, vector<8x128xf32> -> vector<8x128xf32>
    %581 = arith.addf %572, %580 : vector<8x128xf32>
    %582 = vector.extract_strided_slice %568 {offsets = [3, 0], sizes = [8, 72], strides = [1, 1]} : vector<12x72xf32> to vector<8x72xf32>
    %c3_525 = arith.constant 3 : index
    %c0_526 = arith.constant 0 : index
    %c0_527 = arith.constant 0 : index
    %583 = vector.load %arg8[%c3_525, %c0_526, %c0_527] : memref<5x72x128xf32, #tpu.memory_space<vmem>>, vector<1x72x128xf32>
    %584 = vector.shape_cast %583 : vector<1x72x128xf32> to vector<72x128xf32>
    %cst_528 = arith.constant dense<0.000000e+00> : vector<8x128xf32>
    %585 = tpu.matmul %582, %584, %cst_528 {dimension_numbers = #tpu.dot_dimension_numbers<[1], [0], [0], [1], [0, 0, 1, 1], [], []>} : vector<8x72xf32>, vector<72x128xf32>, vector<8x128xf32> -> vector<8x128xf32>
    %586 = arith.addf %576, %585 : vector<8x128xf32>
    %587 = vector.extract_strided_slice %568 {offsets = [4, 0], sizes = [8, 72], strides = [1, 1]} : vector<12x72xf32> to vector<8x72xf32>
    %c4_529 = arith.constant 4 : index
    %c0_530 = arith.constant 0 : index
    %c0_531 = arith.constant 0 : index
    %588 = vector.load %arg8[%c4_529, %c0_530, %c0_531] : memref<5x72x128xf32, #tpu.memory_space<vmem>>, vector<1x72x128xf32>
    %589 = vector.shape_cast %588 : vector<1x72x128xf32> to vector<72x128xf32>
    %cst_532 = arith.constant dense<0.000000e+00> : vector<8x128xf32>
    %590 = tpu.matmul %587, %589, %cst_532 {dimension_numbers = #tpu.dot_dimension_numbers<[1], [0], [0], [1], [0, 0, 1, 1], [], []>} : vector<8x72xf32>, vector<72x128xf32>, vector<8x128xf32> -> vector<8x128xf32>
    %591 = arith.addf %581, %590 : vector<8x128xf32>
    %592 = arith.addf %591, %586 : vector<8x128xf32>
    %c0_533 = arith.constant 0 : index
    %c0_534 = arith.constant 0 : index
    %593 = vector.load %arg9[%c0_533, %c0_534] : memref<1x128xf32, #tpu.memory_space<vmem>>, vector<1x128xf32>
    %594 = vector.broadcast %593 : vector<1x128xf32> to vector<8x128xf32>
    %595 = arith.addf %592, %594 : vector<8x128xf32>
    %cst_535 = arith.constant 0.000000e+00 : f32
    %596 = vector.broadcast %cst_535 : f32 to vector<8x128xf32>
    %597 = arith.maximumf %595, %596 : vector<8x128xf32>
    %c0_536 = arith.constant 0 : index
    %c0_537 = arith.constant 0 : index
    %598 = vector.load %arg10[%c0_536, %c0_537] : memref<128x64xf32, #tpu.memory_space<vmem>>, vector<128x64xf32>
    %cst_538 = arith.constant dense<0.000000e+00> : vector<8x64xf32>
    %599 = tpu.matmul %597, %598, %cst_538 {dimension_numbers = #tpu.dot_dimension_numbers<[1], [0], [0], [1], [0, 0, 1, 1], [], []>} : vector<8x128xf32>, vector<128x64xf32>, vector<8x64xf32> -> vector<8x64xf32>
    %c0_539 = arith.constant 0 : index
    %c0_540 = arith.constant 0 : index
    %600 = vector.load %arg11[%c0_539, %c0_540] : memref<128x64xf32, #tpu.memory_space<vmem>>, vector<128x64xf32>
    %cst_541 = arith.constant dense<0.000000e+00> : vector<8x64xf32>
    %601 = tpu.matmul %597, %600, %cst_541 {dimension_numbers = #tpu.dot_dimension_numbers<[1], [0], [0], [1], [0, 0, 1, 1], [], []>} : vector<8x128xf32>, vector<128x64xf32>, vector<8x64xf32> -> vector<8x64xf32>
    %602 = arith.maximumf %599, %601 : vector<8x64xf32>
    %c0_542 = arith.constant 0 : index
    %c0_543 = arith.constant 0 : index
    %603 = vector.load %arg12[%c0_542, %c0_543] : memref<4x8xf32, #tpu.memory_space<vmem>>, vector<4x8xf32>
    %cst_544 = arith.constant dense<0.000000e+00> : vector<4x64xf32>
    %604 = tpu.matmul %603, %602, %cst_544 {dimension_numbers = #tpu.dot_dimension_numbers<[1], [0], [0], [1], [0, 0, 1, 1], [], []>} : vector<4x8xf32>, vector<8x64xf32>, vector<4x64xf32> -> vector<4x64xf32>
    %c0_545 = arith.constant 0 : index
    %c0_546 = arith.constant 0 : index
    %605 = vector.load %arg13[%c0_545, %c0_546] : memref<4x8xf32, #tpu.memory_space<vmem>>, vector<4x8xf32>
    %cst_547 = arith.constant dense<0.000000e+00> : vector<4x64xf32>
    %606 = tpu.matmul %605, %602, %cst_547 {dimension_numbers = #tpu.dot_dimension_numbers<[1], [0], [0], [1], [0, 0, 1, 1], [], []>} : vector<4x8xf32>, vector<8x64xf32>, vector<4x64xf32> -> vector<4x64xf32>
    %607 = arith.maximumf %604, %606 : vector<4x64xf32>
    %608 = vector.extract_strided_slice %607 {offsets = [0, 0], sizes = [1, 64], strides = [1, 1]} : vector<4x64xf32> to vector<1x64xf32>
    %c6_548 = arith.constant 6 : index
    %c0_549 = arith.constant 0 : index
    %609 = vector.load %arg21[%c6_548, %c0_549] : memref<8x256xf32, #tpu.memory_space<vmem>>, vector<1x64xf32>
    tpu.vector_store %arg21[%c6_548, %c0_549], %608 {strides = array<i32>} : memref<8x256xf32, #tpu.memory_space<vmem>>, vector<1x64xf32>,
    %610 = vector.extract_strided_slice %607 {offsets = [1, 0], sizes = [1, 64], strides = [1, 1]} : vector<4x64xf32> to vector<1x64xf32>
    %c6_550 = arith.constant 6 : index
    %c64_551 = arith.constant 64 : index
    %611 = vector.load %arg21[%c6_550, %c64_551] : memref<8x256xf32, #tpu.memory_space<vmem>>, vector<1x64xf32>
    tpu.vector_store %arg21[%c6_550, %c64_551], %610 {strides = array<i32>} : memref<8x256xf32, #tpu.memory_space<vmem>>, vector<1x64xf32>,
    %612 = vector.extract_strided_slice %607 {offsets = [2, 0], sizes = [1, 64], strides = [1, 1]} : vector<4x64xf32> to vector<1x64xf32>
    %c6_552 = arith.constant 6 : index
    %c128_553 = arith.constant 128 : index
    %613 = vector.load %arg21[%c6_552, %c128_553] : memref<8x256xf32, #tpu.memory_space<vmem>>, vector<1x64xf32>
    tpu.vector_store %arg21[%c6_552, %c128_553], %612 {strides = array<i32>} : memref<8x256xf32, #tpu.memory_space<vmem>>, vector<1x64xf32>,
    %614 = vector.extract_strided_slice %607 {offsets = [3, 0], sizes = [1, 64], strides = [1, 1]} : vector<4x64xf32> to vector<1x64xf32>
    %c6_554 = arith.constant 6 : index
    %c192_555 = arith.constant 192 : index
    %615 = vector.load %arg21[%c6_554, %c192_555] : memref<8x256xf32, #tpu.memory_space<vmem>>, vector<1x64xf32>
    tpu.vector_store %arg21[%c6_554, %c192_555], %614 {strides = array<i32>} : memref<8x256xf32, #tpu.memory_space<vmem>>, vector<1x64xf32>,
    %c7 = arith.constant 7 : index
    %c0_556 = arith.constant 0 : index
    %c0_557 = arith.constant 0 : index
    %616 = vector.load %arg1[%c7, %c0_556, %c0_557] : memref<8x28x28xf32, #tpu.memory_space<vmem>>, vector<1x28x28xf32>
    %617 = vector.shape_cast %616 : vector<1x28x28xf32> to vector<28x28xf32>
    %618 = vector.extract_strided_slice %617 {offsets = [0, 0], sizes = [24, 28], strides = [1, 1]} : vector<28x28xf32> to vector<24x28xf32>
    %c0_558 = arith.constant 0 : index
    %c0_559 = arith.constant 0 : index
    %c0_560 = arith.constant 0 : index
    %619 = vector.load %arg2[%c0_558, %c0_559, %c0_560] : memref<5x28x144xf32, #tpu.memory_space<vmem>>, vector<1x28x144xf32>
    %620 = vector.shape_cast %619 : vector<1x28x144xf32> to vector<28x144xf32>
    %cst_561 = arith.constant dense<0.000000e+00> : vector<24x144xf32>
    %621 = tpu.matmul %618, %620, %cst_561 {dimension_numbers = #tpu.dot_dimension_numbers<[1], [0], [0], [1], [0, 0, 1, 1], [], []>} : vector<24x28xf32>, vector<28x144xf32>, vector<24x144xf32> -> vector<24x144xf32>
    %622 = vector.extract_strided_slice %617 {offsets = [1, 0], sizes = [24, 28], strides = [1, 1]} : vector<28x28xf32> to vector<24x28xf32>
    %c1_562 = arith.constant 1 : index
    %c0_563 = arith.constant 0 : index
    %c0_564 = arith.constant 0 : index
    %623 = vector.load %arg2[%c1_562, %c0_563, %c0_564] : memref<5x28x144xf32, #tpu.memory_space<vmem>>, vector<1x28x144xf32>
    %624 = vector.shape_cast %623 : vector<1x28x144xf32> to vector<28x144xf32>
    %cst_565 = arith.constant dense<0.000000e+00> : vector<24x144xf32>
    %625 = tpu.matmul %622, %624, %cst_565 {dimension_numbers = #tpu.dot_dimension_numbers<[1], [0], [0], [1], [0, 0, 1, 1], [], []>} : vector<24x28xf32>, vector<28x144xf32>, vector<24x144xf32> -> vector<24x144xf32>
    %626 = vector.extract_strided_slice %617 {offsets = [2, 0], sizes = [24, 28], strides = [1, 1]} : vector<28x28xf32> to vector<24x28xf32>
    %c2_566 = arith.constant 2 : index
    %c0_567 = arith.constant 0 : index
    %c0_568 = arith.constant 0 : index
    %627 = vector.load %arg2[%c2_566, %c0_567, %c0_568] : memref<5x28x144xf32, #tpu.memory_space<vmem>>, vector<1x28x144xf32>
    %628 = vector.shape_cast %627 : vector<1x28x144xf32> to vector<28x144xf32>
    %cst_569 = arith.constant dense<0.000000e+00> : vector<24x144xf32>
    %629 = tpu.matmul %626, %628, %cst_569 {dimension_numbers = #tpu.dot_dimension_numbers<[1], [0], [0], [1], [0, 0, 1, 1], [], []>} : vector<24x28xf32>, vector<28x144xf32>, vector<24x144xf32> -> vector<24x144xf32>
    %630 = arith.addf %621, %629 : vector<24x144xf32>
    %631 = vector.extract_strided_slice %617 {offsets = [3, 0], sizes = [24, 28], strides = [1, 1]} : vector<28x28xf32> to vector<24x28xf32>
    %c3_570 = arith.constant 3 : index
    %c0_571 = arith.constant 0 : index
    %c0_572 = arith.constant 0 : index
    %632 = vector.load %arg2[%c3_570, %c0_571, %c0_572] : memref<5x28x144xf32, #tpu.memory_space<vmem>>, vector<1x28x144xf32>
    %633 = vector.shape_cast %632 : vector<1x28x144xf32> to vector<28x144xf32>
    %cst_573 = arith.constant dense<0.000000e+00> : vector<24x144xf32>
    %634 = tpu.matmul %631, %633, %cst_573 {dimension_numbers = #tpu.dot_dimension_numbers<[1], [0], [0], [1], [0, 0, 1, 1], [], []>} : vector<24x28xf32>, vector<28x144xf32>, vector<24x144xf32> -> vector<24x144xf32>
    %635 = arith.addf %625, %634 : vector<24x144xf32>
    %636 = vector.extract_strided_slice %617 {offsets = [4, 0], sizes = [24, 28], strides = [1, 1]} : vector<28x28xf32> to vector<24x28xf32>
    %c4_574 = arith.constant 4 : index
    %c0_575 = arith.constant 0 : index
    %c0_576 = arith.constant 0 : index
    %637 = vector.load %arg2[%c4_574, %c0_575, %c0_576] : memref<5x28x144xf32, #tpu.memory_space<vmem>>, vector<1x28x144xf32>
    %638 = vector.shape_cast %637 : vector<1x28x144xf32> to vector<28x144xf32>
    %cst_577 = arith.constant dense<0.000000e+00> : vector<24x144xf32>
    %639 = tpu.matmul %636, %638, %cst_577 {dimension_numbers = #tpu.dot_dimension_numbers<[1], [0], [0], [1], [0, 0, 1, 1], [], []>} : vector<24x28xf32>, vector<28x144xf32>, vector<24x144xf32> -> vector<24x144xf32>
    %640 = arith.addf %630, %639 : vector<24x144xf32>
    %641 = arith.addf %640, %635 : vector<24x144xf32>
    %c0_578 = arith.constant 0 : index
    %c0_579 = arith.constant 0 : index
    %642 = vector.load %arg3[%c0_578, %c0_579] : memref<1x144xf32, #tpu.memory_space<vmem>>, vector<1x144xf32>
    %643 = vector.broadcast %642 : vector<1x144xf32> to vector<24x144xf32>
    %644 = arith.addf %641, %643 : vector<24x144xf32>
    %cst_580 = arith.constant 0.000000e+00 : f32
    %645 = vector.broadcast %cst_580 : f32 to vector<24x144xf32>
    %646 = arith.maximumf %644, %645 : vector<24x144xf32>
    %c0_581 = arith.constant 0 : index
    %c0_582 = arith.constant 0 : index
    %647 = vector.load %arg4[%c0_581, %c0_582] : memref<144x72xf32, #tpu.memory_space<vmem>>, vector<144x72xf32>
    %cst_583 = arith.constant dense<0.000000e+00> : vector<24x72xf32>
    %648 = tpu.matmul %646, %647, %cst_583 {dimension_numbers = #tpu.dot_dimension_numbers<[1], [0], [0], [1], [0, 0, 1, 1], [], []>} : vector<24x144xf32>, vector<144x72xf32>, vector<24x72xf32> -> vector<24x72xf32>
    %c0_584 = arith.constant 0 : index
    %c0_585 = arith.constant 0 : index
    %649 = vector.load %arg5[%c0_584, %c0_585] : memref<144x72xf32, #tpu.memory_space<vmem>>, vector<144x72xf32>
    %cst_586 = arith.constant dense<0.000000e+00> : vector<24x72xf32>
    %650 = tpu.matmul %646, %649, %cst_586 {dimension_numbers = #tpu.dot_dimension_numbers<[1], [0], [0], [1], [0, 0, 1, 1], [], []>} : vector<24x144xf32>, vector<144x72xf32>, vector<24x72xf32> -> vector<24x72xf32>
    %651 = arith.maximumf %648, %650 : vector<24x72xf32>
    %c0_587 = arith.constant 0 : index
    %c0_588 = arith.constant 0 : index
    %652 = vector.load %arg6[%c0_587, %c0_588] : memref<12x24xf32, #tpu.memory_space<vmem>>, vector<12x24xf32>
    %cst_589 = arith.constant dense<0.000000e+00> : vector<12x72xf32>
    %653 = tpu.matmul %652, %651, %cst_589 {dimension_numbers = #tpu.dot_dimension_numbers<[1], [0], [0], [1], [0, 0, 1, 1], [], []>} : vector<12x24xf32>, vector<24x72xf32>, vector<12x72xf32> -> vector<12x72xf32>
    %c0_590 = arith.constant 0 : index
    %c0_591 = arith.constant 0 : index
    %654 = vector.load %arg7[%c0_590, %c0_591] : memref<12x24xf32, #tpu.memory_space<vmem>>, vector<12x24xf32>
    %cst_592 = arith.constant dense<0.000000e+00> : vector<12x72xf32>
    %655 = tpu.matmul %654, %651, %cst_592 {dimension_numbers = #tpu.dot_dimension_numbers<[1], [0], [0], [1], [0, 0, 1, 1], [], []>} : vector<12x24xf32>, vector<24x72xf32>, vector<12x72xf32> -> vector<12x72xf32>
    %656 = arith.maximumf %653, %655 : vector<12x72xf32>
    %657 = vector.extract_strided_slice %656 {offsets = [0, 0], sizes = [8, 72], strides = [1, 1]} : vector<12x72xf32> to vector<8x72xf32>
    %c0_593 = arith.constant 0 : index
    %c0_594 = arith.constant 0 : index
    %c0_595 = arith.constant 0 : index
    %658 = vector.load %arg8[%c0_593, %c0_594, %c0_595] : memref<5x72x128xf32, #tpu.memory_space<vmem>>, vector<1x72x128xf32>
    %659 = vector.shape_cast %658 : vector<1x72x128xf32> to vector<72x128xf32>
    %cst_596 = arith.constant dense<0.000000e+00> : vector<8x128xf32>
    %660 = tpu.matmul %657, %659, %cst_596 {dimension_numbers = #tpu.dot_dimension_numbers<[1], [0], [0], [1], [0, 0, 1, 1], [], []>} : vector<8x72xf32>, vector<72x128xf32>, vector<8x128xf32> -> vector<8x128xf32>
    %661 = vector.extract_strided_slice %656 {offsets = [1, 0], sizes = [8, 72], strides = [1, 1]} : vector<12x72xf32> to vector<8x72xf32>
    %c1_597 = arith.constant 1 : index
    %c0_598 = arith.constant 0 : index
    %c0_599 = arith.constant 0 : index
    %662 = vector.load %arg8[%c1_597, %c0_598, %c0_599] : memref<5x72x128xf32, #tpu.memory_space<vmem>>, vector<1x72x128xf32>
    %663 = vector.shape_cast %662 : vector<1x72x128xf32> to vector<72x128xf32>
    %cst_600 = arith.constant dense<0.000000e+00> : vector<8x128xf32>
    %664 = tpu.matmul %661, %663, %cst_600 {dimension_numbers = #tpu.dot_dimension_numbers<[1], [0], [0], [1], [0, 0, 1, 1], [], []>} : vector<8x72xf32>, vector<72x128xf32>, vector<8x128xf32> -> vector<8x128xf32>
    %665 = vector.extract_strided_slice %656 {offsets = [2, 0], sizes = [8, 72], strides = [1, 1]} : vector<12x72xf32> to vector<8x72xf32>
    %c2_601 = arith.constant 2 : index
    %c0_602 = arith.constant 0 : index
    %c0_603 = arith.constant 0 : index
    %666 = vector.load %arg8[%c2_601, %c0_602, %c0_603] : memref<5x72x128xf32, #tpu.memory_space<vmem>>, vector<1x72x128xf32>
    %667 = vector.shape_cast %666 : vector<1x72x128xf32> to vector<72x128xf32>
    %cst_604 = arith.constant dense<0.000000e+00> : vector<8x128xf32>
    %668 = tpu.matmul %665, %667, %cst_604 {dimension_numbers = #tpu.dot_dimension_numbers<[1], [0], [0], [1], [0, 0, 1, 1], [], []>} : vector<8x72xf32>, vector<72x128xf32>, vector<8x128xf32> -> vector<8x128xf32>
    %669 = arith.addf %660, %668 : vector<8x128xf32>
    %670 = vector.extract_strided_slice %656 {offsets = [3, 0], sizes = [8, 72], strides = [1, 1]} : vector<12x72xf32> to vector<8x72xf32>
    %c3_605 = arith.constant 3 : index
    %c0_606 = arith.constant 0 : index
    %c0_607 = arith.constant 0 : index
    %671 = vector.load %arg8[%c3_605, %c0_606, %c0_607] : memref<5x72x128xf32, #tpu.memory_space<vmem>>, vector<1x72x128xf32>
    %672 = vector.shape_cast %671 : vector<1x72x128xf32> to vector<72x128xf32>
    %cst_608 = arith.constant dense<0.000000e+00> : vector<8x128xf32>
    %673 = tpu.matmul %670, %672, %cst_608 {dimension_numbers = #tpu.dot_dimension_numbers<[1], [0], [0], [1], [0, 0, 1, 1], [], []>} : vector<8x72xf32>, vector<72x128xf32>, vector<8x128xf32> -> vector<8x128xf32>
    %674 = arith.addf %664, %673 : vector<8x128xf32>
    %675 = vector.extract_strided_slice %656 {offsets = [4, 0], sizes = [8, 72], strides = [1, 1]} : vector<12x72xf32> to vector<8x72xf32>
    %c4_609 = arith.constant 4 : index
    %c0_610 = arith.constant 0 : index
    %c0_611 = arith.constant 0 : index
    %676 = vector.load %arg8[%c4_609, %c0_610, %c0_611] : memref<5x72x128xf32, #tpu.memory_space<vmem>>, vector<1x72x128xf32>
    %677 = vector.shape_cast %676 : vector<1x72x128xf32> to vector<72x128xf32>
    %cst_612 = arith.constant dense<0.000000e+00> : vector<8x128xf32>
    %678 = tpu.matmul %675, %677, %cst_612 {dimension_numbers = #tpu.dot_dimension_numbers<[1], [0], [0], [1], [0, 0, 1, 1], [], []>} : vector<8x72xf32>, vector<72x128xf32>, vector<8x128xf32> -> vector<8x128xf32>
    %679 = arith.addf %669, %678 : vector<8x128xf32>
    %680 = arith.addf %679, %674 : vector<8x128xf32>
    %c0_613 = arith.constant 0 : index
    %c0_614 = arith.constant 0 : index
    %681 = vector.load %arg9[%c0_613, %c0_614] : memref<1x128xf32, #tpu.memory_space<vmem>>, vector<1x128xf32>
    %682 = vector.broadcast %681 : vector<1x128xf32> to vector<8x128xf32>
    %683 = arith.addf %680, %682 : vector<8x128xf32>
    %cst_615 = arith.constant 0.000000e+00 : f32
    %684 = vector.broadcast %cst_615 : f32 to vector<8x128xf32>
    %685 = arith.maximumf %683, %684 : vector<8x128xf32>
    %c0_616 = arith.constant 0 : index
    %c0_617 = arith.constant 0 : index
    %686 = vector.load %arg10[%c0_616, %c0_617] : memref<128x64xf32, #tpu.memory_space<vmem>>, vector<128x64xf32>
    %cst_618 = arith.constant dense<0.000000e+00> : vector<8x64xf32>
    %687 = tpu.matmul %685, %686, %cst_618 {dimension_numbers = #tpu.dot_dimension_numbers<[1], [0], [0], [1], [0, 0, 1, 1], [], []>} : vector<8x128xf32>, vector<128x64xf32>, vector<8x64xf32> -> vector<8x64xf32>
    %c0_619 = arith.constant 0 : index
    %c0_620 = arith.constant 0 : index
    %688 = vector.load %arg11[%c0_619, %c0_620] : memref<128x64xf32, #tpu.memory_space<vmem>>, vector<128x64xf32>
    %cst_621 = arith.constant dense<0.000000e+00> : vector<8x64xf32>
    %689 = tpu.matmul %685, %688, %cst_621 {dimension_numbers = #tpu.dot_dimension_numbers<[1], [0], [0], [1], [0, 0, 1, 1], [], []>} : vector<8x128xf32>, vector<128x64xf32>, vector<8x64xf32> -> vector<8x64xf32>
    %690 = arith.maximumf %687, %689 : vector<8x64xf32>
    %c0_622 = arith.constant 0 : index
    %c0_623 = arith.constant 0 : index
    %691 = vector.load %arg12[%c0_622, %c0_623] : memref<4x8xf32, #tpu.memory_space<vmem>>, vector<4x8xf32>
    %cst_624 = arith.constant dense<0.000000e+00> : vector<4x64xf32>
    %692 = tpu.matmul %691, %690, %cst_624 {dimension_numbers = #tpu.dot_dimension_numbers<[1], [0], [0], [1], [0, 0, 1, 1], [], []>} : vector<4x8xf32>, vector<8x64xf32>, vector<4x64xf32> -> vector<4x64xf32>
    %c0_625 = arith.constant 0 : index
    %c0_626 = arith.constant 0 : index
    %693 = vector.load %arg13[%c0_625, %c0_626] : memref<4x8xf32, #tpu.memory_space<vmem>>, vector<4x8xf32>
    %cst_627 = arith.constant dense<0.000000e+00> : vector<4x64xf32>
    %694 = tpu.matmul %693, %690, %cst_627 {dimension_numbers = #tpu.dot_dimension_numbers<[1], [0], [0], [1], [0, 0, 1, 1], [], []>} : vector<4x8xf32>, vector<8x64xf32>, vector<4x64xf32> -> vector<4x64xf32>
    %695 = arith.maximumf %692, %694 : vector<4x64xf32>
    %696 = vector.extract_strided_slice %695 {offsets = [0, 0], sizes = [1, 64], strides = [1, 1]} : vector<4x64xf32> to vector<1x64xf32>
    %c7_628 = arith.constant 7 : index
    %c0_629 = arith.constant 0 : index
    %697 = vector.load %arg21[%c7_628, %c0_629] : memref<8x256xf32, #tpu.memory_space<vmem>>, vector<1x64xf32>
    tpu.vector_store %arg21[%c7_628, %c0_629], %696 {strides = array<i32>} : memref<8x256xf32, #tpu.memory_space<vmem>>, vector<1x64xf32>,
    %698 = vector.extract_strided_slice %695 {offsets = [1, 0], sizes = [1, 64], strides = [1, 1]} : vector<4x64xf32> to vector<1x64xf32>
    %c7_630 = arith.constant 7 : index
    %c64_631 = arith.constant 64 : index
    %699 = vector.load %arg21[%c7_630, %c64_631] : memref<8x256xf32, #tpu.memory_space<vmem>>, vector<1x64xf32>
    tpu.vector_store %arg21[%c7_630, %c64_631], %698 {strides = array<i32>} : memref<8x256xf32, #tpu.memory_space<vmem>>, vector<1x64xf32>,
    %700 = vector.extract_strided_slice %695 {offsets = [2, 0], sizes = [1, 64], strides = [1, 1]} : vector<4x64xf32> to vector<1x64xf32>
    %c7_632 = arith.constant 7 : index
    %c128_633 = arith.constant 128 : index
    %701 = vector.load %arg21[%c7_632, %c128_633] : memref<8x256xf32, #tpu.memory_space<vmem>>, vector<1x64xf32>
    tpu.vector_store %arg21[%c7_632, %c128_633], %700 {strides = array<i32>} : memref<8x256xf32, #tpu.memory_space<vmem>>, vector<1x64xf32>,
    %702 = vector.extract_strided_slice %695 {offsets = [3, 0], sizes = [1, 64], strides = [1, 1]} : vector<4x64xf32> to vector<1x64xf32>
    %c7_634 = arith.constant 7 : index
    %c192_635 = arith.constant 192 : index
    %703 = vector.load %arg21[%c7_634, %c192_635] : memref<8x256xf32, #tpu.memory_space<vmem>>, vector<1x64xf32>
    tpu.vector_store %arg21[%c7_634, %c192_635], %702 {strides = array<i32>} : memref<8x256xf32, #tpu.memory_space<vmem>>, vector<1x64xf32>,
    %c0_636 = arith.constant 0 : index
    %c0_637 = arith.constant 0 : index
    %704 = vector.load %arg21[%c0_636, %c0_637] : memref<8x256xf32, #tpu.memory_space<vmem>>, vector<8x256xf32>
    %c0_638 = arith.constant 0 : index
    %c0_639 = arith.constant 0 : index
    %705 = vector.load %arg14[%c0_638, %c0_639] : memref<256x120xf32, #tpu.memory_space<vmem>>, vector<256x120xf32>
    %cst_640 = arith.constant dense<0.000000e+00> : vector<8x120xf32>
    %706 = tpu.matmul %704, %705, %cst_640 {dimension_numbers = #tpu.dot_dimension_numbers<[1], [0], [0], [1], [0, 0, 1, 1], [], []>} : vector<8x256xf32>, vector<256x120xf32>, vector<8x120xf32> -> vector<8x120xf32>
    %c0_641 = arith.constant 0 : index
    %c0_642 = arith.constant 0 : index
    %707 = vector.load %arg15[%c0_641, %c0_642] : memref<1x120xf32, #tpu.memory_space<vmem>>, vector<1x120xf32>
    %708 = vector.broadcast %707 : vector<1x120xf32> to vector<8x120xf32>
    %709 = arith.addf %706, %708 : vector<8x120xf32>
    %cst_643 = arith.constant 0.000000e+00 : f32
    %710 = vector.broadcast %cst_643 : f32 to vector<8x120xf32>
    %711 = arith.maximumf %709, %710 : vector<8x120xf32>
    %c0_644 = arith.constant 0 : index
    %c0_645 = arith.constant 0 : index
    %712 = vector.load %arg16[%c0_644, %c0_645] : memref<120x84xf32, #tpu.memory_space<vmem>>, vector<120x84xf32>
    %cst_646 = arith.constant dense<0.000000e+00> : vector<8x84xf32>
    %713 = tpu.matmul %711, %712, %cst_646 {dimension_numbers = #tpu.dot_dimension_numbers<[1], [0], [0], [1], [0, 0, 1, 1], [], []>} : vector<8x120xf32>, vector<120x84xf32>, vector<8x84xf32> -> vector<8x84xf32>
    %c0_647 = arith.constant 0 : index
    %c0_648 = arith.constant 0 : index
    %714 = vector.load %arg17[%c0_647, %c0_648] : memref<1x84xf32, #tpu.memory_space<vmem>>, vector<1x84xf32>
    %715 = vector.broadcast %714 : vector<1x84xf32> to vector<8x84xf32>
    %716 = arith.addf %713, %715 : vector<8x84xf32>
    %cst_649 = arith.constant 0.000000e+00 : f32
    %717 = vector.broadcast %cst_649 : f32 to vector<8x84xf32>
    %718 = arith.maximumf %716, %717 : vector<8x84xf32>
    %c0_650 = arith.constant 0 : index
    %c0_651 = arith.constant 0 : index
    %719 = vector.load %arg18[%c0_650, %c0_651] : memref<84x128xf32, #tpu.memory_space<vmem>>, vector<84x128xf32>
    %cst_652 = arith.constant dense<0.000000e+00> : vector<8x128xf32>
    %720 = tpu.matmul %718, %719, %cst_652 {dimension_numbers = #tpu.dot_dimension_numbers<[1], [0], [0], [1], [0, 0, 1, 1], [], []>} : vector<8x84xf32>, vector<84x128xf32>, vector<8x128xf32> -> vector<8x128xf32>
    %c0_653 = arith.constant 0 : index
    %c0_654 = arith.constant 0 : index
    %721 = vector.load %arg19[%c0_653, %c0_654] : memref<1x128xf32, #tpu.memory_space<vmem>>, vector<1x128xf32>
    %722 = vector.broadcast %721 : vector<1x128xf32> to vector<8x128xf32>
    %723 = arith.addf %720, %722 : vector<8x128xf32>
    %c0_655 = arith.constant 0 : index
    %c0_656 = arith.constant 0 : index
    %724 = vector.load %arg20[%c0_655, %c0_656] : memref<8x128xf32, #tpu.memory_space<vmem>>, vector<8x128xf32>
    tpu.vector_store %arg20[%c0_655, %c0_656], %723 {strides = array<i32>} : memref<8x128xf32, #tpu.memory_space<vmem>>, vector<8x128xf32>,
    return
  }
  func.func @transform_0(%arg0: i32) -> (i32, i32, i32) {
    %c0_i32 = arith.constant 0 : i32
    %c0_i32_0 = arith.constant 0 : i32
    %c0_i32_1 = arith.constant 0 : i32
    return %arg0, %c0_i32, %c0_i32_0 : i32, i32, i32
  }
  func.func @transform_1(%arg0: i32) -> (i32, i32, i32) {
    %c0_i32 = arith.constant 0 : i32
    %c0_i32_0 = arith.constant 0 : i32
    %c0_i32_1 = arith.constant 0 : i32
    %c0_i32_2 = arith.constant 0 : i32
    return %c0_i32, %c0_i32_0, %c0_i32_1 : i32, i32, i32
  }
  func.func @transform_2(%arg0: i32) -> (i32, i32) {
    %c0_i32 = arith.constant 0 : i32
    %c0_i32_0 = arith.constant 0 : i32
    %c0_i32_1 = arith.constant 0 : i32
    return %c0_i32, %c0_i32_0 : i32, i32
  }
  func.func @transform_3(%arg0: i32) -> (i32, i32) {
    %c0_i32 = arith.constant 0 : i32
    %c0_i32_0 = arith.constant 0 : i32
    %c0_i32_1 = arith.constant 0 : i32
    return %c0_i32, %c0_i32_0 : i32, i32
  }
  func.func @transform_4(%arg0: i32) -> (i32, i32) {
    %c0_i32 = arith.constant 0 : i32
    %c0_i32_0 = arith.constant 0 : i32
    %c0_i32_1 = arith.constant 0 : i32
    return %c0_i32, %c0_i32_0 : i32, i32
  }
  func.func @transform_5(%arg0: i32) -> (i32, i32) {
    %c0_i32 = arith.constant 0 : i32
    %c0_i32_0 = arith.constant 0 : i32
    %c0_i32_1 = arith.constant 0 : i32
    return %c0_i32, %c0_i32_0 : i32, i32
  }
  func.func @transform_6(%arg0: i32) -> (i32, i32) {
    %c0_i32 = arith.constant 0 : i32
    %c0_i32_0 = arith.constant 0 : i32
    %c0_i32_1 = arith.constant 0 : i32
    return %c0_i32, %c0_i32_0 : i32, i32
  }
  func.func @transform_7(%arg0: i32) -> (i32, i32, i32) {
    %c0_i32 = arith.constant 0 : i32
    %c0_i32_0 = arith.constant 0 : i32
    %c0_i32_1 = arith.constant 0 : i32
    %c0_i32_2 = arith.constant 0 : i32
    return %c0_i32, %c0_i32_0, %c0_i32_1 : i32, i32, i32
  }
  func.func @transform_8(%arg0: i32) -> (i32, i32) {
    %c0_i32 = arith.constant 0 : i32
    %c0_i32_0 = arith.constant 0 : i32
    %c0_i32_1 = arith.constant 0 : i32
    return %c0_i32, %c0_i32_0 : i32, i32
  }
  func.func @transform_9(%arg0: i32) -> (i32, i32) {
    %c0_i32 = arith.constant 0 : i32
    %c0_i32_0 = arith.constant 0 : i32
    %c0_i32_1 = arith.constant 0 : i32
    return %c0_i32, %c0_i32_0 : i32, i32
  }
  func.func @transform_10(%arg0: i32) -> (i32, i32) {
    %c0_i32 = arith.constant 0 : i32
    %c0_i32_0 = arith.constant 0 : i32
    %c0_i32_1 = arith.constant 0 : i32
    return %c0_i32, %c0_i32_0 : i32, i32
  }
  func.func @transform_11(%arg0: i32) -> (i32, i32) {
    %c0_i32 = arith.constant 0 : i32
    %c0_i32_0 = arith.constant 0 : i32
    %c0_i32_1 = arith.constant 0 : i32
    return %c0_i32, %c0_i32_0 : i32, i32
  }
  func.func @transform_12(%arg0: i32) -> (i32, i32) {
    %c0_i32 = arith.constant 0 : i32
    %c0_i32_0 = arith.constant 0 : i32
    %c0_i32_1 = arith.constant 0 : i32
    return %c0_i32, %c0_i32_0 : i32, i32
  }
  func.func @transform_13(%arg0: i32) -> (i32, i32) {
    %c0_i32 = arith.constant 0 : i32
    %c0_i32_0 = arith.constant 0 : i32
    %c0_i32_1 = arith.constant 0 : i32
    return %c0_i32, %c0_i32_0 : i32, i32
  }
  func.func @transform_14(%arg0: i32) -> (i32, i32) {
    %c0_i32 = arith.constant 0 : i32
    %c0_i32_0 = arith.constant 0 : i32
    %c0_i32_1 = arith.constant 0 : i32
    return %c0_i32, %c0_i32_0 : i32, i32
  }
  func.func @transform_15(%arg0: i32) -> (i32, i32) {
    %c0_i32 = arith.constant 0 : i32
    %c0_i32_0 = arith.constant 0 : i32
    %c0_i32_1 = arith.constant 0 : i32
    return %c0_i32, %c0_i32_0 : i32, i32
  }
  func.func @transform_16(%arg0: i32) -> (i32, i32) {
    %c0_i32 = arith.constant 0 : i32
    %c0_i32_0 = arith.constant 0 : i32
    %c0_i32_1 = arith.constant 0 : i32
    return %c0_i32, %c0_i32_0 : i32, i32
  }
  func.func @transform_17(%arg0: i32) -> (i32, i32) {
    %c0_i32 = arith.constant 0 : i32
    %c0_i32_0 = arith.constant 0 : i32
    %c0_i32_1 = arith.constant 0 : i32
    return %c0_i32, %c0_i32_0 : i32, i32
  }
  func.func @transform_18(%arg0: i32) -> (i32, i32) {
    %c0_i32 = arith.constant 0 : i32
    %c0_i32_0 = arith.constant 0 : i32
    %c0_i32_1 = arith.constant 0 : i32
    return %c0_i32, %c0_i32_0 : i32, i32
  }
  func.func @transform_19(%arg0: i32) -> (i32, i32) {
    %c0_i32 = arith.constant 0 : i32
    %c0_i32_0 = arith.constant 0 : i32
    return %arg0, %c0_i32 : i32, i32
  }
}

</mosaic_0001>

<bundles_post_ra>
// kernel: lenet_forward.1
= control target key start
LH: loop header
LB: loop body
LE: loop exit
PB: predicated region body
PF: predicated region fallthrough
CT: control target
= control target key end

     0   :  { %s26357_s0 = inlined_call_operand.vmem [shape: f32[16,28,28], index: 0, kind: input, shape index: {}]   ;;  %s26358_s1 = inlined_call_operand.vmem [shape: f32[5,28,144], index: 1, kind: input, shape index: {}]   ;;  %s26359_s2 = inlined_call_operand.vmem [shape: f32[1,144], index: 2, kind: input, shape index: {}]   ;;  %s26360_s3 = inlined_call_operand.vmem [shape: f32[144,72], index: 3, kind: input, shape index: {}]   ;;  %s26361_s4 = inlined_call_operand.vmem [shape: f32[144,72], index: 4, kind: input, shape index: {}]   ;;  %s26362_s5 = inlined_call_operand.vmem [shape: f32[12,24], index: 5, kind: input, shape index: {}]   ;;  %s26363_s6 = inlined_call_operand.vmem [shape: f32[12,24], index: 6, kind: input, shape index: {}]   ;;  %s26364_s7 = inlined_call_operand.vmem [shape: f32[5,72,128], index: 7, kind: input, shape index: {}]   ;;  %s26365_s8 = inlined_call_operand.vmem [shape: f32[1,128], index: 8, kind: input, shape index: {}]   ;;  %s26366_s9 = inlined_call_operand.vmem [shape: f32[128,64], index: 9, kind: input, shape index: {}]   ;;  %s26367_s10 = inlined_call_operand.vmem [shape: f32[128,64], index: 10, kind: input, shape index: {}]   ;;  %s26368_s11 = inlined_call_operand.vmem [shape: f32[4,8], index: 11, kind: input, shape index: {}]   ;;  %s26369_s12 = inlined_call_operand.vmem [shape: f32[4,8], index: 12, kind: input, shape index: {}]   ;;  %s26370_s13 = inlined_call_operand.vmem [shape: f32[256,120], index: 13, kind: input, shape index: {}]   ;;  %s26371_s14 = inlined_call_operand.vmem [shape: f32[1,120], index: 14, kind: input, shape index: {}]   ;;  %s26372_s15 = inlined_call_operand.vmem [shape: f32[120,84], index: 15, kind: input, shape index: {}]   ;;  %s26373_s16 = inlined_call_operand.vmem [shape: f32[1,84], index: 16, kind: input, shape index: {}]   ;;  %s26374_s17 = inlined_call_operand.vmem [shape: f32[84,128], index: 17, kind: input, shape index: {}]   ;;  %s26375_s18 = inlined_call_operand.vmem [shape: f32[1,128], index: 18, kind: input, shape index: {}]   ;;  %s26376_s19 = inlined_call_operand.hbm [shape: f32[16,128], index: 19, kind: output, shape index: {}]  }
   0x1   :  { %26391 = sst [smem:[#allocation13_spill]] %s26357_s0 }
   0x2   :  { %26392 = sst [smem:[#allocation14_spill]] %s26358_s1 }
   0x3   :  { %26393 = sst [smem:[#allocation15_spill]] %s26359_s2 }
   0x4   :  { %26394 = sst [smem:[#allocation16_spill]] %s26360_s3 }
   0x5   :  { %26395 = sst [smem:[#allocation17_spill]] %s26361_s4 }
   0x6   :  { %26396 = sst [smem:[#allocation18_spill]] %s26362_s5 }
   0x7   :  { %26397 = sst [smem:[#allocation19_spill]] %s26375_s18 }
   0x8   :  { %26398 = sst [smem:[#allocation20_spill]] %s26376_s19 }
   0x9   :  { %24 = vsyncpa [#allocation4], 0 }
   0xa   :  { %26 = vsyncpa [#allocation4 + $0x1], 0  ;;  %s20550_s0 = smov 0   ;;  %s20552_s30 = smov 0  }
   0xb   :  { %s20554_s20 = smov 0   ;;  %s20556_s21 = smov 0  }
   0xc LB: > { %26399 = sst [smem:[#allocation6_spill]] %s20430_s0  ;;  %s20571_s1 = sadd.s32 4294967295, %s20442_s21   ;;  %s20442_s21 = sphi %s20556_s21, %s26424_s21   ;;  %s20438_s20 = sphi %s20554_s20, %s26426_s20   ;;  %s20434_s30 = sphi %s20552_s30, %s26428_s30   ;;  %s20430_s0 = sphi %s20550_s0, %s26427_s0  }
   0xd   : > { %26400 = sst [smem:[#allocation7_spill]] %s20438_s20  ;;  %s14850_s22 = sadd.s32 4294967294, %s20442_s21  }
   0xe   : > { %26401 = sst [smem:[#allocation8_spill]] %s20442_s21  ;;  %s20575_s2 = sadd.s32 1, %s20442_s21  }
   0xf   : > { %26402 = sst [smem:[#allocation9_spill]] %s20575_s2  ;;  %s443_s23 = sadd.s32 1, %s20438_s20 }
  0x10   : > { %s440_s24 = ssub.s32 %s20442_s21, %s20575_s2  ;;  %p453_p0 = scmp.ne.s32.totalorder %s20438_s20, %s20434_s30 }
  0x11   : > { %p441_p1 = scmp.eq.s32.totalorder %s440_s24, 0  ;;  %p454_p2 = scmp.eq.s32.totalorder %s20571_s1, 1 }
  0x12   : > { %p459_p3 = scmp.ne.s32.totalorder %s20434_s30, %s20430_s0  ;;  %p460_p4 = scmp.eq.s32.totalorder %s14850_s22, 1 }
  0x13   : > { %s20586_s25 = scalar_select %p441_p1, %s20438_s20, %s443_s23  }
  0x14   : > { %p20588_p5 = por %p454_p2, %p453_p0  ;;  %p20592_p6 = por %p460_p4, %p459_p3 }
  0x15   : > { %26403 = sst [smem:[#allocation10_spill]] %s20586_s25  ;;  %p14853_p7 = scmp.ge.s32.totalorder %s20442_s21, 1 }
  0x16   : > { %s26404_s3 = scalar_select %p20588_p5, 1, 0 }
  0x17   : > { %s26406_s26 = scalar_select %p20592_p6, 1, 0 }
  0x18   : > { %26405 = sst [smem:[#allocation11_spill]] %s26404_s3  ;;  %p542_p8 = scmp.lt.s32.totalorder %s20442_s21, 3 }
  0x19   : > { %26407 = sst [smem:[#allocation12_spill]] %s26406_s26 }
  0x1a   : > { %p543_p9 = pnand %p14853_p7, %p542_p8 }
  0x1b   : > { %s26408_s29 = sld [smem:[#allocation14_spill]] (!%p543_p9)  ;;  %vm655_vm0 = vcmask (!%p543_p9), 1043456   ;;  %v20444_v7 = vmov (!%p543_p9), 0.0   ;;  %s14855_s22 = sshll.u32 (!%p543_p9), %s20571_s1, 3  ;;  %vm20445_vm1 = vmmov (!%p543_p9), 1   ;;  %v20446_v16 = vmov (!%p543_p9), 0.0|0.0  }
  0x1c   : > { %546 = sbr.rel (%p543_p9) target bundleno = 10912 (0x2aa0), region = 96  ;;  %726 = vmatprep.mubr.f32.mxu0 (!%p543_p9), %v20444_v7  ;;  %vm20619_vm2 = vmpackc.low (!%p543_p9), %vm655_vm0, %vm20445_vm1  ;;  %p600_p10 = scmp.lt.s32.totalorder (!%p543_p9), %s14855_s22, 15  ;;  %18364 = vmatprep.subr.bf16.mxu1 (!%p543_p9), %v20446_v16  ;;  %vm640_vm3 = vcmask (!%p543_p9), 1045504   ;;  %vm648_vm4 = vcmask (!%p543_p9), 228352   ;;  %vm849_vm5 = vcmask (!%p543_p9), 1044480   ;;  %vm952_vm6 = vcmask (!%p543_p9), 1046528  }
  0x1d   : > { %s26411_s24 = sld [smem:[#allocation13_spill]] (!%p543_p9)  ;;  %s26412_s20 = sld [smem:[#allocation16_spill]] (!%p543_p9)  ;;  %vm1220_vm7 = vcmask (!%p543_p9), 130048   ;;  %vm1413_vm8 = vcmask (!%p543_p9), 195584   ;;  %vm20447_vm9 = vmmov (!%p543_p9), 0   ;;  %vm1614_vm10 = vcmask (!%p543_p9), 588800  }
  0x1e   : > { %s26414_s25 = sld [smem:[#allocation15_spill]] (!%p543_p9)  ;;  %s26415_s4 = sld [smem:[#allocation17_spill]] (!%p543_p9)  ;;  %vm2189_vm11 = vcmask (!%p543_p9), 64512   ;;  %vm2338_vm12 = vcmask (!%p543_p9), 516096   ;;  %vm2345_vm13 = vcmask (!%p543_p9), 1040896   ;;  %vm14606_vm14 = vcmask (!%p543_p9), 982016  }
  0x1f   : > { %s26416_s5 = sld [smem:[#allocation18_spill]] (!%p543_p9)  ;;  %s26387_s26 = smov (!%p543_p9), 64   ;;  %vm14699_vm15 = vcmask (!%p543_p9), 687104  }
  0x20   : > { %s26417_s21 = smov (!%p543_p9), 64   ;;  %s596_s3 = sand.u32 (!%p543_p9), 1, %s20434_s30  }
  0x21   : > { %v14867_v0 = vld [vmem:[%s26408_s29 + $0x88] sm:$0xff] (!%p543_p9)  ;;  %v14869_v1 = vld [vmem:[%s26408_s29 + $0x98] sm:$0xff] (!%p543_p9)  ;;  %v14866_v2 = vld [vmem:[%s26408_s29 + $0x80] sm:$0xff] (!%p543_p9)  ;;  %s14854_s0 = sshll.u32 (!%p543_p9), %s596_s3, 3 }
  0x22   : > { %v18314_v3 = vpack.c.bf16 (!%p543_p9), %v14869_v1, %v14867_v0  ;;  %v14868_v4 = vld [vmem:[%s26408_s29 + $0x90] sm:$0xff] (!%p543_p9)  ;;  %v14871_v5 = vld [vmem:[%s26408_s29 + $0xa8] sm:$0xff] (!%p543_p9)  ;;  %v14873_v6 = vld [vmem:[%s26408_s29 + $0xb8] sm:$0xf] (!%p543_p9) }
  0x23   : > { %v18316_v8 = vpack.c.bf16 %v14868_v4, %v14866_v2  ;;  %v18318_v9 = vpack.c.bf16 %v14873_v6, %v14871_v5  ;;  %v14870_v11 = vld [vmem:[%s26408_s29 + $0xa0] sm:$0xff]  ;;  %v14872_v12 = vld [vmem:[%s26408_s29 + $0xb0] sm:$0xf]  ;;  %v611_v13 = vld [vmem:[%s26408_s29 + $0x8] sm:$0xff]  ;;  %s26430_s22 = smov (!%p600_p10, %s14855_s22), 15  ;;  %s26413_s19 = smov %s26412_s20 }
  0x24   : > { %18315 = vmatprep.subr.bf16.mxu0 %v18314_v3  ;;  %v613_v14 = vld [vmem:[%s26408_s29 + $0x18] sm:$0xff]  ;;  %v18321_v15 = vpack.c.bf16 %v14872_v12, %v14870_v11  ;;  %s15784_s28 = sshll.u32 %s26430_s22, 5  ;;  %v610_v18 = vld [vmem:[%s26408_s29] sm:$0xff]  ;;  %v612_v19 = vld [vmem:[%s26408_s29 + $0x10] sm:$0xff]  ;;  %s598_s22 = scalar_lea.vmem [#allocation3], %s14854_s0 }
  0x25   : > { %18317 = vmatpush1.bf16.msra.mxu0 %v18316_v8  ;;  %v18324_v17 = vpack.c.bf16 %v613_v14, %v611_v13  ;;  %s20647_s27 = scalar_lea.vmem %s26411_s24, %s15784_s28  ;;  %v615_v20 = vld [vmem:[%s26408_s29 + $0x28] sm:$0xff]  ;;  %v617_v21 = vld [vmem:[%s26408_s29 + $0x38] sm:$0xf]  ;;  %v18326_v28 = vpack.c.bf16 %v612_v19, %v610_v18  ;;  %v614_v31 = vld [vmem:[%s26408_s29 + $0x20] sm:$0xff]  ;;  %s14791_s18 = sshll.u32 %s598_s22, 4  ;;  %s26317_s18 = int_to_ptr.vmem [resolvable:$true] %s14791_s18 }
  0x26   : > { %18320 = vmatprep.subr.msk.bf16.mxu0 %vm20619_vm2, %v18318_v9  ;;  %v20658_v22 = vld [vmem:[%s20647_s27] sm:$0xff]  ;;  %v20661_v23 = vld [vmem:[%s20647_s27 + $0x8] sm:$0xff]  ;;  %v20664_v24 = vld [vmem:[%s20647_s27 + $0x10] sm:$0xff]  ;;  %v18328_v30 = vpack.c.bf16 %v617_v21, %v615_v20  ;;  %s26420_s28 = sld [smem:[#allocation20_spill]]  ;;  %s20380_s23 = scalar_lea.vmem %s26317_s18, 128 }
  0x27   : > { %v641_v25 = vrot.slane %v20658_v22, 2  ;;  %v642_v26 = vrot.slane %v20661_v23, 2  ;;  %v644_v27 = vrot.slane %v20664_v24, 2  ;;  %v20670_v29 = vld [vmem:[%s20647_s27 + $0x18] sm:$0xf]  ;;  %v14885_v34 = vld [vmem:[%s26408_s29 + $0xc8] sm:$0xff]  ;;  %p20381_p11 = scmp.ne.s32.totalorder %s26317_s18, %s20380_s23 }
  0x28   : > { %v616_v32 = vld [vmem:[%s26408_s29 + $0x30] sm:$0xf]  ;;  %v14887_v35 = vld [vmem:[%s26408_s29 + $0xd8] sm:$0xff]  ;;  %v646_v37 = vrot.slane %v20670_v29, 2  ;;  %v1202_v40 = vld [vmem:[%s26412_s20] sm:$0xff]  ;;  %v850_v1 = vrot.slane %v20658_v22, 3 }
  0x29   : > { %18323 = vmatpush1.bf16.msk.msra.mxu0 %vm20619_vm2, %v18321_v15  ;;  %v643_v33 = vsel %vm640_vm3, %v641_v25, %v642_v26  ;;  %v645_v36 = vsel %vm640_vm3, %v642_v26, %v644_v27  ;;  %v18331_v38 = vpack.c.bf16 %v616_v32, %v614_v31  ;;  %v18334_v39 = vpack.c.bf16 %v14887_v35, %v14885_v34  ;;  %v1203_v41 = vld [vmem:[%s26413_s19 + $0x8] sm:$0xff]  ;;  %v1204_v43 = vld [vmem:[%s26413_s19 + $0x10] sm:$0xff]  ;;  %v1205_v44 = vld [vmem:[%s26413_s19 + $0x18] sm:$0xff]  ;;  %p20382_p12 = pnand %p20381_p11, %p20588_p5 }
  0x2a   : > { %18325 = vmatprep.subr.bf16.mxu0 %v18324_v17  ;;  %v647_v42 = vsel %vm640_vm3, %v644_v27, %v646_v37  ;;  %v14884_v45 = vld [vmem:[%s26408_s29 + $0xc0] sm:$0xff]  ;;  %v14886_v46 = vld [vmem:[%s26408_s29 + $0xd0] sm:$0xff]  ;;  %v18365_v47 = vpack.c.bf16 %v1203_v41, %v1202_v40  ;;  %v14889_v48 = vld [vmem:[%s26408_s29 + $0xe8] sm:$0xff]  ;;  %v18368_v50 = vpack.c.bf16 %v1205_v44, %v1204_v43  ;;  %v851_v2 = vrot.slane %v20661_v23, 3 }
  0x2b   : > { %v14891_v49 = vld [vmem:[%s26408_s29 + $0xf8] sm:$0xf]  ;;  %v18336_v51 = vpack.c.bf16 %v14886_v46, %v14884_v45  ;;  %v1206_v52 = vld [vmem:[%s26413_s19 + $0x20] sm:$0xff]  ;;  %v1207_v53 = vld [vmem:[%s26413_s19 + $0x28] sm:$0xff]  ;;  %v853_v13 = vrot.slane %v20664_v24, 3  ;;  %v954_v37 = vrot.slane %v20661_v23, 1  ;;  %p20383_p13 = pneg %p20382_p12 }
  0x2c   : > { %14876 = vmatmul.mubr.msk.f32.vlgmr.msra.gmra.mrb[0].mxu0 %vm648_vm4, %v643_v33  ;;  %18366 = vmatpush1.bf16.msra.mxu1 %v18365_v47  ;;  %v18338_v54 = vpack.c.bf16 %v14891_v49, %v14889_v48  ;;  %v14888_v55 = vld [vmem:[%s26408_s29 + $0xe0] sm:$0xff]  ;;  %v14890_v56 = vld [vmem:[%s26408_s29 + $0xf0] sm:$0xf]  ;;  %v14859_v57 = vld [vmem:[%s26408_s29 + $0x48] sm:$0xff]  ;;  %v18371_v59 = vpack.c.bf16 %v1207_v53, %v1206_v52  ;;  %v852_v12 = vsel %vm849_vm5, %v850_v1, %v851_v2  ;;  %v956_v46 = vrot.slane %v20664_v24, 1 }
  0x2d   : > { %732 = vmatprep.mubr.f32.mxu0 %v20444_v7  ;;  %18327 = vmatpush1.bf16.msra.mxu0 %v18326_v28  ;;  %v14861_v58 = vld [vmem:[%s26408_s29 + $0x58] sm:$0xff]  ;;  %v18341_v60 = vpack.c.bf16 %v14890_v56, %v14888_v55  ;;  %v1208_v61 = vld [vmem:[%s26413_s19 + $0x30] sm:$0xff]  ;;  %v1210_v3 = vld [vmem:[%s26413_s19 + $0x40] sm:$0xff]  ;;  %v854_v27 = vsel %vm849_vm5, %v851_v2, %v853_v13  ;;  %v855_v28 = vrot.slane %v20670_v29, 3  ;;  %v958_v52 = vrot.slane %v20670_v29, 1 }
  0x2e   : > { %18330 = vmatprep.subr.msk.bf16.mxu0 %vm20619_vm2, %v18328_v30  ;;  %18367 = vmatprep.subr.bf16.mxu1 %v20446_v16  ;;  %v1209_v62 = vld [vmem:[%s26413_s19 + $0x38] sm:$0xff]  ;;  %v18344_v63 = vpack.c.bf16 %v14861_v58, %v14859_v57  ;;  %v1211_v4 = vld [vmem:[%s26413_s19 + $0x48] sm:$0xff]  ;;  %v14858_v5 = vld [vmem:[%s26408_s29 + $0x40] sm:$0xff]  ;;  %v1064_v55 = vrot.slane %v20658_v22, 4  ;;  %v1065_v56 = vrot.slane %v20661_v23, 4  ;;  %v1067_v58 = vrot.slane %v20664_v24, 4 }
  0x2f   : > { %v18374_v0 = vpack.c.bf16 %v1209_v62, %v1208_v61  ;;  %v14860_v6 = vld [vmem:[%s26408_s29 + $0x50] sm:$0xff]  ;;  %v14863_v8 = vld [vmem:[%s26408_s29 + $0x68] sm:$0xff]  ;;  %v14865_v9 = vld [vmem:[%s26408_s29 + $0x78] sm:$0xf]  ;;  %v18377_v11 = vpack.c.bf16 %v1211_v4, %v1210_v3  ;;  %v856_v35 = vsel %vm849_vm5, %v853_v13, %v855_v28 }
  0x30   : > { %14877 = vmatmul.mubr.msk.f32.gmra.mrb[2].mxu0 %vm648_vm4, %v645_v36  ;;  %18369 = vmatpush1.bf16.msra.mxu1 %v18368_v50  ;;  %v18346_v14 = vpack.c.bf16 %v14860_v6, %v14858_v5  ;;  %v1212_v15 = vld [vmem:[%s26413_s19 + $0x50] sm:$0xff]  ;;  %v1213_v17 = vld [vmem:[%s26413_s19 + $0x58] sm:$0xff]  ;;  %v18348_v18 = vpack.c.bf16 %v14865_v9, %v14863_v8  ;;  %v14862_v19 = vld [vmem:[%s26408_s29 + $0x60] sm:$0xff]  ;;  %v953_v36 = vrot.slane %v20658_v22, 1  ;;  %v1066_v57 = vsel %vm655_vm0, %v1064_v55, %v1065_v56 }
  0x31   : > { %738 = vmatprep.mubr.f32.mxu0 %v20444_v7  ;;  %18333 = vmatpush1.bf16.msk.msra.mxu0 %vm20619_vm2, %v18331_v38  ;;  %v14864_v20 = vld [vmem:[%s26408_s29 + $0x70] sm:$0xf]  ;;  %v14903_v21 = vld [vmem:[%s26408_s29 + $0x108] sm:$0xff]  ;;  %v14905_v25 = vld [vmem:[%s26408_s29 + $0x118] sm:$0xff]  ;;  %v18380_v26 = vpack.c.bf16 %v1213_v17, %v1212_v15 }
  0x32   : > { %18335 = vmatprep.subr.bf16.mxu0 %v18334_v39  ;;  %18370 = vmatprep.subr.bf16.mxu1 %v20446_v16  ;;  %v18351_v30 = vpack.c.bf16 %v14864_v20, %v14862_v19  ;;  %v1214_v31 = vld [vmem:[%s26413_s19 + $0x60] sm:$0xff]  ;;  %v1215_v32 = vld [vmem:[%s26413_s19 + $0x68] sm:$0xff]  ;;  %v18354_v33 = vpack.c.bf16 %v14905_v25, %v14903_v21  ;;  %v1216_v38 = vld [vmem:[%s26413_s19 + $0x70] sm:$0xff]  ;;  %v955_v45 = vsel %vm952_vm6, %v953_v36, %v954_v37 }
  0x33   : > { %v18383_v34 = vpack.c.bf16 %v1215_v32, %v1214_v31  ;;  %v1217_v39 = vld [vmem:[%s26413_s19 + $0x78] sm:$0xff]  ;;  %v14902_v40 = vld [vmem:[%s26408_s29 + $0x100] sm:$0xff]  ;;  %v14904_v41 = vld [vmem:[%s26408_s29 + $0x110] sm:$0xff] }
  0x34   : > { %14878 = vmatmul.mubr.msk.f32.gmra.mrb[4].mxu0 %vm648_vm4, %v647_v42  ;;  %18372 = vmatpush1.bf16.msra.mxu1 %v18371_v59  ;;  %v14907_v42 = vld [vmem:[%s26408_s29 + $0x128] sm:$0xff]  ;;  %v14909_v43 = vld [vmem:[%s26408_s29 + $0x138] sm:$0xf]  ;;  %v18386_v44 = vpack.c.bf16 %v1217_v39, %v1216_v38  ;;  %v18356_v47 = vpack.c.bf16 %v14904_v41, %v14902_v40  ;;  %v14906_v49 = vld [vmem:[%s26408_s29 + $0x120] sm:$0xff]  ;;  %v1068_v59 = vsel %vm655_vm0, %v1065_v56, %v1067_v58 }
  0x35   : > { %821 = vmatprep.mubr.f32.mxu0 %v20444_v7  ;;  %18373 = vmatprep.subr.bf16.mxu1 %v20446_v16  ;;  %v18358_v48 = vpack.c.bf16 %v14909_v43, %v14907_v42  ;;  %v14908_v50 = vld [vmem:[%s26408_s29 + $0x130] sm:$0xf]  ;;  %v1310_v8 = vld [vmem:[%s26415_s4] sm:$0xff]  ;;  %v1311_v9 = vld [vmem:[%s26415_s4 + $0x8] sm:$0xff] }
  0x36   : > { %v18361_v53 = vpack.c.bf16 %v14908_v50, %v14906_v49  ;;  %v1312_v19 = vld [vmem:[%s26415_s4 + $0x10] sm:$0xff]  ;;  %v1313_v20 = vld [vmem:[%s26415_s4 + $0x18] sm:$0xff]  ;;  %v1314_v32 = vld [vmem:[%s26415_s4 + $0x20] sm:$0xff] }
  0x37   : > { %v1316_v38 = vld [vmem:[%s26415_s4 + $0x30] sm:$0xff]  ;;  %v1317_v39 = vld [vmem:[%s26415_s4 + $0x38] sm:$0xff]  ;;  %v1318_v41 = vld [vmem:[%s26415_s4 + $0x40] sm:$0xff] }
  0x38   : > { %14881 = vmatmul.mubr.msk.f32.vlgmr.msra.gmra.mrb[0].mxu0 %vm648_vm4, %v20658_v22  ;;  %18375 = vmatpush1.bf16.msra.mxu1 %v18374_v0  ;;  %v1178_v0 = vld [vmem:[%s26414_s25] sm:$0x3]  ;;  %v18401_v40 = vpack.c.bf16 %v1317_v39, %v1316_v38  ;;  %v1319_v42 = vld [vmem:[%s26415_s4 + $0x48] sm:$0xff]  ;;  %v1324_v50 = vld [vmem:[%s26415_s4 + $0x70] sm:$0xff] }
  0x39   : > { %827 = vmatprep.mubr.f32.mxu0 %v20444_v7  ;;  %18337 = vmatpush1.bf16.msra.mxu0 %v18336_v51  ;;  %v957_v51 = vsel %vm952_vm6, %v954_v37, %v956_v46  ;;  %v18404_v43 = vpack.c.bf16 %v1319_v42, %v1318_v41  ;;  %v1411_v56 = vld [vmem:[%s26416_s5] sm:$0xff]  ;;  %v14941_v39 = vld [vmem:[%s26364_s7 + $0xc8] sm:$0xff]  ;;  %v14942_v42 = vld [vmem:[%s26364_s7 + $0xd0] sm:$0xff] }
  0x3a   : > { %18340 = vmatprep.subr.msk.bf16.mxu0 %vm20619_vm2, %v18338_v54  ;;  %18376 = vmatprep.subr.bf16.mxu1 %v20446_v16  ;;  %v959_v54 = vsel %vm952_vm6, %v956_v46, %v958_v52  ;;  %v14940_v38 = vld [vmem:[%s26364_s7 + $0xc0] sm:$0xff] }
  0x3b   : > { %v1588_v41 = vld [vmem:[%s26364_s7 + $0x40] sm:$0xff] }
  0x3c   : > { %14882 = vmatmul.mubr.msk.f32.gmra.mrb[2].mxu0 %vm648_vm4, %v20661_v23  ;;  %18378 = vmatpush1.bf16.msra.mxu1 %v18377_v11  ;;  %v1218_v23 = vld [vmem:[%s26413_s19 + $0x80] sm:$0xff] }
  0x3d   : > { %833 = vmatprep.mubr.f32.mxu0 %v20444_v7  ;;  %18343 = vmatpush1.bf16.msk.msra.mxu0 %vm20619_vm2, %v18341_v60  ;;  %v1069_v60 = vrot.slane %v20670_v29, 4  ;;  %v1180_v29 = vlaneseq }
  0x3e   : > { %18345 = vmatprep.subr.bf16.mxu0 %v18344_v63  ;;  %18379 = vmatprep.subr.bf16.mxu1 %v20446_v16 }
  0x3f   : > { %v1070_v22 = vsel %vm655_vm0, %v1067_v58, %v1069_v60  ;;  %v1181_v62 = vshrl.u32 %v1180_v29, 7  ;;  %v14935_v58 = vld [vmem:[%s26364_s7 + $0x98] sm:$0xff]  ;;  %v14936_v60 = vld [vmem:[%s26364_s7 + $0xa0] sm:$0xff] }
  0x40   : > { %14883 = vmatmul.mubr.msk.f32.gmra.mrb[4].mxu0 %vm648_vm4, %v20664_v24  ;;  %18381 = vmatpush1.bf16.msra.mxu1 %v18380_v26  ;;  %v1219_v24 = vld [vmem:[%s26413_s19 + $0x88] sm:$0xff] }
  0x41   : > { %933 = vmatprep.mubr.f32.mxu0 %v20444_v7  ;;  %18382 = vmatprep.subr.bf16.mxu1 %v20446_v16  ;;  %v18389_v61 = vpack.c.bf16 %v1219_v24, %v1218_v23  ;;  %v20886_v63 = vsub.s32 0, %v1181_v62  ;;  %v20891_v1 = vsub.s32 1, %v1181_v62 }
  0x43   : > { %v1183_v2 = vrot.slane %v1178_v0, %v20886_v63  ;;  %v1187_v3 = vrot.slane %v1178_v0, %v20891_v1 }
  0x44   : > { %14894 = vmatmul.mubr.msk.f32.vlgmr.msra.gmra.mrb[0].mxu0 %vm648_vm4, %v852_v12  ;;  %18384 = vmatpush1.bf16.msra.mxu1 %v18383_v34 }
  0x45   : > { %939 = vmatprep.mubr.f32.mxu0 %v20444_v7  ;;  %18347 = vmatpush1.bf16.msra.mxu0 %v18346_v14  ;;  %v18392_v14 = vpack.c.bf16 %v1311_v9, %v1310_v8 }
  0x46   : > { %18350 = vmatprep.subr.msk.bf16.mxu0 %vm20619_vm2, %v18348_v18  ;;  %18385 = vmatprep.subr.bf16.mxu1 %v20446_v16 }
  0x48   : > { %14895 = vmatmul.mubr.msk.f32.gmra.mrb[2].mxu0 %vm648_vm4, %v854_v27  ;;  %18387 = vmatpush1.bf16.msra.mxu1 %v18386_v44  ;;  %v18395_v27 = vpack.c.bf16 %v1313_v20, %v1312_v19  ;;  %v1320_v44 = vld [vmem:[%s26415_s4 + $0x50] sm:$0xff]  ;;  %v1581_v19 = vld [vmem:[%s26364_s7 + $0x8] sm:$0xff] }
  0x49   : > { %945 = vmatprep.mubr.f32.mxu0 %v20444_v7  ;;  %18353 = vmatpush1.bf16.msk.msra.mxu0 %vm20619_vm2, %v18351_v30  ;;  %v1496_v20 = vld [vmem:[%s26363_s6 + $0x8] sm:$0xf] }
  0x4a   : > { %18355 = vmatprep.subr.bf16.mxu0 %v18354_v33  ;;  %18388 = vmatprep.subr.bf16.mxu1 %v20446_v16  ;;  %v1315_v33 = vld [vmem:[%s26415_s4 + $0x28] sm:$0xff] }
  0x4b   : > { %v18398_v36 = vpack.c.bf16 %v1315_v33, %v1314_v32  ;;  %v14938_v32 = vld [vmem:[%s26364_s7 + $0xb0] sm:$0xff]  ;;  %v14939_v33 = vld [vmem:[%s26364_s7 + $0xb8] sm:$0xff] }
  0x4c   : > { %14896 = vmatmul.mubr.msk.f32.gmra.mrb[4].mxu0 %vm648_vm4, %v856_v35  ;;  %18390 = vmatpush1.bf16.msra.mxu1 %v18389_v61 }
  0x4d   : > { %1036 = vmatprep.mubr.f32.mxu0 %v20444_v7  ;;  %18391 = vmatprep.subr.bf16.mxu1 %v20446_v16 }
  0x50   : > { %14899 = vmatmul.mubr.msk.f32.vlgmr.msra.gmra.mrb[0].mxu0 %vm648_vm4, %v955_v45  ;;  %v1321_v45 = vld [vmem:[%s26415_s4 + $0x58] sm:$0xff] }
  0x51   : > { %1042 = vmatprep.mubr.f32.mxu0 %v20444_v7  ;;  %18357 = vmatpush1.bf16.msra.mxu0 %v18356_v47  ;;  %v18407_v46 = vpack.c.bf16 %v1321_v45, %v1320_v44  ;;  %v1322_v47 = vld [vmem:[%s26415_s4 + $0x60] sm:$0xff]  ;;  %v14925_v45 = vld [vmem:[%s26364_s7 + $0x48] sm:$0xff] }
  0x52   : > { %18360 = vmatprep.subr.msk.bf16.mxu0 %vm20619_vm2, %v18358_v48  ;;  %v1323_v48 = vld [vmem:[%s26415_s4 + $0x68] sm:$0xff] }
  0x53   : > { %v18410_v49 = vpack.c.bf16 %v1323_v48, %v1322_v47  ;;  %v14945_v47 = vld [vmem:[%s26364_s7 + $0xd8] sm:$0xff]  ;;  %v14946_v48 = vld [vmem:[%s26364_s7 + $0xe0] sm:$0xff] }
  0x54   : > { %14900 = vmatmul.mubr.msk.f32.gmra.mrb[2].mxu0 %vm648_vm4, %v957_v51  ;;  %v1325_v51 = vld [vmem:[%s26415_s4 + $0x78] sm:$0xff] }
  0x55   : > { %1048 = vmatprep.mubr.f32.mxu0 %v20444_v7  ;;  %18363 = vmatpush1.bf16.msk.msra.mxu0 %vm20619_vm2, %v18361_v53  ;;  %v18413_v52 = vpack.c.bf16 %v1325_v51, %v1324_v50  ;;  %v1326_v53 = vld [vmem:[%s26415_s4 + $0x80] sm:$0xff] }
  0x58   : > { %14901 = vmatmul.mubr.msk.f32.gmra.mrb[4].mxu0 %vm648_vm4, %v959_v54  ;;  %v1327_v54 = vld [vmem:[%s26415_s4 + $0x88] sm:$0xff] }
  0x59   : > { %1147 = vmatprep.mubr.f32.mxu0 %v20444_v7  ;;  %v18416_v55 = vpack.c.bf16 %v1327_v54, %v1326_v53  ;;  %v18451_v54 = vpack.c.bf16 %v14946_v48, %v14945_v47  ;;  %v2017_v47 = vld [vmem:[%s26366_s9 + $0x10] sm:$0xff]  ;;  %v2018_v48 = vld [vmem:[%s26366_s9 + $0x18] sm:$0xff] }
  0x5c   : > { %14912 = vmatmul.mubr.msk.f32.vlgmr.msra.gmra.mrb[0].mxu0 %vm648_vm4, %v1066_v57  ;;  %v14934_v57 = vld [vmem:[%s26364_s7 + $0x90] sm:$0xff] }
  0x5d   : > { %1153 = vmatprep.mubr.f32.mxu0 %v20444_v7 }
  0x60   : > { %14913 = vmatmul.mubr.msk.f32.gmra.mrb[2].mxu0 %vm648_vm4, %v1068_v59  ;;  %v18427_v59 = vpack.c.bf16 %v14935_v58, %v14934_v57 }
  0x61   : > { %1159 = vmatprep.mubr.f32.mxu0 %v20444_v7 }
  0x64   : > { %14914 = vmatmul.mubr.msk.f32.gmra.mrb[4].mxu0 %vm648_vm4, %v1070_v22  ;;  %v14937_v22 = vld [vmem:[%s26364_s7 + $0xa8] sm:$0xff] }
  0x65   : > { %16638 = vmatprep.mubr.msk.f32.mxu0 %vm1413_vm8, %v1411_v56  ;;  %v18430_v23 = vpack.c.bf16 %v14937_v22, %v14936_v60  ;;  %v14928_v56 = vld [vmem:[%s26364_s7 + $0x60] sm:$0xff] }
 0x12f   : > { %v1149_v4 = vpop.f32.mrb[0].mxu0 }
 0x130   : > { %v20895_v5 = vadd.f32 %v1183_v2, %v1149_v4  ;;  %v1151_v6 = vpop.f32.mrb[1].mxu0 }
 0x131   : > { %v1191_v11 = vadd.f32 %v1187_v3, %v1151_v6 }
 0x132   : > { %v1196_v15 = vmax.f32 %v20895_v5, 0.0 }
 0x133   : > { %v1197_v12 = vmax.f32 %v1191_v11, 0.0  ;;  %v1155_v13 = vpop.f32.mrb[2].mxu0 }
 0x134   : > { %v1192_v17 = vadd.f32 %v1183_v2, %v1155_v13  ;;  %v1157_v18 = vpop.f32.mrb[3].mxu0 }
 0x135   : > { %v1193_v21 = vadd.f32 %v1187_v3, %v1157_v18  ;;  %14915 = vmatprep.mubr.msk.f32.mxu1 %vm1220_vm7, %v1197_v12  ;;  %v1580_v18 = vld [vmem:[%s26364_s7] sm:$0xff] }
 0x136   : > { %1295 = vmatmul.mubr.f32.vlgmr.msra.gmra.mrb[0].mxu1 %v1196_v15  ;;  %v1198_v28 = vmax.f32 %v1192_v17, 0.0  ;;  %v1495_v17 = vld [vmem:[%s26363_s6] sm:$0xff] }
 0x137   : > { %v1199_v25 = vmax.f32 %v1193_v21, 0.0  ;;  %18393 = vmatpush1.bf16.msra.mxu1 %v18392_v14  ;;  %v1161_v26 = vpop.f32.mrb[4].mxu0  ;;  %v18439_v21 = vpack.c.bf16 %v1581_v19, %v1580_v18  ;;  %v14951_v19 = vld [vmem:[%s26364_s7 + $0x108] sm:$0xff] }
 0x138   : > { %v1194_v30 = vadd.f32 %v1183_v2, %v1161_v26  ;;  %v1163_v31 = vpop.f32.mrb[5].mxu0  ;;  %18394 = vmatprep.subr.bf16.mxu1 %v20446_v16  ;;  %v1583_v26 = vld [vmem:[%s26364_s7 + $0x18] sm:$0xff] }
 0x139   : > { %v1195_v34 = vadd.f32 %v1187_v3, %v1163_v31  ;;  %14916 = vmatprep.mubr.msk.f32.mxu1 %vm1220_vm7, %v1199_v25 }
 0x13a   : > { %1300 = vmatmul.mubr.f32.gmra.mrb[2].mxu1 %v1198_v28  ;;  %v1200_v37 = vmax.f32 %v1194_v30, 0.0  ;;  %v1585_v30 = vld [vmem:[%s26364_s7 + $0x28] sm:$0xff] }
 0x13b   : > { %v1201_v35 = vmax.f32 %v1195_v34, 0.0  ;;  %18396 = vmatpush1.bf16.msra.mxu1 %v18395_v27  ;;  %v18433_v34 = vpack.c.bf16 %v14939_v33, %v14938_v32  ;;  %v14959_v32 = vld [vmem:[%s26364_s7 + $0x138] sm:$0xff] }
 0x13c   : > { %18397 = vmatprep.subr.bf16.mxu1 %v20446_v16 }
 0x13d   : > { %14917 = vmatprep.mubr.msk.f32.mxu1 %vm1220_vm7, %v1201_v35 }
 0x13e   : > { %1305 = vmatmul.mubr.f32.gmra.mrb[4].mxu1 %v1200_v37 }
 0x13f   : > { %18399 = vmatpush1.bf16.msra.mxu1 %v18398_v36  ;;  %14918 = vmatprep.mubr.msk.f32.mxu1 %vm1220_vm7, %v1197_v12  ;;  %v1587_v36 = vld [vmem:[%s26364_s7 + $0x38] sm:$0xff] }
 0x140   : > { %18400 = vmatprep.subr.bf16.mxu1 %v20446_v16 }
 0x143   : > { %18402 = vmatpush1.bf16.msra.mxu1 %v18401_v40  ;;  %v18436_v40 = vpack.c.bf16 %v14941_v39, %v14940_v38  ;;  %v14963_v38 = vld [vmem:[%s26364_s7 + $0x158] sm:$0xff] }
 0x144   : > { %18403 = vmatprep.subr.bf16.mxu1 %v20446_v16 }
 0x147   : > { %18405 = vmatpush1.bf16.msra.mxu1 %v18404_v43 }
 0x148   : > { %18406 = vmatprep.subr.bf16.mxu1 %v20446_v16 }
 0x14b   : > { %18408 = vmatpush1.bf16.msra.mxu1 %v18407_v46  ;;  %v14926_v46 = vld [vmem:[%s26364_s7 + $0x50] sm:$0xff] }
 0x14c   : > { %18409 = vmatprep.subr.bf16.mxu1 %v20446_v16 }
 0x14f   : > { %18411 = vmatpush1.bf16.msra.mxu1 %v18410_v49 }
 0x150   : > { %18412 = vmatprep.subr.bf16.mxu1 %v20446_v16 }
 0x153   : > { %18414 = vmatpush1.bf16.msra.mxu1 %v18413_v52  ;;  %v18463_v52 = vpack.c.bf16 %v14926_v46, %v14925_v45  ;;  %v2102_v45 = vld [vmem:[%s26367_s10 + $0x8] sm:$0xff] }
 0x154   : > { %18415 = vmatprep.subr.bf16.mxu1 %v20446_v16 }
 0x157   : > { %18417 = vmatpush1.bf16.msra.mxu1 %v18416_v55  ;;  %v14927_v55 = vld [vmem:[%s26364_s7 + $0x58] sm:$0xff] }
 0x158   : > { %18426 = vmatprep.subr.bf16.mxu1 %v20446_v16 }
 0x15a   : > { %1393 = vmatmul.mubr.f32.vlgmr.msra.gmra.mrb[6].mxu1 %v1196_v15  ;;  %v1412_v15 = vld [vmem:[%s26416_s5 + $0x8] sm:$0xf] }
 0x15b   : > { %14919 = vmatprep.mubr.msk.f32.mxu1 %vm1220_vm7, %v1199_v25  ;;  %18428 = vmatpush3.bf16.msra.mxu1 %v18427_v59  ;;  %v1582_v25 = vld [vmem:[%s26364_s7 + $0x10] sm:$0xff] }
 0x15c   : > { %18429 = vmatprep.subr.bf16.mxu1 %v20446_v16  ;;  %v18442_v27 = vpack.c.bf16 %v1583_v26, %v1582_v25  ;;  %v14933_v25 = vld [vmem:[%s26364_s7 + $0x88] sm:$0xff]  ;;  %v14956_v26 = vld [vmem:[%s26364_s7 + $0x120] sm:$0xff] }
 0x15e   : > { %1398 = vmatmul.mubr.f32.gmra.mrb[8].mxu1 %v1198_v28  ;;  %v1584_v28 = vld [vmem:[%s26364_s7 + $0x20] sm:$0xff] }
 0x15f   : > { %14920 = vmatprep.mubr.msk.f32.mxu1 %vm1220_vm7, %v1201_v35  ;;  %18431 = vmatpush3.bf16.msra.mxu1 %v18430_v23  ;;  %v18445_v31 = vpack.c.bf16 %v1585_v30, %v1584_v28  ;;  %v1586_v35 = vld [vmem:[%s26364_s7 + $0x30] sm:$0xff]  ;;  %v14953_v28 = vld [vmem:[%s26364_s7 + $0x118] sm:$0xff] }
 0x160   : > { %18432 = vmatprep.subr.bf16.mxu1 %v20446_v16 }
 0x162   : > { %1403 = vmatmul.mubr.f32.gmra.mrb[10].mxu1 %v1200_v37  ;;  %v18448_v37 = vpack.c.bf16 %v1587_v36, %v1586_v35  ;;  %v14961_v35 = vld [vmem:[%s26364_s7 + $0x148] sm:$0xff] }
 0x163   : > { %18434 = vmatpush3.bf16.msra.mxu1 %v18433_v34  ;;  %16668 = vmatprep.mubr.msk.f32.mxu1 %vm20447_vm9, %v20444_v7  ;;  %v14960_v34 = vld [vmem:[%s26364_s7 + $0x140] sm:$0xff] }
 0x164   : > { %18435 = vmatprep.subr.bf16.mxu1 %v20446_v16  ;;  %v18481_v36 = vpack.c.bf16 %v14961_v35, %v14960_v34 }
 0x167   : > { %18437 = vmatpush3.bf16.msra.mxu1 %v18436_v40  ;;  %v14964_v40 = vld [vmem:[%s26364_s7 + $0x160] sm:$0xff] }
 0x168   : > { %16666 = vmatprep.subr.mxu1 %v20444_v7 }
 0x16b   : > { %16667 = vmatpush3.msra.mxu1 %v14942_v42  ;;  %v2016_v42 = vld [vmem:[%s26366_s9 + $0x8] sm:$0xff] }
 0x16c   : > { %18450 = vmatprep.subr.bf16.mxu1 %v20446_v16 }
 0x209   : > { %v1296_v24 = vpop.f32.mrb[0].mxu1 }
 0x20a   : > { %v1298_v61 = vpop.f32.mrb[1].mxu1 }
 0x20d   : > { %v1301_v29 = vpop.f32.mrb[2].mxu1 }
 0x20e   : > { %v1303_v62 = vpop.f32.mrb[3].mxu1 }
 0x20f   : > { %v14947_v62 = vld [vmem:[%s26364_s7 + $0xe8] sm:$0xff] }
 0x211   : > { %v1306_v0 = vpop.f32.mrb[4].mxu1 }
 0x212   : > { %v1308_v2 = vpop.f32.mrb[5].mxu1 }
 0x22d   : > { %v1394_v3 = vpop.f32.mrb[6].mxu1 }
 0x22e   : > { %v1408_v4 = vmax.f32 %v1296_v24, %v1394_v3  ;;  %v1396_v5 = vpop.f32.mrb[7].mxu1  ;;  %v14929_v3 = vld [vmem:[%s26364_s7 + $0x68] sm:$0xff] }
 0x231   : > { %v1399_v6 = vpop.f32.mrb[8].mxu1 }
 0x232   : > { %v1409_v8 = vmax.f32 %v1301_v29, %v1399_v6  ;;  %v1401_v9 = vpop.f32.mrb[9].mxu1  ;;  %v18466_v29 = vpack.c.bf16 %v14928_v56, %v14927_v55  ;;  %v2105_v55 = vld [vmem:[%s26367_s10 + $0x20] sm:$0xff] }
 0x234   : > { %v18418_v11 = vpack.c.bf16 %v1409_v8, %v1408_v4  ;;  %v14930_v4 = vld [vmem:[%s26364_s7 + $0x70] sm:$0xff] }
 0x235   : > { %v1404_v12 = vpop.f32.mrb[10].mxu1 }
 0x236   : > { %v1410_v13 = vmax.f32 %v1306_v0, %v1404_v12  ;;  %v1406_v14 = vpop.f32.mrb[11].mxu1  ;;  %18419 = vmatprep.subr.bf16.mxu0 %v18418_v11  ;;  %v14948_v0 = vld [vmem:[%s26364_s7 + $0xf0] sm:$0xff]  ;;  %v14949_v12 = vld [vmem:[%s26364_s7 + $0xf8] sm:$0xff] }
 0x237   : > { %18421 = vmatpush3.bf16.msra.mxu0 %v18418_v11  ;;  %v18454_v9 = vpack.c.bf16 %v14948_v0, %v14947_v62  ;;  %v14931_v14 = vld [vmem:[%s26364_s7 + $0x78] sm:$0xff]  ;;  %v2024_v62 = vld [vmem:[%s26366_s9 + $0x48] sm:$0xff]  ;;  %v2109_v0 = vld [vmem:[%s26367_s10 + $0x40] sm:$0xff] }
 0x238   : > { %16636 = vmatprep.subr.mxu0 %v1410_v13 }
 0x23b   : > { %16637 = vmatpush3.msra.mxu0 %v1410_v13 }
 0x23c   : > { %16639 = vmatmul.mubr.msk.f32.vlgmr.msra.gmra.mrb[6].mxu0 %vm1413_vm8, %v1412_v15  ;;  %18423 = vmatprep.subr.bf16.mxu0 %v18418_v11  ;;  %v14932_v15 = vld [vmem:[%s26364_s7 + $0x80] sm:$0xff] }
 0x23d   : > { %18425 = vmatpush3.bf16.msra.mxu0 %v18418_v11  ;;  %16647 = vmatprep.mubr.msk.f32.mxu0 %vm1413_vm8, %v1495_v17  ;;  %v18469_v11 = vpack.c.bf16 %v14930_v4, %v14929_v3  ;;  %v18472_v18 = vpack.c.bf16 %v14932_v15, %v14931_v14  ;;  %v2028_v14 = vld [vmem:[%s26366_s9 + $0x68] sm:$0xff]  ;;  %v2113_v15 = vld [vmem:[%s26367_s10 + $0x60] sm:$0xff] }
 0x23e   : > { %16645 = vmatprep.subr.mxu0 %v1410_v13 }
 0x241   : > { %16646 = vmatpush3.msra.mxu0 %v1410_v13  ;;  %v14950_v13 = vld [vmem:[%s26364_s7 + $0x100] sm:$0xff] }
 0x242   : > { %16648 = vmatmul.mubr.msk.f32.vlgmr.msra.gmra.mrb[8].mxu0 %vm1413_vm8, %v1496_v20  ;;  %18438 = vmatprep.subr.bf16.mxu0 %v20446_v16  ;;  %v18457_v17 = vpack.c.bf16 %v14950_v13, %v14949_v12  ;;  %v14952_v20 = vld [vmem:[%s26364_s7 + $0x110] sm:$0xff]  ;;  %v2027_v13 = vld [vmem:[%s26366_s9 + $0x60] sm:$0xff] }
 0x243   : > { %18440 = vmatpush3.bf16.msra.mxu0 %v18439_v21  ;;  %16689 = vmatprep.mubr.msk.f32.mxu0 %vm20447_vm9, %v20444_v7  ;;  %v18460_v21 = vpack.c.bf16 %v14952_v20, %v14951_v19  ;;  %v2029_v20 = vld [vmem:[%s26366_s9 + $0x70] sm:$0xff] }
 0x244   : > { %18441 = vmatprep.subr.bf16.mxu0 %v20446_v16 }
 0x247   : > { %18443 = vmatpush3.bf16.msra.mxu0 %v18442_v27  ;;  %v14957_v27 = vld [vmem:[%s26364_s7 + $0x128] sm:$0xff] }
 0x248   : > { %18444 = vmatprep.subr.bf16.mxu0 %v20446_v16  ;;  %v18475_v30 = vpack.c.bf16 %v14957_v27, %v14956_v26  ;;  %v2115_v26 = vld [vmem:[%s26367_s10 + $0x70] sm:$0xff]  ;;  %v2116_v27 = vld [vmem:[%s26367_s10 + $0x78] sm:$0xff] }
 0x24b   : > { %18446 = vmatpush3.bf16.msra.mxu0 %v18445_v31  ;;  %v14958_v31 = vld [vmem:[%s26364_s7 + $0x130] sm:$0xff] }
 0x24c   : > { %18447 = vmatprep.subr.bf16.mxu0 %v20446_v16  ;;  %v18478_v33 = vpack.c.bf16 %v14959_v32, %v14958_v31 }
 0x24f   : > { %18449 = vmatpush3.bf16.msra.mxu0 %v18448_v37  ;;  %v14962_v37 = vld [vmem:[%s26364_s7 + $0x150] sm:$0xff] }
 0x250   : > { %16687 = vmatprep.subr.mxu0 %v20444_v7  ;;  %v18484_v39 = vpack.c.bf16 %v14963_v38, %v14962_v37 }
 0x253   : > { %16688 = vmatpush3.msra.mxu0 %v1588_v41  ;;  %v2015_v41 = vld [vmem:[%s26366_s9] sm:$0xff] }
 0x254   : > { %18462 = vmatprep.subr.bf16.mxu0 %v20446_v16 }
 0x30f   : > { %v16640_v43 = vpop.f32.mrb[6].mxu0 }
 0x310   : > { %v1486_v44 = vpop.f32.mrb[7].mxu0 }
 0x315   : > { %v16649_v49 = vpop.f32.mrb[8].mxu0 }
 0x316   : > { %v1579_v50 = vmax.f32 %v16640_v43, %v16649_v49  ;;  %v1569_v51 = vpop.f32.mrb[9].mxu0  ;;  %v2101_v43 = vld [vmem:[%s26367_s10] sm:$0xff]  ;;  %v2103_v49 = vld [vmem:[%s26367_s10 + $0x10] sm:$0xff] }
 0x317   : > { %v1578_v53 = vmax.f32 %v1486_v44, %v1569_v51  ;;  %v18487_v44 = vpack.c.bf16 %v2016_v42, %v2015_v41  ;;  %v18511_v46 = vpack.c.bf16 %v2102_v45, %v2101_v43  ;;  %v2104_v51 = vld [vmem:[%s26367_s10 + $0x18] sm:$0xff]  ;;  %v14966_v43 = vld [vmem:[%s26365_s8] ss:$0 sm:$0xff] }
 0x318   : > { %v1612_v57 = vrot.slane %v1579_v50, 2  ;;  %v1770_v58 = vrot.slane %v1579_v50, 3  ;;  %v1845_v59 = vrot.slane %v1579_v50, 1  ;;  %v1930_v60 = vrot.slane %v1579_v50, 4 }
 0x319   : > { %16690 = vmatmul.mubr.msk.f32.vlgmr.msra.gmra.mrb[10].mxu0 %vm1614_vm10, %v1578_v53  ;;  %v1611_v22 = vrot.slane %v1578_v53, 2  ;;  %v1844_v23 = vrot.slane %v1578_v53, 1  ;;  %v1769_v24 = vrot.slane %v1578_v53, 3  ;;  %v1929_v61 = vrot.slane %v1578_v53, 4  ;;  %v2019_v53 = vld [vmem:[%s26366_s9 + $0x20] sm:$0xff] }
 0x31a   : > { %18464 = vmatpush3.bf16.msra.mxu0 %v18463_v52  ;;  %16731 = vmatprep.mubr.msk.f32.mxu0 %vm20447_vm9, %v20444_v7  ;;  %v18490_v50 = vpack.c.bf16 %v2018_v48, %v2017_v47  ;;  %v18514_v52 = vpack.c.bf16 %v2104_v51, %v2103_v49  ;;  %v14982_v47 = vld [vmem:[%s26408_s29 + $0x88] sm:$0xff]  ;;  %v14984_v48 = vld [vmem:[%s26408_s29 + $0x98] sm:$0xff] }
 0x31b   : > { %v1613_v2 = vsel %vm640_vm3, %v1611_v22, %v1612_v57  ;;  %18465 = vmatprep.subr.bf16.mxu0 %v20446_v16  ;;  %v1846_v5 = vsel %vm952_vm6, %v1844_v23, %v1845_v59  ;;  %v1771_v6 = vsel %vm849_vm5, %v1769_v24, %v1770_v58  ;;  %v1931_v8 = vsel %vm655_vm0, %v1929_v61, %v1930_v60  ;;  %v2106_v57 = vld [vmem:[%s26367_s10 + $0x28] sm:$0xff]  ;;  %v2021_v58 = vld [vmem:[%s26366_s9 + $0x30] sm:$0xff]  ;;  %v2022_v59 = vld [vmem:[%s26366_s9 + $0x38] sm:$0xff] }
 0x31c   : > { %16669 = vmatmul.mubr.msk.f32.vlgmr.msra.gmra.mrb[12].mxu1 %vm1614_vm10, %v1613_v2  ;;  %v18517_v60 = vpack.c.bf16 %v2106_v57, %v2105_v55  ;;  %v2107_v22 = vld [vmem:[%s26367_s10 + $0x30] sm:$0xff]  ;;  %v2108_v23 = vld [vmem:[%s26367_s10 + $0x38] sm:$0xff]  ;;  %v18496_v24 = vpack.c.bf16 %v2022_v59, %v2021_v58  ;;  %v2110_v2 = vld [vmem:[%s26367_s10 + $0x48] sm:$0xff]  ;;  %v18534_v55 = vpack.c.bf16 %v14984_v48, %v14982_v47 }
 0x31d   : > { %18452 = vmatpush3.bf16.msra.mxu1 %v18451_v54  ;;  %16710 = vmatprep.mubr.msk.f32.mxu1 %vm20447_vm9, %v20444_v7  ;;  %v2020_v54 = vld [vmem:[%s26366_s9 + $0x28] sm:$0xff]  ;;  %v18520_v61 = vpack.c.bf16 %v2108_v23, %v2107_v22  ;;  %v18523_v4 = vpack.c.bf16 %v2110_v2, %v2109_v0  ;;  %v14983_v57 = vld [vmem:[%s26408_s29 + $0x90] sm:$0xff]  ;;  %v14988_v59 = vld [vmem:[%s26408_s29 + $0xb8] sm:$0xf] }
 0x31e   : > { %18467 = vmatpush3.bf16.msra.mxu0 %v18466_v29  ;;  %18453 = vmatprep.subr.bf16.mxu1 %v20446_v16  ;;  %v18493_v56 = vpack.c.bf16 %v2020_v54, %v2019_v53  ;;  %v2023_v29 = vld [vmem:[%s26366_s9 + $0x40] sm:$0xff]  ;;  %v14986_v58 = vld [vmem:[%s26408_s29 + $0xa8] sm:$0xff]  ;;  %v2363_v2 = vld [vmem:[%s26408_s29 + $0x18] sm:$0xff] }
 0x31f   : > { %18468 = vmatprep.subr.bf16.mxu0 %v20446_v16  ;;  %v18499_v3 = vpack.c.bf16 %v2024_v62, %v2023_v29  ;;  %v2188_v54 = vld [vmem:[%s26368_s11] sm:$0xf]  ;;  %v21322_v62 = vld [vmem:[%s20647_s27 + $0x28] sm:$0xff]  ;;  %v14975_v48 = vld [vmem:[%s26408_s29 + $0x50] sm:$0xff] }
 0x320   : > { %v14985_v23 = vld [vmem:[%s26408_s29 + $0xa0] sm:$0xff]  ;;  %v2361_v0 = vld [vmem:[%s26408_s29 + $0x8] sm:$0xff] }
 0x321   : > { %18455 = vmatpush3.bf16.msra.mxu1 %v18454_v9  ;;  %v2112_v9 = vld [vmem:[%s26367_s10 + $0x58] sm:$0xff]  ;;  %v21319_v29 = vld [vmem:[%s20647_s27 + $0x20] sm:$0xff] }
 0x322   : > { %18470 = vmatpush3.bf16.msra.mxu0 %v18469_v11  ;;  %18456 = vmatprep.subr.bf16.mxu1 %v20446_v16  ;;  %v14973_v47 = vld [vmem:[%s26408_s29 + $0x40] sm:$0xff] }
 0x323   : > { %18471 = vmatprep.subr.bf16.mxu0 %v20446_v16 }
 0x325   : > { %18458 = vmatpush3.bf16.msra.mxu1 %v18457_v17  ;;  %v18505_v17 = vpack.c.bf16 %v2028_v14, %v2027_v13  ;;  %v2367_v13 = vld [vmem:[%s26408_s29 + $0x38] sm:$0xf] }
 0x326   : > { %18473 = vmatpush3.bf16.msra.mxu0 %v18472_v18  ;;  %18459 = vmatprep.subr.bf16.mxu1 %v20446_v16  ;;  %v2114_v18 = vld [vmem:[%s26367_s10 + $0x68] sm:$0xff] }
 0x327   : > { %16729 = vmatprep.subr.mxu0 %v20444_v7  ;;  %v18529_v19 = vpack.c.bf16 %v2114_v18, %v2113_v15  ;;  %v21356_v18 = vld [vmem:[%s20647_s27 + $0x38] sm:$0xf] }
 0x329   : > { %18461 = vmatpush3.bf16.msra.mxu1 %v18460_v21  ;;  %v2030_v21 = vld [vmem:[%s26366_s9 + $0x78] sm:$0xff] }
 0x32a   : > { %16730 = vmatpush3.msra.mxu0 %v14933_v25  ;;  %16708 = vmatprep.subr.mxu1 %v20444_v7  ;;  %v18508_v25 = vpack.c.bf16 %v2030_v21, %v2029_v20  ;;  %v2364_v20 = vld [vmem:[%s26408_s29 + $0x20] sm:$0xff]  ;;  %v2366_v21 = vld [vmem:[%s26408_s29 + $0x30] sm:$0xf] }
 0x32b   : > { %16732 = vmatmul.mubr.msk.f32.vlgmr.msra.gmra.mrb[12].mxu0 %vm1614_vm10, %v1846_v5  ;;  %18486 = vmatprep.subr.bf16.mxu0 %v20446_v16  ;;  %v2025_v5 = vld [vmem:[%s26366_s9 + $0x50] sm:$0xff] }
 0x32c   : > { %16787 = vmatprep.mubr.msk.f32.mxu0 %vm20447_vm9, %v20444_v7  ;;  %18488 = vmatpush3.bf16.msra.mxu0 %v18487_v44 }
 0x32d   : > { %16709 = vmatpush3.msra.mxu1 %v14953_v28  ;;  %18489 = vmatprep.subr.bf16.mxu0 %v20446_v16  ;;  %v18532_v28 = vpack.c.bf16 %v2116_v27, %v2115_v26  ;;  %v15002_v26 = vld [vmem:[%s26408_s29 + $0xd8] sm:$0xff] }
 0x32e   : > { %16711 = vmatmul.mubr.msk.f32.vlgmr.msra.gmra.mrb[14].mxu1 %vm1614_vm10, %v1771_v6  ;;  %18474 = vmatprep.subr.bf16.mxu1 %v20446_v16  ;;  %v2026_v6 = vld [vmem:[%s26366_s9 + $0x58] sm:$0xff] }
 0x32f   : > { %18476 = vmatpush3.bf16.msra.mxu1 %v18475_v30  ;;  %16752 = vmatprep.mubr.msk.f32.mxu1 %vm20447_vm9, %v20444_v7  ;;  %v18502_v11 = vpack.c.bf16 %v2026_v6, %v2025_v5  ;;  %v2389_v5 = vrot.slane %v21322_v62, 2  ;;  %v21337_v6 = vld [vmem:[%s20647_s27 + $0x30] sm:$0xff] }
 0x330   : > { %18477 = vmatprep.subr.bf16.mxu1 %v20446_v16  ;;  %18491 = vmatpush3.bf16.msra.mxu0 %v18490_v50  ;;  %v2391_v15 = vrot.slane %v21337_v6, 2 }
 0x331   : > { %18492 = vmatprep.subr.bf16.mxu0 %v20446_v16 }
 0x332   : > { %v2392_v27 = vsel %vm640_vm3, %v2389_v5, %v2391_v15 }
 0x333   : > { %18479 = vmatpush3.bf16.msra.mxu1 %v18478_v33 }
 0x334   : > { %18480 = vmatprep.subr.bf16.mxu1 %v20446_v16  ;;  %18494 = vmatpush3.bf16.msra.mxu0 %v18493_v56  ;;  %v14981_v56 = vld [vmem:[%s26408_s29 + $0x80] sm:$0xff] }
 0x335   : > { %18495 = vmatprep.subr.bf16.mxu0 %v20446_v16  ;;  %v18536_v22 = vpack.c.bf16 %v14983_v57, %v14981_v56  ;;  %v14979_v56 = vld [vmem:[%s26408_s29 + $0x70] sm:$0xf]  ;;  %v15018_v57 = vld [vmem:[%s26408_s29 + $0x108] sm:$0xff] }
 0x337   : > { %18482 = vmatpush3.bf16.msra.mxu1 %v18481_v36 }
 0x338   : > { %18483 = vmatprep.subr.bf16.mxu1 %v20446_v16  ;;  %18497 = vmatpush3.bf16.msra.mxu0 %v18496_v24  ;;  %v18538_v24 = vpack.c.bf16 %v14988_v59, %v14986_v58  ;;  %v15020_v58 = vld [vmem:[%s26408_s29 + $0x118] sm:$0xff] }
 0x339   : > { %18498 = vmatprep.subr.bf16.mxu0 %v20446_v16 }
 0x33b   : > { %18485 = vmatpush3.bf16.msra.mxu1 %v18484_v39 }
 0x33c   : > { %16750 = vmatprep.subr.mxu1 %v20444_v7  ;;  %18500 = vmatpush3.bf16.msra.mxu0 %v18499_v3 }
 0x33d   : > { %18501 = vmatprep.subr.bf16.mxu0 %v20446_v16 }
 0x33f   : > { %16751 = vmatpush3.msra.mxu1 %v14964_v40 }
 0x340   : > { %16753 = vmatmul.mubr.msk.f32.vlgmr.msra.gmra.mrb[16].mxu1 %vm1614_vm10, %v1931_v8  ;;  %18510 = vmatprep.subr.bf16.mxu1 %v20446_v16  ;;  %v2111_v8 = vld [vmem:[%s26367_s10 + $0x50] sm:$0xff] }
 0x341   : > { %16822 = vmatprep.mubr.msk.f32.mxu1 %vm20447_vm9, %v20444_v7  ;;  %18512 = vmatpush3.bf16.msra.mxu1 %v18511_v46  ;;  %v18526_v12 = vpack.c.bf16 %v2112_v9, %v2111_v8  ;;  %v18544_v8 = vpack.c.bf16 %v2363_v2, %v2361_v0  ;;  %v2360_v9 = vld [vmem:[%s26408_s29] sm:$0xff]  ;;  %v2696_v0 = vrot.slane %v21322_v62, 1 }
 0x342   : > { %18513 = vmatprep.subr.bf16.mxu1 %v20446_v16  ;;  %18503 = vmatpush3.bf16.msra.mxu0 %v18502_v11  ;;  %v2362_v11 = vld [vmem:[%s26408_s29 + $0x10] sm:$0xff]  ;;  %v15017_v2 = vld [vmem:[%s26408_s29 + $0x100] sm:$0xff] }
 0x343   : > { %18504 = vmatprep.subr.bf16.mxu0 %v20446_v16 }
 0x345   : > { %18515 = vmatpush3.bf16.msra.mxu1 %v18514_v52 }
 0x346   : > { %18516 = vmatprep.subr.bf16.mxu1 %v20446_v16  ;;  %18506 = vmatpush3.bf16.msra.mxu0 %v18505_v17  ;;  %v18546_v17 = vpack.c.bf16 %v2362_v11, %v2360_v9  ;;  %v2698_v9 = vrot.slane %v21337_v6, 1 }
 0x347   : > { %18507 = vmatprep.subr.bf16.mxu0 %v20446_v16 }
 0x349   : > { %18518 = vmatpush3.bf16.msra.mxu1 %v18517_v60  ;;  %v2263_v60 = vld [vmem:[%s26369_s12] sm:$0xf] }
 0x34a   : > { %18519 = vmatprep.subr.bf16.mxu1 %v20446_v16  ;;  %18509 = vmatpush3.bf16.msra.mxu0 %v18508_v25  ;;  %v15000_v25 = vld [vmem:[%s26408_s29 + $0xc8] sm:$0xff] }
 0x34b   : > { %16825 = vmatprep.subr.mxu0 %v20444_v7 }
 0x34d   : > { %18521 = vmatpush3.bf16.msra.mxu1 %v18520_v61  ;;  %v14987_v61 = vld [vmem:[%s26408_s29 + $0xb0] sm:$0xf] }
 0x34e   : > { %18522 = vmatprep.subr.bf16.mxu1 %v20446_v16  ;;  %v18541_v3 = vpack.c.bf16 %v14987_v61, %v14985_v23  ;;  %v18574_v23 = vpack.c.bf16 %v15020_v58, %v15018_v57  ;;  %v2695_v61 = vrot.slane %v21319_v29, 1 }
 0x351   : > { %18524 = vmatpush3.bf16.msra.mxu1 %v18523_v4  ;;  %v2388_v4 = vrot.slane %v21319_v29, 2 }
 0x352   : > { %18525 = vmatprep.subr.bf16.mxu1 %v20446_v16 }
 0x353   : > { %v2390_v14 = vsel %vm640_vm3, %v2388_v4, %v2389_v5  ;;  %v15022_v4 = vld [vmem:[%s26408_s29 + $0x128] sm:$0xff]  ;;  %v15024_v5 = vld [vmem:[%s26408_s29 + $0x138] sm:$0xf] }
 0x355   : > { %18527 = vmatpush3.bf16.msra.mxu1 %v18526_v12  ;;  %v2365_v12 = vld [vmem:[%s26408_s29 + $0x28] sm:$0xff] }
 0x356   : > { %18528 = vmatprep.subr.bf16.mxu1 %v20446_v16 }
 0x359   : > { %18530 = vmatpush3.bf16.msra.mxu1 %v18529_v19  ;;  %v18548_v19 = vpack.c.bf16 %v2367_v13, %v2365_v12  ;;  %v18578_v12 = vpack.c.bf16 %v15024_v5, %v15022_v4  ;;  %v15021_v13 = vld [vmem:[%s26408_s29 + $0x120] sm:$0xff] }
 0x35a   : > { %18531 = vmatprep.subr.bf16.mxu1 %v20446_v16  ;;  %v3050_v5 = vld [vmem:[%s26415_s4] sm:$0xff] }
 0x35d   : > { %18533 = vmatpush3.bf16.msra.mxu1 %v18532_v28  ;;  %v2393_v28 = vrot.slane %v21356_v18, 2 }
 0x35e   : > { %18584 = vmatprep.subr.bf16.mxu1 %v20446_v16 }
 0x3ec   : > { %v1755_v30 = vpop.f32.mrb[10].mxu0 }
 0x3ed   : > { %v16691_v31 = vpop.f32.mrb[11].mxu0 }
 0x3ee   : > { %v18554_v31 = vpack.c.bf16 %v15002_v26, %v15000_v25  ;;  %v2806_v25 = vrot.slane %v21322_v62, 4 }
 0x3ef   : > { %v1683_v32 = vpop.f32.mrb[12].mxu1 }
 0x3f0   : > { %v1756_v33 = vadd.f32 %v1755_v30, %v1683_v32  ;;  %v16670_v34 = vpop.f32.mrb[13].mxu1  ;;  %v18551_v30 = vpack.c.bf16 %v2366_v21, %v2364_v20  ;;  %v2394_v32 = vsel %vm640_vm3, %v2391_v15, %v2393_v28  ;;  %v2699_v15 = vsel %vm952_vm6, %v2696_v0, %v2698_v9 }
 0x3f1   : > { %v15001_v34 = vld [vmem:[%s26408_s29 + $0xd0] sm:$0xff]  ;;  %v2805_v21 = vrot.slane %v21319_v29, 4 }
 0x3f3   : > { %v2807_v26 = vsel %vm655_vm0, %v2805_v21, %v2806_v25 }
 0x3fe   : > { %v1915_v35 = vpop.f32.mrb[12].mxu0 }
 0x3ff   : > { %v16733_v36 = vpop.f32.mrb[13].mxu0 }
 0x400   : > { %v15006_v36 = vld [vmem:[%s26408_s29 + $0xf8] sm:$0xf] }
 0x401   : > { %v1840_v37 = vpop.f32.mrb[14].mxu1 }
 0x402   : > { %v1916_v38 = vadd.f32 %v1915_v35, %v1840_v37  ;;  %v16712_v39 = vpop.f32.mrb[15].mxu1  ;;  %v15004_v35 = vld [vmem:[%s26408_s29 + $0xe8] sm:$0xff] }
 0x403   : > { %v15003_v39 = vld [vmem:[%s26408_s29 + $0xe0] sm:$0xff] }
 0x413   : > { %v2000_v40 = vpop.f32.mrb[16].mxu1 }
 0x414   : > { %v2004_v41 = vadd.f32 %v2000_v40, %v1756_v33  ;;  %v16754_v42 = vpop.f32.mrb[17].mxu1  ;;  %v14999_v33 = vld [vmem:[%s26408_s29 + $0xc0] sm:$0xff]  ;;  %v15005_v40 = vld [vmem:[%s26408_s29 + $0xf0] sm:$0xf] }
 0x415   : > { %v18556_v37 = vpack.c.bf16 %v15001_v34, %v14999_v33  ;;  %v14976_v42 = vld [vmem:[%s26408_s29 + $0x58] sm:$0xff]  ;;  %v2947_v34 = vld [vmem:[%s26413_s19 + $0x20] sm:$0xff] }
 0x416   : > { %v2005_v44 = vadd.f32 %v2004_v41, %v1916_v38  ;;  %v18558_v38 = vpack.c.bf16 %v15006_v36, %v15004_v35  ;;  %v14974_v41 = vld [vmem:[%s26408_s29 + $0x48] sm:$0xff] }
 0x417   : > { %v2948_v35 = vld [vmem:[%s26413_s19 + $0x28] sm:$0xff] }
 0x418   : > { %v2013_v45 = vadd.f32 %v14966_v43, %v2005_v44  ;;  %v18561_v43 = vpack.c.bf16 %v15005_v40, %v15003_v39  ;;  %v18564_v44 = vpack.c.bf16 %v14976_v42, %v14974_v41  ;;  %v18591_v36 = vpack.c.bf16 %v2948_v35, %v2947_v34  ;;  %v2951_v40 = vld [vmem:[%s26413_s19 + $0x40] sm:$0xff]  ;;  %v2952_v41 = vld [vmem:[%s26413_s19 + $0x48] sm:$0xff]  ;;  %v3056_v34 = vld [vmem:[%s26415_s4 + $0x30] sm:$0xff] }
 0x419   : > { %v18597_v42 = vpack.c.bf16 %v2952_v41, %v2951_v40  ;;  %v3057_v35 = vld [vmem:[%s26415_s4 + $0x38] sm:$0xff]  ;;  %v3060_v40 = vld [vmem:[%s26415_s4 + $0x50] sm:$0xff] }
 0x41a   : > { %v2014_v46 = vmax.f32 %v2013_v45, 0.0  ;;  %v2593_v45 = vrot.slane %v21319_v29, 3  ;;  %v3061_v41 = vld [vmem:[%s26415_s4 + $0x58] sm:$0xff] }
 0x41c   : > { %16788 = vmatmul.mubr.f32.vlgmr.msra.gmra.mrb[14].mxu0 %v2014_v46  ;;  %16823 = vmatmul.mubr.f32.vlgmr.msra.gmra.mrb[18].mxu1 %v2014_v46  ;;  %v2594_v46 = vrot.slane %v21322_v62, 3 }
 0x41d   : > { %16827 = vmatprep.mubr.msk.f32.mxu0 %vm20447_vm9, %v20444_v7 }
 0x4ef   : > { %v2097_v49 = vpop.f32.mrb[14].mxu0  ;;  %v2183_v50 = vpop.f32.mrb[18].mxu1 }
 0x4f0   : > { %v2187_v51 = vmax.f32 %v2097_v49, %v2183_v50  ;;  %v16789_v52 = vpop.f32.mrb[15].mxu0  ;;  %v16824_v53 = vpop.f32.mrb[19].mxu1  ;;  %v14978_v49 = vld [vmem:[%s26408_s29 + $0x68] sm:$0xff]  ;;  %v14980_v50 = vld [vmem:[%s26408_s29 + $0x78] sm:$0xf] }
 0x4f1   : > { %v2596_v52 = vrot.slane %v21337_v6, 3  ;;  %v18566_v53 = vpack.c.bf16 %v14975_v48, %v14973_v47  ;;  %v2956_v47 = vld [vmem:[%s26413_s19 + $0x68] sm:$0xff] }
 0x4f2   : > { %16826 = vmatpush3.msra.mxu0 %v2187_v51 }
 0x4f3   : > { %16828 = vmatmul.mubr.msk.f32.vlgmr.msra.gmra.mrb[16].mxu0 %vm2189_vm11, %v2188_v54  ;;  %16830 = vmatprep.subr.mxu0 %v20444_v7  ;;  %v18568_v54 = vpack.c.bf16 %v14980_v50, %v14978_v49  ;;  %v2597_v59 = vsel %vm849_vm5, %v2594_v46, %v2596_v52  ;;  %v2957_v49 = vld [vmem:[%s26413_s19 + $0x70] sm:$0xff]  ;;  %v2958_v50 = vld [vmem:[%s26413_s19 + $0x78] sm:$0xff] }
 0x4f4   : > { %16831 = vmatpush3.msra.mxu0 %v2187_v51  ;;  %16832 = vmatprep.mubr.msk.f32.mxu0 %vm20447_vm9, %v20444_v7  ;;  %v2595_v51 = vsel %vm849_vm5, %v2593_v45, %v2594_v46  ;;  %v2955_v46 = vld [vmem:[%s26413_s19 + $0x60] sm:$0xff] }
 0x4f5   : > { %18535 = vmatprep.subr.bf16.mxu0 %v18534_v55  ;;  %v14977_v55 = vld [vmem:[%s26408_s29 + $0x60] sm:$0xff]  ;;  %v18603_v48 = vpack.c.bf16 %v2956_v47, %v2955_v46  ;;  %v3064_v46 = vld [vmem:[%s26415_s4 + $0x70] sm:$0xff]  ;;  %v3065_v47 = vld [vmem:[%s26415_s4 + $0x78] sm:$0xff] }
 0x4f7   : > { %16833 = vmatmul.mubr.msk.f32.vlgmr.msra.gmra.mrb[18].mxu0 %vm2189_vm11, %v2263_v60  ;;  %v2598_v60 = vrot.slane %v21356_v18, 3 }
 0x4f8   : > { %18537 = vmatpush1.bf16.msra.mxu0 %v18536_v22  ;;  %2471 = vmatprep.mubr.f32.mxu0 %v20444_v7  ;;  %v18571_v22 = vpack.c.bf16 %v14979_v56, %v14977_v55 }
 0x4f9   : > { %18540 = vmatprep.subr.msk.bf16.mxu0 %vm20619_vm2, %v18538_v24  ;;  %v2599_v24 = vsel %vm849_vm5, %v2596_v52, %v2598_v60  ;;  %v2959_v52 = vld [vmem:[%s26413_s19 + $0x80] sm:$0xff] }
 0x4fc   : > { %18543 = vmatpush1.bf16.msk.msra.mxu0 %vm20619_vm2, %v18541_v3  ;;  %v15019_v3 = vld [vmem:[%s26408_s29 + $0x110] sm:$0xff] }
 0x4fd   : > { %18545 = vmatprep.subr.bf16.mxu0 %v18544_v8  ;;  %v2697_v8 = vsel %vm952_vm6, %v2695_v61, %v2696_v0  ;;  %v18576_v11 = vpack.c.bf16 %v15019_v3, %v15017_v2 }
 0x4ff   : > { %14991 = vmatmul.mubr.msk.f32.vlgmr.msra.gmra.mrb[20].mxu0 %vm648_vm4, %v2390_v14  ;;  %v15023_v14 = vld [vmem:[%s26408_s29 + $0x130] sm:$0xf] }
 0x500   : > { %2477 = vmatprep.mubr.f32.mxu0 %v20444_v7  ;;  %18547 = vmatpush1.bf16.msra.mxu0 %v18546_v17  ;;  %v2700_v17 = vrot.slane %v21356_v18, 1 }
 0x501   : > { %18550 = vmatprep.subr.msk.bf16.mxu0 %vm20619_vm2, %v18548_v19  ;;  %v18581_v19 = vpack.c.bf16 %v15023_v14, %v15021_v13 }
 0x502   : > { %v2701_v20 = vsel %vm952_vm6, %v2698_v9, %v2700_v17 }
 0x503   : > { %14992 = vmatmul.mubr.msk.f32.gmra.mrb[22].mxu0 %vm648_vm4, %v2392_v27  ;;  %v2808_v27 = vrot.slane %v21337_v6, 4 }
 0x504   : > { %2483 = vmatprep.mubr.f32.mxu0 %v20444_v7  ;;  %18553 = vmatpush1.bf16.msk.msra.mxu0 %vm20619_vm2, %v18551_v30  ;;  %v2810_v30 = vrot.slane %v21356_v18, 4  ;;  %v2945_v18 = vld [vmem:[%s26413_s19 + $0x10] sm:$0xff] }
 0x505   : > { %18555 = vmatprep.subr.bf16.mxu0 %v18554_v31  ;;  %v2809_v28 = vsel %vm655_vm0, %v2806_v25, %v2808_v27 }
 0x507   : > { %14993 = vmatmul.mubr.msk.f32.gmra.mrb[24].mxu0 %vm648_vm4, %v2394_v32  ;;  %v2946_v32 = vld [vmem:[%s26413_s19 + $0x18] sm:$0xff] }
 0x508   : > { %2566 = vmatprep.mubr.f32.mxu0 %v20444_v7  ;;  %v18588_v33 = vpack.c.bf16 %v2946_v32, %v2945_v18 }
 0x50b   : > { %14996 = vmatmul.mubr.msk.f32.vlgmr.msra.gmra.mrb[20].mxu0 %vm648_vm4, %v21319_v29  ;;  %v2811_v29 = vsel %vm655_vm0, %v2808_v27, %v2810_v30 }
 0x50c   : > { %2572 = vmatprep.mubr.f32.mxu0 %v20444_v7  ;;  %18557 = vmatpush1.bf16.msra.mxu0 %v18556_v37  ;;  %v2949_v37 = vld [vmem:[%s26413_s19 + $0x30] sm:$0xff] }
 0x50d   : > { %18560 = vmatprep.subr.msk.bf16.mxu0 %vm20619_vm2, %v18558_v38  ;;  %v2950_v38 = vld [vmem:[%s26413_s19 + $0x38] sm:$0xff] }
 0x50e   : > { %v18594_v39 = vpack.c.bf16 %v2950_v38, %v2949_v37  ;;  %v3058_v37 = vld [vmem:[%s26415_s4 + $0x40] sm:$0xff]  ;;  %v3059_v38 = vld [vmem:[%s26415_s4 + $0x48] sm:$0xff] }
 0x50f   : > { %14997 = vmatmul.mubr.msk.f32.gmra.mrb[22].mxu0 %vm648_vm4, %v21322_v62  ;;  %v2943_v62 = vld [vmem:[%s26413_s19] sm:$0xff] }
 0x510   : > { %2578 = vmatprep.mubr.f32.mxu0 %v20444_v7  ;;  %18563 = vmatpush1.bf16.msk.msra.mxu0 %vm20619_vm2, %v18561_v43  ;;  %v2953_v43 = vld [vmem:[%s26413_s19 + $0x50] sm:$0xff] }
 0x511   : > { %18565 = vmatprep.subr.bf16.mxu0 %v18564_v44  ;;  %v2954_v44 = vld [vmem:[%s26413_s19 + $0x58] sm:$0xff] }
 0x512   : > { %v18600_v45 = vpack.c.bf16 %v2954_v44, %v2953_v43  ;;  %v3062_v43 = vld [vmem:[%s26415_s4 + $0x60] sm:$0xff]  ;;  %v3063_v44 = vld [vmem:[%s26415_s4 + $0x68] sm:$0xff] }
 0x513   : > { %14998 = vmatmul.mubr.msk.f32.gmra.mrb[24].mxu0 %vm648_vm4, %v21337_v6  ;;  %v2944_v6 = vld [vmem:[%s26413_s19 + $0x8] sm:$0xff] }
 0x514   : > { %2676 = vmatprep.mubr.f32.mxu0 %v20444_v7  ;;  %v18585_v31 = vpack.c.bf16 %v2944_v6, %v2943_v62  ;;  %v3054_v62 = vld [vmem:[%s26415_s4 + $0x20] sm:$0xff]  ;;  %v3055_v6 = vld [vmem:[%s26415_s4 + $0x28] sm:$0xff] }
 0x515   : > { %v18618_v32 = vpack.c.bf16 %v3055_v6, %v3054_v62  ;;  %v3324_v62 = vld [vmem:[%s26364_s7 + $0x28] sm:$0xff] }
 0x516   : > { %18586 = vmatpush1.bf16.msra.mxu1 %v18585_v31 }
 0x517   : > { %15009 = vmatmul.mubr.msk.f32.vlgmr.msra.gmra.mrb[20].mxu0 %vm648_vm4, %v2595_v51  ;;  %18587 = vmatprep.subr.bf16.mxu1 %v20446_v16  ;;  %v18606_v51 = vpack.c.bf16 %v2958_v50, %v2957_v49  ;;  %v3066_v49 = vld [vmem:[%s26415_s4 + $0x80] sm:$0xff]  ;;  %v3067_v50 = vld [vmem:[%s26415_s4 + $0x88] sm:$0xff] }
 0x518   : > { %2682 = vmatprep.mubr.f32.mxu0 %v20444_v7  ;;  %18567 = vmatpush1.bf16.msra.mxu0 %v18566_v53  ;;  %v2960_v53 = vld [vmem:[%s26413_s19 + $0x88] sm:$0xff] }
 0x519   : > { %18570 = vmatprep.subr.msk.bf16.mxu0 %vm20619_vm2, %v18568_v54  ;;  %v18609_v54 = vpack.c.bf16 %v2960_v53, %v2959_v52 }
 0x51a   : > { %18589 = vmatpush1.bf16.msra.mxu1 %v18588_v33 }
 0x51b   : > { %15010 = vmatmul.mubr.msk.f32.gmra.mrb[22].mxu0 %vm648_vm4, %v2597_v59  ;;  %18590 = vmatprep.subr.bf16.mxu1 %v20446_v16 }
 0x51c   : > { %2688 = vmatprep.mubr.f32.mxu0 %v20444_v7  ;;  %18573 = vmatpush1.bf16.msk.msra.mxu0 %vm20619_vm2, %v18571_v22 }
 0x51d   : > { %18575 = vmatprep.subr.bf16.mxu0 %v18574_v23 }
 0x51e   : > { %18592 = vmatpush1.bf16.msra.mxu1 %v18591_v36  ;;  %v18621_v36 = vpack.c.bf16 %v3057_v35, %v3056_v34  ;;  %v3326_v34 = vld [vmem:[%s26364_s7 + $0x38] sm:$0xff] }
 0x51f   : > { %15011 = vmatmul.mubr.msk.f32.gmra.mrb[24].mxu0 %vm648_vm4, %v2599_v24  ;;  %18593 = vmatprep.subr.bf16.mxu1 %v20446_v16  ;;  %v2919_v24 = vld [vmem:[%s26414_s25] sm:$0x3] }
 0x520   : > { %2778 = vmatprep.mubr.f32.mxu0 %v20444_v7  ;;  %v2924_v61 = vrot.slane %v2919_v24, %v20886_v63  ;;  %v2928_v0 = vrot.slane %v2919_v24, %v20891_v1 }
 0x522   : > { %18595 = vmatpush1.bf16.msra.mxu1 %v18594_v39  ;;  %v18624_v39 = vpack.c.bf16 %v3059_v38, %v3058_v37  ;;  %v15056_v37 = vld [vmem:[%s26364_s7 + $0xc8] sm:$0xff] }
 0x523   : > { %15014 = vmatmul.mubr.msk.f32.vlgmr.msra.gmra.mrb[20].mxu0 %vm648_vm4, %v2697_v8  ;;  %18596 = vmatprep.subr.bf16.mxu1 %v20446_v16  ;;  %v3051_v8 = vld [vmem:[%s26415_s4 + $0x8] sm:$0xff] }
 0x524   : > { %2784 = vmatprep.mubr.f32.mxu0 %v20444_v7  ;;  %18577 = vmatpush1.bf16.msra.mxu0 %v18576_v11  ;;  %v18612_v13 = vpack.c.bf16 %v3051_v8, %v3050_v5 }
 0x525   : > { %18580 = vmatprep.subr.msk.bf16.mxu0 %vm20619_vm2, %v18578_v12 }
 0x526   : > { %18598 = vmatpush1.bf16.msra.mxu1 %v18597_v42  ;;  %v18627_v42 = vpack.c.bf16 %v3061_v41, %v3060_v40  ;;  %v15057_v40 = vld [vmem:[%s26364_s7 + $0xd0] sm:$0xff] }
 0x527   : > { %15015 = vmatmul.mubr.msk.f32.gmra.mrb[22].mxu0 %vm648_vm4, %v2699_v15  ;;  %18599 = vmatprep.subr.bf16.mxu1 %v20446_v16 }
 0x528   : > { %2790 = vmatprep.mubr.f32.mxu0 %v20444_v7  ;;  %18583 = vmatpush1.bf16.msk.msra.mxu0 %vm20619_vm2, %v18581_v19  ;;  %v3052_v19 = vld [vmem:[%s26415_s4 + $0x10] sm:$0xff] }
 0x52a   : > { %18601 = vmatpush1.bf16.msra.mxu1 %v18600_v45  ;;  %v18630_v45 = vpack.c.bf16 %v3063_v44, %v3062_v43  ;;  %v15040_v43 = vld [vmem:[%s26364_s7 + $0x48] sm:$0xff]  ;;  %v15041_v44 = vld [vmem:[%s26364_s7 + $0x50] sm:$0xff] }
 0x52b   : > { %15016 = vmatmul.mubr.msk.f32.gmra.mrb[24].mxu0 %vm648_vm4, %v2701_v20  ;;  %18602 = vmatprep.subr.bf16.mxu1 %v20446_v16  ;;  %v3053_v20 = vld [vmem:[%s26415_s4 + $0x18] sm:$0xff] }
 0x52c   : > { %2888 = vmatprep.mubr.f32.mxu0 %v20444_v7  ;;  %v18615_v27 = vpack.c.bf16 %v3053_v20, %v3052_v19  ;;  %v3234_v19 = vld [vmem:[%s26363_s6] sm:$0xff]  ;;  %v15049_v20 = vld [vmem:[%s26364_s7 + $0x90] sm:$0xff] }
 0x52e   : > { %18604 = vmatpush1.bf16.msra.mxu1 %v18603_v48  ;;  %v18633_v48 = vpack.c.bf16 %v3065_v47, %v3064_v46  ;;  %v15061_v46 = vld [vmem:[%s26364_s7 + $0xe0] sm:$0xff] }
 0x52f   : > { %15027 = vmatmul.mubr.msk.f32.vlgmr.msra.gmra.mrb[20].mxu0 %vm648_vm4, %v2807_v26  ;;  %18605 = vmatprep.subr.bf16.mxu1 %v20446_v16 }
 0x530   : > { %2894 = vmatprep.mubr.f32.mxu0 %v20444_v7 }
 0x532   : > { %18607 = vmatpush1.bf16.msra.mxu1 %v18606_v51  ;;  %v18636_v51 = vpack.c.bf16 %v3067_v50, %v3066_v49  ;;  %v18683_v50 = vpack.c.bf16 %v15041_v44, %v15040_v43  ;;  %v3836_v43 = vld [vmem:[%s26367_s10 + $0x8] sm:$0xff] }
 0x533   : > { %15028 = vmatmul.mubr.msk.f32.gmra.mrb[22].mxu0 %vm648_vm4, %v2809_v28  ;;  %18608 = vmatprep.subr.bf16.mxu1 %v20446_v16 }
 0x534   : > { %2900 = vmatprep.mubr.f32.mxu0 %v20444_v7 }
 0x536   : > { %18610 = vmatpush1.bf16.msra.mxu1 %v18609_v54  ;;  %v3151_v54 = vld [vmem:[%s26416_s5] sm:$0xff] }
 0x537   : > { %15029 = vmatmul.mubr.msk.f32.gmra.mrb[24].mxu0 %vm648_vm4, %v2811_v29  ;;  %18611 = vmatprep.subr.bf16.mxu1 %v20446_v16 }
 0x538   : > { %16841 = vmatprep.mubr.msk.f32.mxu0 %vm1413_vm8, %v3151_v54  ;;  %v15043_v54 = vld [vmem:[%s26364_s7 + $0x60] sm:$0xff] }
 0x5c6   : > { %v2259_v55 = vpop.f32.mrb[16].mxu0 }
 0x5c7   : > { %v16829_v56 = vpop.f32.mrb[17].mxu0 }
 0x5c8   : > { %v3320_v56 = vld [vmem:[%s26364_s7 + $0x8] sm:$0xff] }
 0x5ca   : > { %v2333_v57 = vpop.f32.mrb[18].mxu0 }
 0x5cb   : > { %v2337_v58 = vmax.f32 %v2259_v55, %v2333_v57  ;;  %v16834_v59 = vpop.f32.mrb[19].mxu0  ;;  %v3319_v55 = vld [vmem:[%s26364_s7] sm:$0xff] }
 0x5cc   : > { %v18659_v57 = vpack.c.bf16 %v3320_v56, %v3319_v55  ;;  %v3322_v59 = vld [vmem:[%s26364_s7 + $0x18] sm:$0xff] }
 0x5cd   : > { %v2350_v60 = vrot.slane %v2337_v58, 3  ;;  %v2347_v22 = vrot.slane %v2337_v58, 2  ;;  %2339 = vst.msk [vmem:[#allocation2] sm:$0x1] %vm2338_vm12, %v2337_v58  ;;  %v2341_v23 = vrot.slane %v2337_v58, 1  ;;  %v3321_v58 = vld [vmem:[%s26364_s7 + $0x10] sm:$0xff] }
 0x5cf   : > { %2351 = vrot.lane.b32.xlu0 %v2350_v60, %s26387_s26  ;;  %2349 = vst.msk [vmem:[#allocation2 + $0x8] sm:$0x1] %vm2338_vm12, %v2347_v22  ;;  %v18662_v60 = vpack.c.bf16 %v3322_v59, %v3321_v58 }
 0x5d3   : > { %2342 = vrot.lane.b32.xlu0 %v2341_v23, %s26387_s26  ;;  %s15781_s26 = sshll.u32 %s20571_s1, 7  ;;  %s20449_s1 = smov [#allocation3]  }
 0x5d4   : > { %s20384_s0 = sshll.u32 %s20449_s1, 4  ;;  %s20385_s0 = int_to_ptr.vmem [resolvable:$false] %s20384_s0 }
 0x5d5   : > { %s20386_s24 = scalar_lea.vmem %s20385_s0, 256  ;;  %p20387_p0 = scmp.lt.s32.totalorder %s26317_s18, %s20385_s0 }
 0x5d6   : > { %p20388_p1 = scmp.lt.s32.totalorder %s20386_s24, %s20380_s23 }
 0x5d8   : > { %p20389_p2 = por %p20388_p1, %p20387_p0 }
 0x5da   : > { %p20390_p3 = pnand %p20389_p2, %p20383_p13 }
 0x602   : > { %v2890_v2 = vpop.f32.mrb[20].mxu0 }
 0x603   : > { %v21580_v3 = vadd.f32 %v2924_v61, %v2890_v2  ;;  %v2892_v4 = vpop.f32.mrb[21].mxu0 }
 0x604   : > { %v2932_v9 = vadd.f32 %v2928_v0, %v2892_v4 }
 0x605   : > { %v2937_v14 = vmax.f32 %v21580_v3, 0.0 }
 0x606   : > { %v2938_v11 = vmax.f32 %v2932_v9, 0.0  ;;  %v2896_v12 = vpop.f32.mrb[22].mxu0 }
 0x607   : > { %v2933_v15 = vadd.f32 %v2924_v61, %v2896_v12  ;;  %v2898_v17 = vpop.f32.mrb[23].mxu0 }
 0x608   : > { %v2934_v21 = vadd.f32 %v2928_v0, %v2898_v17  ;;  %15030 = vmatprep.mubr.msk.f32.mxu1 %vm1220_vm7, %v2938_v11  ;;  %v3152_v17 = vld [vmem:[%s26416_s5 + $0x8] sm:$0xf] }
 0x609   : > { %3035 = vmatmul.mubr.f32.vlgmr.msra.gmra.mrb[20].mxu1 %v2937_v14  ;;  %v2939_v28 = vmax.f32 %v2933_v15, 0.0 }
 0x60a   : > { %v2940_v25 = vmax.f32 %v2934_v21, 0.0  ;;  %18613 = vmatpush1.bf16.msra.mxu1 %v18612_v13  ;;  %v2902_v26 = vpop.f32.mrb[24].mxu0  ;;  %v15050_v21 = vld [vmem:[%s26364_s7 + $0x98] sm:$0xff] }
 0x60b   : > { %v2935_v30 = vadd.f32 %v2924_v61, %v2902_v26  ;;  %v2904_v29 = vpop.f32.mrb[25].mxu0  ;;  %18614 = vmatprep.subr.bf16.mxu1 %v20446_v16  ;;  %v18647_v26 = vpack.c.bf16 %v15050_v21, %v15049_v20  ;;  %v15066_v21 = vld [vmem:[%s26364_s7 + $0x108] sm:$0xff] }
 0x60c   : > { %v2936_v18 = vadd.f32 %v2928_v0, %v2904_v29  ;;  %15031 = vmatprep.mubr.msk.f32.mxu1 %vm1220_vm7, %v2940_v25  ;;  %v3323_v29 = vld [vmem:[%s26364_s7 + $0x20] sm:$0xff] }
 0x60d   : > { %3040 = vmatmul.mubr.f32.gmra.mrb[22].mxu1 %v2939_v28  ;;  %v2941_v33 = vmax.f32 %v2935_v30, 0.0  ;;  %v18665_v6 = vpack.c.bf16 %v3324_v62, %v3323_v29  ;;  %v15068_v29 = vld [vmem:[%s26364_s7 + $0x118] sm:$0xff] }
 0x60e   : > { %v2942_v31 = vmax.f32 %v2936_v18, 0.0  ;;  %18616 = vmatpush1.bf16.msra.mxu1 %v18615_v27  ;;  %v15051_v27 = vld [vmem:[%s26364_s7 + $0xa0] sm:$0xff]  ;;  %v15053_v18 = vld [vmem:[%s26364_s7 + $0xb0] sm:$0xff] }
 0x60f   : > { %18617 = vmatprep.subr.bf16.mxu1 %v20446_v16 }
 0x610   : > { %15032 = vmatprep.mubr.msk.f32.mxu1 %vm1220_vm7, %v2942_v31 }
 0x611   : > { %3045 = vmatmul.mubr.f32.gmra.mrb[24].mxu1 %v2941_v33 }
 0x612   : > { %18619 = vmatpush1.bf16.msra.mxu1 %v18618_v32  ;;  %15033 = vmatprep.mubr.msk.f32.mxu1 %vm1220_vm7, %v2938_v11 }
 0x613   : > { %18620 = vmatprep.subr.bf16.mxu1 %v20446_v16 }
 0x616   : > { %18622 = vmatpush1.bf16.msra.mxu1 %v18621_v36  ;;  %v15055_v36 = vld [vmem:[%s26364_s7 + $0xc0] sm:$0xff] }
 0x617   : > { %18623 = vmatprep.subr.bf16.mxu1 %v20446_v16  ;;  %v18656_v38 = vpack.c.bf16 %v15056_v37, %v15055_v36  ;;  %v15078_v36 = vld [vmem:[%s26364_s7 + $0x158] sm:$0xff] }
 0x61a   : > { %18625 = vmatpush1.bf16.msra.mxu1 %v18624_v39  ;;  %v3327_v39 = vld [vmem:[%s26364_s7 + $0x40] sm:$0xff] }
 0x61b   : > { %18626 = vmatprep.subr.bf16.mxu1 %v20446_v16 }
 0x61e   : > { %18628 = vmatpush1.bf16.msra.mxu1 %v18627_v42 }
 0x61f   : > { %18629 = vmatprep.subr.bf16.mxu1 %v20446_v16 }
 0x622   : > { %18631 = vmatpush1.bf16.msra.mxu1 %v18630_v45  ;;  %v15060_v45 = vld [vmem:[%s26364_s7 + $0xd8] sm:$0xff] }
 0x623   : > { %18632 = vmatprep.subr.bf16.mxu1 %v20446_v16 }
 0x626   : > { %18634 = vmatpush1.bf16.msra.mxu1 %v18633_v48 }
 0x627   : > { %18635 = vmatprep.subr.bf16.mxu1 %v20446_v16 }
 0x62a   : > { %18637 = vmatpush1.bf16.msra.mxu1 %v18636_v51 }
 0x62b   : > { %18658 = vmatprep.subr.bf16.mxu1 %v20446_v16 }
 0x62d   : > { %3133 = vmatmul.mubr.f32.vlgmr.msra.gmra.mrb[26].mxu1 %v2937_v14 }
 0x62e   : > { %15034 = vmatprep.mubr.msk.f32.mxu1 %vm1220_vm7, %v2940_v25  ;;  %18660 = vmatpush3.bf16.msra.mxu1 %v18659_v57  ;;  %v3235_v25 = vld [vmem:[%s26363_s6 + $0x8] sm:$0xf] }
 0x62f   : > { %18661 = vmatprep.subr.bf16.mxu1 %v20446_v16 }
 0x631   : > { %3138 = vmatmul.mubr.f32.gmra.mrb[28].mxu1 %v2939_v28  ;;  %v15052_v28 = vld [vmem:[%s26364_s7 + $0xa8] sm:$0xff] }
 0x632   : > { %15035 = vmatprep.mubr.msk.f32.mxu1 %vm1220_vm7, %v2942_v31  ;;  %18663 = vmatpush3.bf16.msra.mxu1 %v18662_v60  ;;  %v18650_v30 = vpack.c.bf16 %v15052_v28, %v15051_v27  ;;  %v15054_v31 = vld [vmem:[%s26364_s7 + $0xb8] sm:$0xff]  ;;  %v15048_v27 = vld [vmem:[%s26364_s7 + $0x88] sm:$0xff]  ;;  %v15071_v28 = vld [vmem:[%s26364_s7 + $0x120] sm:$0xff] }
 0x633   : > { %18664 = vmatprep.subr.bf16.mxu1 %v20446_v16  ;;  %v18653_v32 = vpack.c.bf16 %v15054_v31, %v15053_v18  ;;  %v15074_v18 = vld [vmem:[%s26364_s7 + $0x138] sm:$0xff] }
 0x635   : > { %3143 = vmatmul.mubr.f32.gmra.mrb[30].mxu1 %v2941_v33  ;;  %v3325_v33 = vld [vmem:[%s26364_s7 + $0x30] sm:$0xff] }
 0x636   : > { %16892 = vmatprep.mubr.msk.f32.mxu1 %vm20447_vm9, %v20444_v7  ;;  %18666 = vmatpush3.bf16.msra.mxu1 %v18665_v6  ;;  %v18668_v35 = vpack.c.bf16 %v3326_v34, %v3325_v33  ;;  %v15073_v6 = vld [vmem:[%s26364_s7 + $0x130] sm:$0xff]  ;;  %v15076_v33 = vld [vmem:[%s26364_s7 + $0x148] sm:$0xff] }
 0x637   : > { %18667 = vmatprep.subr.bf16.mxu1 %v20446_v16  ;;  %v18698_v31 = vpack.c.bf16 %v15074_v18, %v15073_v6 }
 0x63a   : > { %18669 = vmatpush3.bf16.msra.mxu1 %v18668_v35  ;;  %v15077_v35 = vld [vmem:[%s26364_s7 + $0x150] sm:$0xff] }
 0x63b   : > { %16890 = vmatprep.subr.mxu1 %v20444_v7  ;;  %v18704_v37 = vpack.c.bf16 %v15078_v36, %v15077_v35 }
 0x63e   : > { %16891 = vmatpush3.msra.mxu1 %v3327_v39  ;;  %v3749_v39 = vld [vmem:[%s26366_s9] sm:$0xff] }
 0x63f   : > { %18682 = vmatprep.subr.bf16.mxu1 %v20446_v16 }
 0x641   : > { %v2352_v52 = vpop.permute.xlu0 %2351 }
 0x642   : > { %2354 = vst.msk [vmem:[#allocation2 + $0x8] sm:$0x1] %vm2345_vm13, %v2352_v52  ;;  %v18671_v52 = vpack.c.bf16 %v15061_v46, %v15060_v45  ;;  %v3751_v45 = vld [vmem:[%s26366_s9 + $0x10] sm:$0xff]  ;;  %v3752_v46 = vld [vmem:[%s26366_s9 + $0x18] sm:$0xff] }
 0x645   : > { %v2343_v53 = vpop.permute.xlu0 %2342 }
 0x646   : > { %2346 = vst.msk [vmem:[#allocation2] sm:$0x1] %vm2345_vm13, %v2343_v53  ;;  %v15042_v53 = vld [vmem:[%s26364_s7 + $0x58] sm:$0xff] }
 0x6dc   : > { %v3036_v22 = vpop.f32.mrb[20].mxu1 }
 0x6dd   : > { %v3038_v23 = vpop.f32.mrb[21].mxu1 }
 0x6e0   : > { %v3041_v24 = vpop.f32.mrb[22].mxu1 }
 0x6e1   : > { %v3043_v61 = vpop.f32.mrb[23].mxu1 }
 0x6e2   : > { %v15062_v61 = vld [vmem:[%s26364_s7 + $0xe8] sm:$0xff] }
 0x6e4   : > { %v3046_v0 = vpop.f32.mrb[24].mxu1 }
 0x6e5   : > { %v3048_v2 = vpop.f32.mrb[25].mxu1 }
 0x700   : > { %v3134_v3 = vpop.f32.mrb[26].mxu1 }
 0x701   : > { %v3148_v4 = vmax.f32 %v3036_v22, %v3134_v3  ;;  %v3136_v5 = vpop.f32.mrb[27].mxu1  ;;  %v15044_v3 = vld [vmem:[%s26364_s7 + $0x68] sm:$0xff] }
 0x704   : > { %v3139_v8 = vpop.f32.mrb[28].mxu1 }
 0x705   : > { %v3149_v9 = vmax.f32 %v3041_v24, %v3139_v8  ;;  %v3141_v11 = vpop.f32.mrb[29].mxu1  ;;  %v18686_v24 = vpack.c.bf16 %v15043_v54, %v15042_v53  ;;  %v3839_v53 = vld [vmem:[%s26367_s10 + $0x20] sm:$0xff] }
 0x707   : > { %v18638_v12 = vpack.c.bf16 %v3149_v9, %v3148_v4  ;;  %v15045_v4 = vld [vmem:[%s26364_s7 + $0x70] sm:$0xff] }
 0x708   : > { %v3144_v13 = vpop.f32.mrb[30].mxu1 }
 0x709   : > { %v3150_v14 = vmax.f32 %v3046_v0, %v3144_v13  ;;  %v3146_v15 = vpop.f32.mrb[31].mxu1  ;;  %18639 = vmatprep.subr.bf16.mxu0 %v18638_v12  ;;  %v15063_v0 = vld [vmem:[%s26364_s7 + $0xf0] sm:$0xff]  ;;  %v15064_v13 = vld [vmem:[%s26364_s7 + $0xf8] sm:$0xff] }
 0x70a   : > { %18641 = vmatpush3.bf16.msra.mxu0 %v18638_v12  ;;  %v18674_v11 = vpack.c.bf16 %v15063_v0, %v15062_v61  ;;  %v15046_v15 = vld [vmem:[%s26364_s7 + $0x78] sm:$0xff]  ;;  %v3758_v61 = vld [vmem:[%s26366_s9 + $0x48] sm:$0xff]  ;;  %v3843_v0 = vld [vmem:[%s26367_s10 + $0x40] sm:$0xff] }
 0x70b   : > { %16839 = vmatprep.subr.mxu0 %v3150_v14 }
 0x70e   : > { %16840 = vmatpush3.msra.mxu0 %v3150_v14 }
 0x70f   : > { %16842 = vmatmul.mubr.msk.f32.vlgmr.msra.gmra.mrb[26].mxu0 %vm1413_vm8, %v3152_v17  ;;  %18643 = vmatprep.subr.bf16.mxu0 %v18638_v12  ;;  %v15047_v17 = vld [vmem:[%s26364_s7 + $0x80] sm:$0xff] }
 0x710   : > { %18645 = vmatpush3.bf16.msra.mxu0 %v18638_v12  ;;  %16850 = vmatprep.mubr.msk.f32.mxu0 %vm1413_vm8, %v3234_v19  ;;  %v18689_v12 = vpack.c.bf16 %v15045_v4, %v15044_v3  ;;  %v18692_v20 = vpack.c.bf16 %v15047_v17, %v15046_v15  ;;  %v3762_v15 = vld [vmem:[%s26366_s9 + $0x68] sm:$0xff]  ;;  %v3847_v17 = vld [vmem:[%s26367_s10 + $0x60] sm:$0xff] }
 0x711   : > { %16848 = vmatprep.subr.mxu0 %v3150_v14 }
 0x714   : > { %16849 = vmatpush3.msra.mxu0 %v3150_v14  ;;  %v15065_v14 = vld [vmem:[%s26364_s7 + $0x100] sm:$0xff] }
 0x715   : > { %16851 = vmatmul.mubr.msk.f32.vlgmr.msra.gmra.mrb[28].mxu0 %vm1413_vm8, %v3235_v25  ;;  %18646 = vmatprep.subr.bf16.mxu0 %v20446_v16  ;;  %v18677_v19 = vpack.c.bf16 %v15065_v14, %v15064_v13  ;;  %v15067_v25 = vld [vmem:[%s26364_s7 + $0x110] sm:$0xff]  ;;  %v3761_v14 = vld [vmem:[%s26366_s9 + $0x60] sm:$0xff] }
 0x716   : > { %18648 = vmatpush3.bf16.msra.mxu0 %v18647_v26  ;;  %16871 = vmatprep.mubr.msk.f32.mxu0 %vm20447_vm9, %v20444_v7  ;;  %v18680_v26 = vpack.c.bf16 %v15067_v25, %v15066_v21  ;;  %v3763_v25 = vld [vmem:[%s26366_s9 + $0x70] sm:$0xff] }
 0x717   : > { %18649 = vmatprep.subr.bf16.mxu0 %v20446_v16 }
 0x71a   : > { %18651 = vmatpush3.bf16.msra.mxu0 %v18650_v30  ;;  %v15072_v30 = vld [vmem:[%s26364_s7 + $0x128] sm:$0xff] }
 0x71b   : > { %18652 = vmatprep.subr.bf16.mxu0 %v20446_v16  ;;  %v18695_v62 = vpack.c.bf16 %v15072_v30, %v15071_v28  ;;  %v3849_v28 = vld [vmem:[%s26367_s10 + $0x70] sm:$0xff]  ;;  %v3850_v30 = vld [vmem:[%s26367_s10 + $0x78] sm:$0xff] }
 0x71e   : > { %18654 = vmatpush3.bf16.msra.mxu0 %v18653_v32  ;;  %v15075_v32 = vld [vmem:[%s26364_s7 + $0x140] sm:$0xff] }
 0x71f   : > { %18655 = vmatprep.subr.bf16.mxu0 %v20446_v16  ;;  %v18701_v34 = vpack.c.bf16 %v15076_v33, %v15075_v32 }
 0x722   : > { %18657 = vmatpush3.bf16.msra.mxu0 %v18656_v38  ;;  %v15079_v38 = vld [vmem:[%s26364_s7 + $0x160] sm:$0xff] }
 0x723   : > { %16869 = vmatprep.subr.mxu0 %v20444_v7 }
 0x726   : > { %16870 = vmatpush3.msra.mxu0 %v15057_v40  ;;  %v3750_v40 = vld [vmem:[%s26366_s9 + $0x8] sm:$0xff] }
 0x727   : > { %18670 = vmatprep.subr.bf16.mxu0 %v20446_v16 }
 0x7e2   : > { %v16843_v41 = vpop.f32.mrb[26].mxu0 }
 0x7e3   : > { %v3225_v42 = vpop.f32.mrb[27].mxu0 }
 0x7e8   : > { %v16852_v47 = vpop.f32.mrb[28].mxu0 }
 0x7e9   : > { %v3318_v48 = vmax.f32 %v16843_v41, %v16852_v47  ;;  %v3308_v49 = vpop.f32.mrb[29].mxu0  ;;  %v3835_v41 = vld [vmem:[%s26367_s10] sm:$0xff]  ;;  %v3837_v47 = vld [vmem:[%s26367_s10 + $0x10] sm:$0xff] }
 0x7ea   : > { %v3317_v51 = vmax.f32 %v3225_v42, %v3308_v49  ;;  %v18707_v42 = vpack.c.bf16 %v3750_v40, %v3749_v39  ;;  %v18731_v44 = vpack.c.bf16 %v3836_v43, %v3835_v41  ;;  %v3838_v49 = vld [vmem:[%s26367_s10 + $0x18] sm:$0xff]  ;;  %v15081_v41 = vld [vmem:[%s26365_s8] ss:$0 sm:$0xff] }
 0x7eb   : > { %v3349_v55 = vrot.slane %v3318_v48, 2  ;;  %v3505_v56 = vrot.slane %v3318_v48, 3  ;;  %v3580_v57 = vrot.slane %v3318_v48, 1  ;;  %v3664_v58 = vrot.slane %v3318_v48, 4 }
 0x7ec   : > { %16893 = vmatmul.mubr.msk.f32.vlgmr.msra.gmra.mrb[32].mxu1 %vm1614_vm10, %v3317_v51  ;;  %v3348_v59 = vrot.slane %v3317_v51, 2  ;;  %v3579_v60 = vrot.slane %v3317_v51, 1  ;;  %v3504_v22 = vrot.slane %v3317_v51, 3  ;;  %v3663_v23 = vrot.slane %v3317_v51, 4  ;;  %v3753_v51 = vld [vmem:[%s26366_s9 + $0x20] sm:$0xff] }
 0x7ed   : > { %18684 = vmatpush3.bf16.msra.mxu1 %v18683_v50  ;;  %16934 = vmatprep.mubr.msk.f32.mxu1 %vm20447_vm9, %v20444_v7  ;;  %v18710_v48 = vpack.c.bf16 %v3752_v46, %v3751_v45  ;;  %v18734_v50 = vpack.c.bf16 %v3838_v49, %v3837_v47  ;;  %v15097_v45 = vld [vmem:[%s26408_s29 + $0x88] sm:$0xff]  ;;  %v15099_v46 = vld [vmem:[%s26408_s29 + $0x98] sm:$0xff]  ;;  %v15098_v49 = vld [vmem:[%s26408_s29 + $0x90] sm:$0xff] }
 0x7ee   : > { %v3350_v2 = vsel %vm640_vm3, %v3348_v59, %v3349_v55  ;;  %18685 = vmatprep.subr.bf16.mxu1 %v20446_v16  ;;  %v3581_v5 = vsel %vm952_vm6, %v3579_v60, %v3580_v57  ;;  %v3506_v8 = vsel %vm849_vm5, %v3504_v22, %v3505_v56  ;;  %v3665_v9 = vsel %vm655_vm0, %v3663_v23, %v3664_v58  ;;  %v3840_v55 = vld [vmem:[%s26367_s10 + $0x28] sm:$0xff]  ;;  %v3755_v56 = vld [vmem:[%s26366_s9 + $0x30] sm:$0xff]  ;;  %v3756_v57 = vld [vmem:[%s26366_s9 + $0x38] sm:$0xff] }
 0x7ef   : > { %16872 = vmatmul.mubr.msk.f32.vlgmr.msra.gmra.mrb[30].mxu0 %vm1614_vm10, %v3350_v2  ;;  %v18737_v58 = vpack.c.bf16 %v3840_v55, %v3839_v53  ;;  %v3841_v59 = vld [vmem:[%s26367_s10 + $0x30] sm:$0xff]  ;;  %v3842_v60 = vld [vmem:[%s26367_s10 + $0x38] sm:$0xff]  ;;  %v18716_v22 = vpack.c.bf16 %v3756_v57, %v3755_v56  ;;  %v3844_v2 = vld [vmem:[%s26367_s10 + $0x48] sm:$0xff]  ;;  %v21977_v47 = vpack.c.bf16 %v15099_v46, %v15097_v45 }
 0x7f0   : > { %18672 = vmatpush3.bf16.msra.mxu0 %v18671_v52  ;;  %16913 = vmatprep.mubr.msk.f32.mxu0 %vm20447_vm9, %v20444_v7  ;;  %v3754_v52 = vld [vmem:[%s26366_s9 + $0x28] sm:$0xff]  ;;  %v18740_v23 = vpack.c.bf16 %v3842_v60, %v3841_v59  ;;  %v18743_v4 = vpack.c.bf16 %v3844_v2, %v3843_v0  ;;  %v15102_v55 = vld [vmem:[%s26408_s29 + $0xb0] sm:$0xf]  ;;  %v22002_v57 = vld [vmem:[%s20647_s27 + $0x40] sm:$0xff] }
 0x7f1   : > { %18687 = vmatpush3.bf16.msra.mxu1 %v18686_v24  ;;  %18673 = vmatprep.subr.bf16.mxu0 %v20446_v16  ;;  %v18713_v54 = vpack.c.bf16 %v3754_v52, %v3753_v51  ;;  %v3757_v24 = vld [vmem:[%s26366_s9 + $0x40] sm:$0xff]  ;;  %v15101_v51 = vld [vmem:[%s26408_s29 + $0xa8] sm:$0xff]  ;;  %v15103_v52 = vld [vmem:[%s26408_s29 + $0xb8] sm:$0xf]  ;;  %v4119_v59 = vrot.slane %v22002_v57, 2 }
 0x7f2   : > { %18688 = vmatprep.subr.bf16.mxu1 %v20446_v16  ;;  %v18719_v3 = vpack.c.bf16 %v3758_v61, %v3757_v24  ;;  %v18758_v53 = vpack.c.bf16 %v15103_v52, %v15101_v51  ;;  %v22023_v0 = vld [vmem:[%s20647_s27 + $0x58] sm:$0xf]  ;;  %v15088_v45 = vld [vmem:[%s26408_s29 + $0x40] sm:$0xff]  ;;  %v15090_v46 = vld [vmem:[%s26408_s29 + $0x50] sm:$0xff] }
 0x7f3   : > { %v4124_v2 = vrot.slane %v22023_v0, 2 }
 0x7f4   : > { %18675 = vmatpush3.bf16.msra.mxu0 %v18674_v11  ;;  %v3846_v11 = vld [vmem:[%s26367_s10 + $0x58] sm:$0xff] }
 0x7f5   : > { %18690 = vmatpush3.bf16.msra.mxu1 %v18689_v12  ;;  %18676 = vmatprep.subr.bf16.mxu0 %v20446_v16 }
 0x7f6   : > { %18691 = vmatprep.subr.bf16.mxu1 %v20446_v16 }
 0x7f8   : > { %18678 = vmatpush3.bf16.msra.mxu0 %v18677_v19  ;;  %v18725_v19 = vpack.c.bf16 %v3762_v15, %v3761_v14  ;;  %v3922_v14 = vld [vmem:[%s26368_s11] sm:$0xf] }
 0x7f9   : > { %18693 = vmatpush3.bf16.msra.mxu1 %v18692_v20  ;;  %18679 = vmatprep.subr.bf16.mxu0 %v20446_v16  ;;  %v3848_v20 = vld [vmem:[%s26367_s10 + $0x68] sm:$0xff] }
 0x7fa   : > { %16932 = vmatprep.subr.mxu1 %v20444_v7  ;;  %v18749_v21 = vpack.c.bf16 %v3848_v20, %v3847_v17  ;;  %v4091_v17 = vld [vmem:[%s26408_s29] sm:$0xff]  ;;  %v4096_v20 = vld [vmem:[%s26408_s29 + $0x28] sm:$0xff] }
 0x7fc   : > { %18681 = vmatpush3.bf16.msra.mxu0 %v18680_v26  ;;  %v3764_v26 = vld [vmem:[%s26366_s9 + $0x78] sm:$0xff] }
 0x7fd   : > { %16933 = vmatpush3.msra.mxu1 %v15048_v27  ;;  %16911 = vmatprep.subr.mxu0 %v20444_v7  ;;  %v18728_v27 = vpack.c.bf16 %v3764_v26, %v3763_v25  ;;  %v3996_v25 = vld [vmem:[%s26369_s12] sm:$0xf] }
 0x7fe   : > { %16935 = vmatmul.mubr.msk.f32.vlgmr.msra.gmra.mrb[34].mxu1 %vm1614_vm10, %v3581_v5  ;;  %18706 = vmatprep.subr.bf16.mxu1 %v20446_v16  ;;  %v3759_v5 = vld [vmem:[%s26366_s9 + $0x50] sm:$0xff] }
 0x7ff   : > { %16990 = vmatprep.mubr.msk.f32.mxu1 %vm20447_vm9, %v20444_v7  ;;  %18708 = vmatpush3.bf16.msra.mxu1 %v18707_v42 }
 0x800   : > { %16912 = vmatpush3.msra.mxu0 %v15068_v29  ;;  %18709 = vmatprep.subr.bf16.mxu1 %v20446_v16  ;;  %v18752_v29 = vpack.c.bf16 %v3850_v30, %v3849_v28  ;;  %v4095_v28 = vld [vmem:[%s26408_s29 + $0x20] sm:$0xff]  ;;  %v4097_v30 = vld [vmem:[%s26408_s29 + $0x30] sm:$0xf] }
 0x801   : > { %16914 = vmatmul.mubr.msk.f32.vlgmr.msra.gmra.mrb[32].mxu0 %vm1614_vm10, %v3506_v8  ;;  %18694 = vmatprep.subr.bf16.mxu0 %v20446_v16  ;;  %v3760_v8 = vld [vmem:[%s26366_s9 + $0x58] sm:$0xff] }
 0x802   : > { %18696 = vmatpush3.bf16.msra.mxu0 %v18695_v62  ;;  %16955 = vmatprep.mubr.msk.f32.mxu0 %vm20447_vm9, %v20444_v7  ;;  %v18722_v12 = vpack.c.bf16 %v3760_v8, %v3759_v5  ;;  %v4094_v5 = vld [vmem:[%s26408_s29 + $0x18] sm:$0xff] }
 0x803   : > { %18697 = vmatprep.subr.bf16.mxu0 %v20446_v16  ;;  %18711 = vmatpush3.bf16.msra.mxu1 %v18710_v48  ;;  %v15096_v48 = vld [vmem:[%s26408_s29 + $0x80] sm:$0xff] }
 0x804   : > { %18712 = vmatprep.subr.bf16.mxu1 %v20446_v16 }
 0x806   : > { %18699 = vmatpush3.bf16.msra.mxu0 %v18698_v31 }
 0x807   : > { %18700 = vmatprep.subr.bf16.mxu0 %v20446_v16  ;;  %18714 = vmatpush3.bf16.msra.mxu1 %v18713_v54  ;;  %v15100_v54 = vld [vmem:[%s26408_s29 + $0xa0] sm:$0xff] }
 0x808   : > { %18715 = vmatprep.subr.bf16.mxu1 %v20446_v16  ;;  %v18761_v56 = vpack.c.bf16 %v15102_v55, %v15100_v54  ;;  %v15092_v55 = vld [vmem:[%s26408_s29 + $0x60] sm:$0xff] }
 0x80a   : > { %18702 = vmatpush3.bf16.msra.mxu0 %v18701_v34 }
 0x80b   : > { %18703 = vmatprep.subr.bf16.mxu0 %v20446_v16  ;;  %18717 = vmatpush3.bf16.msra.mxu1 %v18716_v22 }
 0x80c   : > { %18718 = vmatprep.subr.bf16.mxu1 %v20446_v16 }
 0x80e   : > { %18705 = vmatpush3.bf16.msra.mxu0 %v18704_v37 }
 0x80f   : > { %16953 = vmatprep.subr.mxu0 %v20444_v7  ;;  %18720 = vmatpush3.bf16.msra.mxu1 %v18719_v3 }
 0x810   : > { %18721 = vmatprep.subr.bf16.mxu1 %v20446_v16 }
 0x812   : > { %16954 = vmatpush3.msra.mxu0 %v15079_v38 }
 0x813   : > { %16956 = vmatmul.mubr.msk.f32.vlgmr.msra.gmra.mrb[34].mxu0 %vm1614_vm10, %v3665_v9  ;;  %18730 = vmatprep.subr.bf16.mxu0 %v20446_v16  ;;  %v3845_v9 = vld [vmem:[%s26367_s10 + $0x50] sm:$0xff] }
 0x814   : > { %17025 = vmatprep.mubr.msk.f32.mxu0 %vm20447_vm9, %v20444_v7  ;;  %18732 = vmatpush3.bf16.msra.mxu0 %v18731_v44  ;;  %v18746_v13 = vpack.c.bf16 %v3846_v11, %v3845_v9 }
 0x815   : > { %18733 = vmatprep.subr.bf16.mxu0 %v20446_v16  ;;  %18723 = vmatpush3.bf16.msra.mxu1 %v18722_v12 }
 0x816   : > { %18724 = vmatprep.subr.bf16.mxu1 %v20446_v16 }
 0x818   : > { %18735 = vmatpush3.bf16.msra.mxu0 %v18734_v50  ;;  %v21985_v50 = vpack.c.bf16 %v15098_v49, %v15096_v48  ;;  %v15093_v48 = vld [vmem:[%s26408_s29 + $0x68] sm:$0xff]  ;;  %v15095_v49 = vld [vmem:[%s26408_s29 + $0x78] sm:$0xf] }
 0x819   : > { %18736 = vmatprep.subr.bf16.mxu0 %v20446_v16  ;;  %18726 = vmatpush3.bf16.msra.mxu1 %v18725_v19  ;;  %v4093_v19 = vld [vmem:[%s26408_s29 + $0x10] sm:$0xff]  ;;  %v18788_v54 = vpack.c.bf16 %v15095_v49, %v15093_v48  ;;  %v4687_v48 = vld [vmem:[%s26413_s19 + $0x68] sm:$0xff] }
 0x81a   : > { %18727 = vmatprep.subr.bf16.mxu1 %v20446_v16  ;;  %v18766_v26 = vpack.c.bf16 %v4093_v19, %v4091_v17  ;;  %v15136_v19 = vld [vmem:[%s26408_s29 + $0x120] sm:$0xff] }
 0x81c   : > { %18738 = vmatpush3.bf16.msra.mxu0 %v18737_v58  ;;  %v22005_v58 = vld [vmem:[%s20647_s27 + $0x48] sm:$0xff] }
 0x81d   : > { %18739 = vmatprep.subr.bf16.mxu0 %v20446_v16  ;;  %18729 = vmatpush3.bf16.msra.mxu1 %v18728_v27  ;;  %v4120_v60 = vrot.slane %v22005_v58, 2 }
 0x81e   : > { %17028 = vmatprep.subr.mxu1 %v20444_v7 }
 0x81f   : > { %v4121_v22 = vsel %vm640_vm3, %v4119_v59, %v4120_v60  ;;  %v15133_v59 = vld [vmem:[%s26408_s29 + $0x108] sm:$0xff] }
 0x820   : > { %18741 = vmatpush3.bf16.msra.mxu0 %v18740_v23  ;;  %v22017_v23 = vld [vmem:[%s20647_s27 + $0x50] sm:$0xff] }
 0x821   : > { %18742 = vmatprep.subr.bf16.mxu0 %v20446_v16  ;;  %v4122_v24 = vrot.slane %v22017_v23, 2  ;;  %v4327_v52 = vrot.slane %v22017_v23, 3 }
 0x823   : > { %v4123_v61 = vsel %vm640_vm3, %v4120_v60, %v4122_v24  ;;  %v4125_v3 = vsel %vm640_vm3, %v4122_v24, %v4124_v2  ;;  %v15135_v60 = vld [vmem:[%s26408_s29 + $0x118] sm:$0xff]  ;;  %v4329_v24 = vrot.slane %v22023_v0, 3 }
 0x824   : > { %18744 = vmatpush3.bf16.msra.mxu0 %v18743_v4  ;;  %v4092_v4 = vld [vmem:[%s26408_s29 + $0x8] sm:$0xff]  ;;  %v18794_v2 = vpack.c.bf16 %v15135_v60, %v15133_v59 }
 0x825   : > { %18745 = vmatprep.subr.bf16.mxu0 %v20446_v16  ;;  %v18764_v15 = vpack.c.bf16 %v4094_v5, %v4092_v4  ;;  %v4427_v4 = vrot.slane %v22005_v58, 1  ;;  %v4330_v5 = vsel %vm849_vm5, %v4327_v52, %v4329_v24  ;;  %v4691_v59 = vld [vmem:[%s26413_s19 + $0x88] sm:$0xff] }
 0x828   : > { %18747 = vmatpush3.bf16.msra.mxu0 %v18746_v13 }
 0x829   : > { %18748 = vmatprep.subr.bf16.mxu0 %v20446_v16 }
 0x82c   : > { %18750 = vmatpush3.bf16.msra.mxu0 %v18749_v21  ;;  %v4098_v21 = vld [vmem:[%s26408_s29 + $0x38] sm:$0xf] }
 0x82d   : > { %18751 = vmatprep.subr.bf16.mxu0 %v20446_v16  ;;  %v18768_v27 = vpack.c.bf16 %v4098_v21, %v4096_v20  ;;  %v15138_v20 = vld [vmem:[%s26408_s29 + $0x130] sm:$0xf] }
 0x830   : > { %18753 = vmatpush3.bf16.msra.mxu0 %v18752_v29  ;;  %v15115_v29 = vld [vmem:[%s26408_s29 + $0xc8] sm:$0xff] }
 0x831   : > { %18755 = vmatprep.subr.bf16.mxu0 %v21977_v47 }
 0x8bf   : > { %v3491_v62 = vpop.f32.mrb[32].mxu1 }
 0x8c0   : > { %v16894_v6 = vpop.f32.mrb[33].mxu1 }
 0x8c1   : > { %v18771_v6 = vpack.c.bf16 %v4097_v30, %v4095_v28  ;;  %v4537_v28 = vrot.slane %v22005_v58, 4 }
 0x8c2   : > { %v3419_v18 = vpop.f32.mrb[30].mxu0 }
 0x8c3   : > { %v3492_v31 = vadd.f32 %v3491_v62, %v3419_v18  ;;  %v16873_v32 = vpop.f32.mrb[31].mxu0  ;;  %v15117_v62 = vld [vmem:[%s26408_s29 + $0xd8] sm:$0xff] }
 0x8c4   : > { %v18774_v18 = vpack.c.bf16 %v15117_v62, %v15115_v29  ;;  %v15116_v32 = vld [vmem:[%s26408_s29 + $0xd0] sm:$0xff]  ;;  %v4539_v62 = vrot.slane %v22017_v23, 4 }
 0x8d1   : > { %v3650_v33 = vpop.f32.mrb[34].mxu1 }
 0x8d2   : > { %v16936_v34 = vpop.f32.mrb[35].mxu1 }
 0x8d3   : > { %v15121_v34 = vld [vmem:[%s26408_s29 + $0xf8] sm:$0xf] }
 0x8d4   : > { %v3575_v35 = vpop.f32.mrb[32].mxu0 }
 0x8d5   : > { %v3651_v36 = vadd.f32 %v3650_v33, %v3575_v35  ;;  %v16915_v37 = vpop.f32.mrb[33].mxu0  ;;  %v15119_v33 = vld [vmem:[%s26408_s29 + $0xe8] sm:$0xff] }
 0x8d6   : > { %v15118_v37 = vld [vmem:[%s26408_s29 + $0xe0] sm:$0xff] }
 0x8e6   : > { %v3734_v38 = vpop.f32.mrb[34].mxu0 }
 0x8e7   : > { %v3738_v39 = vadd.f32 %v3734_v38, %v3492_v31  ;;  %v16957_v40 = vpop.f32.mrb[35].mxu0  ;;  %v15114_v31 = vld [vmem:[%s26408_s29 + $0xc0] sm:$0xff]  ;;  %v15120_v38 = vld [vmem:[%s26408_s29 + $0xf0] sm:$0xf] }
 0x8e8   : > { %v18776_v35 = vpack.c.bf16 %v15116_v32, %v15114_v31  ;;  %v15091_v40 = vld [vmem:[%s26408_s29 + $0x58] sm:$0xff] }
 0x8e9   : > { %v3739_v42 = vadd.f32 %v3738_v39, %v3651_v36  ;;  %v18778_v36 = vpack.c.bf16 %v15121_v34, %v15119_v33  ;;  %v15089_v39 = vld [vmem:[%s26408_s29 + $0x48] sm:$0xff]  ;;  %v4677_v32 = vld [vmem:[%s26413_s19 + $0x18] sm:$0xff]  ;;  %v4678_v34 = vld [vmem:[%s26413_s19 + $0x20] sm:$0xff] }
 0x8eb   : > { %v3747_v43 = vadd.f32 %v15081_v41, %v3739_v42  ;;  %v18781_v41 = vpack.c.bf16 %v15120_v38, %v15118_v37  ;;  %v18784_v42 = vpack.c.bf16 %v15091_v40, %v15089_v39  ;;  %v4680_v37 = vld [vmem:[%s26413_s19 + $0x30] sm:$0xff]  ;;  %v4681_v38 = vld [vmem:[%s26413_s19 + $0x38] sm:$0xff]  ;;  %v4682_v40 = vld [vmem:[%s26413_s19 + $0x40] sm:$0xff] }
 0x8ec   : > { %v18814_v39 = vpack.c.bf16 %v4681_v38, %v4680_v37 }
 0x8ed   : > { %v3748_v44 = vmax.f32 %v3747_v43, 0.0  ;;  %v4324_v43 = vrot.slane %v22002_v57, 3 }
 0x8ef   : > { %16991 = vmatmul.mubr.f32.vlgmr.msra.gmra.mrb[36].mxu1 %v3748_v44  ;;  %17026 = vmatmul.mubr.f32.vlgmr.msra.gmra.mrb[36].mxu0 %v3748_v44  ;;  %v4325_v44 = vrot.slane %v22005_v58, 3 }
 0x8f0   : > { %17030 = vmatprep.mubr.msk.f32.mxu1 %vm20447_vm9, %v20444_v7  ;;  %4202 = vmatprep.mubr.f32.mxu0 %v20444_v7 }
 0x8f1   : > { %18757 = vmatpush1.bf16.msra.mxu0 %v21985_v50  ;;  %v4326_v51 = vsel %vm849_vm5, %v4324_v43, %v4325_v44  ;;  %v4684_v43 = vld [vmem:[%s26413_s19 + $0x50] sm:$0xff] }
 0x8f2   : > { %18760 = vmatprep.subr.msk.bf16.mxu0 %vm20619_vm2, %v18758_v53  ;;  %v18786_v53 = vpack.c.bf16 %v15090_v46, %v15088_v45  ;;  %v4686_v46 = vld [vmem:[%s26413_s19 + $0x60] sm:$0xff] }
 0x8f3   : > { %v18823_v49 = vpack.c.bf16 %v4687_v48, %v4686_v46 }
 0x8f5   : > { %18763 = vmatpush1.bf16.msk.msra.mxu0 %vm20619_vm2, %v18761_v56  ;;  %v15094_v56 = vld [vmem:[%s26408_s29 + $0x70] sm:$0xf] }
 0x8f6   : > { %18804 = vmatprep.subr.bf16.mxu0 %v20446_v16 }
 0x8f8   : > { %15106 = vmatmul.mubr.msk.f32.vlgmr.msra.gmra.mrb[38].mxu0 %vm648_vm4, %v4121_v22  ;;  %v4328_v22 = vsel %vm849_vm5, %v4325_v44, %v4327_v52  ;;  %v4685_v44 = vld [vmem:[%s26413_s19 + $0x58] sm:$0xff] }
 0x8f9   : > { %4208 = vmatprep.mubr.f32.mxu0 %v20444_v7  ;;  %v18820_v45 = vpack.c.bf16 %v4685_v44, %v4684_v43  ;;  %v4689_v52 = vld [vmem:[%s26413_s19 + $0x78] sm:$0xff]  ;;  %v4786_v43 = vld [vmem:[%s26415_s4 + $0x28] sm:$0xff] }
 0x8fc   : > { %15107 = vmatmul.mubr.msk.f32.gmra.mrb[40].mxu0 %vm648_vm4, %v4123_v61  ;;  %v18791_v61 = vpack.c.bf16 %v15094_v56, %v15092_v55  ;;  %v4690_v56 = vld [vmem:[%s26413_s19 + $0x80] sm:$0xff] }
 0x8fd   : > { %4214 = vmatprep.mubr.f32.mxu0 %v20444_v7  ;;  %v18829_v60 = vpack.c.bf16 %v4691_v59, %v4690_v56  ;;  %v4791_v56 = vld [vmem:[%s26415_s4 + $0x50] sm:$0xff]  ;;  %v4792_v59 = vld [vmem:[%s26415_s4 + $0x58] sm:$0xff] }
 0x900   : > { %15108 = vmatmul.mubr.msk.f32.gmra.mrb[42].mxu0 %vm648_vm4, %v4125_v3  ;;  %v4426_v3 = vrot.slane %v22002_v57, 1 }
 0x9c2   : > { %v3831_v8 = vpop.f32.mrb[36].mxu1  ;;  %v3917_v9 = vpop.f32.mrb[36].mxu0 }
 0x9c3   : > { %v3921_v11 = vmax.f32 %v3831_v8, %v3917_v9  ;;  %v16992_v12 = vpop.f32.mrb[37].mxu1  ;;  %v17027_v13 = vpop.f32.mrb[37].mxu0  ;;  %v15132_v8 = vld [vmem:[%s26408_s29 + $0x100] sm:$0xff]  ;;  %v15134_v9 = vld [vmem:[%s26408_s29 + $0x110] sm:$0xff] }
 0x9c4   : > { %v15139_v12 = vld [vmem:[%s26408_s29 + $0x138] sm:$0xf]  ;;  %v4428_v13 = vsel %vm952_vm6, %v4426_v3, %v4427_v4 }
 0x9c5   : > { %17029 = vmatpush3.msra.mxu1 %v3921_v11 }
 0x9c6   : > { %17031 = vmatmul.mubr.msk.f32.vlgmr.msra.gmra.mrb[38].mxu1 %vm2189_vm11, %v3922_v14  ;;  %17033 = vmatprep.subr.mxu1 %v20444_v7  ;;  %v4429_v14 = vrot.slane %v22017_v23, 1 }
 0x9c7   : > { %17034 = vmatpush3.msra.mxu1 %v3921_v11  ;;  %17035 = vmatprep.mubr.msk.f32.mxu1 %vm20447_vm9, %v20444_v7  ;;  %v15137_v11 = vld [vmem:[%s26408_s29 + $0x128] sm:$0xff] }
 0x9c8   : > { %18765 = vmatprep.subr.bf16.mxu1 %v18764_v15  ;;  %v18796_v15 = vpack.c.bf16 %v15134_v9, %v15132_v8  ;;  %v18798_v17 = vpack.c.bf16 %v15139_v12, %v15137_v11  ;;  %v4430_v21 = vsel %vm952_vm6, %v4427_v4, %v4429_v14 }
 0x9ca   : > { %17036 = vmatmul.mubr.msk.f32.vlgmr.msra.gmra.mrb[40].mxu1 %vm2189_vm11, %v3996_v25  ;;  %v4431_v25 = vrot.slane %v22023_v0, 1 }
 0x9cb   : > { %18767 = vmatpush1.bf16.msra.mxu1 %v18766_v26  ;;  %4297 = vmatprep.mubr.f32.mxu1 %v20444_v7  ;;  %v18801_v26 = vpack.c.bf16 %v15138_v20, %v15136_v19 }
 0x9cc   : > { %18770 = vmatprep.subr.msk.bf16.mxu1 %vm20619_vm2, %v18768_v27  ;;  %v4536_v27 = vrot.slane %v22002_v57, 4  ;;  %v4432_v30 = vsel %vm952_vm6, %v4429_v14, %v4431_v25  ;;  %v4650_v14 = vld [vmem:[%s26414_s25] sm:$0x3] }
 0x9cd   : > { %v4659_v19 = vrot.slane %v4650_v14, %v20891_v1 }
 0x9ce   : > { %v4538_v29 = vsel %vm655_vm0, %v4536_v27, %v4537_v28  ;;  %v4781_v27 = vld [vmem:[%s26415_s4] sm:$0xff] }
 0x9cf   : > { %18773 = vmatpush1.bf16.msk.msra.mxu1 %vm20619_vm2, %v18771_v6 }
 0x9d0   : > { %18775 = vmatprep.subr.bf16.mxu1 %v18774_v18  ;;  %v4675_v18 = vld [vmem:[%s26413_s19 + $0x8] sm:$0xff] }
 0x9d2   : > { %15111 = vmatmul.mubr.msk.f32.vlgmr.msra.gmra.mrb[42].mxu1 %vm648_vm4, %v22002_v57  ;;  %v4540_v57 = vsel %vm655_vm0, %v4537_v28, %v4539_v62  ;;  %v4782_v28 = vld [vmem:[%s26415_s4 + $0x8] sm:$0xff] }
 0x9d3   : > { %4303 = vmatprep.mubr.f32.mxu1 %v20444_v7  ;;  %18777 = vmatpush1.bf16.msra.mxu1 %v18776_v35  ;;  %v4679_v35 = vld [vmem:[%s26413_s19 + $0x28] sm:$0xff] }
 0x9d4   : > { %18780 = vmatprep.subr.msk.bf16.mxu1 %vm20619_vm2, %v18778_v36  ;;  %v18811_v36 = vpack.c.bf16 %v4679_v35, %v4678_v34 }
 0x9d6   : > { %15112 = vmatmul.mubr.msk.f32.gmra.mrb[44].mxu1 %vm648_vm4, %v22005_v58  ;;  %v4541_v58 = vrot.slane %v22023_v0, 4  ;;  %v4676_v0 = vld [vmem:[%s26413_s19 + $0x10] sm:$0xff] }
 0x9d7   : > { %4309 = vmatprep.mubr.f32.mxu1 %v20444_v7  ;;  %18783 = vmatpush1.bf16.msk.msra.mxu1 %vm20619_vm2, %v18781_v41  ;;  %v18808_v33 = vpack.c.bf16 %v4677_v32, %v4676_v0  ;;  %v4683_v41 = vld [vmem:[%s26413_s19 + $0x48] sm:$0xff]  ;;  %v4784_v32 = vld [vmem:[%s26415_s4 + $0x18] sm:$0xff] }
 0x9d8   : > { %18785 = vmatprep.subr.bf16.mxu1 %v18784_v42  ;;  %v4542_v6 = vsel %vm655_vm0, %v4539_v62, %v4541_v58  ;;  %v18817_v42 = vpack.c.bf16 %v4683_v41, %v4682_v40 }
 0x9da   : > { %15113 = vmatmul.mubr.msk.f32.gmra.mrb[46].mxu1 %vm648_vm4, %v22017_v23  ;;  %v4674_v23 = vld [vmem:[%s26413_s19] sm:$0xff] }
 0x9db   : > { %4407 = vmatprep.mubr.f32.mxu1 %v20444_v7  ;;  %v18805_v31 = vpack.c.bf16 %v4675_v18, %v4674_v23  ;;  %v18832_v23 = vpack.c.bf16 %v4782_v28, %v4781_v27 }
 0x9dd   : > { %18806 = vmatpush1.bf16.msra.mxu0 %v18805_v31  ;;  %v4783_v31 = vld [vmem:[%s26415_s4 + $0x10] sm:$0xff] }
 0x9de   : > { %15124 = vmatmul.mubr.msk.f32.vlgmr.msra.gmra.mrb[42].mxu1 %vm648_vm4, %v4326_v51  ;;  %18807 = vmatprep.subr.bf16.mxu0 %v20446_v16  ;;  %v4688_v51 = vld [vmem:[%s26413_s19 + $0x70] sm:$0xff] }
 0x9df   : > { %4413 = vmatprep.mubr.f32.mxu1 %v20444_v7  ;;  %18787 = vmatpush1.bf16.msra.mxu1 %v18786_v53  ;;  %v4204_v53 = vpop.f32.mrb[38].mxu0 }
 0x9e0   : > { %18790 = vmatprep.subr.msk.bf16.mxu1 %vm20619_vm2, %v18788_v54  ;;  %v18826_v54 = vpack.c.bf16 %v4689_v52, %v4688_v51  ;;  %v4206_v55 = vpop.f32.mrb[39].mxu0  ;;  %v4788_v51 = vld [vmem:[%s26415_s4 + $0x38] sm:$0xff] }
 0x9e1   : > { %18809 = vmatpush1.bf16.msra.mxu0 %v18808_v33 }
 0x9e2   : > { %15125 = vmatmul.mubr.msk.f32.gmra.mrb[44].mxu1 %vm648_vm4, %v4328_v22  ;;  %18810 = vmatprep.subr.bf16.mxu0 %v20446_v16  ;;  %v4210_v22 = vpop.f32.mrb[40].mxu0 }
 0x9e3   : > { %4419 = vmatprep.mubr.f32.mxu1 %v20444_v7  ;;  %18793 = vmatpush1.bf16.msk.msra.mxu1 %vm20619_vm2, %v18791_v61  ;;  %v4212_v24 = vpop.f32.mrb[41].mxu0 }
 0x9e4   : > { %18795 = vmatprep.subr.bf16.mxu1 %v18794_v2  ;;  %v4216_v61 = vpop.f32.mrb[42].mxu0 }
 0x9e5   : > { %18812 = vmatpush1.bf16.msra.mxu0 %v18811_v36  ;;  %v4218_v2 = vpop.f32.mrb[43].mxu0 }
 0x9e6   : > { %15126 = vmatmul.mubr.msk.f32.gmra.mrb[46].mxu1 %vm648_vm4, %v4330_v5  ;;  %18813 = vmatprep.subr.bf16.mxu0 %v20446_v16 }
 0x9e7   : > { %4509 = vmatprep.mubr.f32.mxu1 %v20444_v7 }
 0x9e9   : > { %18815 = vmatpush1.bf16.msra.mxu0 %v18814_v39  ;;  %v18835_v39 = vpack.c.bf16 %v4784_v32, %v4783_v31 }
 0x9ea   : > { %15129 = vmatmul.mubr.msk.f32.vlgmr.msra.gmra.mrb[42].mxu1 %vm648_vm4, %v4428_v13  ;;  %18816 = vmatprep.subr.bf16.mxu0 %v20446_v16 }
 0x9eb   : > { %4515 = vmatprep.mubr.f32.mxu1 %v20444_v7  ;;  %18797 = vmatpush1.bf16.msra.mxu1 %v18796_v15  ;;  %v4655_v15 = vrot.slane %v4650_v14, %v20886_v63  ;;  %v5050_v14 = vld [vmem:[%s26364_s7] sm:$0xff] }
 0x9ec   : > { %18800 = vmatprep.subr.msk.bf16.mxu1 %vm20619_vm2, %v18798_v17 }
 0x9ed   : > { %18818 = vmatpush1.bf16.msra.mxu0 %v18817_v42  ;;  %v4785_v42 = vld [vmem:[%s26415_s4 + $0x20] sm:$0xff] }
 0x9ee   : > { %15130 = vmatmul.mubr.msk.f32.gmra.mrb[44].mxu1 %vm648_vm4, %v4430_v21  ;;  %18819 = vmatprep.subr.bf16.mxu0 %v20446_v16  ;;  %v18838_v46 = vpack.c.bf16 %v4786_v43, %v4785_v42  ;;  %v5054_v43 = vld [vmem:[%s26364_s7 + $0x20] sm:$0xff] }
 0x9ef   : > { %4521 = vmatprep.mubr.f32.mxu1 %v20444_v7  ;;  %18803 = vmatpush1.bf16.msk.msra.mxu1 %vm20619_vm2, %v18801_v26 }
 0x9f1   : > { %18821 = vmatpush1.bf16.msra.mxu0 %v18820_v45 }
 0x9f2   : > { %15131 = vmatmul.mubr.msk.f32.gmra.mrb[46].mxu1 %vm648_vm4, %v4432_v30  ;;  %18822 = vmatprep.subr.bf16.mxu0 %v20446_v16 }
 0x9f3   : > { %4619 = vmatprep.mubr.f32.mxu1 %v20444_v7 }
 0x9f5   : > { %18824 = vmatpush1.bf16.msra.mxu0 %v18823_v49  ;;  %v4787_v49 = vld [vmem:[%s26415_s4 + $0x30] sm:$0xff] }
 0x9f6   : > { %15142 = vmatmul.mubr.msk.f32.vlgmr.msra.gmra.mrb[42].mxu1 %vm648_vm4, %v4538_v29  ;;  %18825 = vmatprep.subr.bf16.mxu0 %v20446_v16  ;;  %v18841_v52 = vpack.c.bf16 %v4788_v51, %v4787_v49  ;;  %v5056_v51 = vld [vmem:[%s26364_s7 + $0x30] sm:$0xff] }
 0x9f7   : > { %4625 = vmatprep.mubr.f32.mxu1 %v20444_v7 }
 0x9f9   : > { %18827 = vmatpush1.bf16.msra.mxu0 %v18826_v54  ;;  %v4790_v54 = vld [vmem:[%s26415_s4 + $0x48] sm:$0xff] }
 0x9fa   : > { %15143 = vmatmul.mubr.msk.f32.gmra.mrb[44].mxu1 %vm648_vm4, %v4540_v57  ;;  %18828 = vmatprep.subr.bf16.mxu0 %v20446_v16 }
 0x9fb   : > { %4631 = vmatprep.mubr.f32.mxu1 %v20444_v7 }
 0x9fd   : > { %18830 = vmatpush1.bf16.msra.mxu0 %v18829_v60  ;;  %v18847_v60 = vpack.c.bf16 %v4792_v59, %v4791_v56  ;;  %v5058_v59 = vld [vmem:[%s26364_s7 + $0x40] sm:$0xff] }
 0x9fe   : > { %15144 = vmatmul.mubr.msk.f32.gmra.mrb[46].mxu1 %vm648_vm4, %v4542_v6  ;;  %18831 = vmatprep.subr.bf16.mxu0 %v20446_v16 }
 0xa99   : > { %v3992_v3 = vpop.f32.mrb[38].mxu1 }
 0xa9a   : > { %v17032_v4 = vpop.f32.mrb[39].mxu1 }
 0xa9d   : > { %v4066_v5 = vpop.f32.mrb[40].mxu1 }
 0xa9e   : > { %v4070_v8 = vmax.f32 %v3992_v3, %v4066_v5  ;;  %v17037_v9 = vpop.f32.mrb[41].mxu1  ;;  %v4796_v3 = vld [vmem:[%s26415_s4 + $0x78] sm:$0xff]  ;;  %v4797_v5 = vld [vmem:[%s26415_s4 + $0x80] sm:$0xff] }
 0xaa0   : > { %4071 = vst.msk [vmem:[#allocation2 + $0x1] sm:$0x1] %vm2338_vm12, %v4070_v8  ;;  %v4081_v11 = vrot.slane %v4070_v8, 3  ;;  %v4073_v12 = vrot.slane %v4070_v8, 1  ;;  %v4078_v13 = vrot.slane %v4070_v8, 2  ;;  %v4798_v8 = vld [vmem:[%s26415_s4 + $0x88] sm:$0xff] }
 0xaa1   : > { %v18856_v9 = vpack.c.bf16 %v4798_v8, %v4797_v5 }
 0xaa2   : > { %4082 = vrot.lane.b32.xlu0 %v4081_v11, %s26417_s21  ;;  %4074 = vrot.lane.b32.xlu1 %v4073_v12, %s26417_s21  ;;  %4080 = vst.msk [vmem:[#allocation2 + $0x9] sm:$0x1] %vm2338_vm12, %v4078_v13  ;;  %v4882_v13 = vld [vmem:[%s26416_s5] sm:$0xff] }
 0xaa3   : > { %17044 = vmatprep.mubr.msk.f32.mxu1 %vm1413_vm8, %v4882_v13 }
 0xac9   : > { %v4621_v17 = vpop.f32.mrb[42].mxu1 }
 0xaca   : > { %v20142_v20 = vadd.f32 %v4621_v17, %v4204_v53  ;;  %v4623_v21 = vpop.f32.mrb[43].mxu1  ;;  %v4789_v53 = vld [vmem:[%s26415_s4 + $0x40] sm:$0xff] }
 0xacb   : > { %v20143_v25 = vadd.f32 %v4623_v21, %v4206_v55  ;;  %v18844_v55 = vpack.c.bf16 %v4790_v54, %v4789_v53  ;;  %v15170_v54 = vld [vmem:[%s26364_s7 + $0xc0] sm:$0xff] }
 0xacc   : > { %v22273_v26 = vadd.f32 %v20142_v20, %v4655_v15  ;;  %v5053_v20 = vld [vmem:[%s26364_s7 + $0x18] sm:$0xff] }
 0xacd   : > { %v4663_v30 = vadd.f32 %v20143_v25, %v4659_v19  ;;  %v4627_v29 = vpop.f32.mrb[44].mxu1 }
 0xace   : > { %v20144_v62 = vadd.f32 %v4627_v29, %v4210_v22  ;;  %v4629_v57 = vpop.f32.mrb[45].mxu1  ;;  %v4668_v18 = vmax.f32 %v22273_v26, 0.0  ;;  %v4793_v22 = vld [vmem:[%s26415_s4 + $0x60] sm:$0xff] }
 0xacf   : > { %v4669_v58 = vmax.f32 %v4663_v30, 0.0  ;;  %v20145_v6 = vadd.f32 %v4629_v57, %v4212_v24  ;;  %v4794_v24 = vld [vmem:[%s26415_s4 + $0x68] sm:$0xff] }
 0xad0   : > { %v22282_v0 = vadd.f32 %v20144_v62, %v4655_v15 }
 0xad1   : > { %v4665_v33 = vadd.f32 %v20145_v6, %v4659_v19  ;;  %v4633_v34 = vpop.f32.mrb[46].mxu1  ;;  %15145 = vmatprep.mubr.msk.f32.mxu0 %vm1220_vm7, %v4669_v58 }
 0xad2   : > { %v20146_v35 = vadd.f32 %v4633_v34, %v4216_v61  ;;  %v4635_v36 = vpop.f32.mrb[47].mxu1  ;;  %4766 = vmatmul.mubr.f32.vlgmr.msra.gmra.mrb[44].mxu0 %v4668_v18  ;;  %v4670_v40 = vmax.f32 %v22282_v0, 0.0  ;;  %v18850_v61 = vpack.c.bf16 %v4794_v24, %v4793_v22  ;;  %v4883_v34 = vld [vmem:[%s26416_s5 + $0x8] sm:$0xf] }
 0xad3   : > { %v4671_v37 = vmax.f32 %v4665_v33, 0.0  ;;  %v20147_v38 = vadd.f32 %v4635_v36, %v4218_v2  ;;  %18833 = vmatpush1.bf16.msra.mxu0 %v18832_v23  ;;  %v4795_v2 = vld [vmem:[%s26415_s4 + $0x70] sm:$0xff] }
 0xad4   : > { %v4666_v41 = vadd.f32 %v20146_v35, %v4655_v15  ;;  %18834 = vmatprep.subr.bf16.mxu0 %v20446_v16  ;;  %v18853_v4 = vpack.c.bf16 %v4796_v3, %v4795_v2  ;;  %v5051_v15 = vld [vmem:[%s26364_s7 + $0x8] sm:$0xff]  ;;  %v4965_v35 = vld [vmem:[%s26363_s6] sm:$0xff]  ;;  %v15164_v36 = vld [vmem:[%s26364_s7 + $0x90] sm:$0xff] }
 0xad5   : > { %v4667_v44 = vadd.f32 %v20147_v38, %v4659_v19  ;;  %15146 = vmatprep.mubr.msk.f32.mxu0 %vm1220_vm7, %v4671_v37  ;;  %v18879_v17 = vpack.c.bf16 %v5051_v15, %v5050_v14  ;;  %v5052_v19 = vld [vmem:[%s26364_s7 + $0x10] sm:$0xff]  ;;  %v4966_v38 = vld [vmem:[%s26363_s6 + $0x8] sm:$0xf]  ;;  %v15175_v3 = vld [vmem:[%s26364_s7 + $0xd8] sm:$0xff] }
 0xad6   : > { %4771 = vmatmul.mubr.f32.gmra.mrb[46].mxu0 %v4670_v40  ;;  %v4672_v48 = vmax.f32 %v4666_v41, 0.0  ;;  %v18882_v21 = vpack.c.bf16 %v5053_v20, %v5052_v19  ;;  %v15167_v41 = vld [vmem:[%s26364_s7 + $0xa8] sm:$0xff]  ;;  %v15156_v2 = vld [vmem:[%s26364_s7 + $0x50] sm:$0xff]  ;;  %v15157_v14 = vld [vmem:[%s26364_s7 + $0x58] sm:$0xff] }
 0xad7   : > { %v4673_v45 = vmax.f32 %v4667_v44, 0.0  ;;  %18836 = vmatpush1.bf16.msra.mxu0 %v18835_v39  ;;  %v5055_v44 = vld [vmem:[%s26364_s7 + $0x28] sm:$0xff]  ;;  %v15158_v15 = vld [vmem:[%s26364_s7 + $0x60] sm:$0xff] }
 0xad8   : > { %18837 = vmatprep.subr.bf16.mxu0 %v20446_v16 }
 0xad9   : > { %15147 = vmatprep.mubr.msk.f32.mxu0 %vm1220_vm7, %v4673_v45 }
 0xada   : > { %4776 = vmatmul.mubr.f32.gmra.mrb[48].mxu0 %v4672_v48 }
 0xadb   : > { %18839 = vmatpush1.bf16.msra.mxu0 %v18838_v46  ;;  %15148 = vmatprep.mubr.msk.f32.mxu0 %vm1220_vm7, %v4669_v58  ;;  %v15168_v46 = vld [vmem:[%s26364_s7 + $0xb0] sm:$0xff] }
 0xadc   : > { %18840 = vmatprep.subr.bf16.mxu0 %v20446_v16 }
 0xadf   : > { %18842 = vmatpush1.bf16.msra.mxu0 %v18841_v52  ;;  %v5057_v52 = vld [vmem:[%s26364_s7 + $0x38] sm:$0xff] }
 0xae0   : > { %18843 = vmatprep.subr.bf16.mxu0 %v20446_v16  ;;  %v18888_v53 = vpack.c.bf16 %v5057_v52, %v5056_v51  ;;  %v15190_v52 = vld [vmem:[%s26364_s7 + $0x140] sm:$0xff] }
 0xae3   : > { %18845 = vmatpush1.bf16.msra.mxu0 %v18844_v55  ;;  %v15171_v55 = vld [vmem:[%s26364_s7 + $0xc8] sm:$0xff] }
 0xae4   : > { %18846 = vmatprep.subr.bf16.mxu0 %v20446_v16  ;;  %v18876_v56 = vpack.c.bf16 %v15171_v55, %v15170_v54  ;;  %v15192_v55 = vld [vmem:[%s26364_s7 + $0x150] sm:$0xff] }
 0xae7   : > { %18848 = vmatpush1.bf16.msra.mxu0 %v18847_v60  ;;  %v15172_v60 = vld [vmem:[%s26364_s7 + $0xd0] sm:$0xff] }
 0xae8   : > { %18849 = vmatprep.subr.bf16.mxu0 %v20446_v16 }
 0xaeb   : > { %18851 = vmatpush1.bf16.msra.mxu0 %v18850_v61  ;;  %v15155_v61 = vld [vmem:[%s26364_s7 + $0x48] sm:$0xff] }
 0xaec   : > { %18852 = vmatprep.subr.bf16.mxu0 %v20446_v16 }
 0xaef   : > { %18854 = vmatpush1.bf16.msra.mxu0 %v18853_v4  ;;  %v15176_v4 = vld [vmem:[%s26364_s7 + $0xe0] sm:$0xff] }
 0xaf0   : > { %18855 = vmatprep.subr.bf16.mxu0 %v20446_v16  ;;  %v18891_v13 = vpack.c.bf16 %v15176_v4, %v15175_v3  ;;  %v5567_v3 = vld [vmem:[%s26367_s10 + $0x8] sm:$0xff] }
 0xaf3   : > { %18857 = vmatpush1.bf16.msra.mxu0 %v18856_v9 }
 0xaf4   : > { %18878 = vmatprep.subr.bf16.mxu0 %v20446_v16 }
 0xaf6   : > { %4864 = vmatmul.mubr.f32.vlgmr.msra.gmra.mrb[50].mxu0 %v4668_v18 }
 0xaf7   : > { %15149 = vmatprep.mubr.msk.f32.mxu0 %vm1220_vm7, %v4671_v37  ;;  %18880 = vmatpush3.bf16.msra.mxu0 %v18879_v17  ;;  %v15165_v37 = vld [vmem:[%s26364_s7 + $0x98] sm:$0xff] }
 0xaf8   : > { %18881 = vmatprep.subr.bf16.mxu0 %v20446_v16  ;;  %v18867_v39 = vpack.c.bf16 %v15165_v37, %v15164_v36  ;;  %v15162_v36 = vld [vmem:[%s26364_s7 + $0x80] sm:$0xff] }
 0xafa   : > { %4869 = vmatmul.mubr.f32.gmra.mrb[52].mxu0 %v4670_v40  ;;  %v15166_v40 = vld [vmem:[%s26364_s7 + $0xa0] sm:$0xff] }
 0xafb   : > { %15150 = vmatprep.mubr.msk.f32.mxu0 %vm1220_vm7, %v4673_v45  ;;  %18883 = vmatpush3.bf16.msra.mxu0 %v18882_v21  ;;  %v18870_v42 = vpack.c.bf16 %v15167_v41, %v15166_v40  ;;  %v18885_v45 = vpack.c.bf16 %v5055_v44, %v5054_v43  ;;  %v15182_v40 = vld [vmem:[%s26364_s7 + $0x110] sm:$0xff]  ;;  %v15186_v43 = vld [vmem:[%s26364_s7 + $0x120] sm:$0xff]  ;;  %v15187_v44 = vld [vmem:[%s26364_s7 + $0x128] sm:$0xff] }
 0xafc   : > { %18884 = vmatprep.subr.bf16.mxu0 %v20446_v16 }
 0xafe   : > { %4874 = vmatmul.mubr.f32.gmra.mrb[54].mxu0 %v4672_v48  ;;  %v15169_v48 = vld [vmem:[%s26364_s7 + $0xb8] sm:$0xff] }
 0xaff   : > { %17095 = vmatprep.mubr.msk.f32.mxu0 %vm20447_vm9, %v20444_v7  ;;  %18886 = vmatpush3.bf16.msra.mxu0 %v18885_v45  ;;  %v18873_v49 = vpack.c.bf16 %v15169_v48, %v15168_v46  ;;  %v15183_v45 = vld [vmem:[%s26364_s7 + $0x118] sm:$0xff]  ;;  %v18915_v46 = vpack.c.bf16 %v15187_v44, %v15186_v43  ;;  %v15188_v48 = vld [vmem:[%s26364_s7 + $0x130] sm:$0xff] }
 0xb00   : > { %18887 = vmatprep.subr.bf16.mxu0 %v20446_v16  ;;  %v5495_v43 = vld [vmem:[%s26366_s9 + $0x78] sm:$0xff] }
 0xb03   : > { %18889 = vmatpush3.bf16.msra.mxu0 %v18888_v53  ;;  %v15191_v53 = vld [vmem:[%s26364_s7 + $0x148] sm:$0xff] }
 0xb04   : > { %17093 = vmatprep.subr.mxu0 %v20444_v7  ;;  %v18921_v54 = vpack.c.bf16 %v15191_v53, %v15190_v52 }
 0xb07   : > { %17094 = vmatpush3.msra.mxu0 %v5058_v59 }
 0xb08   : > { %18902 = vmatprep.subr.bf16.mxu0 %v20446_v16 }
 0xb14   : > { %v4083_v11 = vpop.permute.xlu0 %4082  ;;  %v4075_v12 = vpop.permute.xlu1 %4074 }
 0xb15   : > { %4085 = vst.msk [vmem:[#allocation2 + $0x9] sm:$0x1] %vm2345_vm13, %v4083_v11  ;;  %4077 = vst.msk [vmem:[#allocation2 + $0x1] sm:$0x1] %vm2345_vm13, %v4075_v12  ;;  %v18903_v11 = vpack.c.bf16 %v15156_v2, %v15155_v61  ;;  %v5566_v61 = vld [vmem:[%s26367_s10] sm:$0xff] }
 0xb16   : > { %v18951_v4 = vpack.c.bf16 %v5567_v3, %v5566_v61  ;;  %v15196_v3 = vld [vmem:[%s26365_s8] ss:$0 sm:$0xff] }
 0xba5   : > { %v4767_v25 = vpop.f32.mrb[44].mxu0 }
 0xba6   : > { %v4769_v26 = vpop.f32.mrb[45].mxu0 }
 0xba9   : > { %v4772_v27 = vpop.f32.mrb[46].mxu0 }
 0xbaa   : > { %v4774_v28 = vpop.f32.mrb[47].mxu0 }
 0xbad   : > { %v4777_v30 = vpop.f32.mrb[48].mxu0 }
 0xbae   : > { %v4779_v29 = vpop.f32.mrb[49].mxu0 }
 0xbaf   : > { %v15177_v29 = vld [vmem:[%s26364_s7 + $0xe8] sm:$0xff] }
 0xbc9   : > { %v4865_v62 = vpop.f32.mrb[50].mxu0 }
 0xbca   : > { %v4879_v57 = vmax.f32 %v4767_v25, %v4865_v62  ;;  %v4867_v58 = vpop.f32.mrb[51].mxu0  ;;  %v15178_v62 = vld [vmem:[%s26364_s7 + $0xf0] sm:$0xff] }
 0xbcb   : > { %v15159_v58 = vld [vmem:[%s26364_s7 + $0x68] sm:$0xff] }
 0xbcd   : > { %v4870_v6 = vpop.f32.mrb[52].mxu0 }
 0xbce   : > { %v4880_v23 = vmax.f32 %v4772_v27, %v4870_v6  ;;  %v4872_v18 = vpop.f32.mrb[53].mxu0  ;;  %v15160_v6 = vld [vmem:[%s26364_s7 + $0x70] sm:$0xff] }
 0xbd0   : > { %v18858_v0 = vpack.c.bf16 %v4880_v23, %v4879_v57 }
 0xbd1   : > { %v4875_v31 = vpop.f32.mrb[54].mxu0 }
 0xbd2   : > { %v4881_v32 = vmax.f32 %v4777_v30, %v4875_v31  ;;  %v4877_v33 = vpop.f32.mrb[55].mxu0  ;;  %18859 = vmatprep.subr.bf16.mxu1 %v18858_v0  ;;  %v18906_v30 = vpack.c.bf16 %v15158_v15, %v15157_v14  ;;  %v18894_v31 = vpack.c.bf16 %v15178_v62, %v15177_v29  ;;  %v5484_v14 = vld [vmem:[%s26366_s9 + $0x20] sm:$0xff]  ;;  %v5485_v15 = vld [vmem:[%s26366_s9 + $0x28] sm:$0xff] }
 0xbd3   : > { %18861 = vmatpush3.bf16.msra.mxu1 %v18858_v0  ;;  %v15179_v33 = vld [vmem:[%s26364_s7 + $0xf8] sm:$0xff]  ;;  %v5488_v62 = vld [vmem:[%s26366_s9 + $0x40] sm:$0xff] }
 0xbd4   : > { %17042 = vmatprep.subr.mxu1 %v4881_v32 }
 0xbd7   : > { %17043 = vmatpush3.msra.mxu1 %v4881_v32 }
 0xbd8   : > { %17045 = vmatmul.mubr.msk.f32.vlgmr.msra.gmra.mrb[48].mxu1 %vm1413_vm8, %v4883_v34  ;;  %18863 = vmatprep.subr.bf16.mxu1 %v18858_v0  ;;  %v15180_v34 = vld [vmem:[%s26364_s7 + $0x100] sm:$0xff] }
 0xbd9   : > { %18865 = vmatpush3.bf16.msra.mxu1 %v18858_v0  ;;  %17053 = vmatprep.mubr.msk.f32.mxu1 %vm1413_vm8, %v4965_v35  ;;  %v15161_v35 = vld [vmem:[%s26364_s7 + $0x78] sm:$0xff]  ;;  %v18897_v37 = vpack.c.bf16 %v15180_v34, %v15179_v33 }
 0xbda   : > { %17051 = vmatprep.subr.mxu1 %v4881_v32  ;;  %v5577_v33 = vld [vmem:[%s26367_s10 + $0x58] sm:$0xff] }
 0xbdd   : > { %17052 = vmatpush3.msra.mxu1 %v4881_v32  ;;  %v18909_v32 = vpack.c.bf16 %v15160_v6, %v15159_v58  ;;  %v5574_v58 = vld [vmem:[%s26367_s10 + $0x40] sm:$0xff]  ;;  %v5575_v6 = vld [vmem:[%s26367_s10 + $0x48] sm:$0xff] }
 0xbde   : > { %17054 = vmatmul.mubr.msk.f32.vlgmr.msra.gmra.mrb[50].mxu1 %vm1413_vm8, %v4966_v38  ;;  %18866 = vmatprep.subr.bf16.mxu1 %v20446_v16  ;;  %v18912_v38 = vpack.c.bf16 %v15162_v36, %v15161_v35  ;;  %v5492_v36 = vld [vmem:[%s26366_s9 + $0x60] sm:$0xff] }
 0xbdf   : > { %18868 = vmatpush3.bf16.msra.mxu1 %v18867_v39  ;;  %17074 = vmatprep.mubr.msk.f32.mxu1 %vm20447_vm9, %v20444_v7  ;;  %v15181_v39 = vld [vmem:[%s26364_s7 + $0x108] sm:$0xff] }
 0xbe0   : > { %18869 = vmatprep.subr.bf16.mxu1 %v20446_v16  ;;  %v18900_v41 = vpack.c.bf16 %v15182_v40, %v15181_v39  ;;  %v5579_v40 = vld [vmem:[%s26367_s10 + $0x68] sm:$0xff] }
 0xbe3   : > { %18871 = vmatpush3.bf16.msra.mxu1 %v18870_v42  ;;  %v15163_v42 = vld [vmem:[%s26364_s7 + $0x88] sm:$0xff] }
 0xbe4   : > { %18872 = vmatprep.subr.bf16.mxu1 %v20446_v16 }
 0xbe7   : > { %18874 = vmatpush3.bf16.msra.mxu1 %v18873_v49  ;;  %v15189_v49 = vld [vmem:[%s26364_s7 + $0x138] sm:$0xff] }
 0xbe8   : > { %18875 = vmatprep.subr.bf16.mxu1 %v20446_v16  ;;  %v18918_v51 = vpack.c.bf16 %v15189_v49, %v15188_v48 }
 0xbeb   : > { %18877 = vmatpush3.bf16.msra.mxu1 %v18876_v56  ;;  %v15193_v56 = vld [vmem:[%s26364_s7 + $0x158] sm:$0xff] }
 0xbec   : > { %17072 = vmatprep.subr.mxu1 %v20444_v7  ;;  %v18924_v59 = vpack.c.bf16 %v15193_v56, %v15192_v55 }
 0xbef   : > { %17073 = vmatpush3.msra.mxu1 %v15172_v60  ;;  %v15194_v60 = vld [vmem:[%s26364_s7 + $0x160] sm:$0xff] }
 0xbf0   : > { %18890 = vmatprep.subr.bf16.mxu1 %v20446_v16 }
 0xcab   : > { %v17046_v22 = vpop.f32.mrb[48].mxu1 }
 0xcac   : > { %v4956_v24 = vpop.f32.mrb[49].mxu1 }
 0xcb1   : > { %v17055_v5 = vpop.f32.mrb[50].mxu1 }
 0xcb2   : > { %v5049_v8 = vmax.f32 %v17046_v22, %v17055_v5  ;;  %v5039_v9 = vpop.f32.mrb[51].mxu1  ;;  %v5480_v22 = vld [vmem:[%s26366_s9] sm:$0xff]  ;;  %v5482_v5 = vld [vmem:[%s26366_s9 + $0x10] sm:$0xff] }
 0xcb3   : > { %v5048_v12 = vmax.f32 %v4956_v24, %v5039_v9  ;;  %v5481_v24 = vld [vmem:[%s26366_s9 + $0x8] sm:$0xff]  ;;  %v5568_v9 = vld [vmem:[%s26367_s10 + $0x10] sm:$0xff] }
 0xcb4   : > { %v5080_v17 = vrot.slane %v5049_v8, 2  ;;  %v5236_v19 = vrot.slane %v5049_v8, 3  ;;  %v5311_v20 = vrot.slane %v5049_v8, 1  ;;  %v5395_v21 = vrot.slane %v5049_v8, 4  ;;  %v5483_v8 = vld [vmem:[%s26366_s9 + $0x18] sm:$0xff] }
 0xcb5   : > { %17096 = vmatmul.mubr.msk.f32.vlgmr.msra.gmra.mrb[56].mxu0 %vm1614_vm10, %v5048_v12  ;;  %v5079_v25 = vrot.slane %v5048_v12, 2  ;;  %v5310_v26 = vrot.slane %v5048_v12, 1  ;;  %v5235_v27 = vrot.slane %v5048_v12, 3  ;;  %v5394_v28 = vrot.slane %v5048_v12, 4  ;;  %v5569_v12 = vld [vmem:[%s26367_s10 + $0x18] sm:$0xff] }
 0xcb6   : > { %18904 = vmatpush3.bf16.msra.mxu0 %v18903_v11  ;;  %17137 = vmatprep.mubr.msk.f32.mxu0 %vm20447_vm9, %v20444_v7  ;;  %v18927_v2 = vpack.c.bf16 %v5481_v24, %v5480_v22  ;;  %v18930_v11 = vpack.c.bf16 %v5483_v8, %v5482_v5 }
 0xcb7   : > { %v5081_v57 = vsel %vm640_vm3, %v5079_v25, %v5080_v17  ;;  %18905 = vmatprep.subr.bf16.mxu0 %v20446_v16  ;;  %v5312_v23 = vsel %vm952_vm6, %v5310_v26, %v5311_v20  ;;  %v5237_v18 = vsel %vm849_vm5, %v5235_v27, %v5236_v19  ;;  %v5396_v0 = vsel %vm655_vm0, %v5394_v28, %v5395_v21  ;;  %v5570_v17 = vld [vmem:[%s26367_s10 + $0x20] sm:$0xff]  ;;  %v5571_v20 = vld [vmem:[%s26367_s10 + $0x28] sm:$0xff]  ;;  %v5486_v21 = vld [vmem:[%s26366_s9 + $0x30] sm:$0xff] }
 0xcb8   : > { %17075 = vmatmul.mubr.msk.f32.vlgmr.msra.gmra.mrb[52].mxu1 %vm1614_vm10, %v5081_v57  ;;  %v18933_v19 = vpack.c.bf16 %v5485_v15, %v5484_v14  ;;  %v5487_v25 = vld [vmem:[%s26366_s9 + $0x38] sm:$0xff]  ;;  %v18957_v26 = vpack.c.bf16 %v5571_v20, %v5570_v17  ;;  %v5572_v27 = vld [vmem:[%s26367_s10 + $0x30] sm:$0xff]  ;;  %v5489_v57 = vld [vmem:[%s26366_s9 + $0x48] sm:$0xff] }
 0xcb9   : > { %18892 = vmatpush3.bf16.msra.mxu1 %v18891_v13  ;;  %17116 = vmatprep.mubr.msk.f32.mxu1 %vm20447_vm9, %v20444_v7  ;;  %v18954_v13 = vpack.c.bf16 %v5569_v12, %v5568_v9  ;;  %v5573_v28 = vld [vmem:[%s26367_s10 + $0x38] sm:$0xff]  ;;  %v5653_v15 = vld [vmem:[%s26368_s11] sm:$0xf]  ;;  %v20378_v20 = vld [vmem:[%s26408_s29 + $0xa8] sm:$0xff] }
 0xcba   : > { %18907 = vmatpush3.bf16.msra.mxu0 %v18906_v30  ;;  %18893 = vmatprep.subr.bf16.mxu1 %v20446_v16  ;;  %v18936_v30 = vpack.c.bf16 %v5487_v25, %v5486_v21  ;;  %v18960_v29 = vpack.c.bf16 %v5573_v28, %v5572_v27  ;;  %v15218_v17 = vld [vmem:[%s26408_s29 + $0xb8] sm:$0xf]  ;;  %v15217_v25 = vld [vmem:[%s26408_s29 + $0xb0] sm:$0xf]  ;;  %v22691_v27 = vld [vmem:[%s20647_s27 + $0x68] sm:$0xff] }
 0xcbb   : > { %18908 = vmatprep.subr.bf16.mxu0 %v20446_v16  ;;  %v18978_v21 = vpack.c.bf16 %v15218_v17, %v20378_v20  ;;  %v5823_v28 = vld [vmem:[%s26408_s29 + $0x8] sm:$0xff] }
 0xcbd   : > { %18895 = vmatpush3.bf16.msra.mxu1 %v18894_v31  ;;  %v5491_v31 = vld [vmem:[%s26366_s9 + $0x58] sm:$0xff] }
 0xcbe   : > { %18910 = vmatpush3.bf16.msra.mxu0 %v18909_v32  ;;  %18896 = vmatprep.subr.bf16.mxu1 %v20446_v16  ;;  %v5576_v32 = vld [vmem:[%s26367_s10 + $0x50] sm:$0xff] }
 0xcbf   : > { %18911 = vmatprep.subr.bf16.mxu0 %v20446_v16  ;;  %v18966_v35 = vpack.c.bf16 %v5577_v33, %v5576_v32 }
 0xcc1   : > { %18898 = vmatpush3.bf16.msra.mxu1 %v18897_v37  ;;  %v5493_v37 = vld [vmem:[%s26366_s9 + $0x68] sm:$0xff] }
 0xcc2   : > { %18913 = vmatpush3.bf16.msra.mxu0 %v18912_v38  ;;  %18899 = vmatprep.subr.bf16.mxu1 %v20446_v16  ;;  %v5578_v38 = vld [vmem:[%s26367_s10 + $0x60] sm:$0xff]  ;;  %v18945_v39 = vpack.c.bf16 %v5493_v37, %v5492_v36  ;;  %v5828_v37 = vld [vmem:[%s26408_s29 + $0x30] sm:$0xf] }
 0xcc3   : > { %17135 = vmatprep.subr.mxu0 %v20444_v7  ;;  %v5826_v36 = vld [vmem:[%s26408_s29 + $0x20] sm:$0xff] }
 0xcc5   : > { %18901 = vmatpush3.bf16.msra.mxu1 %v18900_v41  ;;  %v18969_v41 = vpack.c.bf16 %v5579_v40, %v5578_v38  ;;  %v15230_v38 = vld [vmem:[%s26408_s29 + $0xc8] sm:$0xff] }
 0xcc6   : > { %17136 = vmatpush3.msra.mxu0 %v15163_v42  ;;  %17114 = vmatprep.subr.mxu1 %v20444_v7  ;;  %v5494_v42 = vld [vmem:[%s26366_s9 + $0x70] sm:$0xff] }
 0xcc7   : > { %17138 = vmatmul.mubr.msk.f32.vlgmr.msra.gmra.mrb[58].mxu0 %vm1614_vm10, %v5312_v23  ;;  %18926 = vmatprep.subr.bf16.mxu0 %v20446_v16  ;;  %v18939_v23 = vpack.c.bf16 %v5489_v57, %v5488_v62  ;;  %v18948_v44 = vpack.c.bf16 %v5495_v43, %v5494_v42  ;;  %v5851_v57 = vrot.slane %v22691_v27, 2  ;;  %v18991_v42 = vpack.c.bf16 %v5828_v37, %v5826_v36 }
 0xcc8   : > { %17193 = vmatprep.mubr.msk.f32.mxu0 %vm20447_vm9, %v20444_v7  ;;  %18928 = vmatpush3.bf16.msra.mxu0 %v18927_v2 }
 0xcc9   : > { %17115 = vmatpush3.msra.mxu1 %v15183_v45  ;;  %18929 = vmatprep.subr.bf16.mxu0 %v20446_v16  ;;  %v5580_v45 = vld [vmem:[%s26367_s10 + $0x70] sm:$0xff] }
 0xcca   : > { %17117 = vmatmul.mubr.msk.f32.vlgmr.msra.gmra.mrb[54].mxu1 %vm1614_vm10, %v5237_v18  ;;  %18914 = vmatprep.subr.bf16.mxu1 %v20446_v16  ;;  %v18963_v18 = vpack.c.bf16 %v5575_v6, %v5574_v58  ;;  %v22710_v58 = vld [vmem:[%s20647_s27 + $0x70] sm:$0xff] }
 0xccb   : > { %18916 = vmatpush3.bf16.msra.mxu1 %v18915_v46  ;;  %17158 = vmatprep.mubr.msk.f32.mxu1 %vm20447_vm9, %v20444_v7  ;;  %v5581_v46 = vld [vmem:[%s26367_s10 + $0x78] sm:$0xff]  ;;  %v5853_v32 = vrot.slane %v22710_v58, 2 }
 0xccc   : > { %18917 = vmatprep.subr.bf16.mxu1 %v20446_v16  ;;  %18931 = vmatpush3.bf16.msra.mxu0 %v18930_v11  ;;  %v18972_v48 = vpack.c.bf16 %v5581_v46, %v5580_v45  ;;  %v15229_v45 = vld [vmem:[%s26408_s29 + $0xc0] sm:$0xff]  ;;  %v15231_v46 = vld [vmem:[%s26408_s29 + $0xd0] sm:$0xff] }
 0xccd   : > { %18932 = vmatprep.subr.bf16.mxu0 %v20446_v16  ;;  %v5854_v40 = vsel %vm640_vm3, %v5851_v57, %v5853_v32 }
 0xccf   : > { %18919 = vmatpush3.bf16.msra.mxu1 %v18918_v51 }
 0xcd0   : > { %18920 = vmatprep.subr.bf16.mxu1 %v20446_v16  ;;  %18934 = vmatpush3.bf16.msra.mxu0 %v18933_v19  ;;  %v5727_v19 = vld [vmem:[%s26369_s12] sm:$0xf] }
 0xcd1   : > { %18935 = vmatprep.subr.bf16.mxu0 %v20446_v16 }
 0xcd3   : > { %18922 = vmatpush3.bf16.msra.mxu1 %v18921_v54 }
 0xcd4   : > { %18923 = vmatprep.subr.bf16.mxu1 %v20446_v16  ;;  %18937 = vmatpush3.bf16.msra.mxu0 %v18936_v30  ;;  %v20379_v30 = vld [vmem:[%s26408_s29 + $0xa0] sm:$0xff] }
 0xcd5   : > { %18938 = vmatprep.subr.bf16.mxu0 %v20446_v16 }
 0xcd7   : > { %18925 = vmatpush3.bf16.msra.mxu1 %v18924_v59 }
 0xcd8   : > { %17156 = vmatprep.subr.mxu1 %v20444_v7  ;;  %18940 = vmatpush3.bf16.msra.mxu0 %v18939_v23  ;;  %v5824_v23 = vld [vmem:[%s26408_s29 + $0x10] sm:$0xff] }
 0xcd9   : > { %18941 = vmatprep.subr.bf16.mxu0 %v20446_v16 }
 0xcdb   : > { %17157 = vmatpush3.msra.mxu1 %v15194_v60 }
 0xcdc   : > { %17159 = vmatmul.mubr.msk.f32.vlgmr.msra.gmra.mrb[56].mxu1 %vm1614_vm10, %v5396_v0  ;;  %18950 = vmatprep.subr.bf16.mxu1 %v20446_v16  ;;  %v5490_v0 = vld [vmem:[%s26366_s9 + $0x50] sm:$0xff] }
 0xcdd   : > { %17228 = vmatprep.mubr.msk.f32.mxu1 %vm20447_vm9, %v20444_v7  ;;  %18952 = vmatpush3.bf16.msra.mxu1 %v18951_v4  ;;  %v18942_v34 = vpack.c.bf16 %v5491_v31, %v5490_v0  ;;  %v5829_v0 = vld [vmem:[%s26408_s29 + $0x38] sm:$0xf] }
 0xcde   : > { %18953 = vmatprep.subr.bf16.mxu1 %v20446_v16 }
 0xcdf   : > { %18943 = vmatpush3.bf16.msra.mxu0 %v18942_v34  ;;  %v22729_v34 = vld [vmem:[%s20647_s27 + $0x78] sm:$0xf] }
 0xce0   : > { %18944 = vmatprep.subr.bf16.mxu0 %v20446_v16 }
 0xce1   : > { %18955 = vmatpush3.bf16.msra.mxu1 %v18954_v13 }
 0xce2   : > { %18956 = vmatprep.subr.bf16.mxu1 %v20446_v16 }
 0xce3   : > { %18946 = vmatpush3.bf16.msra.mxu0 %v18945_v39  ;;  %v15232_v39 = vld [vmem:[%s26408_s29 + $0xd8] sm:$0xff] }
 0xce4   : > { %18947 = vmatprep.subr.bf16.mxu0 %v20446_v16  ;;  %v18994_v43 = vpack.c.bf16 %v15232_v39, %v15230_v38  ;;  %v6268_v38 = vrot.slane %v22691_v27, 4 }
 0xce5   : > { %18958 = vmatpush3.bf16.msra.mxu1 %v18957_v26  ;;  %v22688_v26 = vld [vmem:[%s20647_s27 + $0x60] sm:$0xff] }
 0xce6   : > { %18959 = vmatprep.subr.bf16.mxu1 %v20446_v16  ;;  %v5850_v62 = vrot.slane %v22688_v26, 2  ;;  %v6267_v37 = vrot.slane %v22688_v26, 4 }
 0xce7   : > { %18949 = vmatpush3.bf16.msra.mxu0 %v18948_v44 }
 0xce8   : > { %17231 = vmatprep.subr.mxu0 %v20444_v7  ;;  %v5852_v31 = vsel %vm640_vm3, %v5850_v62, %v5851_v57  ;;  %v15252_v62 = vld [vmem:[%s26408_s29 + $0x128] sm:$0xff]  ;;  %v15254_v57 = vld [vmem:[%s26408_s29 + $0x138] sm:$0xf]  ;;  %v6269_v39 = vsel %vm655_vm0, %v6267_v37, %v6268_v38 }
 0xce9   : > { %18961 = vmatpush3.bf16.msra.mxu1 %v18960_v29  ;;  %v18981_v29 = vpack.c.bf16 %v15217_v25, %v20379_v30  ;;  %v15247_v30 = vld [vmem:[%s26408_s29 + $0x100] sm:$0xff] }
 0xcea   : > { %18962 = vmatprep.subr.bf16.mxu1 %v20446_v16 }
 0xced   : > { %18964 = vmatpush3.bf16.msra.mxu1 %v18963_v18  ;;  %v5827_v18 = vld [vmem:[%s26408_s29 + $0x28] sm:$0xff] }
 0xcee   : > { %18965 = vmatprep.subr.bf16.mxu1 %v20446_v16 }
 0xcf1   : > { %18967 = vmatpush3.bf16.msra.mxu1 %v18966_v35  ;;  %v18988_v35 = vpack.c.bf16 %v5829_v0, %v5827_v18  ;;  %v19018_v18 = vpack.c.bf16 %v15254_v57, %v15252_v62  ;;  %v15251_v0 = vld [vmem:[%s26408_s29 + $0x120] sm:$0xff] }
 0xcf2   : > { %18968 = vmatprep.subr.bf16.mxu1 %v20446_v16  ;;  %v6512_v57 = vld [vmem:[%s26415_s4] sm:$0xff] }
 0xcf5   : > { %18970 = vmatpush3.bf16.msra.mxu1 %v18969_v41  ;;  %v5855_v41 = vrot.slane %v22729_v34, 2 }
 0xcf6   : > { %18971 = vmatprep.subr.bf16.mxu1 %v20446_v16 }
 0xcf7   : > { %v5856_v44 = vsel %vm640_vm3, %v5853_v32, %v5855_v41 }
 0xcf9   : > { %18973 = vmatpush3.bf16.msra.mxu1 %v18972_v48  ;;  %v15234_v48 = vld [vmem:[%s26408_s29 + $0xe8] sm:$0xff] }
 0xcfa   : > { %19024 = vmatprep.subr.bf16.mxu1 %v20446_v16 }
 0xd88   : > { %v5222_v49 = vpop.f32.mrb[56].mxu0 }
 0xd89   : > { %v17097_v51 = vpop.f32.mrb[57].mxu0 }
 0xd8a   : > { %v18996_v51 = vpack.c.bf16 %v15231_v46, %v15229_v45  ;;  %v6409_v46 = vld [vmem:[%s26413_s19 + $0x20] sm:$0xff] }
 0xd8b   : > { %v5150_v52 = vpop.f32.mrb[52].mxu1 }
 0xd8c   : > { %v5223_v53 = vadd.f32 %v5222_v49, %v5150_v52  ;;  %v17076_v54 = vpop.f32.mrb[53].mxu1  ;;  %v15236_v49 = vld [vmem:[%s26408_s29 + $0xf8] sm:$0xf] }
 0xd8d   : > { %v18998_v52 = vpack.c.bf16 %v15236_v49, %v15234_v48  ;;  %v15235_v54 = vld [vmem:[%s26408_s29 + $0xf0] sm:$0xf]  ;;  %v6410_v48 = vld [vmem:[%s26413_s19 + $0x28] sm:$0xff] }
 0xd8e   : > { %v19031_v49 = vpack.c.bf16 %v6410_v48, %v6409_v46  ;;  %v6518_v46 = vld [vmem:[%s26415_s4 + $0x30] sm:$0xff]  ;;  %v6519_v48 = vld [vmem:[%s26415_s4 + $0x38] sm:$0xff] }
 0xd9a   : > { %v5381_v55 = vpop.f32.mrb[58].mxu0 }
 0xd9b   : > { %v17139_v56 = vpop.f32.mrb[59].mxu0 }
 0xd9c   : > { %v15206_v56 = vld [vmem:[%s26408_s29 + $0x58] sm:$0xff] }
 0xd9d   : > { %v5306_v59 = vpop.f32.mrb[54].mxu1 }
 0xd9e   : > { %v5382_v60 = vadd.f32 %v5381_v55, %v5306_v59  ;;  %v17118_v22 = vpop.f32.mrb[55].mxu1  ;;  %v15204_v55 = vld [vmem:[%s26408_s29 + $0x48] sm:$0xff] }
 0xd9f   : > { %v6055_v22 = vrot.slane %v22688_v26, 3 }
 0xdaf   : > { %v5465_v24 = vpop.f32.mrb[56].mxu1 }
 0xdb0   : > { %v5469_v61 = vadd.f32 %v5465_v24, %v5223_v53  ;;  %v17160_v2 = vpop.f32.mrb[57].mxu1  ;;  %v15233_v53 = vld [vmem:[%s26408_s29 + $0xe0] sm:$0xff]  ;;  %v6056_v24 = vrot.slane %v22691_v27, 3 }
 0xdb1   : > { %v19001_v59 = vpack.c.bf16 %v15235_v54, %v15233_v53  ;;  %v15205_v2 = vld [vmem:[%s26408_s29 + $0x50] sm:$0xff]  ;;  %v6413_v54 = vld [vmem:[%s26413_s19 + $0x40] sm:$0xff] }
 0xdb2   : > { %v5470_v4 = vadd.f32 %v5469_v61, %v5382_v60  ;;  %v19004_v60 = vpack.c.bf16 %v15206_v56, %v15204_v55  ;;  %v15203_v61 = vld [vmem:[%s26408_s29 + $0x40] sm:$0xff]  ;;  %v6414_v55 = vld [vmem:[%s26413_s19 + $0x48] sm:$0xff] }
 0xdb3   : > { %v19037_v56 = vpack.c.bf16 %v6414_v55, %v6413_v54  ;;  %v6522_v54 = vld [vmem:[%s26415_s4 + $0x50] sm:$0xff]  ;;  %v6523_v55 = vld [vmem:[%s26415_s4 + $0x58] sm:$0xff] }
 0xdb4   : > { %v5478_v5 = vadd.f32 %v15196_v3, %v5470_v4  ;;  %v15208_v3 = vld [vmem:[%s26408_s29 + $0x68] sm:$0xff]  ;;  %v15210_v4 = vld [vmem:[%s26408_s29 + $0x78] sm:$0xf] }
 0xdb6   : > { %v5479_v8 = vmax.f32 %v5478_v5, 0.0  ;;  %v6057_v5 = vsel %vm849_vm5, %v6055_v22, %v6056_v24 }
 0xdb8   : > { %17194 = vmatmul.mubr.f32.vlgmr.msra.gmra.mrb[60].mxu0 %v5479_v8  ;;  %17229 = vmatmul.mubr.f32.vlgmr.msra.gmra.mrb[58].mxu1 %v5479_v8  ;;  %v6058_v8 = vrot.slane %v22710_v58, 3 }
 0xdb9   : > { %17233 = vmatprep.mubr.msk.f32.mxu0 %vm20447_vm9, %v20444_v7 }
 0xdba   : > { %v6059_v17 = vsel %vm849_vm5, %v6056_v24, %v6058_v8  ;;  %v6417_v24 = vld [vmem:[%s26413_s19 + $0x60] sm:$0xff] }
 0xe8b   : > { %v5562_v9 = vpop.f32.mrb[60].mxu0  ;;  %v5648_v11 = vpop.f32.mrb[58].mxu1 }
 0xe8c   : > { %v5652_v12 = vmax.f32 %v5562_v9, %v5648_v11  ;;  %v17195_v13 = vpop.f32.mrb[61].mxu0  ;;  %v17230_v14 = vpop.f32.mrb[59].mxu1  ;;  %v19006_v9 = vpack.c.bf16 %v15205_v2, %v15203_v61  ;;  %v19008_v11 = vpack.c.bf16 %v15210_v4, %v15208_v3  ;;  %v6418_v61 = vld [vmem:[%s26413_s19 + $0x68] sm:$0xff]  ;;  %v6419_v3 = vld [vmem:[%s26413_s19 + $0x70] sm:$0xff]  ;;  %v6420_v4 = vld [vmem:[%s26413_s19 + $0x78] sm:$0xff] }
 0xe8d   : > { %v15209_v13 = vld [vmem:[%s26408_s29 + $0x70] sm:$0xf]  ;;  %v15248_v14 = vld [vmem:[%s26408_s29 + $0x108] sm:$0xff]  ;;  %v19043_v2 = vpack.c.bf16 %v6418_v61, %v6417_v24  ;;  %v6527_v61 = vld [vmem:[%s26415_s4 + $0x78] sm:$0xff] }
 0xe8e   : > { %17232 = vmatpush3.msra.mxu0 %v5652_v12  ;;  %v6526_v24 = vld [vmem:[%s26415_s4 + $0x70] sm:$0xff] }
 0xe8f   : > { %17234 = vmatmul.mubr.msk.f32.vlgmr.msra.gmra.mrb[62].mxu0 %vm2189_vm11, %v5653_v15  ;;  %17236 = vmatprep.subr.mxu0 %v20444_v7  ;;  %v15250_v15 = vld [vmem:[%s26408_s29 + $0x118] sm:$0xff] }
 0xe90   : > { %17237 = vmatpush3.msra.mxu0 %v5652_v12  ;;  %17238 = vmatprep.mubr.msk.f32.mxu0 %vm20447_vm9, %v20444_v7  ;;  %v15207_v12 = vld [vmem:[%s26408_s29 + $0x60] sm:$0xff] }
 0xe91   : > { %18975 = vmatprep.subr.bf16.mxu0 %v21977_v47  ;;  %v5825_v47 = vld [vmem:[%s26408_s29 + $0x18] sm:$0xff]  ;;  %v19011_v20 = vpack.c.bf16 %v15209_v13, %v15207_v12 }
 0xe92   : > { %v18984_v6 = vpack.c.bf16 %v5825_v47, %v5823_v28  ;;  %v6157_v28 = vrot.slane %v22688_v26, 1  ;;  %v6158_v47 = vrot.slane %v22691_v27, 1 }
 0xe93   : > { %17239 = vmatmul.mubr.msk.f32.vlgmr.msra.gmra.mrb[64].mxu0 %vm2189_vm11, %v5727_v19  ;;  %v6060_v19 = vrot.slane %v22729_v34, 3 }
 0xe94   : > { %18977 = vmatpush1.bf16.msra.mxu0 %v21985_v50  ;;  %5933 = vmatprep.mubr.f32.mxu0 %v20444_v7  ;;  %v5822_v50 = vld [vmem:[%s26408_s29] sm:$0xff] }
 0xe95   : > { %18980 = vmatprep.subr.msk.bf16.mxu0 %vm20619_vm2, %v18978_v21  ;;  %v18986_v33 = vpack.c.bf16 %v5824_v23, %v5822_v50  ;;  %v19014_v21 = vpack.c.bf16 %v15250_v15, %v15248_v14  ;;  %v6061_v25 = vsel %vm849_vm5, %v6058_v8, %v6060_v19  ;;  %v6160_v50 = vrot.slane %v22710_v58, 1  ;;  %v6421_v8 = vld [vmem:[%s26413_s19 + $0x80] sm:$0xff] }
 0xe97   : > { %v6161_v32 = vsel %vm952_vm6, %v6158_v47, %v6160_v50 }
 0xe98   : > { %18983 = vmatpush1.bf16.msk.msra.mxu0 %vm20619_vm2, %v18981_v29  ;;  %v15249_v29 = vld [vmem:[%s26408_s29 + $0x110] sm:$0xff] }
 0xe99   : > { %18985 = vmatprep.subr.bf16.mxu0 %v18984_v6  ;;  %v6159_v6 = vsel %vm952_vm6, %v6157_v28, %v6158_v47  ;;  %v19016_v23 = vpack.c.bf16 %v15249_v29, %v15247_v30 }
 0xe9b   : > { %15221 = vmatmul.mubr.msk.f32.vlgmr.msra.gmra.mrb[66].mxu0 %vm648_vm4, %v5852_v31  ;;  %v15253_v31 = vld [vmem:[%s26408_s29 + $0x130] sm:$0xf] }
 0xe9c   : > { %5939 = vmatprep.mubr.f32.mxu0 %v20444_v7  ;;  %18987 = vmatpush1.bf16.msra.mxu0 %v18986_v33  ;;  %v6162_v33 = vrot.slane %v22729_v34, 1 }
 0xe9d   : > { %18990 = vmatprep.subr.msk.bf16.mxu0 %vm20619_vm2, %v18988_v35  ;;  %v19021_v35 = vpack.c.bf16 %v15253_v31, %v15251_v0 }
 0xe9e   : > { %v6163_v36 = vsel %vm952_vm6, %v6160_v50, %v6162_v33 }
 0xe9f   : > { %15222 = vmatmul.mubr.msk.f32.gmra.mrb[68].mxu0 %vm648_vm4, %v5854_v40  ;;  %v6270_v40 = vrot.slane %v22710_v58, 4 }
 0xea0   : > { %5945 = vmatprep.mubr.f32.mxu0 %v20444_v7  ;;  %18993 = vmatpush1.bf16.msk.msra.mxu0 %vm20619_vm2, %v18991_v42  ;;  %v6272_v42 = vrot.slane %v22729_v34, 4  ;;  %v6407_v34 = vld [vmem:[%s26413_s19 + $0x10] sm:$0xff] }
 0xea1   : > { %18995 = vmatprep.subr.bf16.mxu0 %v18994_v43  ;;  %v6271_v41 = vsel %vm655_vm0, %v6268_v38, %v6270_v40 }
 0xea3   : > { %15223 = vmatmul.mubr.msk.f32.gmra.mrb[70].mxu0 %vm648_vm4, %v5856_v44  ;;  %v6408_v44 = vld [vmem:[%s26413_s19 + $0x18] sm:$0xff] }
 0xea4   : > { %6028 = vmatprep.mubr.f32.mxu0 %v20444_v7  ;;  %v19028_v45 = vpack.c.bf16 %v6408_v44, %v6407_v34 }
 0xea7   : > { %15226 = vmatmul.mubr.msk.f32.vlgmr.msra.gmra.mrb[66].mxu0 %vm648_vm4, %v22688_v26  ;;  %v6273_v26 = vsel %vm655_vm0, %v6270_v40, %v6272_v42 }
 0xea8   : > { %6034 = vmatprep.mubr.f32.mxu0 %v20444_v7  ;;  %18997 = vmatpush1.bf16.msra.mxu0 %v18996_v51  ;;  %v6411_v51 = vld [vmem:[%s26413_s19 + $0x30] sm:$0xff] }
 0xea9   : > { %19000 = vmatprep.subr.msk.bf16.mxu0 %vm20619_vm2, %v18998_v52  ;;  %v6412_v52 = vld [vmem:[%s26413_s19 + $0x38] sm:$0xff] }
 0xeaa   : > { %v19034_v53 = vpack.c.bf16 %v6412_v52, %v6411_v51  ;;  %v6520_v51 = vld [vmem:[%s26415_s4 + $0x40] sm:$0xff]  ;;  %v6521_v52 = vld [vmem:[%s26415_s4 + $0x48] sm:$0xff] }
 0xeab   : > { %15227 = vmatmul.mubr.msk.f32.gmra.mrb[68].mxu0 %vm648_vm4, %v22691_v27  ;;  %v6405_v27 = vld [vmem:[%s26413_s19] sm:$0xff] }
 0xeac   : > { %6040 = vmatprep.mubr.f32.mxu0 %v20444_v7  ;;  %19003 = vmatpush1.bf16.msk.msra.mxu0 %vm20619_vm2, %v19001_v59  ;;  %v6415_v59 = vld [vmem:[%s26413_s19 + $0x50] sm:$0xff] }
 0xead   : > { %19005 = vmatprep.subr.bf16.mxu0 %v19004_v60  ;;  %v6416_v60 = vld [vmem:[%s26413_s19 + $0x58] sm:$0xff] }
 0xeae   : > { %v19040_v22 = vpack.c.bf16 %v6416_v60, %v6415_v59  ;;  %v6524_v59 = vld [vmem:[%s26415_s4 + $0x60] sm:$0xff]  ;;  %v6525_v60 = vld [vmem:[%s26415_s4 + $0x68] sm:$0xff] }
 0xeaf   : > { %15228 = vmatmul.mubr.msk.f32.gmra.mrb[70].mxu0 %vm648_vm4, %v22710_v58  ;;  %v6406_v58 = vld [vmem:[%s26413_s19 + $0x8] sm:$0xff] }
 0xeb0   : > { %6138 = vmatprep.mubr.f32.mxu0 %v20444_v7  ;;  %v19025_v43 = vpack.c.bf16 %v6406_v58, %v6405_v27  ;;  %v6516_v27 = vld [vmem:[%s26415_s4 + $0x20] sm:$0xff]  ;;  %v6517_v58 = vld [vmem:[%s26415_s4 + $0x28] sm:$0xff] }
 0xeb1   : > { %v19058_v44 = vpack.c.bf16 %v6517_v58, %v6516_v27  ;;  %v6786_v27 = vld [vmem:[%s26364_s7 + $0x28] sm:$0xff] }
 0xeb2   : > { %19026 = vmatpush1.bf16.msra.mxu1 %v19025_v43 }
 0xeb3   : > { %15239 = vmatmul.mubr.msk.f32.vlgmr.msra.gmra.mrb[66].mxu0 %vm648_vm4, %v6057_v5  ;;  %19027 = vmatprep.subr.bf16.mxu1 %v20446_v16  ;;  %v19046_v5 = vpack.c.bf16 %v6420_v4, %v6419_v3  ;;  %v6528_v3 = vld [vmem:[%s26415_s4 + $0x80] sm:$0xff]  ;;  %v6529_v4 = vld [vmem:[%s26415_s4 + $0x88] sm:$0xff] }
 0xeb4   : > { %6144 = vmatprep.mubr.f32.mxu0 %v20444_v7  ;;  %19007 = vmatpush1.bf16.msra.mxu0 %v19006_v9  ;;  %v6422_v9 = vld [vmem:[%s26413_s19 + $0x88] sm:$0xff] }
 0xeb5   : > { %19010 = vmatprep.subr.msk.bf16.mxu0 %vm20619_vm2, %v19008_v11  ;;  %v19049_v11 = vpack.c.bf16 %v6422_v9, %v6421_v8 }
 0xeb6   : > { %19029 = vmatpush1.bf16.msra.mxu1 %v19028_v45 }
 0xeb7   : > { %15240 = vmatmul.mubr.msk.f32.gmra.mrb[68].mxu0 %vm648_vm4, %v6059_v17  ;;  %19030 = vmatprep.subr.bf16.mxu1 %v20446_v16 }
 0xeb8   : > { %6150 = vmatprep.mubr.f32.mxu0 %v20444_v7  ;;  %19013 = vmatpush1.bf16.msk.msra.mxu0 %vm20619_vm2, %v19011_v20 }
 0xeb9   : > { %19015 = vmatprep.subr.bf16.mxu0 %v19014_v21 }
 0xeba   : > { %19032 = vmatpush1.bf16.msra.mxu1 %v19031_v49  ;;  %v19061_v49 = vpack.c.bf16 %v6519_v48, %v6518_v46  ;;  %v6788_v46 = vld [vmem:[%s26364_s7 + $0x38] sm:$0xff] }
 0xebb   : > { %15241 = vmatmul.mubr.msk.f32.gmra.mrb[70].mxu0 %vm648_vm4, %v6061_v25  ;;  %19033 = vmatprep.subr.bf16.mxu1 %v20446_v16  ;;  %v6381_v25 = vld [vmem:[%s26414_s25] sm:$0x3] }
 0xebc   : > { %6240 = vmatprep.mubr.f32.mxu0 %v20444_v7  ;;  %v6386_v28 = vrot.slane %v6381_v25, %v20886_v63  ;;  %v6390_v47 = vrot.slane %v6381_v25, %v20891_v1 }
 0xebe   : > { %19035 = vmatpush1.bf16.msra.mxu1 %v19034_v53  ;;  %v19064_v53 = vpack.c.bf16 %v6521_v52, %v6520_v51  ;;  %v15286_v51 = vld [vmem:[%s26364_s7 + $0xc8] sm:$0xff] }
 0xebf   : > { %15244 = vmatmul.mubr.msk.f32.vlgmr.msra.gmra.mrb[66].mxu0 %vm648_vm4, %v6159_v6  ;;  %19036 = vmatprep.subr.bf16.mxu1 %v20446_v16  ;;  %v6513_v6 = vld [vmem:[%s26415_s4 + $0x8] sm:$0xff] }
 0xec0   : > { %6246 = vmatprep.mubr.f32.mxu0 %v20444_v7  ;;  %19017 = vmatpush1.bf16.msra.mxu0 %v19016_v23  ;;  %v19052_v0 = vpack.c.bf16 %v6513_v6, %v6512_v57 }
 0xec1   : > { %19020 = vmatprep.subr.msk.bf16.mxu0 %vm20619_vm2, %v19018_v18 }
 0xec2   : > { %19038 = vmatpush1.bf16.msra.mxu1 %v19037_v56  ;;  %v19067_v56 = vpack.c.bf16 %v6523_v55, %v6522_v54  ;;  %v15287_v54 = vld [vmem:[%s26364_s7 + $0xd0] sm:$0xff] }
 0xec3   : > { %15245 = vmatmul.mubr.msk.f32.gmra.mrb[68].mxu0 %vm648_vm4, %v6161_v32  ;;  %19039 = vmatprep.subr.bf16.mxu1 %v20446_v16 }
 0xec4   : > { %6252 = vmatprep.mubr.f32.mxu0 %v20444_v7  ;;  %19023 = vmatpush1.bf16.msk.msra.mxu0 %vm20619_vm2, %v19021_v35  ;;  %v6514_v35 = vld [vmem:[%s26415_s4 + $0x10] sm:$0xff] }
 0xec6   : > { %19041 = vmatpush1.bf16.msra.mxu1 %v19040_v22  ;;  %v19070_v22 = vpack.c.bf16 %v6525_v60, %v6524_v59  ;;  %v15270_v59 = vld [vmem:[%s26364_s7 + $0x48] sm:$0xff]  ;;  %v15271_v60 = vld [vmem:[%s26364_s7 + $0x50] sm:$0xff] }
 0xec7   : > { %15246 = vmatmul.mubr.msk.f32.gmra.mrb[70].mxu0 %vm648_vm4, %v6163_v36  ;;  %19042 = vmatprep.subr.bf16.mxu1 %v20446_v16  ;;  %v6515_v36 = vld [vmem:[%s26415_s4 + $0x18] sm:$0xff] }
 0xec8   : > { %6350 = vmatprep.mubr.f32.mxu0 %v20444_v7  ;;  %v19055_v40 = vpack.c.bf16 %v6515_v36, %v6514_v35  ;;  %v6696_v35 = vld [vmem:[%s26363_s6] sm:$0xff]  ;;  %v15279_v36 = vld [vmem:[%s26364_s7 + $0x90] sm:$0xff] }
 0xeca   : > { %19044 = vmatpush1.bf16.msra.mxu1 %v19043_v2  ;;  %v19073_v2 = vpack.c.bf16 %v6527_v61, %v6526_v24  ;;  %v15291_v24 = vld [vmem:[%s26364_s7 + $0xe0] sm:$0xff] }
 0xecb   : > { %15257 = vmatmul.mubr.msk.f32.vlgmr.msra.gmra.mrb[66].mxu0 %vm648_vm4, %v6269_v39  ;;  %19045 = vmatprep.subr.bf16.mxu1 %v20446_v16 }
 0xecc   : > { %6356 = vmatprep.mubr.f32.mxu0 %v20444_v7 }
 0xece   : > { %19047 = vmatpush1.bf16.msra.mxu1 %v19046_v5  ;;  %v19076_v5 = vpack.c.bf16 %v6529_v4, %v6528_v3  ;;  %v19123_v4 = vpack.c.bf16 %v15271_v60, %v15270_v59  ;;  %v7298_v59 = vld [vmem:[%s26367_s10 + $0x8] sm:$0xff] }
 0xecf   : > { %15258 = vmatmul.mubr.msk.f32.gmra.mrb[68].mxu0 %vm648_vm4, %v6271_v41  ;;  %19048 = vmatprep.subr.bf16.mxu1 %v20446_v16 }
 0xed0   : > { %6362 = vmatprep.mubr.f32.mxu0 %v20444_v7 }
 0xed2   : > { %19050 = vmatpush1.bf16.msra.mxu1 %v19049_v11  ;;  %v6613_v11 = vld [vmem:[%s26416_s5] sm:$0xff] }
 0xed3   : > { %15259 = vmatmul.mubr.msk.f32.gmra.mrb[70].mxu0 %vm648_vm4, %v6273_v26  ;;  %19051 = vmatprep.subr.bf16.mxu1 %v20446_v16 }
 0xed4   : > { %17247 = vmatprep.mubr.msk.f32.mxu0 %vm1413_vm8, %v6613_v11  ;;  %v15273_v11 = vld [vmem:[%s26364_s7 + $0x60] sm:$0xff] }
 0xf62   : > { %v5723_v12 = vpop.f32.mrb[62].mxu0 }
 0xf63   : > { %v17235_v13 = vpop.f32.mrb[63].mxu0 }
 0xf64   : > { %v6782_v13 = vld [vmem:[%s26364_s7 + $0x8] sm:$0xff] }
 0xf66   : > { %v5797_v14 = vpop.f32.mrb[64].mxu0 }
 0xf67   : > { %v5801_v15 = vmax.f32 %v5723_v12, %v5797_v14  ;;  %v17240_v17 = vpop.f32.mrb[65].mxu0  ;;  %v6781_v12 = vld [vmem:[%s26364_s7] sm:$0xff] }
 0xf68   : > { %v19099_v14 = vpack.c.bf16 %v6782_v13, %v6781_v12  ;;  %v6784_v17 = vld [vmem:[%s26364_s7 + $0x18] sm:$0xff] }
 0xf69   : > { %5802 = vst.msk [vmem:[#allocation2 + $0x2] sm:$0x1] %vm2338_vm12, %v5801_v15  ;;  %v5812_v19 = vrot.slane %v5801_v15, 3  ;;  %v5804_v20 = vrot.slane %v5801_v15, 1  ;;  %v5809_v21 = vrot.slane %v5801_v15, 2  ;;  %v6783_v15 = vld [vmem:[%s26364_s7 + $0x10] sm:$0xff] }
 0xf6b   : > { %5813 = vrot.lane.b32.xlu1 %v5812_v19, %s26417_s21  ;;  %5805 = vrot.lane.b32.xlu0 %v5804_v20, %s26417_s21  ;;  %5811 = vst.msk [vmem:[#allocation2 + $0xa] sm:$0x1] %vm2338_vm12, %v5809_v21  ;;  %v19102_v19 = vpack.c.bf16 %v6784_v17, %v6783_v15 }
 0xf9e   : > { %v6352_v30 = vpop.f32.mrb[66].mxu0 }
 0xf9f   : > { %v22953_v29 = vadd.f32 %v6386_v28, %v6352_v30  ;;  %v6354_v62 = vpop.f32.mrb[67].mxu0 }
 0xfa0   : > { %v6394_v50 = vadd.f32 %v6390_v47, %v6354_v62 }
 0xfa1   : > { %v6399_v31 = vmax.f32 %v22953_v29, 0.0 }
 0xfa2   : > { %v6400_v23 = vmax.f32 %v6394_v50, 0.0  ;;  %v6358_v18 = vpop.f32.mrb[68].mxu0 }
 0xfa3   : > { %v6395_v32 = vadd.f32 %v6386_v28, %v6358_v18  ;;  %v6360_v33 = vpop.f32.mrb[69].mxu0 }
 0xfa4   : > { %v6396_v37 = vadd.f32 %v6390_v47, %v6360_v33  ;;  %15260 = vmatprep.mubr.msk.f32.mxu1 %vm1220_vm7, %v6400_v23  ;;  %v6614_v33 = vld [vmem:[%s26416_s5 + $0x8] sm:$0xf] }
 0xfa5   : > { %6497 = vmatmul.mubr.f32.vlgmr.msra.gmra.mrb[60].mxu1 %v6399_v31  ;;  %v6401_v41 = vmax.f32 %v6395_v32, 0.0 }
 0xfa6   : > { %v6402_v38 = vmax.f32 %v6396_v37, 0.0  ;;  %19053 = vmatpush1.bf16.msra.mxu1 %v19052_v0  ;;  %v6364_v39 = vpop.f32.mrb[70].mxu0  ;;  %v15280_v37 = vld [vmem:[%s26364_s7 + $0x98] sm:$0xff] }
 0xfa7   : > { %v6397_v42 = vadd.f32 %v6386_v28, %v6364_v39  ;;  %v6366_v26 = vpop.f32.mrb[71].mxu0  ;;  %19054 = vmatprep.subr.bf16.mxu1 %v20446_v16  ;;  %v19087_v39 = vpack.c.bf16 %v15280_v37, %v15279_v36  ;;  %v15296_v37 = vld [vmem:[%s26364_s7 + $0x108] sm:$0xff] }
 0xfa8   : > { %v6398_v34 = vadd.f32 %v6390_v47, %v6366_v26  ;;  %15261 = vmatprep.mubr.msk.f32.mxu1 %vm1220_vm7, %v6402_v38  ;;  %v6785_v26 = vld [vmem:[%s26364_s7 + $0x20] sm:$0xff] }
 0xfa9   : > { %6502 = vmatmul.mubr.f32.gmra.mrb[62].mxu1 %v6401_v41  ;;  %v6403_v45 = vmax.f32 %v6397_v42, 0.0  ;;  %v19105_v58 = vpack.c.bf16 %v6786_v27, %v6785_v26  ;;  %v15298_v26 = vld [vmem:[%s26364_s7 + $0x118] sm:$0xff] }
 0xfaa   : > { %v6404_v43 = vmax.f32 %v6398_v34, 0.0  ;;  %19056 = vmatpush1.bf16.msra.mxu1 %v19055_v40  ;;  %v15281_v40 = vld [vmem:[%s26364_s7 + $0xa0] sm:$0xff]  ;;  %v15283_v34 = vld [vmem:[%s26364_s7 + $0xb0] sm:$0xff] }
 0xfab   : > { %19057 = vmatprep.subr.bf16.mxu1 %v20446_v16 }
 0xfac   : > { %15262 = vmatprep.mubr.msk.f32.mxu1 %vm1220_vm7, %v6404_v43 }
 0xfad   : > { %6507 = vmatmul.mubr.f32.gmra.mrb[64].mxu1 %v6403_v45 }
 0xfae   : > { %19059 = vmatpush1.bf16.msra.mxu1 %v19058_v44  ;;  %15263 = vmatprep.mubr.msk.f32.mxu1 %vm1220_vm7, %v6400_v23 }
 0xfaf   : > { %19060 = vmatprep.subr.bf16.mxu1 %v20446_v16 }
 0xfb2   : > { %19062 = vmatpush1.bf16.msra.mxu1 %v19061_v49  ;;  %v15285_v49 = vld [vmem:[%s26364_s7 + $0xc0] sm:$0xff] }
 0xfb3   : > { %19063 = vmatprep.subr.bf16.mxu1 %v20446_v16  ;;  %v19096_v52 = vpack.c.bf16 %v15286_v51, %v15285_v49  ;;  %v15308_v49 = vld [vmem:[%s26364_s7 + $0x158] sm:$0xff] }
 0xfb6   : > { %19065 = vmatpush1.bf16.msra.mxu1 %v19064_v53  ;;  %v6789_v53 = vld [vmem:[%s26364_s7 + $0x40] sm:$0xff] }
 0xfb7   : > { %19066 = vmatprep.subr.bf16.mxu1 %v20446_v16 }
 0xfba   : > { %19068 = vmatpush1.bf16.msra.mxu1 %v19067_v56 }
 0xfbb   : > { %19069 = vmatprep.subr.bf16.mxu1 %v20446_v16 }
 0xfbe   : > { %19071 = vmatpush1.bf16.msra.mxu1 %v19070_v22  ;;  %v15290_v22 = vld [vmem:[%s26364_s7 + $0xd8] sm:$0xff] }
 0xfbf   : > { %19072 = vmatprep.subr.bf16.mxu1 %v20446_v16 }
 0xfc2   : > { %19074 = vmatpush1.bf16.msra.mxu1 %v19073_v2 }
 0xfc3   : > { %19075 = vmatprep.subr.bf16.mxu1 %v20446_v16 }
 0xfc6   : > { %19077 = vmatpush1.bf16.msra.mxu1 %v19076_v5 }
 0xfc7   : > { %19098 = vmatprep.subr.bf16.mxu1 %v20446_v16 }
 0xfc9   : > { %6595 = vmatmul.mubr.f32.vlgmr.msra.gmra.mrb[66].mxu1 %v6399_v31 }
 0xfca   : > { %15264 = vmatprep.mubr.msk.f32.mxu1 %vm1220_vm7, %v6402_v38  ;;  %19100 = vmatpush3.bf16.msra.mxu1 %v19099_v14  ;;  %v6697_v38 = vld [vmem:[%s26363_s6 + $0x8] sm:$0xf] }
 0xfcb   : > { %19101 = vmatprep.subr.bf16.mxu1 %v20446_v16 }
 0xfcd   : > { %6600 = vmatmul.mubr.f32.gmra.mrb[68].mxu1 %v6401_v41  ;;  %v15282_v41 = vld [vmem:[%s26364_s7 + $0xa8] sm:$0xff] }
 0xfce   : > { %15265 = vmatprep.mubr.msk.f32.mxu1 %vm1220_vm7, %v6404_v43  ;;  %19103 = vmatpush3.bf16.msra.mxu1 %v19102_v19  ;;  %v19090_v42 = vpack.c.bf16 %v15282_v41, %v15281_v40  ;;  %v15284_v43 = vld [vmem:[%s26364_s7 + $0xb8] sm:$0xff]  ;;  %v15278_v40 = vld [vmem:[%s26364_s7 + $0x88] sm:$0xff]  ;;  %v15301_v41 = vld [vmem:[%s26364_s7 + $0x120] sm:$0xff] }
 0xfcf   : > { %19104 = vmatprep.subr.bf16.mxu1 %v20446_v16  ;;  %v19093_v44 = vpack.c.bf16 %v15284_v43, %v15283_v34  ;;  %v15304_v34 = vld [vmem:[%s26364_s7 + $0x138] sm:$0xff] }
 0xfd1   : > { %6605 = vmatmul.mubr.f32.gmra.mrb[70].mxu1 %v6403_v45  ;;  %v6787_v45 = vld [vmem:[%s26364_s7 + $0x30] sm:$0xff] }
 0xfd2   : > { %17298 = vmatprep.mubr.msk.f32.mxu1 %vm20447_vm9, %v20444_v7  ;;  %19106 = vmatpush3.bf16.msra.mxu1 %v19105_v58  ;;  %v19108_v48 = vpack.c.bf16 %v6788_v46, %v6787_v45  ;;  %v15303_v58 = vld [vmem:[%s26364_s7 + $0x130] sm:$0xff]  ;;  %v15306_v45 = vld [vmem:[%s26364_s7 + $0x148] sm:$0xff] }
 0xfd3   : > { %19107 = vmatprep.subr.bf16.mxu1 %v20446_v16  ;;  %v19138_v43 = vpack.c.bf16 %v15304_v34, %v15303_v58 }
 0xfd6   : > { %19109 = vmatpush3.bf16.msra.mxu1 %v19108_v48  ;;  %v15307_v48 = vld [vmem:[%s26364_s7 + $0x150] sm:$0xff] }
 0xfd7   : > { %17296 = vmatprep.subr.mxu1 %v20444_v7  ;;  %v19144_v51 = vpack.c.bf16 %v15308_v49, %v15307_v48 }
 0xfda   : > { %17297 = vmatpush3.msra.mxu1 %v6789_v53  ;;  %v7211_v53 = vld [vmem:[%s26366_s9] sm:$0xff] }
 0xfdb   : > { %19122 = vmatprep.subr.bf16.mxu1 %v20446_v16 }
 0xfdd   : > { %v5814_v8 = vpop.permute.xlu1 %5813  ;;  %v5806_v9 = vpop.permute.xlu0 %5805 }
 0xfde   : > { %5816 = vst.msk [vmem:[#allocation2 + $0xa] sm:$0x1] %vm2345_vm13, %v5814_v8  ;;  %5808 = vst.msk [vmem:[#allocation2 + $0x2] sm:$0x1] %vm2345_vm13, %v5806_v9  ;;  %v19111_v8 = vpack.c.bf16 %v15291_v24, %v15290_v22  ;;  %v15272_v9 = vld [vmem:[%s26364_s7 + $0x58] sm:$0xff]  ;;  %v7213_v22 = vld [vmem:[%s26366_s9 + $0x10] sm:$0xff] }
 0xfdf   : > { %v7214_v24 = vld [vmem:[%s26366_s9 + $0x18] sm:$0xff] }
0x1078   : > { %v6498_v20 = vpop.f32.mrb[60].mxu1 }
0x1079   : > { %v6500_v21 = vpop.f32.mrb[61].mxu1 }
0x107c   : > { %v6503_v25 = vpop.f32.mrb[62].mxu1 }
0x107d   : > { %v6505_v28 = vpop.f32.mrb[63].mxu1 }
0x107e   : > { %v15292_v28 = vld [vmem:[%s26364_s7 + $0xe8] sm:$0xff] }
0x1080   : > { %v6508_v47 = vpop.f32.mrb[64].mxu1 }
0x1081   : > { %v6510_v30 = vpop.f32.mrb[65].mxu1 }
0x109c   : > { %v6596_v29 = vpop.f32.mrb[66].mxu1 }
0x109d   : > { %v6610_v62 = vmax.f32 %v6498_v20, %v6596_v29  ;;  %v6598_v57 = vpop.f32.mrb[67].mxu1  ;;  %v15274_v29 = vld [vmem:[%s26364_s7 + $0x68] sm:$0xff] }
0x10a0   : > { %v6601_v6 = vpop.f32.mrb[68].mxu1 }
0x10a1   : > { %v6611_v50 = vmax.f32 %v6503_v25, %v6601_v6  ;;  %v6603_v23 = vpop.f32.mrb[69].mxu1  ;;  %v19126_v25 = vpack.c.bf16 %v15273_v11, %v15272_v9  ;;  %v7301_v9 = vld [vmem:[%s26367_s10 + $0x20] sm:$0xff] }
0x10a3   : > { %v19078_v18 = vpack.c.bf16 %v6611_v50, %v6610_v62  ;;  %v15275_v62 = vld [vmem:[%s26364_s7 + $0x70] sm:$0xff] }
0x10a4   : > { %v6606_v0 = vpop.f32.mrb[70].mxu1 }
0x10a5   : > { %v6612_v31 = vmax.f32 %v6508_v47, %v6606_v0  ;;  %v6608_v32 = vpop.f32.mrb[71].mxu1  ;;  %19079 = vmatprep.subr.bf16.mxu0 %v19078_v18  ;;  %v15293_v47 = vld [vmem:[%s26364_s7 + $0xf0] sm:$0xff]  ;;  %v15294_v0 = vld [vmem:[%s26364_s7 + $0xf8] sm:$0xff] }
0x10a6   : > { %19081 = vmatpush3.bf16.msra.mxu0 %v19078_v18  ;;  %v19114_v23 = vpack.c.bf16 %v15293_v47, %v15292_v28  ;;  %v15276_v32 = vld [vmem:[%s26364_s7 + $0x78] sm:$0xff]  ;;  %v7220_v28 = vld [vmem:[%s26366_s9 + $0x48] sm:$0xff]  ;;  %v7305_v47 = vld [vmem:[%s26367_s10 + $0x40] sm:$0xff] }
0x10a7   : > { %17245 = vmatprep.subr.mxu0 %v6612_v31 }
0x10aa   : > { %17246 = vmatpush3.msra.mxu0 %v6612_v31 }
0x10ab   : > { %17248 = vmatmul.mubr.msk.f32.vlgmr.msra.gmra.mrb[72].mxu0 %vm1413_vm8, %v6614_v33  ;;  %19083 = vmatprep.subr.bf16.mxu0 %v19078_v18  ;;  %v15277_v33 = vld [vmem:[%s26364_s7 + $0x80] sm:$0xff] }
0x10ac   : > { %19085 = vmatpush3.bf16.msra.mxu0 %v19078_v18  ;;  %17256 = vmatprep.mubr.msk.f32.mxu0 %vm1413_vm8, %v6696_v35  ;;  %v19129_v18 = vpack.c.bf16 %v15275_v62, %v15274_v29  ;;  %v19132_v36 = vpack.c.bf16 %v15277_v33, %v15276_v32  ;;  %v7224_v32 = vld [vmem:[%s26366_s9 + $0x68] sm:$0xff]  ;;  %v7309_v33 = vld [vmem:[%s26367_s10 + $0x60] sm:$0xff] }
0x10ad   : > { %17254 = vmatprep.subr.mxu0 %v6612_v31 }
0x10b0   : > { %17255 = vmatpush3.msra.mxu0 %v6612_v31  ;;  %v15295_v31 = vld [vmem:[%s26364_s7 + $0x100] sm:$0xff] }
0x10b1   : > { %17257 = vmatmul.mubr.msk.f32.vlgmr.msra.gmra.mrb[74].mxu0 %vm1413_vm8, %v6697_v38  ;;  %19086 = vmatprep.subr.bf16.mxu0 %v20446_v16  ;;  %v19117_v35 = vpack.c.bf16 %v15295_v31, %v15294_v0  ;;  %v15297_v38 = vld [vmem:[%s26364_s7 + $0x110] sm:$0xff]  ;;  %v7223_v31 = vld [vmem:[%s26366_s9 + $0x60] sm:$0xff] }
0x10b2   : > { %19088 = vmatpush3.bf16.msra.mxu0 %v19087_v39  ;;  %17277 = vmatprep.mubr.msk.f32.mxu0 %vm20447_vm9, %v20444_v7  ;;  %v19120_v39 = vpack.c.bf16 %v15297_v38, %v15296_v37  ;;  %v7225_v38 = vld [vmem:[%s26366_s9 + $0x70] sm:$0xff] }
0x10b3   : > { %19089 = vmatprep.subr.bf16.mxu0 %v20446_v16 }
0x10b6   : > { %19091 = vmatpush3.bf16.msra.mxu0 %v19090_v42  ;;  %v15302_v42 = vld [vmem:[%s26364_s7 + $0x128] sm:$0xff] }
0x10b7   : > { %19092 = vmatprep.subr.bf16.mxu0 %v20446_v16  ;;  %v19135_v27 = vpack.c.bf16 %v15302_v42, %v15301_v41  ;;  %v7311_v41 = vld [vmem:[%s26367_s10 + $0x70] sm:$0xff]  ;;  %v7312_v42 = vld [vmem:[%s26367_s10 + $0x78] sm:$0xff] }
0x10ba   : > { %19094 = vmatpush3.bf16.msra.mxu0 %v19093_v44  ;;  %v15305_v44 = vld [vmem:[%s26364_s7 + $0x140] sm:$0xff] }
0x10bb   : > { %19095 = vmatprep.subr.bf16.mxu0 %v20446_v16  ;;  %v19141_v46 = vpack.c.bf16 %v15306_v45, %v15305_v44 }
0x10be   : > { %19097 = vmatpush3.bf16.msra.mxu0 %v19096_v52  ;;  %v15309_v52 = vld [vmem:[%s26364_s7 + $0x160] sm:$0xff] }
0x10bf   : > { %17275 = vmatprep.subr.mxu0 %v20444_v7 }
0x10c2   : > { %17276 = vmatpush3.msra.mxu0 %v15287_v54  ;;  %v7212_v54 = vld [vmem:[%s26366_s9 + $0x8] sm:$0xff] }
0x10c3   : > { %19110 = vmatprep.subr.bf16.mxu0 %v20446_v16 }
0x117e   : > { %v17249_v55 = vpop.f32.mrb[72].mxu0 }
0x117f   : > { %v6687_v56 = vpop.f32.mrb[73].mxu0 }
0x1184   : > { %v17258_v61 = vpop.f32.mrb[74].mxu0 }
0x1185   : > { %v6780_v2 = vmax.f32 %v17249_v55, %v17258_v61  ;;  %v6770_v3 = vpop.f32.mrb[75].mxu0  ;;  %v7297_v55 = vld [vmem:[%s26367_s10] sm:$0xff]  ;;  %v7299_v61 = vld [vmem:[%s26367_s10 + $0x10] sm:$0xff] }
0x1186   : > { %v6779_v5 = vmax.f32 %v6687_v56, %v6770_v3  ;;  %v19147_v56 = vpack.c.bf16 %v7212_v54, %v7211_v53  ;;  %v19171_v60 = vpack.c.bf16 %v7298_v59, %v7297_v55  ;;  %v7300_v3 = vld [vmem:[%s26367_s10 + $0x18] sm:$0xff]  ;;  %v15311_v55 = vld [vmem:[%s26365_s8] ss:$0 sm:$0xff] }
0x1187   : > { %v6811_v12 = vrot.slane %v6780_v2, 2  ;;  %v6967_v13 = vrot.slane %v6780_v2, 3  ;;  %v7042_v14 = vrot.slane %v6780_v2, 1  ;;  %v7126_v15 = vrot.slane %v6780_v2, 4 }
0x1188   : > { %17299 = vmatmul.mubr.msk.f32.vlgmr.msra.gmra.mrb[72].mxu1 %vm1614_vm10, %v6779_v5  ;;  %v6810_v17 = vrot.slane %v6779_v5, 2  ;;  %v7041_v19 = vrot.slane %v6779_v5, 1  ;;  %v6966_v20 = vrot.slane %v6779_v5, 3  ;;  %v7125_v21 = vrot.slane %v6779_v5, 4  ;;  %v7215_v5 = vld [vmem:[%s26366_s9 + $0x20] sm:$0xff] }
0x1189   : > { %19124 = vmatpush3.bf16.msra.mxu1 %v19123_v4  ;;  %17340 = vmatprep.mubr.msk.f32.mxu1 %vm20447_vm9, %v20444_v7  ;;  %v19150_v2 = vpack.c.bf16 %v7214_v24, %v7213_v22  ;;  %v19174_v4 = vpack.c.bf16 %v7300_v3, %v7299_v61  ;;  %v15327_v22 = vld [vmem:[%s26408_s29 + $0x88] sm:$0xff]  ;;  %v15329_v24 = vld [vmem:[%s26408_s29 + $0x98] sm:$0xff] }
0x118a   : > { %v6812_v30 = vsel %vm640_vm3, %v6810_v17, %v6811_v12  ;;  %19125 = vmatprep.subr.bf16.mxu1 %v20446_v16  ;;  %v7043_v57 = vsel %vm952_vm6, %v7041_v19, %v7042_v14  ;;  %v6968_v6 = vsel %vm849_vm5, %v6966_v20, %v6967_v13  ;;  %v7127_v50 = vsel %vm655_vm0, %v7125_v21, %v7126_v15  ;;  %v7302_v12 = vld [vmem:[%s26367_s10 + $0x28] sm:$0xff]  ;;  %v7217_v13 = vld [vmem:[%s26366_s9 + $0x30] sm:$0xff]  ;;  %v7218_v14 = vld [vmem:[%s26366_s9 + $0x38] sm:$0xff] }
0x118b   : > { %17278 = vmatmul.mubr.msk.f32.vlgmr.msra.gmra.mrb[76].mxu0 %vm1614_vm10, %v6812_v30  ;;  %v19177_v15 = vpack.c.bf16 %v7302_v12, %v7301_v9  ;;  %v7303_v17 = vld [vmem:[%s26367_s10 + $0x30] sm:$0xff]  ;;  %v7304_v19 = vld [vmem:[%s26367_s10 + $0x38] sm:$0xff]  ;;  %v19156_v20 = vpack.c.bf16 %v7218_v14, %v7217_v13  ;;  %v7306_v30 = vld [vmem:[%s26367_s10 + $0x48] sm:$0xff]  ;;  %v19194_v9 = vpack.c.bf16 %v15329_v24, %v15327_v22 }
0x118c   : > { %19112 = vmatpush3.bf16.msra.mxu0 %v19111_v8  ;;  %17319 = vmatprep.mubr.msk.f32.mxu0 %vm20447_vm9, %v20444_v7  ;;  %v7216_v8 = vld [vmem:[%s26366_s9 + $0x28] sm:$0xff]  ;;  %v19180_v21 = vpack.c.bf16 %v7304_v19, %v7303_v17  ;;  %v19183_v62 = vpack.c.bf16 %v7306_v30, %v7305_v47  ;;  %v15328_v12 = vld [vmem:[%s26408_s29 + $0x90] sm:$0xff]  ;;  %v15333_v14 = vld [vmem:[%s26408_s29 + $0xb8] sm:$0xf] }
0x118d   : > { %19127 = vmatpush3.bf16.msra.mxu1 %v19126_v25  ;;  %19113 = vmatprep.subr.bf16.mxu0 %v20446_v16  ;;  %v19153_v11 = vpack.c.bf16 %v7216_v8, %v7215_v5  ;;  %v7219_v25 = vld [vmem:[%s26366_s9 + $0x40] sm:$0xff]  ;;  %v15331_v13 = vld [vmem:[%s26408_s29 + $0xa8] sm:$0xff]  ;;  %v7556_v30 = vld [vmem:[%s26408_s29 + $0x18] sm:$0xff] }
0x118e   : > { %19128 = vmatprep.subr.bf16.mxu1 %v20446_v16  ;;  %v19159_v29 = vpack.c.bf16 %v7220_v28, %v7219_v25  ;;  %v7384_v8 = vld [vmem:[%s26368_s11] sm:$0xf]  ;;  %v23382_v28 = vld [vmem:[%s20647_s27 + $0x88] sm:$0xff]  ;;  %v15320_v24 = vld [vmem:[%s26408_s29 + $0x50] sm:$0xff] }
0x118f   : > { %v15330_v19 = vld [vmem:[%s26408_s29 + $0xa0] sm:$0xff]  ;;  %v7554_v47 = vld [vmem:[%s26408_s29 + $0x8] sm:$0xff] }
0x1190   : > { %19115 = vmatpush3.bf16.msra.mxu0 %v19114_v23  ;;  %v7308_v23 = vld [vmem:[%s26367_s10 + $0x58] sm:$0xff]  ;;  %v23379_v25 = vld [vmem:[%s20647_s27 + $0x80] sm:$0xff] }
0x1191   : > { %19130 = vmatpush3.bf16.msra.mxu1 %v19129_v18  ;;  %19116 = vmatprep.subr.bf16.mxu0 %v20446_v16  ;;  %v15318_v22 = vld [vmem:[%s26408_s29 + $0x40] sm:$0xff] }
0x1192   : > { %19131 = vmatprep.subr.bf16.mxu1 %v20446_v16 }
0x1194   : > { %19118 = vmatpush3.bf16.msra.mxu0 %v19117_v35  ;;  %v19165_v35 = vpack.c.bf16 %v7224_v32, %v7223_v31  ;;  %v7560_v31 = vld [vmem:[%s26408_s29 + $0x38] sm:$0xf] }
0x1195   : > { %19133 = vmatpush3.bf16.msra.mxu1 %v19132_v36  ;;  %19119 = vmatprep.subr.bf16.mxu0 %v20446_v16  ;;  %v7310_v36 = vld [vmem:[%s26367_s10 + $0x68] sm:$0xff] }
0x1196   : > { %17338 = vmatprep.subr.mxu1 %v20444_v7  ;;  %v19189_v37 = vpack.c.bf16 %v7310_v36, %v7309_v33  ;;  %v23416_v36 = vld [vmem:[%s20647_s27 + $0x98] sm:$0xf] }
0x1198   : > { %19121 = vmatpush3.bf16.msra.mxu0 %v19120_v39  ;;  %v7226_v39 = vld [vmem:[%s26366_s9 + $0x78] sm:$0xff] }
0x1199   : > { %17339 = vmatpush3.msra.mxu1 %v15278_v40  ;;  %17317 = vmatprep.subr.mxu0 %v20444_v7  ;;  %v19168_v40 = vpack.c.bf16 %v7226_v39, %v7225_v38  ;;  %v7557_v38 = vld [vmem:[%s26408_s29 + $0x20] sm:$0xff]  ;;  %v7559_v39 = vld [vmem:[%s26408_s29 + $0x30] sm:$0xf] }
0x119a   : > { %17341 = vmatmul.mubr.msk.f32.vlgmr.msra.gmra.mrb[74].mxu1 %vm1614_vm10, %v7043_v57  ;;  %19146 = vmatprep.subr.bf16.mxu1 %v20446_v16  ;;  %v7221_v57 = vld [vmem:[%s26366_s9 + $0x50] sm:$0xff] }
0x119b   : > { %17396 = vmatprep.mubr.msk.f32.mxu1 %vm20447_vm9, %v20444_v7  ;;  %19148 = vmatpush3.bf16.msra.mxu1 %v19147_v56 }
0x119c   : > { %17318 = vmatpush3.msra.mxu0 %v15298_v26  ;;  %19149 = vmatprep.subr.bf16.mxu1 %v20446_v16  ;;  %v19192_v26 = vpack.c.bf16 %v7312_v42, %v7311_v41  ;;  %v15347_v41 = vld [vmem:[%s26408_s29 + $0xd8] sm:$0xff] }
0x119d   : > { %17320 = vmatmul.mubr.msk.f32.vlgmr.msra.gmra.mrb[78].mxu0 %vm1614_vm10, %v6968_v6  ;;  %19134 = vmatprep.subr.bf16.mxu0 %v20446_v16  ;;  %v7222_v6 = vld [vmem:[%s26366_s9 + $0x58] sm:$0xff] }
0x119e   : > { %19136 = vmatpush3.bf16.msra.mxu0 %v19135_v27  ;;  %17361 = vmatprep.mubr.msk.f32.mxu0 %vm20447_vm9, %v20444_v7  ;;  %v19162_v18 = vpack.c.bf16 %v7222_v6, %v7221_v57  ;;  %v7582_v57 = vrot.slane %v23382_v28, 2  ;;  %v23397_v6 = vld [vmem:[%s20647_s27 + $0x90] sm:$0xff] }
0x119f   : > { %19137 = vmatprep.subr.bf16.mxu0 %v20446_v16  ;;  %19151 = vmatpush3.bf16.msra.mxu1 %v19150_v2  ;;  %v7584_v33 = vrot.slane %v23397_v6, 2 }
0x11a0   : > { %19152 = vmatprep.subr.bf16.mxu1 %v20446_v16 }
0x11a1   : > { %v7585_v42 = vsel %vm640_vm3, %v7582_v57, %v7584_v33 }
0x11a2   : > { %19139 = vmatpush3.bf16.msra.mxu0 %v19138_v43 }
0x11a3   : > { %19140 = vmatprep.subr.bf16.mxu0 %v20446_v16  ;;  %19154 = vmatpush3.bf16.msra.mxu1 %v19153_v11  ;;  %v15326_v11 = vld [vmem:[%s26408_s29 + $0x80] sm:$0xff] }
0x11a4   : > { %19155 = vmatprep.subr.bf16.mxu1 %v20446_v16  ;;  %v19196_v17 = vpack.c.bf16 %v15328_v12, %v15326_v11  ;;  %v15324_v11 = vld [vmem:[%s26408_s29 + $0x70] sm:$0xf]  ;;  %v15363_v12 = vld [vmem:[%s26408_s29 + $0x108] sm:$0xff] }
0x11a6   : > { %19142 = vmatpush3.bf16.msra.mxu0 %v19141_v46 }
0x11a7   : > { %19143 = vmatprep.subr.bf16.mxu0 %v20446_v16  ;;  %19157 = vmatpush3.bf16.msra.mxu1 %v19156_v20  ;;  %v19198_v20 = vpack.c.bf16 %v15333_v14, %v15331_v13  ;;  %v15365_v13 = vld [vmem:[%s26408_s29 + $0x118] sm:$0xff] }
0x11a8   : > { %19158 = vmatprep.subr.bf16.mxu1 %v20446_v16 }
0x11aa   : > { %19145 = vmatpush3.bf16.msra.mxu0 %v19144_v51 }
0x11ab   : > { %17359 = vmatprep.subr.mxu0 %v20444_v7  ;;  %19160 = vmatpush3.bf16.msra.mxu1 %v19159_v29 }
0x11ac   : > { %19161 = vmatprep.subr.bf16.mxu1 %v20446_v16 }
0x11ae   : > { %17360 = vmatpush3.msra.mxu0 %v15309_v52 }
0x11af   : > { %17362 = vmatmul.mubr.msk.f32.vlgmr.msra.gmra.mrb[80].mxu0 %vm1614_vm10, %v7127_v50  ;;  %19170 = vmatprep.subr.bf16.mxu0 %v20446_v16  ;;  %v7307_v50 = vld [vmem:[%s26367_s10 + $0x50] sm:$0xff] }
0x11b0   : > { %17431 = vmatprep.mubr.msk.f32.mxu0 %vm20447_vm9, %v20444_v7  ;;  %19172 = vmatpush3.bf16.msra.mxu0 %v19171_v60  ;;  %v19186_v0 = vpack.c.bf16 %v7308_v23, %v7307_v50  ;;  %v19204_v50 = vpack.c.bf16 %v7556_v30, %v7554_v47  ;;  %v7553_v23 = vld [vmem:[%s26408_s29] sm:$0xff]  ;;  %v7889_v47 = vrot.slane %v23382_v28, 1 }
0x11b1   : > { %19173 = vmatprep.subr.bf16.mxu0 %v20446_v16  ;;  %19163 = vmatpush3.bf16.msra.mxu1 %v19162_v18  ;;  %v7555_v18 = vld [vmem:[%s26408_s29 + $0x10] sm:$0xff]  ;;  %v15362_v30 = vld [vmem:[%s26408_s29 + $0x100] sm:$0xff] }
0x11b2   : > { %19164 = vmatprep.subr.bf16.mxu1 %v20446_v16 }
0x11b4   : > { %19175 = vmatpush3.bf16.msra.mxu0 %v19174_v4 }
0x11b5   : > { %19176 = vmatprep.subr.bf16.mxu0 %v20446_v16  ;;  %19166 = vmatpush3.bf16.msra.mxu1 %v19165_v35  ;;  %v19206_v35 = vpack.c.bf16 %v7555_v18, %v7553_v23  ;;  %v7891_v23 = vrot.slane %v23397_v6, 1 }
0x11b6   : > { %19167 = vmatprep.subr.bf16.mxu1 %v20446_v16 }
0x11b8   : > { %19178 = vmatpush3.bf16.msra.mxu0 %v19177_v15  ;;  %v7458_v15 = vld [vmem:[%s26369_s12] sm:$0xf] }
0x11b9   : > { %19179 = vmatprep.subr.bf16.mxu0 %v20446_v16  ;;  %19169 = vmatpush3.bf16.msra.mxu1 %v19168_v40  ;;  %v15345_v40 = vld [vmem:[%s26408_s29 + $0xc8] sm:$0xff] }
0x11ba   : > { %17434 = vmatprep.subr.mxu1 %v20444_v7 }
0x11bc   : > { %19181 = vmatpush3.bf16.msra.mxu0 %v19180_v21  ;;  %v15332_v21 = vld [vmem:[%s26408_s29 + $0xb0] sm:$0xf] }
0x11bd   : > { %19182 = vmatprep.subr.bf16.mxu0 %v20446_v16  ;;  %v19201_v29 = vpack.c.bf16 %v15332_v21, %v15330_v19  ;;  %v19234_v19 = vpack.c.bf16 %v15365_v13, %v15363_v12  ;;  %v7888_v21 = vrot.slane %v23379_v25, 1 }
0x11c0   : > { %19184 = vmatpush3.bf16.msra.mxu0 %v19183_v62  ;;  %v7581_v62 = vrot.slane %v23379_v25, 2 }
0x11c1   : > { %19185 = vmatprep.subr.bf16.mxu0 %v20446_v16 }
0x11c2   : > { %v7583_v32 = vsel %vm640_vm3, %v7581_v62, %v7582_v57  ;;  %v15367_v62 = vld [vmem:[%s26408_s29 + $0x128] sm:$0xff]  ;;  %v15369_v57 = vld [vmem:[%s26408_s29 + $0x138] sm:$0xf] }
0x11c4   : > { %19187 = vmatpush3.bf16.msra.mxu0 %v19186_v0  ;;  %v7558_v0 = vld [vmem:[%s26408_s29 + $0x28] sm:$0xff] }
0x11c5   : > { %19188 = vmatprep.subr.bf16.mxu0 %v20446_v16 }
0x11c8   : > { %19190 = vmatpush3.bf16.msra.mxu0 %v19189_v37  ;;  %v19208_v37 = vpack.c.bf16 %v7560_v31, %v7558_v0  ;;  %v19238_v0 = vpack.c.bf16 %v15369_v57, %v15367_v62  ;;  %v15366_v31 = vld [vmem:[%s26408_s29 + $0x120] sm:$0xff] }
0x11c9   : > { %19191 = vmatprep.subr.bf16.mxu0 %v20446_v16  ;;  %v8243_v57 = vld [vmem:[%s26415_s4] sm:$0xff] }
0x11cc   : > { %19193 = vmatpush3.bf16.msra.mxu0 %v19192_v26  ;;  %v7586_v26 = vrot.slane %v23416_v36, 2 }
0x11cd   : > { %19244 = vmatprep.subr.bf16.mxu0 %v20446_v16 }
0x125b   : > { %v6953_v27 = vpop.f32.mrb[72].mxu1 }
0x125c   : > { %v17300_v58 = vpop.f32.mrb[73].mxu1 }
0x125d   : > { %v19214_v58 = vpack.c.bf16 %v15347_v41, %v15345_v40  ;;  %v7999_v40 = vrot.slane %v23382_v28, 4 }
0x125e   : > { %v6881_v34 = vpop.f32.mrb[76].mxu0 }
0x125f   : > { %v6954_v43 = vadd.f32 %v6953_v27, %v6881_v34  ;;  %v17279_v44 = vpop.f32.mrb[77].mxu0  ;;  %v19211_v27 = vpack.c.bf16 %v7559_v39, %v7557_v38  ;;  %v7587_v34 = vsel %vm640_vm3, %v7584_v33, %v7586_v26  ;;  %v7892_v33 = vsel %vm952_vm6, %v7889_v47, %v7891_v23 }
0x1260   : > { %v15346_v44 = vld [vmem:[%s26408_s29 + $0xd0] sm:$0xff]  ;;  %v7998_v39 = vrot.slane %v23379_v25, 4 }
0x1262   : > { %v8000_v41 = vsel %vm655_vm0, %v7998_v39, %v7999_v40 }
0x126d   : > { %v7112_v45 = vpop.f32.mrb[74].mxu1 }
0x126e   : > { %v17342_v46 = vpop.f32.mrb[75].mxu1 }
0x126f   : > { %v15351_v46 = vld [vmem:[%s26408_s29 + $0xf8] sm:$0xf] }
0x1270   : > { %v7037_v48 = vpop.f32.mrb[78].mxu0 }
0x1271   : > { %v7113_v49 = vadd.f32 %v7112_v45, %v7037_v48  ;;  %v17321_v51 = vpop.f32.mrb[79].mxu0  ;;  %v15349_v45 = vld [vmem:[%s26408_s29 + $0xe8] sm:$0xff] }
0x1272   : > { %v15348_v51 = vld [vmem:[%s26408_s29 + $0xe0] sm:$0xff] }
0x1282   : > { %v7196_v52 = vpop.f32.mrb[80].mxu0 }
0x1283   : > { %v7200_v53 = vadd.f32 %v7196_v52, %v6954_v43  ;;  %v17363_v54 = vpop.f32.mrb[81].mxu0  ;;  %v15344_v43 = vld [vmem:[%s26408_s29 + $0xc0] sm:$0xff]  ;;  %v15350_v52 = vld [vmem:[%s26408_s29 + $0xf0] sm:$0xf] }
0x1284   : > { %v19216_v48 = vpack.c.bf16 %v15346_v44, %v15344_v43  ;;  %v15321_v54 = vld [vmem:[%s26408_s29 + $0x58] sm:$0xff]  ;;  %v8140_v44 = vld [vmem:[%s26413_s19 + $0x20] sm:$0xff] }
0x1285   : > { %v7201_v56 = vadd.f32 %v7200_v53, %v7113_v49  ;;  %v19218_v49 = vpack.c.bf16 %v15351_v46, %v15349_v45  ;;  %v15319_v53 = vld [vmem:[%s26408_s29 + $0x48] sm:$0xff] }
0x1286   : > { %v8141_v45 = vld [vmem:[%s26413_s19 + $0x28] sm:$0xff] }
0x1287   : > { %v7209_v59 = vadd.f32 %v15311_v55, %v7201_v56  ;;  %v19221_v55 = vpack.c.bf16 %v15350_v52, %v15348_v51  ;;  %v19224_v56 = vpack.c.bf16 %v15321_v54, %v15319_v53  ;;  %v19251_v46 = vpack.c.bf16 %v8141_v45, %v8140_v44  ;;  %v8144_v52 = vld [vmem:[%s26413_s19 + $0x40] sm:$0xff]  ;;  %v8145_v53 = vld [vmem:[%s26413_s19 + $0x48] sm:$0xff]  ;;  %v8249_v44 = vld [vmem:[%s26415_s4 + $0x30] sm:$0xff] }
0x1288   : > { %v19257_v54 = vpack.c.bf16 %v8145_v53, %v8144_v52  ;;  %v8250_v45 = vld [vmem:[%s26415_s4 + $0x38] sm:$0xff]  ;;  %v8253_v52 = vld [vmem:[%s26415_s4 + $0x50] sm:$0xff] }
0x1289   : > { %v7210_v60 = vmax.f32 %v7209_v59, 0.0  ;;  %v7786_v59 = vrot.slane %v23379_v25, 3  ;;  %v8254_v53 = vld [vmem:[%s26415_s4 + $0x58] sm:$0xff] }
0x128b   : > { %17397 = vmatmul.mubr.f32.vlgmr.msra.gmra.mrb[76].mxu1 %v7210_v60  ;;  %17432 = vmatmul.mubr.f32.vlgmr.msra.gmra.mrb[82].mxu0 %v7210_v60  ;;  %v7787_v60 = vrot.slane %v23382_v28, 3 }
0x128c   : > { %17436 = vmatprep.mubr.msk.f32.mxu1 %vm20447_vm9, %v20444_v7 }
0x135e   : > { %v7293_v61 = vpop.f32.mrb[76].mxu1  ;;  %v7379_v2 = vpop.f32.mrb[82].mxu0 }
0x135f   : > { %v7383_v3 = vmax.f32 %v7293_v61, %v7379_v2  ;;  %v17398_v4 = vpop.f32.mrb[77].mxu1  ;;  %v17433_v5 = vpop.f32.mrb[83].mxu0  ;;  %v15323_v61 = vld [vmem:[%s26408_s29 + $0x68] sm:$0xff]  ;;  %v15325_v2 = vld [vmem:[%s26408_s29 + $0x78] sm:$0xf] }
0x1360   : > { %v7789_v4 = vrot.slane %v23397_v6, 3  ;;  %v19226_v5 = vpack.c.bf16 %v15320_v24, %v15318_v22  ;;  %v8149_v22 = vld [vmem:[%s26413_s19 + $0x68] sm:$0xff] }
0x1361   : > { %17435 = vmatpush3.msra.mxu1 %v7383_v3 }
0x1362   : > { %17437 = vmatmul.mubr.msk.f32.vlgmr.msra.gmra.mrb[78].mxu1 %vm2189_vm11, %v7384_v8  ;;  %17439 = vmatprep.subr.mxu1 %v20444_v7  ;;  %v19228_v8 = vpack.c.bf16 %v15325_v2, %v15323_v61  ;;  %v7790_v14 = vsel %vm849_vm5, %v7787_v60, %v7789_v4  ;;  %v8150_v61 = vld [vmem:[%s26413_s19 + $0x70] sm:$0xff]  ;;  %v8151_v2 = vld [vmem:[%s26413_s19 + $0x78] sm:$0xff] }
0x1363   : > { %17440 = vmatpush3.msra.mxu1 %v7383_v3  ;;  %17441 = vmatprep.mubr.msk.f32.mxu1 %vm20447_vm9, %v20444_v7  ;;  %v7788_v3 = vsel %vm849_vm5, %v7786_v59, %v7787_v60  ;;  %v8148_v60 = vld [vmem:[%s26413_s19 + $0x60] sm:$0xff] }
0x1364   : > { %19195 = vmatprep.subr.bf16.mxu1 %v19194_v9  ;;  %v15322_v9 = vld [vmem:[%s26408_s29 + $0x60] sm:$0xff]  ;;  %v19263_v24 = vpack.c.bf16 %v8149_v22, %v8148_v60  ;;  %v8257_v60 = vld [vmem:[%s26415_s4 + $0x70] sm:$0xff]  ;;  %v8258_v22 = vld [vmem:[%s26415_s4 + $0x78] sm:$0xff] }
0x1366   : > { %17442 = vmatmul.mubr.msk.f32.vlgmr.msra.gmra.mrb[80].mxu1 %vm2189_vm11, %v7458_v15  ;;  %v7791_v15 = vrot.slane %v23416_v36, 3 }
0x1367   : > { %19197 = vmatpush1.bf16.msra.mxu1 %v19196_v17  ;;  %7664 = vmatprep.mubr.f32.mxu1 %v20444_v7  ;;  %v19231_v17 = vpack.c.bf16 %v15324_v11, %v15322_v9 }
0x1368   : > { %19200 = vmatprep.subr.msk.bf16.mxu1 %vm20619_vm2, %v19198_v20  ;;  %v7792_v20 = vsel %vm849_vm5, %v7789_v4, %v7791_v15  ;;  %v8152_v4 = vld [vmem:[%s26413_s19 + $0x80] sm:$0xff] }
0x136b   : > { %19203 = vmatpush1.bf16.msk.msra.mxu1 %vm20619_vm2, %v19201_v29  ;;  %v15364_v29 = vld [vmem:[%s26408_s29 + $0x110] sm:$0xff] }
0x136c   : > { %19205 = vmatprep.subr.bf16.mxu1 %v19204_v50  ;;  %v7890_v50 = vsel %vm952_vm6, %v7888_v21, %v7889_v47  ;;  %v19236_v18 = vpack.c.bf16 %v15364_v29, %v15362_v30 }
0x136e   : > { %15336 = vmatmul.mubr.msk.f32.vlgmr.msra.gmra.mrb[82].mxu1 %vm648_vm4, %v7583_v32  ;;  %v15368_v32 = vld [vmem:[%s26408_s29 + $0x130] sm:$0xf] }
0x136f   : > { %7670 = vmatprep.mubr.f32.mxu1 %v20444_v7  ;;  %19207 = vmatpush1.bf16.msra.mxu1 %v19206_v35  ;;  %v7893_v35 = vrot.slane %v23416_v36, 1 }
0x1370   : > { %19210 = vmatprep.subr.msk.bf16.mxu1 %vm20619_vm2, %v19208_v37  ;;  %v19241_v37 = vpack.c.bf16 %v15368_v32, %v15366_v31 }
0x1371   : > { %v7894_v38 = vsel %vm952_vm6, %v7891_v23, %v7893_v35 }
0x1372   : > { %15337 = vmatmul.mubr.msk.f32.gmra.mrb[84].mxu1 %vm648_vm4, %v7585_v42  ;;  %v8001_v42 = vrot.slane %v23397_v6, 4 }
0x1373   : > { %7676 = vmatprep.mubr.f32.mxu1 %v20444_v7  ;;  %19213 = vmatpush1.bf16.msk.msra.mxu1 %vm20619_vm2, %v19211_v27  ;;  %v8003_v27 = vrot.slane %v23416_v36, 4  ;;  %v8138_v36 = vld [vmem:[%s26413_s19 + $0x10] sm:$0xff] }
0x1374   : > { %19215 = vmatprep.subr.bf16.mxu1 %v19214_v58  ;;  %v8002_v26 = vsel %vm655_vm0, %v7999_v40, %v8001_v42 }
0x1376   : > { %15338 = vmatmul.mubr.msk.f32.gmra.mrb[86].mxu1 %vm648_vm4, %v7587_v34  ;;  %v8139_v34 = vld [vmem:[%s26413_s19 + $0x18] sm:$0xff] }
0x1377   : > { %7759 = vmatprep.mubr.f32.mxu1 %v20444_v7  ;;  %v19248_v43 = vpack.c.bf16 %v8139_v34, %v8138_v36 }
0x137a   : > { %15341 = vmatmul.mubr.msk.f32.vlgmr.msra.gmra.mrb[82].mxu1 %vm648_vm4, %v23379_v25  ;;  %v8004_v25 = vsel %vm655_vm0, %v8001_v42, %v8003_v27 }
0x137b   : > { %7765 = vmatprep.mubr.f32.mxu1 %v20444_v7  ;;  %19217 = vmatpush1.bf16.msra.mxu1 %v19216_v48  ;;  %v8142_v48 = vld [vmem:[%s26413_s19 + $0x30] sm:$0xff] }
0x137c   : > { %19220 = vmatprep.subr.msk.bf16.mxu1 %vm20619_vm2, %v19218_v49  ;;  %v8143_v49 = vld [vmem:[%s26413_s19 + $0x38] sm:$0xff] }
0x137d   : > { %v19254_v51 = vpack.c.bf16 %v8143_v49, %v8142_v48  ;;  %v8251_v48 = vld [vmem:[%s26415_s4 + $0x40] sm:$0xff]  ;;  %v8252_v49 = vld [vmem:[%s26415_s4 + $0x48] sm:$0xff] }
0x137e   : > { %15342 = vmatmul.mubr.msk.f32.gmra.mrb[84].mxu1 %vm648_vm4, %v23382_v28  ;;  %v8136_v28 = vld [vmem:[%s26413_s19] sm:$0xff] }
0x137f   : > { %7771 = vmatprep.mubr.f32.mxu1 %v20444_v7  ;;  %19223 = vmatpush1.bf16.msk.msra.mxu1 %vm20619_vm2, %v19221_v55  ;;  %v8146_v55 = vld [vmem:[%s26413_s19 + $0x50] sm:$0xff] }
0x1380   : > { %19225 = vmatprep.subr.bf16.mxu1 %v19224_v56  ;;  %v8147_v56 = vld [vmem:[%s26413_s19 + $0x58] sm:$0xff] }
0x1381   : > { %v19260_v59 = vpack.c.bf16 %v8147_v56, %v8146_v55  ;;  %v8255_v55 = vld [vmem:[%s26415_s4 + $0x60] sm:$0xff]  ;;  %v8256_v56 = vld [vmem:[%s26415_s4 + $0x68] sm:$0xff] }
0x1382   : > { %15343 = vmatmul.mubr.msk.f32.gmra.mrb[86].mxu1 %vm648_vm4, %v23397_v6  ;;  %v8137_v6 = vld [vmem:[%s26413_s19 + $0x8] sm:$0xff] }
0x1383   : > { %7869 = vmatprep.mubr.f32.mxu1 %v20444_v7  ;;  %v19245_v58 = vpack.c.bf16 %v8137_v6, %v8136_v28  ;;  %v8247_v28 = vld [vmem:[%s26415_s4 + $0x20] sm:$0xff]  ;;  %v8248_v6 = vld [vmem:[%s26415_s4 + $0x28] sm:$0xff] }
0x1384   : > { %v19278_v34 = vpack.c.bf16 %v8248_v6, %v8247_v28  ;;  %v8517_v28 = vld [vmem:[%s26364_s7 + $0x28] sm:$0xff] }
0x1385   : > { %19246 = vmatpush1.bf16.msra.mxu0 %v19245_v58 }
0x1386   : > { %15354 = vmatmul.mubr.msk.f32.vlgmr.msra.gmra.mrb[82].mxu1 %vm648_vm4, %v7788_v3  ;;  %19247 = vmatprep.subr.bf16.mxu0 %v20446_v16  ;;  %v19266_v3 = vpack.c.bf16 %v8151_v2, %v8150_v61  ;;  %v8259_v61 = vld [vmem:[%s26415_s4 + $0x80] sm:$0xff]  ;;  %v8260_v2 = vld [vmem:[%s26415_s4 + $0x88] sm:$0xff] }
0x1387   : > { %7875 = vmatprep.mubr.f32.mxu1 %v20444_v7  ;;  %19227 = vmatpush1.bf16.msra.mxu1 %v19226_v5  ;;  %v8153_v5 = vld [vmem:[%s26413_s19 + $0x88] sm:$0xff] }
0x1388   : > { %19230 = vmatprep.subr.msk.bf16.mxu1 %vm20619_vm2, %v19228_v8  ;;  %v19269_v8 = vpack.c.bf16 %v8153_v5, %v8152_v4 }
0x1389   : > { %19249 = vmatpush1.bf16.msra.mxu0 %v19248_v43 }
0x138a   : > { %15355 = vmatmul.mubr.msk.f32.gmra.mrb[84].mxu1 %vm648_vm4, %v7790_v14  ;;  %19250 = vmatprep.subr.bf16.mxu0 %v20446_v16 }
0x138b   : > { %7881 = vmatprep.mubr.f32.mxu1 %v20444_v7  ;;  %19233 = vmatpush1.bf16.msk.msra.mxu1 %vm20619_vm2, %v19231_v17 }
0x138c   : > { %19235 = vmatprep.subr.bf16.mxu1 %v19234_v19 }
0x138d   : > { %19252 = vmatpush1.bf16.msra.mxu0 %v19251_v46  ;;  %v19281_v46 = vpack.c.bf16 %v8250_v45, %v8249_v44  ;;  %v8519_v44 = vld [vmem:[%s26364_s7 + $0x38] sm:$0xff] }
0x138e   : > { %15356 = vmatmul.mubr.msk.f32.gmra.mrb[86].mxu1 %vm648_vm4, %v7792_v20  ;;  %19253 = vmatprep.subr.bf16.mxu0 %v20446_v16  ;;  %v8112_v20 = vld [vmem:[%s26414_s25] sm:$0x3] }
0x138f   : > { %7971 = vmatprep.mubr.f32.mxu1 %v20444_v7  ;;  %v8117_v21 = vrot.slane %v8112_v20, %v20886_v63  ;;  %v8121_v47 = vrot.slane %v8112_v20, %v20891_v1 }
0x1391   : > { %19255 = vmatpush1.bf16.msra.mxu0 %v19254_v51  ;;  %v19284_v51 = vpack.c.bf16 %v8252_v49, %v8251_v48  ;;  %v15401_v48 = vld [vmem:[%s26364_s7 + $0xc8] sm:$0xff] }
0x1392   : > { %15359 = vmatmul.mubr.msk.f32.vlgmr.msra.gmra.mrb[82].mxu1 %vm648_vm4, %v7890_v50  ;;  %19256 = vmatprep.subr.bf16.mxu0 %v20446_v16  ;;  %v8244_v50 = vld [vmem:[%s26415_s4 + $0x8] sm:$0xff] }
0x1393   : > { %7977 = vmatprep.mubr.f32.mxu1 %v20444_v7  ;;  %19237 = vmatpush1.bf16.msra.mxu1 %v19236_v18  ;;  %v19272_v31 = vpack.c.bf16 %v8244_v50, %v8243_v57 }
0x1394   : > { %19240 = vmatprep.subr.msk.bf16.mxu1 %vm20619_vm2, %v19238_v0 }
0x1395   : > { %19258 = vmatpush1.bf16.msra.mxu0 %v19257_v54  ;;  %v19287_v54 = vpack.c.bf16 %v8254_v53, %v8253_v52  ;;  %v15402_v52 = vld [vmem:[%s26364_s7 + $0xd0] sm:$0xff] }
0x1396   : > { %15360 = vmatmul.mubr.msk.f32.gmra.mrb[84].mxu1 %vm648_vm4, %v7892_v33  ;;  %19259 = vmatprep.subr.bf16.mxu0 %v20446_v16 }
0x1397   : > { %7983 = vmatprep.mubr.f32.mxu1 %v20444_v7  ;;  %19243 = vmatpush1.bf16.msk.msra.mxu1 %vm20619_vm2, %v19241_v37  ;;  %v8245_v37 = vld [vmem:[%s26415_s4 + $0x10] sm:$0xff] }
0x1399   : > { %19261 = vmatpush1.bf16.msra.mxu0 %v19260_v59  ;;  %v19290_v59 = vpack.c.bf16 %v8256_v56, %v8255_v55  ;;  %v15385_v55 = vld [vmem:[%s26364_s7 + $0x48] sm:$0xff]  ;;  %v15386_v56 = vld [vmem:[%s26364_s7 + $0x50] sm:$0xff] }
0x139a   : > { %15361 = vmatmul.mubr.msk.f32.gmra.mrb[86].mxu1 %vm648_vm4, %v7894_v38  ;;  %19262 = vmatprep.subr.bf16.mxu0 %v20446_v16  ;;  %v8246_v38 = vld [vmem:[%s26415_s4 + $0x18] sm:$0xff] }
0x139b   : > { %8081 = vmatprep.mubr.f32.mxu1 %v20444_v7  ;;  %v19275_v42 = vpack.c.bf16 %v8246_v38, %v8245_v37  ;;  %v8427_v37 = vld [vmem:[%s26363_s6] sm:$0xff]  ;;  %v15394_v38 = vld [vmem:[%s26364_s7 + $0x90] sm:$0xff] }
0x139d   : > { %19264 = vmatpush1.bf16.msra.mxu0 %v19263_v24  ;;  %v19293_v24 = vpack.c.bf16 %v8258_v22, %v8257_v60  ;;  %v15406_v60 = vld [vmem:[%s26364_s7 + $0xe0] sm:$0xff] }
0x139e   : > { %15372 = vmatmul.mubr.msk.f32.vlgmr.msra.gmra.mrb[82].mxu1 %vm648_vm4, %v8000_v41  ;;  %19265 = vmatprep.subr.bf16.mxu0 %v20446_v16 }
0x139f   : > { %8087 = vmatprep.mubr.f32.mxu1 %v20444_v7 }
0x13a1   : > { %19267 = vmatpush1.bf16.msra.mxu0 %v19266_v3  ;;  %v19296_v3 = vpack.c.bf16 %v8260_v2, %v8259_v61  ;;  %v19343_v2 = vpack.c.bf16 %v15386_v56, %v15385_v55  ;;  %v9029_v55 = vld [vmem:[%s26367_s10 + $0x8] sm:$0xff] }
0x13a2   : > { %15373 = vmatmul.mubr.msk.f32.gmra.mrb[84].mxu1 %vm648_vm4, %v8002_v26  ;;  %19268 = vmatprep.subr.bf16.mxu0 %v20446_v16 }
0x13a3   : > { %8093 = vmatprep.mubr.f32.mxu1 %v20444_v7 }
0x13a5   : > { %19270 = vmatpush1.bf16.msra.mxu0 %v19269_v8  ;;  %v8344_v8 = vld [vmem:[%s26416_s5] sm:$0xff] }
0x13a6   : > { %15374 = vmatmul.mubr.msk.f32.gmra.mrb[86].mxu1 %vm648_vm4, %v8004_v25  ;;  %19271 = vmatprep.subr.bf16.mxu0 %v20446_v16 }
0x13a7   : > { %17450 = vmatprep.mubr.msk.f32.mxu1 %vm1413_vm8, %v8344_v8  ;;  %v15388_v8 = vld [vmem:[%s26364_s7 + $0x60] sm:$0xff] }
0x1435   : > { %v7454_v9 = vpop.f32.mrb[78].mxu1 }
0x1436   : > { %v17438_v11 = vpop.f32.mrb[79].mxu1 }
0x1437   : > { %v8513_v11 = vld [vmem:[%s26364_s7 + $0x8] sm:$0xff] }
0x1439   : > { %v7528_v12 = vpop.f32.mrb[80].mxu1 }
0x143a   : > { %v7532_v13 = vmax.f32 %v7454_v9, %v7528_v12  ;;  %v17443_v14 = vpop.f32.mrb[81].mxu1  ;;  %v8512_v9 = vld [vmem:[%s26364_s7] sm:$0xff] }
0x143b   : > { %v19319_v12 = vpack.c.bf16 %v8513_v11, %v8512_v9  ;;  %v8515_v14 = vld [vmem:[%s26364_s7 + $0x18] sm:$0xff] }
0x143c   : > { %7533 = vst.msk [vmem:[#allocation2 + $0x3] sm:$0x1] %vm2338_vm12, %v7532_v13  ;;  %v7543_v15 = vrot.slane %v7532_v13, 3  ;;  %v7540_v17 = vrot.slane %v7532_v13, 2  ;;  %v7535_v19 = vrot.slane %v7532_v13, 1  ;;  %v8514_v13 = vld [vmem:[%s26364_s7 + $0x10] sm:$0xff] }
0x143e   : > { %7544 = vrot.lane.b32.xlu1 %v7543_v15, %s26417_s21  ;;  %7542 = vst.msk [vmem:[#allocation2 + $0xb] sm:$0x1] %vm2338_vm12, %v7540_v17  ;;  %v19322_v15 = vpack.c.bf16 %v8515_v14, %v8514_v13 }
0x1442   : > { %7536 = vrot.lane.b32.xlu1 %v7535_v19, %s26417_s21 }
0x1471   : > { %v8083_v30 = vpop.f32.mrb[82].mxu1 }
0x1472   : > { %v23640_v29 = vadd.f32 %v8117_v21, %v8083_v30  ;;  %v8085_v62 = vpop.f32.mrb[83].mxu1 }
0x1473   : > { %v8125_v23 = vadd.f32 %v8121_v47, %v8085_v62 }
0x1474   : > { %v8130_v32 = vmax.f32 %v23640_v29, 0.0 }
0x1475   : > { %v8131_v18 = vmax.f32 %v8125_v23, 0.0  ;;  %v8089_v0 = vpop.f32.mrb[84].mxu1 }
0x1476   : > { %v8126_v33 = vadd.f32 %v8117_v21, %v8089_v0  ;;  %v8091_v35 = vpop.f32.mrb[85].mxu1 }
0x1477   : > { %v8127_v39 = vadd.f32 %v8121_v47, %v8091_v35  ;;  %15375 = vmatprep.mubr.msk.f32.mxu0 %vm1220_vm7, %v8131_v18  ;;  %v8345_v35 = vld [vmem:[%s26416_s5 + $0x8] sm:$0xf] }
0x1478   : > { %8228 = vmatmul.mubr.f32.vlgmr.msra.gmra.mrb[84].mxu0 %v8130_v32  ;;  %v8132_v26 = vmax.f32 %v8126_v33, 0.0 }
0x1479   : > { %v8133_v40 = vmax.f32 %v8127_v39, 0.0  ;;  %19273 = vmatpush1.bf16.msra.mxu0 %v19272_v31  ;;  %v8095_v41 = vpop.f32.mrb[86].mxu1  ;;  %v15395_v39 = vld [vmem:[%s26364_s7 + $0x98] sm:$0xff] }
0x147a   : > { %v8128_v27 = vadd.f32 %v8117_v21, %v8095_v41  ;;  %v8097_v25 = vpop.f32.mrb[87].mxu1  ;;  %19274 = vmatprep.subr.bf16.mxu0 %v20446_v16  ;;  %v19307_v41 = vpack.c.bf16 %v15395_v39, %v15394_v38  ;;  %v15411_v39 = vld [vmem:[%s26364_s7 + $0x108] sm:$0xff] }
0x147b   : > { %v8129_v36 = vadd.f32 %v8121_v47, %v8097_v25  ;;  %15376 = vmatprep.mubr.msk.f32.mxu0 %vm1220_vm7, %v8133_v40  ;;  %v8516_v25 = vld [vmem:[%s26364_s7 + $0x20] sm:$0xff] }
0x147c   : > { %8233 = vmatmul.mubr.f32.gmra.mrb[86].mxu0 %v8132_v26  ;;  %v8134_v43 = vmax.f32 %v8128_v27, 0.0  ;;  %v19325_v6 = vpack.c.bf16 %v8517_v28, %v8516_v25  ;;  %v15413_v25 = vld [vmem:[%s26364_s7 + $0x118] sm:$0xff] }
0x147d   : > { %v8135_v58 = vmax.f32 %v8129_v36, 0.0  ;;  %19276 = vmatpush1.bf16.msra.mxu0 %v19275_v42  ;;  %v15396_v42 = vld [vmem:[%s26364_s7 + $0xa0] sm:$0xff]  ;;  %v15398_v36 = vld [vmem:[%s26364_s7 + $0xb0] sm:$0xff] }
0x147e   : > { %19277 = vmatprep.subr.bf16.mxu0 %v20446_v16 }
0x147f   : > { %15377 = vmatprep.mubr.msk.f32.mxu0 %vm1220_vm7, %v8135_v58 }
0x1480   : > { %8238 = vmatmul.mubr.f32.gmra.mrb[88].mxu0 %v8134_v43 }
0x1481   : > { %19279 = vmatpush1.bf16.msra.mxu0 %v19278_v34  ;;  %15378 = vmatprep.mubr.msk.f32.mxu0 %vm1220_vm7, %v8131_v18 }
0x1482   : > { %19280 = vmatprep.subr.bf16.mxu0 %v20446_v16 }
0x1485   : > { %19282 = vmatpush1.bf16.msra.mxu0 %v19281_v46  ;;  %v15400_v46 = vld [vmem:[%s26364_s7 + $0xc0] sm:$0xff] }
0x1486   : > { %19283 = vmatprep.subr.bf16.mxu0 %v20446_v16  ;;  %v19316_v49 = vpack.c.bf16 %v15401_v48, %v15400_v46  ;;  %v15423_v46 = vld [vmem:[%s26364_s7 + $0x158] sm:$0xff] }
0x1489   : > { %19285 = vmatpush1.bf16.msra.mxu0 %v19284_v51  ;;  %v8520_v51 = vld [vmem:[%s26364_s7 + $0x40] sm:$0xff] }
0x148a   : > { %19286 = vmatprep.subr.bf16.mxu0 %v20446_v16 }
0x148d   : > { %19288 = vmatpush1.bf16.msra.mxu0 %v19287_v54 }
0x148e   : > { %19289 = vmatprep.subr.bf16.mxu0 %v20446_v16 }
0x1491   : > { %19291 = vmatpush1.bf16.msra.mxu0 %v19290_v59  ;;  %v15405_v59 = vld [vmem:[%s26364_s7 + $0xd8] sm:$0xff] }
0x1492   : > { %19292 = vmatprep.subr.bf16.mxu0 %v20446_v16 }
0x1495   : > { %19294 = vmatpush1.bf16.msra.mxu0 %v19293_v24 }
0x1496   : > { %19295 = vmatprep.subr.bf16.mxu0 %v20446_v16 }
0x1499   : > { %19297 = vmatpush1.bf16.msra.mxu0 %v19296_v3 }
0x149a   : > { %19318 = vmatprep.subr.bf16.mxu0 %v20446_v16 }
0x149c   : > { %8326 = vmatmul.mubr.f32.vlgmr.msra.gmra.mrb[90].mxu0 %v8130_v32 }
0x149d   : > { %15379 = vmatprep.mubr.msk.f32.mxu0 %vm1220_vm7, %v8133_v40  ;;  %19320 = vmatpush3.bf16.msra.mxu0 %v19319_v12  ;;  %v8428_v40 = vld [vmem:[%s26363_s6 + $0x8] sm:$0xf] }
0x149e   : > { %19321 = vmatprep.subr.bf16.mxu0 %v20446_v16 }
0x14a0   : > { %8331 = vmatmul.mubr.f32.gmra.mrb[92].mxu0 %v8132_v26  ;;  %v15397_v26 = vld [vmem:[%s26364_s7 + $0xa8] sm:$0xff] }
0x14a1   : > { %15380 = vmatprep.mubr.msk.f32.mxu0 %vm1220_vm7, %v8135_v58  ;;  %19323 = vmatpush3.bf16.msra.mxu0 %v19322_v15  ;;  %v19310_v27 = vpack.c.bf16 %v15397_v26, %v15396_v42  ;;  %v15399_v58 = vld [vmem:[%s26364_s7 + $0xb8] sm:$0xff]  ;;  %v15393_v42 = vld [vmem:[%s26364_s7 + $0x88] sm:$0xff]  ;;  %v15416_v26 = vld [vmem:[%s26364_s7 + $0x120] sm:$0xff] }
0x14a2   : > { %19324 = vmatprep.subr.bf16.mxu0 %v20446_v16  ;;  %v19313_v34 = vpack.c.bf16 %v15399_v58, %v15398_v36  ;;  %v15419_v36 = vld [vmem:[%s26364_s7 + $0x138] sm:$0xff] }
0x14a4   : > { %8336 = vmatmul.mubr.f32.gmra.mrb[94].mxu0 %v8134_v43  ;;  %v8518_v43 = vld [vmem:[%s26364_s7 + $0x30] sm:$0xff] }
0x14a5   : > { %17501 = vmatprep.mubr.msk.f32.mxu0 %vm20447_vm9, %v20444_v7  ;;  %19326 = vmatpush3.bf16.msra.mxu0 %v19325_v6  ;;  %v19328_v45 = vpack.c.bf16 %v8519_v44, %v8518_v43  ;;  %v15418_v6 = vld [vmem:[%s26364_s7 + $0x130] sm:$0xff]  ;;  %v15421_v43 = vld [vmem:[%s26364_s7 + $0x148] sm:$0xff] }
0x14a6   : > { %19327 = vmatprep.subr.bf16.mxu0 %v20446_v16  ;;  %v19358_v58 = vpack.c.bf16 %v15419_v36, %v15418_v6 }
0x14a9   : > { %19329 = vmatpush3.bf16.msra.mxu0 %v19328_v45  ;;  %v15422_v45 = vld [vmem:[%s26364_s7 + $0x150] sm:$0xff] }
0x14aa   : > { %17499 = vmatprep.subr.mxu0 %v20444_v7  ;;  %v19364_v48 = vpack.c.bf16 %v15423_v46, %v15422_v45 }
0x14ad   : > { %17500 = vmatpush3.msra.mxu0 %v8520_v51  ;;  %v8942_v51 = vld [vmem:[%s26366_s9] sm:$0xff] }
0x14ae   : > { %19342 = vmatprep.subr.bf16.mxu0 %v20446_v16 }
0x14b0   : > { %v7545_v4 = vpop.permute.xlu1 %7544 }
0x14b1   : > { %7547 = vst.msk [vmem:[#allocation2 + $0xb] sm:$0x1] %vm2345_vm13, %v7545_v4  ;;  %v19331_v4 = vpack.c.bf16 %v15406_v60, %v15405_v59  ;;  %v8944_v59 = vld [vmem:[%s26366_s9 + $0x10] sm:$0xff]  ;;  %v8945_v60 = vld [vmem:[%s26366_s9 + $0x18] sm:$0xff] }
0x14b4   : > { %v7537_v5 = vpop.permute.xlu1 %7536 }
0x14b5   : > { %7539 = vst.msk [vmem:[#allocation2 + $0x3] sm:$0x1] %vm2345_vm13, %v7537_v5  ;;  %v15387_v5 = vld [vmem:[%s26364_s7 + $0x58] sm:$0xff] }
0x154b   : > { %v8229_v17 = vpop.f32.mrb[84].mxu0 }
0x154c   : > { %v8231_v19 = vpop.f32.mrb[85].mxu0 }
0x154f   : > { %v8234_v20 = vpop.f32.mrb[86].mxu0 }
0x1550   : > { %v8236_v21 = vpop.f32.mrb[87].mxu0 }
0x1551   : > { %v15407_v21 = vld [vmem:[%s26364_s7 + $0xe8] sm:$0xff] }
0x1553   : > { %v8239_v47 = vpop.f32.mrb[88].mxu0 }
0x1554   : > { %v8241_v30 = vpop.f32.mrb[89].mxu0 }
0x156f   : > { %v8327_v29 = vpop.f32.mrb[90].mxu0 }
0x1570   : > { %v8341_v62 = vmax.f32 %v8229_v17, %v8327_v29  ;;  %v8329_v57 = vpop.f32.mrb[91].mxu0  ;;  %v15389_v29 = vld [vmem:[%s26364_s7 + $0x68] sm:$0xff] }
0x1573   : > { %v8332_v50 = vpop.f32.mrb[92].mxu0 }
0x1574   : > { %v8342_v23 = vmax.f32 %v8234_v20, %v8332_v50  ;;  %v8334_v18 = vpop.f32.mrb[93].mxu0  ;;  %v19346_v20 = vpack.c.bf16 %v15388_v8, %v15387_v5  ;;  %v9032_v5 = vld [vmem:[%s26367_s10 + $0x20] sm:$0xff] }
0x1576   : > { %v19298_v0 = vpack.c.bf16 %v8342_v23, %v8341_v62  ;;  %v15390_v62 = vld [vmem:[%s26364_s7 + $0x70] sm:$0xff] }
0x1577   : > { %v8337_v31 = vpop.f32.mrb[94].mxu0 }
0x1578   : > { %v8343_v32 = vmax.f32 %v8239_v47, %v8337_v31  ;;  %v8339_v33 = vpop.f32.mrb[95].mxu0  ;;  %19299 = vmatprep.subr.bf16.mxu1 %v19298_v0  ;;  %v15408_v47 = vld [vmem:[%s26364_s7 + $0xf0] sm:$0xff]  ;;  %v15409_v31 = vld [vmem:[%s26364_s7 + $0xf8] sm:$0xff] }
0x1579   : > { %19301 = vmatpush3.bf16.msra.mxu1 %v19298_v0  ;;  %v19334_v18 = vpack.c.bf16 %v15408_v47, %v15407_v21  ;;  %v15391_v33 = vld [vmem:[%s26364_s7 + $0x78] sm:$0xff]  ;;  %v8951_v21 = vld [vmem:[%s26366_s9 + $0x48] sm:$0xff]  ;;  %v9036_v47 = vld [vmem:[%s26367_s10 + $0x40] sm:$0xff] }
0x157a   : > { %17448 = vmatprep.subr.mxu1 %v8343_v32 }
0x157d   : > { %17449 = vmatpush3.msra.mxu1 %v8343_v32 }
0x157e   : > { %17451 = vmatmul.mubr.msk.f32.vlgmr.msra.gmra.mrb[88].mxu1 %vm1413_vm8, %v8345_v35  ;;  %19303 = vmatprep.subr.bf16.mxu1 %v19298_v0  ;;  %v15392_v35 = vld [vmem:[%s26364_s7 + $0x80] sm:$0xff] }
0x157f   : > { %19305 = vmatpush3.bf16.msra.mxu1 %v19298_v0  ;;  %17459 = vmatprep.mubr.msk.f32.mxu1 %vm1413_vm8, %v8427_v37  ;;  %v19349_v0 = vpack.c.bf16 %v15390_v62, %v15389_v29  ;;  %v19352_v38 = vpack.c.bf16 %v15392_v35, %v15391_v33  ;;  %v8955_v33 = vld [vmem:[%s26366_s9 + $0x68] sm:$0xff]  ;;  %v9040_v35 = vld [vmem:[%s26367_s10 + $0x60] sm:$0xff] }
0x1580   : > { %17457 = vmatprep.subr.mxu1 %v8343_v32 }
0x1583   : > { %17458 = vmatpush3.msra.mxu1 %v8343_v32  ;;  %v15410_v32 = vld [vmem:[%s26364_s7 + $0x100] sm:$0xff] }
0x1584   : > { %17460 = vmatmul.mubr.msk.f32.vlgmr.msra.gmra.mrb[90].mxu1 %vm1413_vm8, %v8428_v40  ;;  %19306 = vmatprep.subr.bf16.mxu1 %v20446_v16  ;;  %v19337_v37 = vpack.c.bf16 %v15410_v32, %v15409_v31  ;;  %v15412_v40 = vld [vmem:[%s26364_s7 + $0x110] sm:$0xff]  ;;  %v8954_v32 = vld [vmem:[%s26366_s9 + $0x60] sm:$0xff] }
0x1585   : > { %19308 = vmatpush3.bf16.msra.mxu1 %v19307_v41  ;;  %17480 = vmatprep.mubr.msk.f32.mxu1 %vm20447_vm9, %v20444_v7  ;;  %v19340_v41 = vpack.c.bf16 %v15412_v40, %v15411_v39  ;;  %v8956_v40 = vld [vmem:[%s26366_s9 + $0x70] sm:$0xff] }
0x1586   : > { %19309 = vmatprep.subr.bf16.mxu1 %v20446_v16 }
0x1589   : > { %19311 = vmatpush3.bf16.msra.mxu1 %v19310_v27  ;;  %v15417_v27 = vld [vmem:[%s26364_s7 + $0x128] sm:$0xff] }
0x158a   : > { %19312 = vmatprep.subr.bf16.mxu1 %v20446_v16  ;;  %v19355_v28 = vpack.c.bf16 %v15417_v27, %v15416_v26  ;;  %v9042_v26 = vld [vmem:[%s26367_s10 + $0x70] sm:$0xff]  ;;  %v9043_v27 = vld [vmem:[%s26367_s10 + $0x78] sm:$0xff] }
0x158d   : > { %19314 = vmatpush3.bf16.msra.mxu1 %v19313_v34  ;;  %v15420_v34 = vld [vmem:[%s26364_s7 + $0x140] sm:$0xff] }
0x158e   : > { %19315 = vmatprep.subr.bf16.mxu1 %v20446_v16  ;;  %v19361_v44 = vpack.c.bf16 %v15421_v43, %v15420_v34 }
0x1591   : > { %19317 = vmatpush3.bf16.msra.mxu1 %v19316_v49  ;;  %v15424_v49 = vld [vmem:[%s26364_s7 + $0x160] sm:$0xff] }
0x1592   : > { %17478 = vmatprep.subr.mxu1 %v20444_v7 }
0x1595   : > { %17479 = vmatpush3.msra.mxu1 %v15402_v52  ;;  %v8943_v52 = vld [vmem:[%s26366_s9 + $0x8] sm:$0xff] }
0x1596   : > { %19330 = vmatprep.subr.bf16.mxu1 %v20446_v16 }
0x1651   : > { %v17452_v53 = vpop.f32.mrb[88].mxu1 }
0x1652   : > { %v8418_v54 = vpop.f32.mrb[89].mxu1 }
0x1657   : > { %v17461_v22 = vpop.f32.mrb[90].mxu1 }
0x1658   : > { %v8511_v24 = vmax.f32 %v17452_v53, %v17461_v22  ;;  %v8501_v61 = vpop.f32.mrb[91].mxu1  ;;  %v9028_v53 = vld [vmem:[%s26367_s10] sm:$0xff]  ;;  %v9030_v22 = vld [vmem:[%s26367_s10 + $0x10] sm:$0xff] }
0x1659   : > { %v8510_v3 = vmax.f32 %v8418_v54, %v8501_v61  ;;  %v19367_v54 = vpack.c.bf16 %v8943_v52, %v8942_v51  ;;  %v19391_v56 = vpack.c.bf16 %v9029_v55, %v9028_v53  ;;  %v9031_v61 = vld [vmem:[%s26367_s10 + $0x18] sm:$0xff]  ;;  %v15426_v53 = vld [vmem:[%s26365_s8] ss:$0 sm:$0xff] }
0x165a   : > { %v8542_v9 = vrot.slane %v8511_v24, 2  ;;  %v8698_v11 = vrot.slane %v8511_v24, 3  ;;  %v8773_v12 = vrot.slane %v8511_v24, 1  ;;  %v8857_v13 = vrot.slane %v8511_v24, 4 }
0x165b   : > { %17502 = vmatmul.mubr.msk.f32.vlgmr.msra.gmra.mrb[96].mxu0 %vm1614_vm10, %v8510_v3  ;;  %v8541_v14 = vrot.slane %v8510_v3, 2  ;;  %v8772_v15 = vrot.slane %v8510_v3, 1  ;;  %v8697_v17 = vrot.slane %v8510_v3, 3  ;;  %v8856_v19 = vrot.slane %v8510_v3, 4  ;;  %v8946_v3 = vld [vmem:[%s26366_s9 + $0x20] sm:$0xff] }
0x165c   : > { %19344 = vmatpush3.bf16.msra.mxu0 %v19343_v2  ;;  %17543 = vmatprep.mubr.msk.f32.mxu0 %vm20447_vm9, %v20444_v7  ;;  %v19370_v24 = vpack.c.bf16 %v8945_v60, %v8944_v59  ;;  %v19394_v2 = vpack.c.bf16 %v9031_v61, %v9030_v22  ;;  %v15442_v59 = vld [vmem:[%s26408_s29 + $0x88] sm:$0xff]  ;;  %v15444_v60 = vld [vmem:[%s26408_s29 + $0x98] sm:$0xff] }
0x165d   : > { %v8543_v30 = vsel %vm640_vm3, %v8541_v14, %v8542_v9  ;;  %19345 = vmatprep.subr.bf16.mxu0 %v20446_v16  ;;  %v8774_v57 = vsel %vm952_vm6, %v8772_v15, %v8773_v12  ;;  %v8699_v50 = vsel %vm849_vm5, %v8697_v17, %v8698_v11  ;;  %v8858_v23 = vsel %vm655_vm0, %v8856_v19, %v8857_v13  ;;  %v9033_v9 = vld [vmem:[%s26367_s10 + $0x28] sm:$0xff]  ;;  %v8948_v11 = vld [vmem:[%s26366_s9 + $0x30] sm:$0xff]  ;;  %v8949_v12 = vld [vmem:[%s26366_s9 + $0x38] sm:$0xff] }
0x165e   : > { %17481 = vmatmul.mubr.msk.f32.vlgmr.msra.gmra.mrb[92].mxu1 %vm1614_vm10, %v8543_v30  ;;  %v19397_v13 = vpack.c.bf16 %v9033_v9, %v9032_v5  ;;  %v9034_v14 = vld [vmem:[%s26367_s10 + $0x30] sm:$0xff]  ;;  %v9035_v15 = vld [vmem:[%s26367_s10 + $0x38] sm:$0xff]  ;;  %v19376_v17 = vpack.c.bf16 %v8949_v12, %v8948_v11  ;;  %v9037_v30 = vld [vmem:[%s26367_s10 + $0x48] sm:$0xff]  ;;  %v19414_v5 = vpack.c.bf16 %v15444_v60, %v15442_v59 }
0x165f   : > { %19332 = vmatpush3.bf16.msra.mxu1 %v19331_v4  ;;  %17522 = vmatprep.mubr.msk.f32.mxu1 %vm20447_vm9, %v20444_v7  ;;  %v8947_v4 = vld [vmem:[%s26366_s9 + $0x28] sm:$0xff]  ;;  %v19400_v19 = vpack.c.bf16 %v9035_v15, %v9034_v14  ;;  %v19403_v62 = vpack.c.bf16 %v9037_v30, %v9036_v47  ;;  %v15443_v9 = vld [vmem:[%s26408_s29 + $0x90] sm:$0xff]  ;;  %v15448_v12 = vld [vmem:[%s26408_s29 + $0xb8] sm:$0xf] }
0x1660   : > { %19347 = vmatpush3.bf16.msra.mxu0 %v19346_v20  ;;  %19333 = vmatprep.subr.bf16.mxu1 %v20446_v16  ;;  %v19373_v8 = vpack.c.bf16 %v8947_v4, %v8946_v3  ;;  %v8950_v20 = vld [vmem:[%s26366_s9 + $0x40] sm:$0xff]  ;;  %v15446_v11 = vld [vmem:[%s26408_s29 + $0xa8] sm:$0xff]  ;;  %v9287_v30 = vld [vmem:[%s26408_s29 + $0x18] sm:$0xff] }
0x1661   : > { %19348 = vmatprep.subr.bf16.mxu0 %v20446_v16  ;;  %v19379_v29 = vpack.c.bf16 %v8951_v21, %v8950_v20  ;;  %v9115_v4 = vld [vmem:[%s26368_s11] sm:$0xf]  ;;  %v24069_v21 = vld [vmem:[%s20647_s27 + $0xa8] sm:$0xff]  ;;  %v15435_v60 = vld [vmem:[%s26408_s29 + $0x50] sm:$0xff] }
0x1662   : > { %v15445_v15 = vld [vmem:[%s26408_s29 + $0xa0] sm:$0xff]  ;;  %v9285_v47 = vld [vmem:[%s26408_s29 + $0x8] sm:$0xff] }
0x1663   : > { %19335 = vmatpush3.bf16.msra.mxu1 %v19334_v18  ;;  %v9039_v18 = vld [vmem:[%s26367_s10 + $0x58] sm:$0xff]  ;;  %v24066_v20 = vld [vmem:[%s20647_s27 + $0xa0] sm:$0xff] }
0x1664   : > { %19350 = vmatpush3.bf16.msra.mxu0 %v19349_v0  ;;  %19336 = vmatprep.subr.bf16.mxu1 %v20446_v16  ;;  %v15433_v59 = vld [vmem:[%s26408_s29 + $0x40] sm:$0xff] }
0x1665   : > { %19351 = vmatprep.subr.bf16.mxu0 %v20446_v16 }
0x1667   : > { %19338 = vmatpush3.bf16.msra.mxu1 %v19337_v37  ;;  %v19385_v37 = vpack.c.bf16 %v8955_v33, %v8954_v32  ;;  %v9291_v32 = vld [vmem:[%s26408_s29 + $0x38] sm:$0xf] }
0x1668   : > { %19353 = vmatpush3.bf16.msra.mxu0 %v19352_v38  ;;  %19339 = vmatprep.subr.bf16.mxu1 %v20446_v16  ;;  %v9041_v38 = vld [vmem:[%s26367_s10 + $0x68] sm:$0xff] }
0x1669   : > { %17541 = vmatprep.subr.mxu0 %v20444_v7  ;;  %v19409_v39 = vpack.c.bf16 %v9041_v38, %v9040_v35  ;;  %v24103_v38 = vld [vmem:[%s20647_s27 + $0xb8] sm:$0xf] }
0x166b   : > { %19341 = vmatpush3.bf16.msra.mxu1 %v19340_v41  ;;  %v8957_v41 = vld [vmem:[%s26366_s9 + $0x78] sm:$0xff] }
0x166c   : > { %17542 = vmatpush3.msra.mxu0 %v15393_v42  ;;  %17520 = vmatprep.subr.mxu1 %v20444_v7  ;;  %v19388_v42 = vpack.c.bf16 %v8957_v41, %v8956_v40  ;;  %v9288_v40 = vld [vmem:[%s26408_s29 + $0x20] sm:$0xff]  ;;  %v9290_v41 = vld [vmem:[%s26408_s29 + $0x30] sm:$0xf] }
0x166d   : > { %17544 = vmatmul.mubr.msk.f32.vlgmr.msra.gmra.mrb[98].mxu0 %vm1614_vm10, %v8774_v57  ;;  %19366 = vmatprep.subr.bf16.mxu0 %v20446_v16  ;;  %v8952_v57 = vld [vmem:[%s26366_s9 + $0x50] sm:$0xff] }
0x166e   : > { %17599 = vmatprep.mubr.msk.f32.mxu0 %vm20447_vm9, %v20444_v7  ;;  %19368 = vmatpush3.bf16.msra.mxu0 %v19367_v54 }
0x166f   : > { %17521 = vmatpush3.msra.mxu1 %v15413_v25  ;;  %19369 = vmatprep.subr.bf16.mxu0 %v20446_v16  ;;  %v19412_v25 = vpack.c.bf16 %v9043_v27, %v9042_v26  ;;  %v15462_v26 = vld [vmem:[%s26408_s29 + $0xd8] sm:$0xff] }
0x1670   : > { %17523 = vmatmul.mubr.msk.f32.vlgmr.msra.gmra.mrb[94].mxu1 %vm1614_vm10, %v8699_v50  ;;  %19354 = vmatprep.subr.bf16.mxu1 %v20446_v16  ;;  %v8953_v50 = vld [vmem:[%s26366_s9 + $0x58] sm:$0xff] }
0x1671   : > { %19356 = vmatpush3.bf16.msra.mxu1 %v19355_v28  ;;  %17564 = vmatprep.mubr.msk.f32.mxu1 %vm20447_vm9, %v20444_v7  ;;  %v19382_v0 = vpack.c.bf16 %v8953_v50, %v8952_v57  ;;  %v9313_v57 = vrot.slane %v24069_v21, 2  ;;  %v24084_v50 = vld [vmem:[%s20647_s27 + $0xb0] sm:$0xff] }
0x1672   : > { %19357 = vmatprep.subr.bf16.mxu1 %v20446_v16  ;;  %19371 = vmatpush3.bf16.msra.mxu0 %v19370_v24  ;;  %v9315_v35 = vrot.slane %v24084_v50, 2 }
0x1673   : > { %19372 = vmatprep.subr.bf16.mxu0 %v20446_v16 }
0x1674   : > { %v9316_v27 = vsel %vm640_vm3, %v9313_v57, %v9315_v35 }
0x1675   : > { %19359 = vmatpush3.bf16.msra.mxu1 %v19358_v58 }
0x1676   : > { %19360 = vmatprep.subr.bf16.mxu1 %v20446_v16  ;;  %19374 = vmatpush3.bf16.msra.mxu0 %v19373_v8  ;;  %v15441_v8 = vld [vmem:[%s26408_s29 + $0x80] sm:$0xff] }
0x1677   : > { %19375 = vmatprep.subr.bf16.mxu0 %v20446_v16  ;;  %v19416_v14 = vpack.c.bf16 %v15443_v9, %v15441_v8  ;;  %v15439_v8 = vld [vmem:[%s26408_s29 + $0x70] sm:$0xf]  ;;  %v15478_v9 = vld [vmem:[%s26408_s29 + $0x108] sm:$0xff] }
0x1679   : > { %19362 = vmatpush3.bf16.msra.mxu1 %v19361_v44 }
0x167a   : > { %19363 = vmatprep.subr.bf16.mxu1 %v20446_v16  ;;  %19377 = vmatpush3.bf16.msra.mxu0 %v19376_v17  ;;  %v19418_v17 = vpack.c.bf16 %v15448_v12, %v15446_v11  ;;  %v15480_v11 = vld [vmem:[%s26408_s29 + $0x118] sm:$0xff] }
0x167b   : > { %19378 = vmatprep.subr.bf16.mxu0 %v20446_v16 }
0x167d   : > { %19365 = vmatpush3.bf16.msra.mxu1 %v19364_v48 }
0x167e   : > { %17562 = vmatprep.subr.mxu1 %v20444_v7  ;;  %19380 = vmatpush3.bf16.msra.mxu0 %v19379_v29 }
0x167f   : > { %19381 = vmatprep.subr.bf16.mxu0 %v20446_v16 }
0x1681   : > { %17563 = vmatpush3.msra.mxu1 %v15424_v49 }
0x1682   : > { %17565 = vmatmul.mubr.msk.f32.vlgmr.msra.gmra.mrb[96].mxu1 %vm1614_vm10, %v8858_v23  ;;  %19390 = vmatprep.subr.bf16.mxu1 %v20446_v16  ;;  %v9038_v23 = vld [vmem:[%s26367_s10 + $0x50] sm:$0xff] }
0x1683   : > { %17634 = vmatprep.mubr.msk.f32.mxu1 %vm20447_vm9, %v20444_v7  ;;  %19392 = vmatpush3.bf16.msra.mxu1 %v19391_v56  ;;  %v19406_v31 = vpack.c.bf16 %v9039_v18, %v9038_v23  ;;  %v19424_v23 = vpack.c.bf16 %v9287_v30, %v9285_v47  ;;  %v9284_v18 = vld [vmem:[%s26408_s29] sm:$0xff]  ;;  %v9620_v47 = vrot.slane %v24069_v21, 1 }
0x1684   : > { %19393 = vmatprep.subr.bf16.mxu1 %v20446_v16  ;;  %19383 = vmatpush3.bf16.msra.mxu0 %v19382_v0  ;;  %v9286_v0 = vld [vmem:[%s26408_s29 + $0x10] sm:$0xff]  ;;  %v15477_v30 = vld [vmem:[%s26408_s29 + $0x100] sm:$0xff] }
0x1685   : > { %19384 = vmatprep.subr.bf16.mxu0 %v20446_v16 }
0x1687   : > { %19395 = vmatpush3.bf16.msra.mxu1 %v19394_v2 }
0x1688   : > { %19396 = vmatprep.subr.bf16.mxu1 %v20446_v16  ;;  %19386 = vmatpush3.bf16.msra.mxu0 %v19385_v37  ;;  %v19426_v37 = vpack.c.bf16 %v9286_v0, %v9284_v18  ;;  %v9622_v18 = vrot.slane %v24084_v50, 1 }
0x1689   : > { %19387 = vmatprep.subr.bf16.mxu0 %v20446_v16 }
0x168b   : > { %19398 = vmatpush3.bf16.msra.mxu1 %v19397_v13  ;;  %v9189_v13 = vld [vmem:[%s26369_s12] sm:$0xf] }
0x168c   : > { %19399 = vmatprep.subr.bf16.mxu1 %v20446_v16  ;;  %19389 = vmatpush3.bf16.msra.mxu0 %v19388_v42  ;;  %v15460_v42 = vld [vmem:[%s26408_s29 + $0xc8] sm:$0xff] }
0x168d   : > { %17637 = vmatprep.subr.mxu0 %v20444_v7 }
0x168f   : > { %19401 = vmatpush3.bf16.msra.mxu1 %v19400_v19  ;;  %v15447_v19 = vld [vmem:[%s26408_s29 + $0xb0] sm:$0xf] }
0x1690   : > { %19402 = vmatprep.subr.bf16.mxu1 %v20446_v16  ;;  %v19421_v29 = vpack.c.bf16 %v15447_v19, %v15445_v15  ;;  %v19454_v15 = vpack.c.bf16 %v15480_v11, %v15478_v9  ;;  %v9619_v19 = vrot.slane %v24066_v20, 1 }
0x1693   : > { %19404 = vmatpush3.bf16.msra.mxu1 %v19403_v62  ;;  %v9312_v62 = vrot.slane %v24066_v20, 2 }
0x1694   : > { %19405 = vmatprep.subr.bf16.mxu1 %v20446_v16 }
0x1695   : > { %v9314_v33 = vsel %vm640_vm3, %v9312_v62, %v9313_v57  ;;  %v15482_v62 = vld [vmem:[%s26408_s29 + $0x128] sm:$0xff]  ;;  %v15484_v57 = vld [vmem:[%s26408_s29 + $0x138] sm:$0xf] }
0x1697   : > { %19407 = vmatpush3.bf16.msra.mxu1 %v19406_v31  ;;  %v9289_v31 = vld [vmem:[%s26408_s29 + $0x28] sm:$0xff] }
0x1698   : > { %19408 = vmatprep.subr.bf16.mxu1 %v20446_v16 }
0x169b   : > { %19410 = vmatpush3.bf16.msra.mxu1 %v19409_v39  ;;  %v19428_v39 = vpack.c.bf16 %v9291_v32, %v9289_v31  ;;  %v19458_v31 = vpack.c.bf16 %v15484_v57, %v15482_v62  ;;  %v15481_v32 = vld [vmem:[%s26408_s29 + $0x120] sm:$0xff] }
0x169c   : > { %19411 = vmatprep.subr.bf16.mxu1 %v20446_v16  ;;  %v9974_v57 = vld [vmem:[%s26415_s4] sm:$0xff] }
0x169f   : > { %19413 = vmatpush3.bf16.msra.mxu1 %v19412_v25  ;;  %v9317_v25 = vrot.slane %v24103_v38, 2 }
0x16a0   : > { %19464 = vmatprep.subr.bf16.mxu1 %v20446_v16 }
0x172e   : > { %v8684_v28 = vpop.f32.mrb[96].mxu0 }
0x172f   : > { %v17503_v6 = vpop.f32.mrb[97].mxu0 }
0x1730   : > { %v19434_v6 = vpack.c.bf16 %v15462_v26, %v15460_v42  ;;  %v9730_v42 = vrot.slane %v24069_v21, 4 }
0x1731   : > { %v8612_v36 = vpop.f32.mrb[92].mxu1 }
0x1732   : > { %v8685_v58 = vadd.f32 %v8684_v28, %v8612_v36  ;;  %v17482_v34 = vpop.f32.mrb[93].mxu1  ;;  %v19431_v28 = vpack.c.bf16 %v9290_v41, %v9288_v40  ;;  %v9318_v36 = vsel %vm640_vm3, %v9315_v35, %v9317_v25  ;;  %v9623_v35 = vsel %vm952_vm6, %v9620_v47, %v9622_v18 }
0x1733   : > { %v15461_v34 = vld [vmem:[%s26408_s29 + $0xd0] sm:$0xff]  ;;  %v9729_v41 = vrot.slane %v24066_v20, 4 }
0x1735   : > { %v9731_v26 = vsel %vm655_vm0, %v9729_v41, %v9730_v42 }
0x1740   : > { %v8843_v43 = vpop.f32.mrb[98].mxu0 }
0x1741   : > { %v17545_v44 = vpop.f32.mrb[99].mxu0 }
0x1742   : > { %v15466_v44 = vld [vmem:[%s26408_s29 + $0xf8] sm:$0xf] }
0x1743   : > { %v8768_v45 = vpop.f32.mrb[94].mxu1 }
0x1744   : > { %v8844_v46 = vadd.f32 %v8843_v43, %v8768_v45  ;;  %v17524_v48 = vpop.f32.mrb[95].mxu1  ;;  %v15464_v43 = vld [vmem:[%s26408_s29 + $0xe8] sm:$0xff] }
0x1745   : > { %v15463_v48 = vld [vmem:[%s26408_s29 + $0xe0] sm:$0xff] }
0x1755   : > { %v8927_v49 = vpop.f32.mrb[96].mxu1 }
0x1756   : > { %v8931_v51 = vadd.f32 %v8927_v49, %v8685_v58  ;;  %v17566_v52 = vpop.f32.mrb[97].mxu1  ;;  %v15459_v58 = vld [vmem:[%s26408_s29 + $0xc0] sm:$0xff]  ;;  %v15465_v49 = vld [vmem:[%s26408_s29 + $0xf0] sm:$0xf] }
0x1757   : > { %v19436_v45 = vpack.c.bf16 %v15461_v34, %v15459_v58  ;;  %v15436_v52 = vld [vmem:[%s26408_s29 + $0x58] sm:$0xff]  ;;  %v9871_v34 = vld [vmem:[%s26413_s19 + $0x20] sm:$0xff] }
0x1758   : > { %v8932_v54 = vadd.f32 %v8931_v51, %v8844_v46  ;;  %v19438_v46 = vpack.c.bf16 %v15466_v44, %v15464_v43  ;;  %v15434_v51 = vld [vmem:[%s26408_s29 + $0x48] sm:$0xff] }
0x1759   : > { %v9872_v43 = vld [vmem:[%s26413_s19 + $0x28] sm:$0xff] }
0x175a   : > { %v8940_v55 = vadd.f32 %v15426_v53, %v8932_v54  ;;  %v19441_v53 = vpack.c.bf16 %v15465_v49, %v15463_v48  ;;  %v19444_v54 = vpack.c.bf16 %v15436_v52, %v15434_v51  ;;  %v19471_v44 = vpack.c.bf16 %v9872_v43, %v9871_v34  ;;  %v9875_v49 = vld [vmem:[%s26413_s19 + $0x40] sm:$0xff]  ;;  %v9876_v51 = vld [vmem:[%s26413_s19 + $0x48] sm:$0xff]  ;;  %v9980_v34 = vld [vmem:[%s26415_s4 + $0x30] sm:$0xff] }
0x175b   : > { %v19477_v52 = vpack.c.bf16 %v9876_v51, %v9875_v49  ;;  %v9981_v43 = vld [vmem:[%s26415_s4 + $0x38] sm:$0xff]  ;;  %v9984_v49 = vld [vmem:[%s26415_s4 + $0x50] sm:$0xff] }
0x175c   : > { %v8941_v56 = vmax.f32 %v8940_v55, 0.0  ;;  %v9517_v55 = vrot.slane %v24066_v20, 3  ;;  %v9985_v51 = vld [vmem:[%s26415_s4 + $0x58] sm:$0xff] }
0x175e   : > { %17600 = vmatmul.mubr.f32.vlgmr.msra.gmra.mrb[100].mxu0 %v8941_v56  ;;  %17635 = vmatmul.mubr.f32.vlgmr.msra.gmra.mrb[98].mxu1 %v8941_v56  ;;  %v9518_v56 = vrot.slane %v24069_v21, 3 }
0x175f   : > { %17639 = vmatprep.mubr.msk.f32.mxu0 %vm20447_vm9, %v20444_v7 }
0x1831   : > { %v9024_v22 = vpop.f32.mrb[100].mxu0  ;;  %v9110_v24 = vpop.f32.mrb[98].mxu1 }
0x1832   : > { %v9114_v61 = vmax.f32 %v9024_v22, %v9110_v24  ;;  %v17601_v2 = vpop.f32.mrb[101].mxu0  ;;  %v17636_v3 = vpop.f32.mrb[99].mxu1  ;;  %v15438_v22 = vld [vmem:[%s26408_s29 + $0x68] sm:$0xff]  ;;  %v15440_v24 = vld [vmem:[%s26408_s29 + $0x78] sm:$0xf] }
0x1833   : > { %v9520_v2 = vrot.slane %v24084_v50, 3  ;;  %v19446_v3 = vpack.c.bf16 %v15435_v60, %v15433_v59  ;;  %v9880_v59 = vld [vmem:[%s26413_s19 + $0x68] sm:$0xff] }
0x1834   : > { %17638 = vmatpush3.msra.mxu0 %v9114_v61 }
0x1835   : > { %17640 = vmatmul.mubr.msk.f32.vlgmr.msra.gmra.mrb[102].mxu0 %vm2189_vm11, %v9115_v4  ;;  %17642 = vmatprep.subr.mxu0 %v20444_v7  ;;  %v19448_v4 = vpack.c.bf16 %v15440_v24, %v15438_v22  ;;  %v9521_v12 = vsel %vm849_vm5, %v9518_v56, %v9520_v2  ;;  %v9881_v22 = vld [vmem:[%s26413_s19 + $0x70] sm:$0xff]  ;;  %v9882_v24 = vld [vmem:[%s26413_s19 + $0x78] sm:$0xff] }
0x1836   : > { %17643 = vmatpush3.msra.mxu0 %v9114_v61  ;;  %17644 = vmatprep.mubr.msk.f32.mxu0 %vm20447_vm9, %v20444_v7  ;;  %v9519_v61 = vsel %vm849_vm5, %v9517_v55, %v9518_v56  ;;  %v9879_v56 = vld [vmem:[%s26413_s19 + $0x60] sm:$0xff] }
0x1837   : > { %19415 = vmatprep.subr.bf16.mxu0 %v19414_v5  ;;  %v15437_v5 = vld [vmem:[%s26408_s29 + $0x60] sm:$0xff]  ;;  %v19483_v60 = vpack.c.bf16 %v9880_v59, %v9879_v56  ;;  %v9988_v56 = vld [vmem:[%s26415_s4 + $0x70] sm:$0xff]  ;;  %v9989_v59 = vld [vmem:[%s26415_s4 + $0x78] sm:$0xff] }
0x1839   : > { %17645 = vmatmul.mubr.msk.f32.vlgmr.msra.gmra.mrb[104].mxu0 %vm2189_vm11, %v9189_v13  ;;  %v9522_v13 = vrot.slane %v24103_v38, 3 }
0x183a   : > { %19417 = vmatpush1.bf16.msra.mxu0 %v19416_v14  ;;  %9395 = vmatprep.mubr.f32.mxu0 %v20444_v7  ;;  %v19451_v14 = vpack.c.bf16 %v15439_v8, %v15437_v5 }
0x183b   : > { %19420 = vmatprep.subr.msk.bf16.mxu0 %vm20619_vm2, %v19418_v17  ;;  %v9523_v17 = vsel %vm849_vm5, %v9520_v2, %v9522_v13  ;;  %v9883_v2 = vld [vmem:[%s26413_s19 + $0x80] sm:$0xff] }
0x183e   : > { %19423 = vmatpush1.bf16.msk.msra.mxu0 %vm20619_vm2, %v19421_v29  ;;  %v15479_v29 = vld [vmem:[%s26408_s29 + $0x110] sm:$0xff] }
0x183f   : > { %19425 = vmatprep.subr.bf16.mxu0 %v19424_v23  ;;  %v9621_v23 = vsel %vm952_vm6, %v9619_v19, %v9620_v47  ;;  %v19456_v0 = vpack.c.bf16 %v15479_v29, %v15477_v30 }
0x1841   : > { %15451 = vmatmul.mubr.msk.f32.vlgmr.msra.gmra.mrb[106].mxu0 %vm648_vm4, %v9314_v33  ;;  %v15483_v33 = vld [vmem:[%s26408_s29 + $0x130] sm:$0xf] }
0x1842   : > { %9401 = vmatprep.mubr.f32.mxu0 %v20444_v7  ;;  %19427 = vmatpush1.bf16.msra.mxu0 %v19426_v37  ;;  %v9624_v37 = vrot.slane %v24103_v38, 1 }
0x1843   : > { %19430 = vmatprep.subr.msk.bf16.mxu0 %vm20619_vm2, %v19428_v39  ;;  %v19461_v39 = vpack.c.bf16 %v15483_v33, %v15481_v32 }
0x1844   : > { %v9625_v40 = vsel %vm952_vm6, %v9622_v18, %v9624_v37 }
0x1845   : > { %15452 = vmatmul.mubr.msk.f32.gmra.mrb[108].mxu0 %vm648_vm4, %v9316_v27  ;;  %v9732_v27 = vrot.slane %v24084_v50, 4 }
0x1846   : > { %9407 = vmatprep.mubr.f32.mxu0 %v20444_v7  ;;  %19433 = vmatpush1.bf16.msk.msra.mxu0 %vm20619_vm2, %v19431_v28  ;;  %v9734_v28 = vrot.slane %v24103_v38, 4  ;;  %v9869_v38 = vld [vmem:[%s26413_s19 + $0x10] sm:$0xff] }
0x1847   : > { %19435 = vmatprep.subr.bf16.mxu0 %v19434_v6  ;;  %v9733_v25 = vsel %vm655_vm0, %v9730_v42, %v9732_v27 }
0x1849   : > { %15453 = vmatmul.mubr.msk.f32.gmra.mrb[110].mxu0 %vm648_vm4, %v9318_v36  ;;  %v9870_v36 = vld [vmem:[%s26413_s19 + $0x18] sm:$0xff] }
0x184a   : > { %9490 = vmatprep.mubr.f32.mxu0 %v20444_v7  ;;  %v19468_v58 = vpack.c.bf16 %v9870_v36, %v9869_v38 }
0x184d   : > { %15456 = vmatmul.mubr.msk.f32.vlgmr.msra.gmra.mrb[106].mxu0 %vm648_vm4, %v24066_v20  ;;  %v9735_v20 = vsel %vm655_vm0, %v9732_v27, %v9734_v28 }
0x184e   : > { %9496 = vmatprep.mubr.f32.mxu0 %v20444_v7  ;;  %19437 = vmatpush1.bf16.msra.mxu0 %v19436_v45  ;;  %v9873_v45 = vld [vmem:[%s26413_s19 + $0x30] sm:$0xff] }
0x184f   : > { %19440 = vmatprep.subr.msk.bf16.mxu0 %vm20619_vm2, %v19438_v46  ;;  %v9874_v46 = vld [vmem:[%s26413_s19 + $0x38] sm:$0xff] }
0x1850   : > { %v19474_v48 = vpack.c.bf16 %v9874_v46, %v9873_v45  ;;  %v9982_v45 = vld [vmem:[%s26415_s4 + $0x40] sm:$0xff]  ;;  %v9983_v46 = vld [vmem:[%s26415_s4 + $0x48] sm:$0xff] }
0x1851   : > { %15457 = vmatmul.mubr.msk.f32.gmra.mrb[108].mxu0 %vm648_vm4, %v24069_v21  ;;  %v9867_v21 = vld [vmem:[%s26413_s19] sm:$0xff] }
0x1852   : > { %9502 = vmatprep.mubr.f32.mxu0 %v20444_v7  ;;  %19443 = vmatpush1.bf16.msk.msra.mxu0 %vm20619_vm2, %v19441_v53  ;;  %v9877_v53 = vld [vmem:[%s26413_s19 + $0x50] sm:$0xff] }
0x1853   : > { %19445 = vmatprep.subr.bf16.mxu0 %v19444_v54  ;;  %v9878_v54 = vld [vmem:[%s26413_s19 + $0x58] sm:$0xff] }
0x1854   : > { %v19480_v55 = vpack.c.bf16 %v9878_v54, %v9877_v53  ;;  %v9986_v53 = vld [vmem:[%s26415_s4 + $0x60] sm:$0xff]  ;;  %v9987_v54 = vld [vmem:[%s26415_s4 + $0x68] sm:$0xff] }
0x1855   : > { %15458 = vmatmul.mubr.msk.f32.gmra.mrb[110].mxu0 %vm648_vm4, %v24084_v50  ;;  %v9868_v50 = vld [vmem:[%s26413_s19 + $0x8] sm:$0xff] }
0x1856   : > { %9600 = vmatprep.mubr.f32.mxu0 %v20444_v7  ;;  %v19465_v6 = vpack.c.bf16 %v9868_v50, %v9867_v21  ;;  %v9978_v21 = vld [vmem:[%s26415_s4 + $0x20] sm:$0xff]  ;;  %v9979_v50 = vld [vmem:[%s26415_s4 + $0x28] sm:$0xff] }
0x1857   : > { %v19498_v36 = vpack.c.bf16 %v9979_v50, %v9978_v21  ;;  %v10248_v21 = vld [vmem:[%s26364_s7 + $0x28] sm:$0xff] }
0x1858   : > { %19466 = vmatpush1.bf16.msra.mxu1 %v19465_v6 }
0x1859   : > { %15469 = vmatmul.mubr.msk.f32.vlgmr.msra.gmra.mrb[106].mxu0 %vm648_vm4, %v9519_v61  ;;  %19467 = vmatprep.subr.bf16.mxu1 %v20446_v16  ;;  %v19486_v61 = vpack.c.bf16 %v9882_v24, %v9881_v22  ;;  %v9990_v22 = vld [vmem:[%s26415_s4 + $0x80] sm:$0xff]  ;;  %v9991_v24 = vld [vmem:[%s26415_s4 + $0x88] sm:$0xff] }
0x185a   : > { %9606 = vmatprep.mubr.f32.mxu0 %v20444_v7  ;;  %19447 = vmatpush1.bf16.msra.mxu0 %v19446_v3  ;;  %v9884_v3 = vld [vmem:[%s26413_s19 + $0x88] sm:$0xff] }
0x185b   : > { %19450 = vmatprep.subr.msk.bf16.mxu0 %vm20619_vm2, %v19448_v4  ;;  %v19489_v4 = vpack.c.bf16 %v9884_v3, %v9883_v2 }
0x185c   : > { %19469 = vmatpush1.bf16.msra.mxu1 %v19468_v58 }
0x185d   : > { %15470 = vmatmul.mubr.msk.f32.gmra.mrb[108].mxu0 %vm648_vm4, %v9521_v12  ;;  %19470 = vmatprep.subr.bf16.mxu1 %v20446_v16 }
0x185e   : > { %9612 = vmatprep.mubr.f32.mxu0 %v20444_v7  ;;  %19453 = vmatpush1.bf16.msk.msra.mxu0 %vm20619_vm2, %v19451_v14 }
0x185f   : > { %19455 = vmatprep.subr.bf16.mxu0 %v19454_v15 }
0x1860   : > { %19472 = vmatpush1.bf16.msra.mxu1 %v19471_v44  ;;  %v19501_v44 = vpack.c.bf16 %v9981_v43, %v9980_v34  ;;  %v10250_v34 = vld [vmem:[%s26364_s7 + $0x38] sm:$0xff] }
0x1861   : > { %15471 = vmatmul.mubr.msk.f32.gmra.mrb[110].mxu0 %vm648_vm4, %v9523_v17  ;;  %19473 = vmatprep.subr.bf16.mxu1 %v20446_v16  ;;  %v9843_v17 = vld [vmem:[%s26414_s25] sm:$0x3] }
0x1862   : > { %9702 = vmatprep.mubr.f32.mxu0 %v20444_v7  ;;  %v9848_v19 = vrot.slane %v9843_v17, %v20886_v63  ;;  %v9852_v47 = vrot.slane %v9843_v17, %v20891_v1 }
0x1864   : > { %19475 = vmatpush1.bf16.msra.mxu1 %v19474_v48  ;;  %v19504_v48 = vpack.c.bf16 %v9983_v46, %v9982_v45  ;;  %v15516_v45 = vld [vmem:[%s26364_s7 + $0xc8] sm:$0xff] }
0x1865   : > { %15474 = vmatmul.mubr.msk.f32.vlgmr.msra.gmra.mrb[106].mxu0 %vm648_vm4, %v9621_v23  ;;  %19476 = vmatprep.subr.bf16.mxu1 %v20446_v16  ;;  %v9975_v23 = vld [vmem:[%s26415_s4 + $0x8] sm:$0xff] }
0x1866   : > { %9708 = vmatprep.mubr.f32.mxu0 %v20444_v7  ;;  %19457 = vmatpush1.bf16.msra.mxu0 %v19456_v0  ;;  %v19492_v32 = vpack.c.bf16 %v9975_v23, %v9974_v57 }
0x1867   : > { %19460 = vmatprep.subr.msk.bf16.mxu0 %vm20619_vm2, %v19458_v31 }
0x1868   : > { %19478 = vmatpush1.bf16.msra.mxu1 %v19477_v52  ;;  %v19507_v52 = vpack.c.bf16 %v9985_v51, %v9984_v49  ;;  %v15517_v49 = vld [vmem:[%s26364_s7 + $0xd0] sm:$0xff] }
0x1869   : > { %15475 = vmatmul.mubr.msk.f32.gmra.mrb[108].mxu0 %vm648_vm4, %v9623_v35  ;;  %19479 = vmatprep.subr.bf16.mxu1 %v20446_v16 }
0x186a   : > { %9714 = vmatprep.mubr.f32.mxu0 %v20444_v7  ;;  %19463 = vmatpush1.bf16.msk.msra.mxu0 %vm20619_vm2, %v19461_v39  ;;  %v9976_v39 = vld [vmem:[%s26415_s4 + $0x10] sm:$0xff] }
0x186c   : > { %19481 = vmatpush1.bf16.msra.mxu1 %v19480_v55  ;;  %v19510_v55 = vpack.c.bf16 %v9987_v54, %v9986_v53  ;;  %v15500_v53 = vld [vmem:[%s26364_s7 + $0x48] sm:$0xff]  ;;  %v15501_v54 = vld [vmem:[%s26364_s7 + $0x50] sm:$0xff] }
0x186d   : > { %15476 = vmatmul.mubr.msk.f32.gmra.mrb[110].mxu0 %vm648_vm4, %v9625_v40  ;;  %19482 = vmatprep.subr.bf16.mxu1 %v20446_v16  ;;  %v9977_v40 = vld [vmem:[%s26415_s4 + $0x18] sm:$0xff] }
0x186e   : > { %9812 = vmatprep.mubr.f32.mxu0 %v20444_v7  ;;  %v19495_v27 = vpack.c.bf16 %v9977_v40, %v9976_v39  ;;  %v10158_v39 = vld [vmem:[%s26363_s6] sm:$0xff]  ;;  %v15509_v40 = vld [vmem:[%s26364_s7 + $0x90] sm:$0xff] }
0x1870   : > { %19484 = vmatpush1.bf16.msra.mxu1 %v19483_v60  ;;  %v19513_v60 = vpack.c.bf16 %v9989_v59, %v9988_v56  ;;  %v15521_v56 = vld [vmem:[%s26364_s7 + $0xe0] sm:$0xff] }
0x1871   : > { %15487 = vmatmul.mubr.msk.f32.vlgmr.msra.gmra.mrb[106].mxu0 %vm648_vm4, %v9731_v26  ;;  %19485 = vmatprep.subr.bf16.mxu1 %v20446_v16 }
0x1872   : > { %9818 = vmatprep.mubr.f32.mxu0 %v20444_v7 }
0x1874   : > { %19487 = vmatpush1.bf16.msra.mxu1 %v19486_v61  ;;  %v19516_v61 = vpack.c.bf16 %v9991_v24, %v9990_v22  ;;  %v19563_v24 = vpack.c.bf16 %v15501_v54, %v15500_v53  ;;  %v10760_v53 = vld [vmem:[%s26367_s10 + $0x8] sm:$0xff] }
0x1875   : > { %15488 = vmatmul.mubr.msk.f32.gmra.mrb[108].mxu0 %vm648_vm4, %v9733_v25  ;;  %19488 = vmatprep.subr.bf16.mxu1 %v20446_v16 }
0x1876   : > { %9824 = vmatprep.mubr.f32.mxu0 %v20444_v7 }
0x1878   : > { %19490 = vmatpush1.bf16.msra.mxu1 %v19489_v4  ;;  %v10075_v4 = vld [vmem:[%s26416_s5] sm:$0xff] }
0x1879   : > { %15489 = vmatmul.mubr.msk.f32.gmra.mrb[110].mxu0 %vm648_vm4, %v9735_v20  ;;  %19491 = vmatprep.subr.bf16.mxu1 %v20446_v16 }
0x187a   : > { %17653 = vmatprep.mubr.msk.f32.mxu0 %vm1413_vm8, %v10075_v4  ;;  %v15503_v4 = vld [vmem:[%s26364_s7 + $0x60] sm:$0xff] }
0x1908   : > { %v9185_v5 = vpop.f32.mrb[102].mxu0 }
0x1909   : > { %v17641_v8 = vpop.f32.mrb[103].mxu0 }
0x190a   : > { %v10244_v8 = vld [vmem:[%s26364_s7 + $0x8] sm:$0xff] }
0x190c   : > { %v9259_v9 = vpop.f32.mrb[104].mxu0 }
0x190d   : > { %v9263_v11 = vmax.f32 %v9185_v5, %v9259_v9  ;;  %v17646_v12 = vpop.f32.mrb[105].mxu0  ;;  %v10243_v5 = vld [vmem:[%s26364_s7] sm:$0xff] }
0x190e   : > { %v19539_v9 = vpack.c.bf16 %v10244_v8, %v10243_v5  ;;  %v10246_v12 = vld [vmem:[%s26364_s7 + $0x18] sm:$0xff] }
0x190f   : > { %9264 = vst.msk [vmem:[#allocation2 + $0x4] sm:$0x1] %vm2338_vm12, %v9263_v11  ;;  %v9274_v13 = vrot.slane %v9263_v11, 3  ;;  %v9271_v14 = vrot.slane %v9263_v11, 2  ;;  %v9266_v15 = vrot.slane %v9263_v11, 1  ;;  %v10245_v11 = vld [vmem:[%s26364_s7 + $0x10] sm:$0xff] }
0x1911   : > { %9275 = vrot.lane.b32.xlu0 %v9274_v13, %s26417_s21  ;;  %9273 = vst.msk [vmem:[#allocation2 + $0xc] sm:$0x1] %vm2338_vm12, %v9271_v14  ;;  %v19542_v13 = vpack.c.bf16 %v10246_v12, %v10245_v11 }
0x1915   : > { %9267 = vrot.lane.b32.xlu0 %v9266_v15, %s26417_s21 }
0x1944   : > { %v9814_v30 = vpop.f32.mrb[106].mxu0 }
0x1945   : > { %v24327_v29 = vadd.f32 %v9848_v19, %v9814_v30  ;;  %v9816_v62 = vpop.f32.mrb[107].mxu0 }
0x1946   : > { %v9856_v18 = vadd.f32 %v9852_v47, %v9816_v62 }
0x1947   : > { %v9861_v33 = vmax.f32 %v24327_v29, 0.0 }
0x1948   : > { %v9862_v0 = vmax.f32 %v9856_v18, 0.0  ;;  %v9820_v31 = vpop.f32.mrb[108].mxu0 }
0x1949   : > { %v9857_v35 = vadd.f32 %v9848_v19, %v9820_v31  ;;  %v9822_v37 = vpop.f32.mrb[109].mxu0 }
0x194a   : > { %v9858_v41 = vadd.f32 %v9852_v47, %v9822_v37  ;;  %15490 = vmatprep.mubr.msk.f32.mxu1 %vm1220_vm7, %v9862_v0  ;;  %v10076_v37 = vld [vmem:[%s26416_s5 + $0x8] sm:$0xf] }
0x194b   : > { %9959 = vmatmul.mubr.f32.vlgmr.msra.gmra.mrb[100].mxu1 %v9861_v33  ;;  %v9863_v25 = vmax.f32 %v9857_v35, 0.0 }
0x194c   : > { %v9864_v42 = vmax.f32 %v9858_v41, 0.0  ;;  %19493 = vmatpush1.bf16.msra.mxu1 %v19492_v32  ;;  %v9826_v26 = vpop.f32.mrb[110].mxu0  ;;  %v15510_v41 = vld [vmem:[%s26364_s7 + $0x98] sm:$0xff] }
0x194d   : > { %v9859_v28 = vadd.f32 %v9848_v19, %v9826_v26  ;;  %v9828_v20 = vpop.f32.mrb[111].mxu0  ;;  %19494 = vmatprep.subr.bf16.mxu1 %v20446_v16  ;;  %v19527_v26 = vpack.c.bf16 %v15510_v41, %v15509_v40  ;;  %v15526_v41 = vld [vmem:[%s26364_s7 + $0x108] sm:$0xff] }
0x194e   : > { %v9860_v38 = vadd.f32 %v9852_v47, %v9828_v20  ;;  %15491 = vmatprep.mubr.msk.f32.mxu1 %vm1220_vm7, %v9864_v42  ;;  %v10247_v20 = vld [vmem:[%s26364_s7 + $0x20] sm:$0xff] }
0x194f   : > { %9964 = vmatmul.mubr.f32.gmra.mrb[102].mxu1 %v9863_v25  ;;  %v9865_v58 = vmax.f32 %v9859_v28, 0.0  ;;  %v19545_v50 = vpack.c.bf16 %v10248_v21, %v10247_v20  ;;  %v15528_v20 = vld [vmem:[%s26364_s7 + $0x118] sm:$0xff] }
0x1950   : > { %v9866_v6 = vmax.f32 %v9860_v38, 0.0  ;;  %19496 = vmatpush1.bf16.msra.mxu1 %v19495_v27  ;;  %v15511_v27 = vld [vmem:[%s26364_s7 + $0xa0] sm:$0xff]  ;;  %v15513_v38 = vld [vmem:[%s26364_s7 + $0xb0] sm:$0xff] }
0x1951   : > { %19497 = vmatprep.subr.bf16.mxu1 %v20446_v16 }
0x1952   : > { %15492 = vmatprep.mubr.msk.f32.mxu1 %vm1220_vm7, %v9866_v6 }
0x1953   : > { %9969 = vmatmul.mubr.f32.gmra.mrb[104].mxu1 %v9865_v58 }
0x1954   : > { %19499 = vmatpush1.bf16.msra.mxu1 %v19498_v36  ;;  %15493 = vmatprep.mubr.msk.f32.mxu1 %vm1220_vm7, %v9862_v0 }
0x1955   : > { %19500 = vmatprep.subr.bf16.mxu1 %v20446_v16 }
0x1958   : > { %19502 = vmatpush1.bf16.msra.mxu1 %v19501_v44  ;;  %v15515_v44 = vld [vmem:[%s26364_s7 + $0xc0] sm:$0xff] }
0x1959   : > { %19503 = vmatprep.subr.bf16.mxu1 %v20446_v16  ;;  %v19536_v46 = vpack.c.bf16 %v15516_v45, %v15515_v44  ;;  %v15538_v44 = vld [vmem:[%s26364_s7 + $0x158] sm:$0xff] }
0x195c   : > { %19505 = vmatpush1.bf16.msra.mxu1 %v19504_v48  ;;  %v10251_v48 = vld [vmem:[%s26364_s7 + $0x40] sm:$0xff] }
0x195d   : > { %19506 = vmatprep.subr.bf16.mxu1 %v20446_v16 }
0x1960   : > { %19508 = vmatpush1.bf16.msra.mxu1 %v19507_v52 }
0x1961   : > { %19509 = vmatprep.subr.bf16.mxu1 %v20446_v16 }
0x1964   : > { %19511 = vmatpush1.bf16.msra.mxu1 %v19510_v55  ;;  %v15520_v55 = vld [vmem:[%s26364_s7 + $0xd8] sm:$0xff] }
0x1965   : > { %19512 = vmatprep.subr.bf16.mxu1 %v20446_v16 }
0x1968   : > { %19514 = vmatpush1.bf16.msra.mxu1 %v19513_v60 }
0x1969   : > { %19515 = vmatprep.subr.bf16.mxu1 %v20446_v16 }
0x196c   : > { %19517 = vmatpush1.bf16.msra.mxu1 %v19516_v61 }
0x196d   : > { %19538 = vmatprep.subr.bf16.mxu1 %v20446_v16 }
0x196f   : > { %10057 = vmatmul.mubr.f32.vlgmr.msra.gmra.mrb[106].mxu1 %v9861_v33 }
0x1970   : > { %15494 = vmatprep.mubr.msk.f32.mxu1 %vm1220_vm7, %v9864_v42  ;;  %19540 = vmatpush3.bf16.msra.mxu1 %v19539_v9  ;;  %v10159_v42 = vld [vmem:[%s26363_s6 + $0x8] sm:$0xf] }
0x1971   : > { %19541 = vmatprep.subr.bf16.mxu1 %v20446_v16 }
0x1973   : > { %10062 = vmatmul.mubr.f32.gmra.mrb[108].mxu1 %v9863_v25  ;;  %v15512_v25 = vld [vmem:[%s26364_s7 + $0xa8] sm:$0xff] }
0x1974   : > { %15495 = vmatprep.mubr.msk.f32.mxu1 %vm1220_vm7, %v9866_v6  ;;  %19543 = vmatpush3.bf16.msra.mxu1 %v19542_v13  ;;  %v19530_v28 = vpack.c.bf16 %v15512_v25, %v15511_v27  ;;  %v15514_v6 = vld [vmem:[%s26364_s7 + $0xb8] sm:$0xff]  ;;  %v15508_v27 = vld [vmem:[%s26364_s7 + $0x88] sm:$0xff]  ;;  %v15531_v25 = vld [vmem:[%s26364_s7 + $0x120] sm:$0xff] }
0x1975   : > { %19544 = vmatprep.subr.bf16.mxu1 %v20446_v16  ;;  %v19533_v36 = vpack.c.bf16 %v15514_v6, %v15513_v38  ;;  %v15534_v38 = vld [vmem:[%s26364_s7 + $0x138] sm:$0xff] }
0x1977   : > { %10067 = vmatmul.mubr.f32.gmra.mrb[110].mxu1 %v9865_v58  ;;  %v10249_v58 = vld [vmem:[%s26364_s7 + $0x30] sm:$0xff] }
0x1978   : > { %17704 = vmatprep.mubr.msk.f32.mxu1 %vm20447_vm9, %v20444_v7  ;;  %19546 = vmatpush3.bf16.msra.mxu1 %v19545_v50  ;;  %v19548_v43 = vpack.c.bf16 %v10250_v34, %v10249_v58  ;;  %v15533_v50 = vld [vmem:[%s26364_s7 + $0x130] sm:$0xff]  ;;  %v15536_v58 = vld [vmem:[%s26364_s7 + $0x148] sm:$0xff] }
0x1979   : > { %19547 = vmatprep.subr.bf16.mxu1 %v20446_v16  ;;  %v19578_v6 = vpack.c.bf16 %v15534_v38, %v15533_v50 }
0x197c   : > { %19549 = vmatpush3.bf16.msra.mxu1 %v19548_v43  ;;  %v15537_v43 = vld [vmem:[%s26364_s7 + $0x150] sm:$0xff] }
0x197d   : > { %17702 = vmatprep.subr.mxu1 %v20444_v7  ;;  %v19584_v45 = vpack.c.bf16 %v15538_v44, %v15537_v43 }
0x1980   : > { %17703 = vmatpush3.msra.mxu1 %v10251_v48  ;;  %v10673_v48 = vld [vmem:[%s26366_s9] sm:$0xff] }
0x1981   : > { %19562 = vmatprep.subr.bf16.mxu1 %v20446_v16 }
0x1983   : > { %v9276_v2 = vpop.permute.xlu0 %9275 }
0x1984   : > { %9278 = vst.msk [vmem:[#allocation2 + $0xc] sm:$0x1] %vm2345_vm13, %v9276_v2  ;;  %v19551_v2 = vpack.c.bf16 %v15521_v56, %v15520_v55  ;;  %v10675_v55 = vld [vmem:[%s26366_s9 + $0x10] sm:$0xff]  ;;  %v10676_v56 = vld [vmem:[%s26366_s9 + $0x18] sm:$0xff] }
0x1987   : > { %v9268_v3 = vpop.permute.xlu0 %9267 }
0x1988   : > { %9270 = vst.msk [vmem:[#allocation2 + $0x4] sm:$0x1] %vm2345_vm13, %v9268_v3  ;;  %v15502_v3 = vld [vmem:[%s26364_s7 + $0x58] sm:$0xff] }
0x1a1e   : > { %v9960_v14 = vpop.f32.mrb[100].mxu1 }
0x1a1f   : > { %v9962_v15 = vpop.f32.mrb[101].mxu1 }
0x1a22   : > { %v9965_v17 = vpop.f32.mrb[102].mxu1 }
0x1a23   : > { %v9967_v19 = vpop.f32.mrb[103].mxu1 }
0x1a24   : > { %v15522_v19 = vld [vmem:[%s26364_s7 + $0xe8] sm:$0xff] }
0x1a26   : > { %v9970_v47 = vpop.f32.mrb[104].mxu1 }
0x1a27   : > { %v9972_v30 = vpop.f32.mrb[105].mxu1 }
0x1a42   : > { %v10058_v29 = vpop.f32.mrb[106].mxu1 }
0x1a43   : > { %v10072_v62 = vmax.f32 %v9960_v14, %v10058_v29  ;;  %v10060_v57 = vpop.f32.mrb[107].mxu1  ;;  %v15504_v29 = vld [vmem:[%s26364_s7 + $0x68] sm:$0xff] }
0x1a46   : > { %v10063_v23 = vpop.f32.mrb[108].mxu1 }
0x1a47   : > { %v10073_v18 = vmax.f32 %v9965_v17, %v10063_v23  ;;  %v10065_v0 = vpop.f32.mrb[109].mxu1  ;;  %v19566_v17 = vpack.c.bf16 %v15503_v4, %v15502_v3  ;;  %v10763_v3 = vld [vmem:[%s26367_s10 + $0x20] sm:$0xff] }
0x1a49   : > { %v19518_v31 = vpack.c.bf16 %v10073_v18, %v10072_v62  ;;  %v15505_v62 = vld [vmem:[%s26364_s7 + $0x70] sm:$0xff] }
0x1a4a   : > { %v10068_v32 = vpop.f32.mrb[110].mxu1 }
0x1a4b   : > { %v10074_v33 = vmax.f32 %v9970_v47, %v10068_v32  ;;  %v10070_v35 = vpop.f32.mrb[111].mxu1  ;;  %19519 = vmatprep.subr.bf16.mxu0 %v19518_v31  ;;  %v15523_v47 = vld [vmem:[%s26364_s7 + $0xf0] sm:$0xff]  ;;  %v15524_v32 = vld [vmem:[%s26364_s7 + $0xf8] sm:$0xff] }
0x1a4c   : > { %19521 = vmatpush3.bf16.msra.mxu0 %v19518_v31  ;;  %v19554_v0 = vpack.c.bf16 %v15523_v47, %v15522_v19  ;;  %v15506_v35 = vld [vmem:[%s26364_s7 + $0x78] sm:$0xff]  ;;  %v10682_v19 = vld [vmem:[%s26366_s9 + $0x48] sm:$0xff]  ;;  %v10767_v47 = vld [vmem:[%s26367_s10 + $0x40] sm:$0xff] }
0x1a4d   : > { %17651 = vmatprep.subr.mxu0 %v10074_v33 }
0x1a50   : > { %17652 = vmatpush3.msra.mxu0 %v10074_v33 }
0x1a51   : > { %17654 = vmatmul.mubr.msk.f32.vlgmr.msra.gmra.mrb[112].mxu0 %vm1413_vm8, %v10076_v37  ;;  %19523 = vmatprep.subr.bf16.mxu0 %v19518_v31  ;;  %v15507_v37 = vld [vmem:[%s26364_s7 + $0x80] sm:$0xff] }
0x1a52   : > { %19525 = vmatpush3.bf16.msra.mxu0 %v19518_v31  ;;  %17662 = vmatprep.mubr.msk.f32.mxu0 %vm1413_vm8, %v10158_v39  ;;  %v19569_v31 = vpack.c.bf16 %v15505_v62, %v15504_v29  ;;  %v19572_v40 = vpack.c.bf16 %v15507_v37, %v15506_v35  ;;  %v10686_v35 = vld [vmem:[%s26366_s9 + $0x68] sm:$0xff]  ;;  %v10771_v37 = vld [vmem:[%s26367_s10 + $0x60] sm:$0xff] }
0x1a53   : > { %17660 = vmatprep.subr.mxu0 %v10074_v33 }
0x1a56   : > { %17661 = vmatpush3.msra.mxu0 %v10074_v33  ;;  %v15525_v33 = vld [vmem:[%s26364_s7 + $0x100] sm:$0xff] }
0x1a57   : > { %17663 = vmatmul.mubr.msk.f32.vlgmr.msra.gmra.mrb[114].mxu0 %vm1413_vm8, %v10159_v42  ;;  %19526 = vmatprep.subr.bf16.mxu0 %v20446_v16  ;;  %v19557_v39 = vpack.c.bf16 %v15525_v33, %v15524_v32  ;;  %v15527_v42 = vld [vmem:[%s26364_s7 + $0x110] sm:$0xff]  ;;  %v10685_v33 = vld [vmem:[%s26366_s9 + $0x60] sm:$0xff] }
0x1a58   : > { %19528 = vmatpush3.bf16.msra.mxu0 %v19527_v26  ;;  %17683 = vmatprep.mubr.msk.f32.mxu0 %vm20447_vm9, %v20444_v7  ;;  %v19560_v26 = vpack.c.bf16 %v15527_v42, %v15526_v41  ;;  %v10687_v42 = vld [vmem:[%s26366_s9 + $0x70] sm:$0xff] }
0x1a59   : > { %19529 = vmatprep.subr.bf16.mxu0 %v20446_v16 }
0x1a5c   : > { %19531 = vmatpush3.bf16.msra.mxu0 %v19530_v28  ;;  %v15532_v28 = vld [vmem:[%s26364_s7 + $0x128] sm:$0xff] }
0x1a5d   : > { %19532 = vmatprep.subr.bf16.mxu0 %v20446_v16  ;;  %v19575_v21 = vpack.c.bf16 %v15532_v28, %v15531_v25  ;;  %v10773_v25 = vld [vmem:[%s26367_s10 + $0x70] sm:$0xff]  ;;  %v10774_v28 = vld [vmem:[%s26367_s10 + $0x78] sm:$0xff] }
0x1a60   : > { %19534 = vmatpush3.bf16.msra.mxu0 %v19533_v36  ;;  %v15535_v36 = vld [vmem:[%s26364_s7 + $0x140] sm:$0xff] }
0x1a61   : > { %19535 = vmatprep.subr.bf16.mxu0 %v20446_v16  ;;  %v19581_v34 = vpack.c.bf16 %v15536_v58, %v15535_v36 }
0x1a64   : > { %19537 = vmatpush3.bf16.msra.mxu0 %v19536_v46  ;;  %v15539_v46 = vld [vmem:[%s26364_s7 + $0x160] sm:$0xff] }
0x1a65   : > { %17681 = vmatprep.subr.mxu0 %v20444_v7 }
0x1a68   : > { %17682 = vmatpush3.msra.mxu0 %v15517_v49  ;;  %v10674_v49 = vld [vmem:[%s26366_s9 + $0x8] sm:$0xff] }
0x1a69   : > { %19550 = vmatprep.subr.bf16.mxu0 %v20446_v16 }
0x1b24   : > { %v17655_v51 = vpop.f32.mrb[112].mxu0 }
0x1b25   : > { %v10149_v52 = vpop.f32.mrb[113].mxu0 }
0x1b2a   : > { %v17664_v59 = vpop.f32.mrb[114].mxu0 }
0x1b2b   : > { %v10242_v60 = vmax.f32 %v17655_v51, %v17664_v59  ;;  %v10232_v22 = vpop.f32.mrb[115].mxu0  ;;  %v10759_v51 = vld [vmem:[%s26367_s10] sm:$0xff]  ;;  %v10761_v59 = vld [vmem:[%s26367_s10 + $0x10] sm:$0xff] }
0x1b2c   : > { %v10241_v61 = vmax.f32 %v10149_v52, %v10232_v22  ;;  %v19587_v52 = vpack.c.bf16 %v10674_v49, %v10673_v48  ;;  %v19611_v54 = vpack.c.bf16 %v10760_v53, %v10759_v51  ;;  %v10762_v22 = vld [vmem:[%s26367_s10 + $0x18] sm:$0xff]  ;;  %v15541_v51 = vld [vmem:[%s26365_s8] ss:$0 sm:$0xff] }
0x1b2d   : > { %v10273_v5 = vrot.slane %v10242_v60, 2  ;;  %v10429_v8 = vrot.slane %v10242_v60, 3  ;;  %v10504_v9 = vrot.slane %v10242_v60, 1  ;;  %v10588_v11 = vrot.slane %v10242_v60, 4 }
0x1b2e   : > { %17705 = vmatmul.mubr.msk.f32.vlgmr.msra.gmra.mrb[112].mxu1 %vm1614_vm10, %v10241_v61  ;;  %v10272_v12 = vrot.slane %v10241_v61, 2  ;;  %v10503_v13 = vrot.slane %v10241_v61, 1  ;;  %v10428_v14 = vrot.slane %v10241_v61, 3  ;;  %v10587_v15 = vrot.slane %v10241_v61, 4  ;;  %v10677_v61 = vld [vmem:[%s26366_s9 + $0x20] sm:$0xff] }
0x1b2f   : > { %19564 = vmatpush3.bf16.msra.mxu1 %v19563_v24  ;;  %17746 = vmatprep.mubr.msk.f32.mxu1 %vm20447_vm9, %v20444_v7  ;;  %v19590_v60 = vpack.c.bf16 %v10676_v56, %v10675_v55  ;;  %v19614_v24 = vpack.c.bf16 %v10762_v22, %v10761_v59  ;;  %v15557_v55 = vld [vmem:[%s26408_s29 + $0x88] sm:$0xff]  ;;  %v15559_v56 = vld [vmem:[%s26408_s29 + $0x98] sm:$0xff] }
0x1b30   : > { %v10274_v30 = vsel %vm640_vm3, %v10272_v12, %v10273_v5  ;;  %19565 = vmatprep.subr.bf16.mxu1 %v20446_v16  ;;  %v10505_v57 = vsel %vm952_vm6, %v10503_v13, %v10504_v9  ;;  %v10430_v23 = vsel %vm849_vm5, %v10428_v14, %v10429_v8  ;;  %v10589_v18 = vsel %vm655_vm0, %v10587_v15, %v10588_v11  ;;  %v10764_v5 = vld [vmem:[%s26367_s10 + $0x28] sm:$0xff]  ;;  %v10679_v8 = vld [vmem:[%s26366_s9 + $0x30] sm:$0xff]  ;;  %v10680_v9 = vld [vmem:[%s26366_s9 + $0x38] sm:$0xff] }
0x1b31   : > { %17684 = vmatmul.mubr.msk.f32.vlgmr.msra.gmra.mrb[116].mxu0 %vm1614_vm10, %v10274_v30  ;;  %v19617_v11 = vpack.c.bf16 %v10764_v5, %v10763_v3  ;;  %v10765_v12 = vld [vmem:[%s26367_s10 + $0x30] sm:$0xff]  ;;  %v10766_v13 = vld [vmem:[%s26367_s10 + $0x38] sm:$0xff]  ;;  %v19596_v14 = vpack.c.bf16 %v10680_v9, %v10679_v8  ;;  %v10768_v30 = vld [vmem:[%s26367_s10 + $0x48] sm:$0xff]  ;;  %v19634_v3 = vpack.c.bf16 %v15559_v56, %v15557_v55 }
0x1b32   : > { %19552 = vmatpush3.bf16.msra.mxu0 %v19551_v2  ;;  %17725 = vmatprep.mubr.msk.f32.mxu0 %vm20447_vm9, %v20444_v7  ;;  %v10678_v2 = vld [vmem:[%s26366_s9 + $0x28] sm:$0xff]  ;;  %v19620_v15 = vpack.c.bf16 %v10766_v13, %v10765_v12  ;;  %v19623_v62 = vpack.c.bf16 %v10768_v30, %v10767_v47  ;;  %v15558_v5 = vld [vmem:[%s26408_s29 + $0x90] sm:$0xff]  ;;  %v15563_v9 = vld [vmem:[%s26408_s29 + $0xb8] sm:$0xf] }
0x1b33   : > { %19567 = vmatpush3.bf16.msra.mxu1 %v19566_v17  ;;  %19553 = vmatprep.subr.bf16.mxu0 %v20446_v16  ;;  %v19593_v4 = vpack.c.bf16 %v10678_v2, %v10677_v61  ;;  %v10681_v17 = vld [vmem:[%s26366_s9 + $0x40] sm:$0xff]  ;;  %v15561_v8 = vld [vmem:[%s26408_s29 + $0xa8] sm:$0xff]  ;;  %v11018_v30 = vld [vmem:[%s26408_s29 + $0x18] sm:$0xff] }
0x1b34   : > { %19568 = vmatprep.subr.bf16.mxu1 %v20446_v16  ;;  %v19599_v29 = vpack.c.bf16 %v10682_v19, %v10681_v17  ;;  %v10846_v2 = vld [vmem:[%s26368_s11] sm:$0xf]  ;;  %v24756_v19 = vld [vmem:[%s20647_s27 + $0xc8] sm:$0xff]  ;;  %v15550_v56 = vld [vmem:[%s26408_s29 + $0x50] sm:$0xff] }
0x1b35   : > { %v15560_v13 = vld [vmem:[%s26408_s29 + $0xa0] sm:$0xff]  ;;  %v11016_v47 = vld [vmem:[%s26408_s29 + $0x8] sm:$0xff] }
0x1b36   : > { %19555 = vmatpush3.bf16.msra.mxu0 %v19554_v0  ;;  %v10770_v0 = vld [vmem:[%s26367_s10 + $0x58] sm:$0xff]  ;;  %v24753_v17 = vld [vmem:[%s20647_s27 + $0xc0] sm:$0xff] }
0x1b37   : > { %19570 = vmatpush3.bf16.msra.mxu1 %v19569_v31  ;;  %19556 = vmatprep.subr.bf16.mxu0 %v20446_v16  ;;  %v15548_v55 = vld [vmem:[%s26408_s29 + $0x40] sm:$0xff] }
0x1b38   : > { %19571 = vmatprep.subr.bf16.mxu1 %v20446_v16 }
0x1b3a   : > { %19558 = vmatpush3.bf16.msra.mxu0 %v19557_v39  ;;  %v19605_v39 = vpack.c.bf16 %v10686_v35, %v10685_v33  ;;  %v11022_v33 = vld [vmem:[%s26408_s29 + $0x38] sm:$0xf] }
0x1b3b   : > { %19573 = vmatpush3.bf16.msra.mxu1 %v19572_v40  ;;  %19559 = vmatprep.subr.bf16.mxu0 %v20446_v16  ;;  %v10772_v40 = vld [vmem:[%s26367_s10 + $0x68] sm:$0xff] }
0x1b3c   : > { %17744 = vmatprep.subr.mxu1 %v20444_v7  ;;  %v19629_v41 = vpack.c.bf16 %v10772_v40, %v10771_v37  ;;  %v24790_v40 = vld [vmem:[%s20647_s27 + $0xd8] sm:$0xf] }
0x1b3e   : > { %19561 = vmatpush3.bf16.msra.mxu0 %v19560_v26  ;;  %v10688_v26 = vld [vmem:[%s26366_s9 + $0x78] sm:$0xff] }
0x1b3f   : > { %17745 = vmatpush3.msra.mxu1 %v15508_v27  ;;  %17723 = vmatprep.subr.mxu0 %v20444_v7  ;;  %v19608_v27 = vpack.c.bf16 %v10688_v26, %v10687_v42  ;;  %v11019_v42 = vld [vmem:[%s26408_s29 + $0x20] sm:$0xff]  ;;  %v11021_v26 = vld [vmem:[%s26408_s29 + $0x30] sm:$0xf] }
0x1b40   : > { %17747 = vmatmul.mubr.msk.f32.vlgmr.msra.gmra.mrb[114].mxu1 %vm1614_vm10, %v10505_v57  ;;  %19586 = vmatprep.subr.bf16.mxu1 %v20446_v16  ;;  %v10683_v57 = vld [vmem:[%s26366_s9 + $0x50] sm:$0xff] }
0x1b41   : > { %17802 = vmatprep.mubr.msk.f32.mxu1 %vm20447_vm9, %v20444_v7  ;;  %19588 = vmatpush3.bf16.msra.mxu1 %v19587_v52 }
0x1b42   : > { %17724 = vmatpush3.msra.mxu0 %v15528_v20  ;;  %19589 = vmatprep.subr.bf16.mxu1 %v20446_v16  ;;  %v19632_v20 = vpack.c.bf16 %v10774_v28, %v10773_v25  ;;  %v15577_v25 = vld [vmem:[%s26408_s29 + $0xd8] sm:$0xff] }
0x1b43   : > { %17726 = vmatmul.mubr.msk.f32.vlgmr.msra.gmra.mrb[118].mxu0 %vm1614_vm10, %v10430_v23  ;;  %19574 = vmatprep.subr.bf16.mxu0 %v20446_v16  ;;  %v10684_v23 = vld [vmem:[%s26366_s9 + $0x58] sm:$0xff] }
0x1b44   : > { %19576 = vmatpush3.bf16.msra.mxu0 %v19575_v21  ;;  %17767 = vmatprep.mubr.msk.f32.mxu0 %vm20447_vm9, %v20444_v7  ;;  %v19602_v31 = vpack.c.bf16 %v10684_v23, %v10683_v57  ;;  %v11044_v57 = vrot.slane %v24756_v19, 2  ;;  %v24771_v23 = vld [vmem:[%s20647_s27 + $0xd0] sm:$0xff] }
0x1b45   : > { %19577 = vmatprep.subr.bf16.mxu0 %v20446_v16  ;;  %19591 = vmatpush3.bf16.msra.mxu1 %v19590_v60  ;;  %v11046_v37 = vrot.slane %v24771_v23, 2 }
0x1b46   : > { %19592 = vmatprep.subr.bf16.mxu1 %v20446_v16 }
0x1b47   : > { %v11047_v28 = vsel %vm640_vm3, %v11044_v57, %v11046_v37 }
0x1b48   : > { %19579 = vmatpush3.bf16.msra.mxu0 %v19578_v6 }
0x1b49   : > { %19580 = vmatprep.subr.bf16.mxu0 %v20446_v16  ;;  %19594 = vmatpush3.bf16.msra.mxu1 %v19593_v4  ;;  %v15556_v4 = vld [vmem:[%s26408_s29 + $0x80] sm:$0xff] }
0x1b4a   : > { %19595 = vmatprep.subr.bf16.mxu1 %v20446_v16  ;;  %v19636_v12 = vpack.c.bf16 %v15558_v5, %v15556_v4  ;;  %v15554_v4 = vld [vmem:[%s26408_s29 + $0x70] sm:$0xf]  ;;  %v15593_v5 = vld [vmem:[%s26408_s29 + $0x108] sm:$0xff] }
0x1b4c   : > { %19582 = vmatpush3.bf16.msra.mxu0 %v19581_v34 }
0x1b4d   : > { %19583 = vmatprep.subr.bf16.mxu0 %v20446_v16  ;;  %19597 = vmatpush3.bf16.msra.mxu1 %v19596_v14  ;;  %v19638_v14 = vpack.c.bf16 %v15563_v9, %v15561_v8  ;;  %v15595_v8 = vld [vmem:[%s26408_s29 + $0x118] sm:$0xff] }
0x1b4e   : > { %19598 = vmatprep.subr.bf16.mxu1 %v20446_v16 }
0x1b50   : > { %19585 = vmatpush3.bf16.msra.mxu0 %v19584_v45 }
0x1b51   : > { %17765 = vmatprep.subr.mxu0 %v20444_v7  ;;  %19600 = vmatpush3.bf16.msra.mxu1 %v19599_v29 }
0x1b52   : > { %19601 = vmatprep.subr.bf16.mxu1 %v20446_v16 }
0x1b54   : > { %17766 = vmatpush3.msra.mxu0 %v15539_v46 }
0x1b55   : > { %17768 = vmatmul.mubr.msk.f32.vlgmr.msra.gmra.mrb[120].mxu0 %vm1614_vm10, %v10589_v18  ;;  %19610 = vmatprep.subr.bf16.mxu0 %v20446_v16  ;;  %v10769_v18 = vld [vmem:[%s26367_s10 + $0x50] sm:$0xff] }
0x1b56   : > { %17837 = vmatprep.mubr.msk.f32.mxu0 %vm20447_vm9, %v20444_v7  ;;  %19612 = vmatpush3.bf16.msra.mxu0 %v19611_v54  ;;  %v19626_v32 = vpack.c.bf16 %v10770_v0, %v10769_v18  ;;  %v19644_v18 = vpack.c.bf16 %v11018_v30, %v11016_v47  ;;  %v11015_v0 = vld [vmem:[%s26408_s29] sm:$0xff]  ;;  %v11351_v47 = vrot.slane %v24756_v19, 1 }
0x1b57   : > { %19613 = vmatprep.subr.bf16.mxu0 %v20446_v16  ;;  %19603 = vmatpush3.bf16.msra.mxu1 %v19602_v31  ;;  %v11017_v31 = vld [vmem:[%s26408_s29 + $0x10] sm:$0xff]  ;;  %v15592_v30 = vld [vmem:[%s26408_s29 + $0x100] sm:$0xff] }
0x1b58   : > { %19604 = vmatprep.subr.bf16.mxu1 %v20446_v16 }
0x1b5a   : > { %19615 = vmatpush3.bf16.msra.mxu0 %v19614_v24 }
0x1b5b   : > { %19616 = vmatprep.subr.bf16.mxu0 %v20446_v16  ;;  %19606 = vmatpush3.bf16.msra.mxu1 %v19605_v39  ;;  %v19646_v39 = vpack.c.bf16 %v11017_v31, %v11015_v0  ;;  %v11353_v0 = vrot.slane %v24771_v23, 1 }
0x1b5c   : > { %19607 = vmatprep.subr.bf16.mxu1 %v20446_v16 }
0x1b5e   : > { %19618 = vmatpush3.bf16.msra.mxu0 %v19617_v11  ;;  %v10920_v11 = vld [vmem:[%s26369_s12] sm:$0xf] }
0x1b5f   : > { %19619 = vmatprep.subr.bf16.mxu0 %v20446_v16  ;;  %19609 = vmatpush3.bf16.msra.mxu1 %v19608_v27  ;;  %v15575_v27 = vld [vmem:[%s26408_s29 + $0xc8] sm:$0xff] }
0x1b60   : > { %17840 = vmatprep.subr.mxu1 %v20444_v7 }
0x1b62   : > { %19621 = vmatpush3.bf16.msra.mxu0 %v19620_v15  ;;  %v15562_v15 = vld [vmem:[%s26408_s29 + $0xb0] sm:$0xf] }
0x1b63   : > { %19622 = vmatprep.subr.bf16.mxu0 %v20446_v16  ;;  %v19641_v29 = vpack.c.bf16 %v15562_v15, %v15560_v13  ;;  %v19674_v13 = vpack.c.bf16 %v15595_v8, %v15593_v5  ;;  %v11350_v15 = vrot.slane %v24753_v17, 1 }
0x1b66   : > { %19624 = vmatpush3.bf16.msra.mxu0 %v19623_v62  ;;  %v11043_v62 = vrot.slane %v24753_v17, 2 }
0x1b67   : > { %19625 = vmatprep.subr.bf16.mxu0 %v20446_v16 }
0x1b68   : > { %v11045_v35 = vsel %vm640_vm3, %v11043_v62, %v11044_v57  ;;  %v15597_v62 = vld [vmem:[%s26408_s29 + $0x128] sm:$0xff]  ;;  %v15599_v57 = vld [vmem:[%s26408_s29 + $0x138] sm:$0xf] }
0x1b6a   : > { %19627 = vmatpush3.bf16.msra.mxu0 %v19626_v32  ;;  %v11020_v32 = vld [vmem:[%s26408_s29 + $0x28] sm:$0xff] }
0x1b6b   : > { %19628 = vmatprep.subr.bf16.mxu0 %v20446_v16 }
0x1b6e   : > { %19630 = vmatpush3.bf16.msra.mxu0 %v19629_v41  ;;  %v19648_v41 = vpack.c.bf16 %v11022_v33, %v11020_v32  ;;  %v19678_v32 = vpack.c.bf16 %v15599_v57, %v15597_v62  ;;  %v15596_v33 = vld [vmem:[%s26408_s29 + $0x120] sm:$0xff] }
0x1b6f   : > { %19631 = vmatprep.subr.bf16.mxu0 %v20446_v16  ;;  %v11705_v57 = vld [vmem:[%s26415_s4] sm:$0xff] }
0x1b72   : > { %19633 = vmatpush3.bf16.msra.mxu0 %v19632_v20  ;;  %v11048_v20 = vrot.slane %v24790_v40, 2 }
0x1b73   : > { %19684 = vmatprep.subr.bf16.mxu0 %v20446_v16 }
0x1c01   : > { %v10415_v21 = vpop.f32.mrb[112].mxu1 }
0x1c02   : > { %v17706_v50 = vpop.f32.mrb[113].mxu1 }
0x1c03   : > { %v19654_v50 = vpack.c.bf16 %v15577_v25, %v15575_v27  ;;  %v11461_v27 = vrot.slane %v24756_v19, 4 }
0x1c04   : > { %v10343_v38 = vpop.f32.mrb[116].mxu0 }
0x1c05   : > { %v10416_v6 = vadd.f32 %v10415_v21, %v10343_v38  ;;  %v17685_v36 = vpop.f32.mrb[117].mxu0  ;;  %v19651_v21 = vpack.c.bf16 %v11021_v26, %v11019_v42  ;;  %v11049_v38 = vsel %vm640_vm3, %v11046_v37, %v11048_v20  ;;  %v11354_v37 = vsel %vm952_vm6, %v11351_v47, %v11353_v0 }
0x1c06   : > { %v15576_v36 = vld [vmem:[%s26408_s29 + $0xd0] sm:$0xff]  ;;  %v11460_v26 = vrot.slane %v24753_v17, 4 }
0x1c08   : > { %v11462_v25 = vsel %vm655_vm0, %v11460_v26, %v11461_v27 }
0x1c13   : > { %v10574_v58 = vpop.f32.mrb[114].mxu1 }
0x1c14   : > { %v17748_v34 = vpop.f32.mrb[115].mxu1 }
0x1c15   : > { %v15581_v34 = vld [vmem:[%s26408_s29 + $0xf8] sm:$0xf] }
0x1c16   : > { %v10499_v43 = vpop.f32.mrb[118].mxu0 }
0x1c17   : > { %v10575_v44 = vadd.f32 %v10574_v58, %v10499_v43  ;;  %v17727_v45 = vpop.f32.mrb[119].mxu0  ;;  %v15579_v58 = vld [vmem:[%s26408_s29 + $0xe8] sm:$0xff] }
0x1c18   : > { %v15578_v45 = vld [vmem:[%s26408_s29 + $0xe0] sm:$0xff] }
0x1c28   : > { %v10658_v46 = vpop.f32.mrb[120].mxu0 }
0x1c29   : > { %v10662_v48 = vadd.f32 %v10658_v46, %v10416_v6  ;;  %v17769_v49 = vpop.f32.mrb[121].mxu0  ;;  %v15574_v6 = vld [vmem:[%s26408_s29 + $0xc0] sm:$0xff]  ;;  %v15580_v46 = vld [vmem:[%s26408_s29 + $0xf0] sm:$0xf] }
0x1c2a   : > { %v19656_v43 = vpack.c.bf16 %v15576_v36, %v15574_v6  ;;  %v15551_v49 = vld [vmem:[%s26408_s29 + $0x58] sm:$0xff]  ;;  %v11602_v36 = vld [vmem:[%s26413_s19 + $0x20] sm:$0xff] }
0x1c2b   : > { %v10663_v52 = vadd.f32 %v10662_v48, %v10575_v44  ;;  %v19658_v44 = vpack.c.bf16 %v15581_v34, %v15579_v58  ;;  %v15549_v48 = vld [vmem:[%s26408_s29 + $0x48] sm:$0xff] }
0x1c2c   : > { %v11603_v58 = vld [vmem:[%s26413_s19 + $0x28] sm:$0xff] }
0x1c2d   : > { %v10671_v53 = vadd.f32 %v15541_v51, %v10663_v52  ;;  %v19661_v51 = vpack.c.bf16 %v15580_v46, %v15578_v45  ;;  %v19664_v52 = vpack.c.bf16 %v15551_v49, %v15549_v48  ;;  %v19691_v34 = vpack.c.bf16 %v11603_v58, %v11602_v36  ;;  %v11606_v46 = vld [vmem:[%s26413_s19 + $0x40] sm:$0xff]  ;;  %v11607_v48 = vld [vmem:[%s26413_s19 + $0x48] sm:$0xff]  ;;  %v11711_v36 = vld [vmem:[%s26415_s4 + $0x30] sm:$0xff] }
0x1c2e   : > { %v19697_v49 = vpack.c.bf16 %v11607_v48, %v11606_v46  ;;  %v11712_v58 = vld [vmem:[%s26415_s4 + $0x38] sm:$0xff]  ;;  %v11715_v46 = vld [vmem:[%s26415_s4 + $0x50] sm:$0xff] }
0x1c2f   : > { %v10672_v54 = vmax.f32 %v10671_v53, 0.0  ;;  %v11248_v53 = vrot.slane %v24753_v17, 3  ;;  %v11716_v48 = vld [vmem:[%s26415_s4 + $0x58] sm:$0xff] }
0x1c31   : > { %17803 = vmatmul.mubr.f32.vlgmr.msra.gmra.mrb[116].mxu1 %v10672_v54  ;;  %17838 = vmatmul.mubr.f32.vlgmr.msra.gmra.mrb[122].mxu0 %v10672_v54  ;;  %v11249_v54 = vrot.slane %v24756_v19, 3 }
0x1c32   : > { %17842 = vmatprep.mubr.msk.f32.mxu1 %vm20447_vm9, %v20444_v7 }
0x1d04   : > { %v10755_v59 = vpop.f32.mrb[116].mxu1  ;;  %v10841_v60 = vpop.f32.mrb[122].mxu0 }
0x1d05   : > { %v10845_v22 = vmax.f32 %v10755_v59, %v10841_v60  ;;  %v17804_v24 = vpop.f32.mrb[117].mxu1  ;;  %v17839_v61 = vpop.f32.mrb[123].mxu0  ;;  %v15553_v59 = vld [vmem:[%s26408_s29 + $0x68] sm:$0xff]  ;;  %v15555_v60 = vld [vmem:[%s26408_s29 + $0x78] sm:$0xf] }
0x1d06   : > { %v11251_v24 = vrot.slane %v24771_v23, 3  ;;  %v19666_v61 = vpack.c.bf16 %v15550_v56, %v15548_v55  ;;  %v11611_v55 = vld [vmem:[%s26413_s19 + $0x68] sm:$0xff] }
0x1d07   : > { %17841 = vmatpush3.msra.mxu1 %v10845_v22 }
0x1d08   : > { %17843 = vmatmul.mubr.msk.f32.vlgmr.msra.gmra.mrb[118].mxu1 %vm2189_vm11, %v10846_v2  ;;  %17845 = vmatprep.subr.mxu1 %v20444_v7  ;;  %v19668_v2 = vpack.c.bf16 %v15555_v60, %v15553_v59  ;;  %v11252_v9 = vsel %vm849_vm5, %v11249_v54, %v11251_v24  ;;  %v11612_v59 = vld [vmem:[%s26413_s19 + $0x70] sm:$0xff]  ;;  %v11613_v60 = vld [vmem:[%s26413_s19 + $0x78] sm:$0xff] }
0x1d09   : > { %17846 = vmatpush3.msra.mxu1 %v10845_v22  ;;  %17847 = vmatprep.mubr.msk.f32.mxu1 %vm20447_vm9, %v20444_v7  ;;  %v11250_v22 = vsel %vm849_vm5, %v11248_v53, %v11249_v54  ;;  %v11610_v54 = vld [vmem:[%s26413_s19 + $0x60] sm:$0xff] }
0x1d0a   : > { %19635 = vmatprep.subr.bf16.mxu1 %v19634_v3  ;;  %v15552_v3 = vld [vmem:[%s26408_s29 + $0x60] sm:$0xff]  ;;  %v19703_v56 = vpack.c.bf16 %v11611_v55, %v11610_v54  ;;  %v11719_v54 = vld [vmem:[%s26415_s4 + $0x70] sm:$0xff]  ;;  %v11720_v55 = vld [vmem:[%s26415_s4 + $0x78] sm:$0xff] }
0x1d0c   : > { %17848 = vmatmul.mubr.msk.f32.vlgmr.msra.gmra.mrb[120].mxu1 %vm2189_vm11, %v10920_v11  ;;  %v11253_v11 = vrot.slane %v24790_v40, 3 }
0x1d0d   : > { %19637 = vmatpush1.bf16.msra.mxu1 %v19636_v12  ;;  %11126 = vmatprep.mubr.f32.mxu1 %v20444_v7  ;;  %v19671_v12 = vpack.c.bf16 %v15554_v4, %v15552_v3 }
0x1d0e   : > { %19640 = vmatprep.subr.msk.bf16.mxu1 %vm20619_vm2, %v19638_v14  ;;  %v11254_v14 = vsel %vm849_vm5, %v11251_v24, %v11253_v11  ;;  %v11614_v24 = vld [vmem:[%s26413_s19 + $0x80] sm:$0xff] }
0x1d11   : > { %19643 = vmatpush1.bf16.msk.msra.mxu1 %vm20619_vm2, %v19641_v29  ;;  %v15594_v29 = vld [vmem:[%s26408_s29 + $0x110] sm:$0xff] }
0x1d12   : > { %19645 = vmatprep.subr.bf16.mxu1 %v19644_v18  ;;  %v11352_v18 = vsel %vm952_vm6, %v11350_v15, %v11351_v47  ;;  %v19676_v31 = vpack.c.bf16 %v15594_v29, %v15592_v30 }
0x1d14   : > { %15566 = vmatmul.mubr.msk.f32.vlgmr.msra.gmra.mrb[122].mxu1 %vm648_vm4, %v11045_v35  ;;  %v15598_v35 = vld [vmem:[%s26408_s29 + $0x130] sm:$0xf] }
0x1d15   : > { %11132 = vmatprep.mubr.f32.mxu1 %v20444_v7  ;;  %19647 = vmatpush1.bf16.msra.mxu1 %v19646_v39  ;;  %v11355_v39 = vrot.slane %v24790_v40, 1 }
0x1d16   : > { %19650 = vmatprep.subr.msk.bf16.mxu1 %vm20619_vm2, %v19648_v41  ;;  %v19681_v41 = vpack.c.bf16 %v15598_v35, %v15596_v33 }
0x1d17   : > { %v11356_v42 = vsel %vm952_vm6, %v11353_v0, %v11355_v39 }
0x1d18   : > { %15567 = vmatmul.mubr.msk.f32.gmra.mrb[124].mxu1 %vm648_vm4, %v11047_v28  ;;  %v11463_v28 = vrot.slane %v24771_v23, 4 }
0x1d19   : > { %11138 = vmatprep.mubr.f32.mxu1 %v20444_v7  ;;  %19653 = vmatpush1.bf16.msk.msra.mxu1 %vm20619_vm2, %v19651_v21  ;;  %v11465_v21 = vrot.slane %v24790_v40, 4  ;;  %v11600_v40 = vld [vmem:[%s26413_s19 + $0x10] sm:$0xff] }
0x1d1a   : > { %19655 = vmatprep.subr.bf16.mxu1 %v19654_v50  ;;  %v11464_v20 = vsel %vm655_vm0, %v11461_v27, %v11463_v28 }
0x1d1c   : > { %15568 = vmatmul.mubr.msk.f32.gmra.mrb[126].mxu1 %vm648_vm4, %v11049_v38  ;;  %v11601_v38 = vld [vmem:[%s26413_s19 + $0x18] sm:$0xff] }
0x1d1d   : > { %11221 = vmatprep.mubr.f32.mxu1 %v20444_v7  ;;  %v19688_v6 = vpack.c.bf16 %v11601_v38, %v11600_v40 }
0x1d20   : > { %15571 = vmatmul.mubr.msk.f32.vlgmr.msra.gmra.mrb[122].mxu1 %vm648_vm4, %v24753_v17  ;;  %v11466_v17 = vsel %vm655_vm0, %v11463_v28, %v11465_v21 }
0x1d21   : > { %11227 = vmatprep.mubr.f32.mxu1 %v20444_v7  ;;  %19657 = vmatpush1.bf16.msra.mxu1 %v19656_v43  ;;  %v11604_v43 = vld [vmem:[%s26413_s19 + $0x30] sm:$0xff] }
0x1d22   : > { %19660 = vmatprep.subr.msk.bf16.mxu1 %vm20619_vm2, %v19658_v44  ;;  %v11605_v44 = vld [vmem:[%s26413_s19 + $0x38] sm:$0xff] }
0x1d23   : > { %v19694_v45 = vpack.c.bf16 %v11605_v44, %v11604_v43  ;;  %v11713_v43 = vld [vmem:[%s26415_s4 + $0x40] sm:$0xff]  ;;  %v11714_v44 = vld [vmem:[%s26415_s4 + $0x48] sm:$0xff] }
0x1d24   : > { %15572 = vmatmul.mubr.msk.f32.gmra.mrb[124].mxu1 %vm648_vm4, %v24756_v19  ;;  %v11598_v19 = vld [vmem:[%s26413_s19] sm:$0xff] }
0x1d25   : > { %11233 = vmatprep.mubr.f32.mxu1 %v20444_v7  ;;  %19663 = vmatpush1.bf16.msk.msra.mxu1 %vm20619_vm2, %v19661_v51  ;;  %v11608_v51 = vld [vmem:[%s26413_s19 + $0x50] sm:$0xff] }
0x1d26   : > { %19665 = vmatprep.subr.bf16.mxu1 %v19664_v52  ;;  %v11609_v52 = vld [vmem:[%s26413_s19 + $0x58] sm:$0xff] }
0x1d27   : > { %v19700_v53 = vpack.c.bf16 %v11609_v52, %v11608_v51  ;;  %v11717_v51 = vld [vmem:[%s26415_s4 + $0x60] sm:$0xff]  ;;  %v11718_v52 = vld [vmem:[%s26415_s4 + $0x68] sm:$0xff] }
0x1d28   : > { %15573 = vmatmul.mubr.msk.f32.gmra.mrb[126].mxu1 %vm648_vm4, %v24771_v23  ;;  %v11599_v23 = vld [vmem:[%s26413_s19 + $0x8] sm:$0xff] }
0x1d29   : > { %11331 = vmatprep.mubr.f32.mxu1 %v20444_v7  ;;  %v19685_v50 = vpack.c.bf16 %v11599_v23, %v11598_v19  ;;  %v11709_v19 = vld [vmem:[%s26415_s4 + $0x20] sm:$0xff]  ;;  %v11710_v23 = vld [vmem:[%s26415_s4 + $0x28] sm:$0xff] }
0x1d2a   : > { %v19718_v38 = vpack.c.bf16 %v11710_v23, %v11709_v19  ;;  %v11979_v19 = vld [vmem:[%s26364_s7 + $0x28] sm:$0xff] }
0x1d2b   : > { %19686 = vmatpush1.bf16.msra.mxu0 %v19685_v50 }
0x1d2c   : > { %15584 = vmatmul.mubr.msk.f32.vlgmr.msra.gmra.mrb[122].mxu1 %vm648_vm4, %v11250_v22  ;;  %19687 = vmatprep.subr.bf16.mxu0 %v20446_v16  ;;  %v19706_v22 = vpack.c.bf16 %v11613_v60, %v11612_v59  ;;  %v11721_v59 = vld [vmem:[%s26415_s4 + $0x80] sm:$0xff]  ;;  %v11722_v60 = vld [vmem:[%s26415_s4 + $0x88] sm:$0xff] }
0x1d2d   : > { %11337 = vmatprep.mubr.f32.mxu1 %v20444_v7  ;;  %19667 = vmatpush1.bf16.msra.mxu1 %v19666_v61  ;;  %v11615_v61 = vld [vmem:[%s26413_s19 + $0x88] sm:$0xff] }
0x1d2e   : > { %19670 = vmatprep.subr.msk.bf16.mxu1 %vm20619_vm2, %v19668_v2  ;;  %v19709_v2 = vpack.c.bf16 %v11615_v61, %v11614_v24 }
0x1d2f   : > { %19689 = vmatpush1.bf16.msra.mxu0 %v19688_v6 }
0x1d30   : > { %15585 = vmatmul.mubr.msk.f32.gmra.mrb[124].mxu1 %vm648_vm4, %v11252_v9  ;;  %19690 = vmatprep.subr.bf16.mxu0 %v20446_v16 }
0x1d31   : > { %11343 = vmatprep.mubr.f32.mxu1 %v20444_v7  ;;  %19673 = vmatpush1.bf16.msk.msra.mxu1 %vm20619_vm2, %v19671_v12 }
0x1d32   : > { %19675 = vmatprep.subr.bf16.mxu1 %v19674_v13 }
0x1d33   : > { %19692 = vmatpush1.bf16.msra.mxu0 %v19691_v34  ;;  %v19721_v34 = vpack.c.bf16 %v11712_v58, %v11711_v36  ;;  %v11981_v36 = vld [vmem:[%s26364_s7 + $0x38] sm:$0xff] }
0x1d34   : > { %15586 = vmatmul.mubr.msk.f32.gmra.mrb[126].mxu1 %vm648_vm4, %v11254_v14  ;;  %19693 = vmatprep.subr.bf16.mxu0 %v20446_v16  ;;  %v11574_v14 = vld [vmem:[%s26414_s25] sm:$0x3] }
0x1d35   : > { %11433 = vmatprep.mubr.f32.mxu1 %v20444_v7  ;;  %v11579_v15 = vrot.slane %v11574_v14, %v20886_v63  ;;  %v11583_v47 = vrot.slane %v11574_v14, %v20891_v1 }
0x1d37   : > { %19695 = vmatpush1.bf16.msra.mxu0 %v19694_v45  ;;  %v19724_v45 = vpack.c.bf16 %v11714_v44, %v11713_v43  ;;  %v15631_v43 = vld [vmem:[%s26364_s7 + $0xc8] sm:$0xff] }
0x1d38   : > { %15589 = vmatmul.mubr.msk.f32.vlgmr.msra.gmra.mrb[122].mxu1 %vm648_vm4, %v11352_v18  ;;  %19696 = vmatprep.subr.bf16.mxu0 %v20446_v16  ;;  %v11706_v18 = vld [vmem:[%s26415_s4 + $0x8] sm:$0xff] }
0x1d39   : > { %11439 = vmatprep.mubr.f32.mxu1 %v20444_v7  ;;  %19677 = vmatpush1.bf16.msra.mxu1 %v19676_v31  ;;  %v19712_v33 = vpack.c.bf16 %v11706_v18, %v11705_v57 }
0x1d3a   : > { %19680 = vmatprep.subr.msk.bf16.mxu1 %vm20619_vm2, %v19678_v32 }
0x1d3b   : > { %19698 = vmatpush1.bf16.msra.mxu0 %v19697_v49  ;;  %v19727_v49 = vpack.c.bf16 %v11716_v48, %v11715_v46  ;;  %v15632_v46 = vld [vmem:[%s26364_s7 + $0xd0] sm:$0xff] }
0x1d3c   : > { %15590 = vmatmul.mubr.msk.f32.gmra.mrb[124].mxu1 %vm648_vm4, %v11354_v37  ;;  %19699 = vmatprep.subr.bf16.mxu0 %v20446_v16 }
0x1d3d   : > { %11445 = vmatprep.mubr.f32.mxu1 %v20444_v7  ;;  %19683 = vmatpush1.bf16.msk.msra.mxu1 %vm20619_vm2, %v19681_v41  ;;  %v11707_v41 = vld [vmem:[%s26415_s4 + $0x10] sm:$0xff] }
0x1d3f   : > { %19701 = vmatpush1.bf16.msra.mxu0 %v19700_v53  ;;  %v19730_v53 = vpack.c.bf16 %v11718_v52, %v11717_v51  ;;  %v15615_v51 = vld [vmem:[%s26364_s7 + $0x48] sm:$0xff]  ;;  %v15616_v52 = vld [vmem:[%s26364_s7 + $0x50] sm:$0xff] }
0x1d40   : > { %15591 = vmatmul.mubr.msk.f32.gmra.mrb[126].mxu1 %vm648_vm4, %v11356_v42  ;;  %19702 = vmatprep.subr.bf16.mxu0 %v20446_v16  ;;  %v11708_v42 = vld [vmem:[%s26415_s4 + $0x18] sm:$0xff] }
0x1d41   : > { %11543 = vmatprep.mubr.f32.mxu1 %v20444_v7  ;;  %v19715_v28 = vpack.c.bf16 %v11708_v42, %v11707_v41  ;;  %v11889_v41 = vld [vmem:[%s26363_s6] sm:$0xff]  ;;  %v15624_v42 = vld [vmem:[%s26364_s7 + $0x90] sm:$0xff] }
0x1d43   : > { %19704 = vmatpush1.bf16.msra.mxu0 %v19703_v56  ;;  %v19733_v56 = vpack.c.bf16 %v11720_v55, %v11719_v54  ;;  %v15636_v54 = vld [vmem:[%s26364_s7 + $0xe0] sm:$0xff] }
0x1d44   : > { %15602 = vmatmul.mubr.msk.f32.vlgmr.msra.gmra.mrb[122].mxu1 %vm648_vm4, %v11462_v25  ;;  %19705 = vmatprep.subr.bf16.mxu0 %v20446_v16 }
0x1d45   : > { %11549 = vmatprep.mubr.f32.mxu1 %v20444_v7 }
0x1d47   : > { %19707 = vmatpush1.bf16.msra.mxu0 %v19706_v22  ;;  %v19736_v22 = vpack.c.bf16 %v11722_v60, %v11721_v59  ;;  %v19783_v60 = vpack.c.bf16 %v15616_v52, %v15615_v51  ;;  %v12491_v51 = vld [vmem:[%s26367_s10 + $0x8] sm:$0xff] }
0x1d48   : > { %15603 = vmatmul.mubr.msk.f32.gmra.mrb[124].mxu1 %vm648_vm4, %v11464_v20  ;;  %19708 = vmatprep.subr.bf16.mxu0 %v20446_v16 }
0x1d49   : > { %11555 = vmatprep.mubr.f32.mxu1 %v20444_v7 }
0x1d4b   : > { %19710 = vmatpush1.bf16.msra.mxu0 %v19709_v2  ;;  %v11806_v2 = vld [vmem:[%s26416_s5] sm:$0xff] }
0x1d4c   : > { %15604 = vmatmul.mubr.msk.f32.gmra.mrb[126].mxu1 %vm648_vm4, %v11466_v17  ;;  %19711 = vmatprep.subr.bf16.mxu0 %v20446_v16 }
0x1d4d   : > { %17856 = vmatprep.mubr.msk.f32.mxu1 %vm1413_vm8, %v11806_v2  ;;  %v15618_v2 = vld [vmem:[%s26364_s7 + $0x60] sm:$0xff] }
0x1ddb   : > { %v10916_v3 = vpop.f32.mrb[118].mxu1 }
0x1ddc   : > { %v17844_v4 = vpop.f32.mrb[119].mxu1 }
0x1ddd   : > { %v11975_v4 = vld [vmem:[%s26364_s7 + $0x8] sm:$0xff] }
0x1ddf   : > { %v10990_v5 = vpop.f32.mrb[120].mxu1 }
0x1de0   : > { %v10994_v8 = vmax.f32 %v10916_v3, %v10990_v5  ;;  %v17849_v9 = vpop.f32.mrb[121].mxu1  ;;  %v11974_v3 = vld [vmem:[%s26364_s7] sm:$0xff] }
0x1de1   : > { %v19759_v5 = vpack.c.bf16 %v11975_v4, %v11974_v3  ;;  %v11977_v9 = vld [vmem:[%s26364_s7 + $0x18] sm:$0xff] }
0x1de2   : > { %10995 = vst.msk [vmem:[#allocation2 + $0x5] sm:$0x1] %vm2338_vm12, %v10994_v8  ;;  %v11005_v11 = vrot.slane %v10994_v8, 3  ;;  %v11002_v12 = vrot.slane %v10994_v8, 2  ;;  %v10997_v13 = vrot.slane %v10994_v8, 1  ;;  %v11976_v8 = vld [vmem:[%s26364_s7 + $0x10] sm:$0xff] }
0x1de4   : > { %11006 = vrot.lane.b32.xlu1 %v11005_v11, %s26417_s21  ;;  %11004 = vst.msk [vmem:[#allocation2 + $0xd] sm:$0x1] %vm2338_vm12, %v11002_v12  ;;  %v19762_v11 = vpack.c.bf16 %v11977_v9, %v11976_v8 }
0x1de8   : > { %10998 = vrot.lane.b32.xlu1 %v10997_v13, %s26417_s21 }
0x1e17   : > { %v11545_v30 = vpop.f32.mrb[122].mxu1 }
0x1e18   : > { %v25014_v29 = vadd.f32 %v11579_v15, %v11545_v30  ;;  %v11547_v62 = vpop.f32.mrb[123].mxu1 }
0x1e19   : > { %v11587_v0 = vadd.f32 %v11583_v47, %v11547_v62 }
0x1e1a   : > { %v11592_v35 = vmax.f32 %v25014_v29, 0.0 }
0x1e1b   : > { %v11593_v31 = vmax.f32 %v11587_v0, 0.0  ;;  %v11551_v32 = vpop.f32.mrb[124].mxu1 }
0x1e1c   : > { %v11588_v37 = vadd.f32 %v11579_v15, %v11551_v32  ;;  %v11553_v39 = vpop.f32.mrb[125].mxu1 }
0x1e1d   : > { %v11589_v26 = vadd.f32 %v11583_v47, %v11553_v39  ;;  %15605 = vmatprep.mubr.msk.f32.mxu0 %vm1220_vm7, %v11593_v31  ;;  %v11807_v39 = vld [vmem:[%s26416_s5 + $0x8] sm:$0xf] }
0x1e1e   : > { %11690 = vmatmul.mubr.f32.vlgmr.msra.gmra.mrb[124].mxu0 %v11592_v35  ;;  %v11594_v20 = vmax.f32 %v11588_v37, 0.0 }
0x1e1f   : > { %v11595_v27 = vmax.f32 %v11589_v26, 0.0  ;;  %19713 = vmatpush1.bf16.msra.mxu0 %v19712_v33  ;;  %v11557_v25 = vpop.f32.mrb[126].mxu1  ;;  %v15625_v26 = vld [vmem:[%s26364_s7 + $0x98] sm:$0xff] }
0x1e20   : > { %v11590_v21 = vadd.f32 %v11579_v15, %v11557_v25  ;;  %v11559_v17 = vpop.f32.mrb[127].mxu1  ;;  %19714 = vmatprep.subr.bf16.mxu0 %v20446_v16  ;;  %v19747_v25 = vpack.c.bf16 %v15625_v26, %v15624_v42  ;;  %v15641_v26 = vld [vmem:[%s26364_s7 + $0x108] sm:$0xff] }
0x1e21   : > { %v11591_v40 = vadd.f32 %v11583_v47, %v11559_v17  ;;  %15606 = vmatprep.mubr.msk.f32.mxu0 %vm1220_vm7, %v11595_v27  ;;  %v11978_v17 = vld [vmem:[%s26364_s7 + $0x20] sm:$0xff] }
0x1e22   : > { %11695 = vmatmul.mubr.f32.gmra.mrb[126].mxu0 %v11594_v20  ;;  %v11596_v6 = vmax.f32 %v11590_v21, 0.0  ;;  %v19765_v23 = vpack.c.bf16 %v11979_v19, %v11978_v17  ;;  %v15643_v17 = vld [vmem:[%s26364_s7 + $0x118] sm:$0xff] }
0x1e23   : > { %v11597_v50 = vmax.f32 %v11591_v40, 0.0  ;;  %19716 = vmatpush1.bf16.msra.mxu0 %v19715_v28  ;;  %v15626_v28 = vld [vmem:[%s26364_s7 + $0xa0] sm:$0xff]  ;;  %v15628_v40 = vld [vmem:[%s26364_s7 + $0xb0] sm:$0xff] }
0x1e24   : > { %19717 = vmatprep.subr.bf16.mxu0 %v20446_v16 }
0x1e25   : > { %15607 = vmatprep.mubr.msk.f32.mxu0 %vm1220_vm7, %v11597_v50 }
0x1e26   : > { %11700 = vmatmul.mubr.f32.gmra.mrb[128].mxu0 %v11596_v6 }
0x1e27   : > { %19719 = vmatpush1.bf16.msra.mxu0 %v19718_v38  ;;  %15608 = vmatprep.mubr.msk.f32.mxu0 %vm1220_vm7, %v11593_v31 }
0x1e28   : > { %19720 = vmatprep.subr.bf16.mxu0 %v20446_v16 }
0x1e2b   : > { %19722 = vmatpush1.bf16.msra.mxu0 %v19721_v34  ;;  %v15630_v34 = vld [vmem:[%s26364_s7 + $0xc0] sm:$0xff] }
0x1e2c   : > { %19723 = vmatprep.subr.bf16.mxu0 %v20446_v16  ;;  %v19756_v44 = vpack.c.bf16 %v15631_v43, %v15630_v34  ;;  %v15653_v34 = vld [vmem:[%s26364_s7 + $0x158] sm:$0xff] }
0x1e2f   : > { %19725 = vmatpush1.bf16.msra.mxu0 %v19724_v45  ;;  %v11982_v45 = vld [vmem:[%s26364_s7 + $0x40] sm:$0xff] }
0x1e30   : > { %19726 = vmatprep.subr.bf16.mxu0 %v20446_v16 }
0x1e33   : > { %19728 = vmatpush1.bf16.msra.mxu0 %v19727_v49 }
0x1e34   : > { %19729 = vmatprep.subr.bf16.mxu0 %v20446_v16 }
0x1e37   : > { %19731 = vmatpush1.bf16.msra.mxu0 %v19730_v53  ;;  %v15635_v53 = vld [vmem:[%s26364_s7 + $0xd8] sm:$0xff] }
0x1e38   : > { %19732 = vmatprep.subr.bf16.mxu0 %v20446_v16 }
0x1e3b   : > { %19734 = vmatpush1.bf16.msra.mxu0 %v19733_v56 }
0x1e3c   : > { %19735 = vmatprep.subr.bf16.mxu0 %v20446_v16 }
0x1e3f   : > { %19737 = vmatpush1.bf16.msra.mxu0 %v19736_v22 }
0x1e40   : > { %19758 = vmatprep.subr.bf16.mxu0 %v20446_v16 }
0x1e42   : > { %11788 = vmatmul.mubr.f32.vlgmr.msra.gmra.mrb[130].mxu0 %v11592_v35 }
0x1e43   : > { %15609 = vmatprep.mubr.msk.f32.mxu0 %vm1220_vm7, %v11595_v27  ;;  %19760 = vmatpush3.bf16.msra.mxu0 %v19759_v5  ;;  %v11890_v27 = vld [vmem:[%s26363_s6 + $0x8] sm:$0xf] }
0x1e44   : > { %19761 = vmatprep.subr.bf16.mxu0 %v20446_v16 }
0x1e46   : > { %11793 = vmatmul.mubr.f32.gmra.mrb[132].mxu0 %v11594_v20  ;;  %v15627_v20 = vld [vmem:[%s26364_s7 + $0xa8] sm:$0xff] }
0x1e47   : > { %15610 = vmatprep.mubr.msk.f32.mxu0 %vm1220_vm7, %v11597_v50  ;;  %19763 = vmatpush3.bf16.msra.mxu0 %v19762_v11  ;;  %v19750_v21 = vpack.c.bf16 %v15627_v20, %v15626_v28  ;;  %v15629_v50 = vld [vmem:[%s26364_s7 + $0xb8] sm:$0xff]  ;;  %v15623_v28 = vld [vmem:[%s26364_s7 + $0x88] sm:$0xff]  ;;  %v15646_v20 = vld [vmem:[%s26364_s7 + $0x120] sm:$0xff] }
0x1e48   : > { %19764 = vmatprep.subr.bf16.mxu0 %v20446_v16  ;;  %v19753_v38 = vpack.c.bf16 %v15629_v50, %v15628_v40  ;;  %v15649_v40 = vld [vmem:[%s26364_s7 + $0x138] sm:$0xff] }
0x1e4a   : > { %11798 = vmatmul.mubr.f32.gmra.mrb[134].mxu0 %v11596_v6  ;;  %v11980_v6 = vld [vmem:[%s26364_s7 + $0x30] sm:$0xff] }
0x1e4b   : > { %17907 = vmatprep.mubr.msk.f32.mxu0 %vm20447_vm9, %v20444_v7  ;;  %19766 = vmatpush3.bf16.msra.mxu0 %v19765_v23  ;;  %v19768_v58 = vpack.c.bf16 %v11981_v36, %v11980_v6  ;;  %v15648_v23 = vld [vmem:[%s26364_s7 + $0x130] sm:$0xff]  ;;  %v15651_v6 = vld [vmem:[%s26364_s7 + $0x148] sm:$0xff] }
0x1e4c   : > { %19767 = vmatprep.subr.bf16.mxu0 %v20446_v16  ;;  %v19798_v50 = vpack.c.bf16 %v15649_v40, %v15648_v23 }
0x1e4f   : > { %19769 = vmatpush3.bf16.msra.mxu0 %v19768_v58  ;;  %v15652_v58 = vld [vmem:[%s26364_s7 + $0x150] sm:$0xff] }
0x1e50   : > { %17905 = vmatprep.subr.mxu0 %v20444_v7  ;;  %v19804_v43 = vpack.c.bf16 %v15653_v34, %v15652_v58 }
0x1e53   : > { %17906 = vmatpush3.msra.mxu0 %v11982_v45  ;;  %v12404_v45 = vld [vmem:[%s26366_s9] sm:$0xff] }
0x1e54   : > { %19782 = vmatprep.subr.bf16.mxu0 %v20446_v16 }
0x1e56   : > { %v11007_v24 = vpop.permute.xlu1 %11006 }
0x1e57   : > { %11009 = vst.msk [vmem:[#allocation2 + $0xd] sm:$0x1] %vm2345_vm13, %v11007_v24  ;;  %v19771_v24 = vpack.c.bf16 %v15636_v54, %v15635_v53  ;;  %v12406_v53 = vld [vmem:[%s26366_s9 + $0x10] sm:$0xff]  ;;  %v12407_v54 = vld [vmem:[%s26366_s9 + $0x18] sm:$0xff] }
0x1e5a   : > { %v10999_v61 = vpop.permute.xlu1 %10998 }
0x1e5b   : > { %11001 = vst.msk [vmem:[#allocation2 + $0x5] sm:$0x1] %vm2345_vm13, %v10999_v61  ;;  %v15617_v61 = vld [vmem:[%s26364_s7 + $0x58] sm:$0xff] }
0x1ef1   : > { %v11691_v12 = vpop.f32.mrb[124].mxu0 }
0x1ef2   : > { %v11693_v13 = vpop.f32.mrb[125].mxu0 }
0x1ef5   : > { %v11696_v14 = vpop.f32.mrb[126].mxu0 }
0x1ef6   : > { %v11698_v15 = vpop.f32.mrb[127].mxu0 }
0x1ef7   : > { %v15637_v15 = vld [vmem:[%s26364_s7 + $0xe8] sm:$0xff] }
0x1ef9   : > { %v11701_v47 = vpop.f32.mrb[128].mxu0 }
0x1efa   : > { %v11703_v30 = vpop.f32.mrb[129].mxu0 }
0x1f15   : > { %v11789_v29 = vpop.f32.mrb[130].mxu0 }
0x1f16   : > { %v11803_v62 = vmax.f32 %v11691_v12, %v11789_v29  ;;  %v11791_v57 = vpop.f32.mrb[131].mxu0  ;;  %v15619_v29 = vld [vmem:[%s26364_s7 + $0x68] sm:$0xff] }
0x1f19   : > { %v11794_v18 = vpop.f32.mrb[132].mxu0 }
0x1f1a   : > { %v11804_v0 = vmax.f32 %v11696_v14, %v11794_v18  ;;  %v11796_v31 = vpop.f32.mrb[133].mxu0  ;;  %v19786_v14 = vpack.c.bf16 %v15618_v2, %v15617_v61  ;;  %v12494_v61 = vld [vmem:[%s26367_s10 + $0x20] sm:$0xff] }
0x1f1c   : > { %v19738_v32 = vpack.c.bf16 %v11804_v0, %v11803_v62  ;;  %v15620_v62 = vld [vmem:[%s26364_s7 + $0x70] sm:$0xff] }
0x1f1d   : > { %v11799_v33 = vpop.f32.mrb[134].mxu0 }
0x1f1e   : > { %v11805_v35 = vmax.f32 %v11701_v47, %v11799_v33  ;;  %v11801_v37 = vpop.f32.mrb[135].mxu0  ;;  %19739 = vmatprep.subr.bf16.mxu1 %v19738_v32  ;;  %v15638_v47 = vld [vmem:[%s26364_s7 + $0xf0] sm:$0xff]  ;;  %v15639_v33 = vld [vmem:[%s26364_s7 + $0xf8] sm:$0xff] }
0x1f1f   : > { %19741 = vmatpush3.bf16.msra.mxu1 %v19738_v32  ;;  %v19774_v31 = vpack.c.bf16 %v15638_v47, %v15637_v15  ;;  %v15621_v37 = vld [vmem:[%s26364_s7 + $0x78] sm:$0xff]  ;;  %v12413_v15 = vld [vmem:[%s26366_s9 + $0x48] sm:$0xff]  ;;  %v12498_v47 = vld [vmem:[%s26367_s10 + $0x40] sm:$0xff] }
0x1f20   : > { %17854 = vmatprep.subr.mxu1 %v11805_v35 }
0x1f23   : > { %17855 = vmatpush3.msra.mxu1 %v11805_v35 }
0x1f24   : > { %17857 = vmatmul.mubr.msk.f32.vlgmr.msra.gmra.mrb[128].mxu1 %vm1413_vm8, %v11807_v39  ;;  %19743 = vmatprep.subr.bf16.mxu1 %v19738_v32  ;;  %v15622_v39 = vld [vmem:[%s26364_s7 + $0x80] sm:$0xff] }
0x1f25   : > { %19745 = vmatpush3.bf16.msra.mxu1 %v19738_v32  ;;  %17865 = vmatprep.mubr.msk.f32.mxu1 %vm1413_vm8, %v11889_v41  ;;  %v19789_v32 = vpack.c.bf16 %v15620_v62, %v15619_v29  ;;  %v19792_v42 = vpack.c.bf16 %v15622_v39, %v15621_v37  ;;  %v12417_v37 = vld [vmem:[%s26366_s9 + $0x68] sm:$0xff]  ;;  %v12502_v39 = vld [vmem:[%s26367_s10 + $0x60] sm:$0xff] }
0x1f26   : > { %17863 = vmatprep.subr.mxu1 %v11805_v35 }
0x1f29   : > { %17864 = vmatpush3.msra.mxu1 %v11805_v35  ;;  %v15640_v35 = vld [vmem:[%s26364_s7 + $0x100] sm:$0xff] }
0x1f2a   : > { %17866 = vmatmul.mubr.msk.f32.vlgmr.msra.gmra.mrb[130].mxu1 %vm1413_vm8, %v11890_v27  ;;  %19746 = vmatprep.subr.bf16.mxu1 %v20446_v16  ;;  %v19777_v41 = vpack.c.bf16 %v15640_v35, %v15639_v33  ;;  %v15642_v27 = vld [vmem:[%s26364_s7 + $0x110] sm:$0xff]  ;;  %v12416_v35 = vld [vmem:[%s26366_s9 + $0x60] sm:$0xff] }
0x1f2b   : > { %19748 = vmatpush3.bf16.msra.mxu1 %v19747_v25  ;;  %17886 = vmatprep.mubr.msk.f32.mxu1 %vm20447_vm9, %v20444_v7  ;;  %v19780_v25 = vpack.c.bf16 %v15642_v27, %v15641_v26  ;;  %v12418_v27 = vld [vmem:[%s26366_s9 + $0x70] sm:$0xff] }
0x1f2c   : > { %19749 = vmatprep.subr.bf16.mxu1 %v20446_v16 }
0x1f2f   : > { %19751 = vmatpush3.bf16.msra.mxu1 %v19750_v21  ;;  %v15647_v21 = vld [vmem:[%s26364_s7 + $0x128] sm:$0xff] }
0x1f30   : > { %19752 = vmatprep.subr.bf16.mxu1 %v20446_v16  ;;  %v19795_v19 = vpack.c.bf16 %v15647_v21, %v15646_v20  ;;  %v12504_v20 = vld [vmem:[%s26367_s10 + $0x70] sm:$0xff]  ;;  %v12505_v21 = vld [vmem:[%s26367_s10 + $0x78] sm:$0xff] }
0x1f33   : > { %19754 = vmatpush3.bf16.msra.mxu1 %v19753_v38  ;;  %v15650_v38 = vld [vmem:[%s26364_s7 + $0x140] sm:$0xff] }
0x1f34   : > { %19755 = vmatprep.subr.bf16.mxu1 %v20446_v16  ;;  %v19801_v36 = vpack.c.bf16 %v15651_v6, %v15650_v38 }
0x1f37   : > { %19757 = vmatpush3.bf16.msra.mxu1 %v19756_v44  ;;  %v15654_v44 = vld [vmem:[%s26364_s7 + $0x160] sm:$0xff] }
0x1f38   : > { %17884 = vmatprep.subr.mxu1 %v20444_v7 }
0x1f3b   : > { %17885 = vmatpush3.msra.mxu1 %v15632_v46  ;;  %v12405_v46 = vld [vmem:[%s26366_s9 + $0x8] sm:$0xff] }
0x1f3c   : > { %19770 = vmatprep.subr.bf16.mxu1 %v20446_v16 }
0x1ff7   : > { %v17858_v48 = vpop.f32.mrb[128].mxu1 }
0x1ff8   : > { %v11880_v49 = vpop.f32.mrb[129].mxu1 }
0x1ffd   : > { %v17867_v55 = vpop.f32.mrb[130].mxu1 }
0x1ffe   : > { %v11973_v56 = vmax.f32 %v17858_v48, %v17867_v55  ;;  %v11963_v59 = vpop.f32.mrb[131].mxu1  ;;  %v12490_v48 = vld [vmem:[%s26367_s10] sm:$0xff]  ;;  %v12492_v55 = vld [vmem:[%s26367_s10 + $0x10] sm:$0xff] }
0x1fff   : > { %v11972_v22 = vmax.f32 %v11880_v49, %v11963_v59  ;;  %v19807_v49 = vpack.c.bf16 %v12405_v46, %v12404_v45  ;;  %v19831_v52 = vpack.c.bf16 %v12491_v51, %v12490_v48  ;;  %v12493_v59 = vld [vmem:[%s26367_s10 + $0x18] sm:$0xff]  ;;  %v15656_v48 = vld [vmem:[%s26365_s8] ss:$0 sm:$0xff] }
0x2000   : > { %v12004_v3 = vrot.slane %v11973_v56, 2  ;;  %v12160_v4 = vrot.slane %v11973_v56, 3  ;;  %v12235_v5 = vrot.slane %v11973_v56, 1  ;;  %v12319_v8 = vrot.slane %v11973_v56, 4 }
0x2001   : > { %17908 = vmatmul.mubr.msk.f32.vlgmr.msra.gmra.mrb[136].mxu0 %vm1614_vm10, %v11972_v22  ;;  %v12003_v9 = vrot.slane %v11972_v22, 2  ;;  %v12234_v11 = vrot.slane %v11972_v22, 1  ;;  %v12159_v12 = vrot.slane %v11972_v22, 3  ;;  %v12318_v13 = vrot.slane %v11972_v22, 4  ;;  %v12408_v22 = vld [vmem:[%s26366_s9 + $0x20] sm:$0xff] }
0x2002   : > { %19784 = vmatpush3.bf16.msra.mxu0 %v19783_v60  ;;  %17949 = vmatprep.mubr.msk.f32.mxu0 %vm20447_vm9, %v20444_v7  ;;  %v19810_v56 = vpack.c.bf16 %v12407_v54, %v12406_v53  ;;  %v19834_v60 = vpack.c.bf16 %v12493_v59, %v12492_v55  ;;  %v15672_v53 = vld [vmem:[%s26408_s29 + $0x88] sm:$0xff]  ;;  %v15674_v54 = vld [vmem:[%s26408_s29 + $0x98] sm:$0xff] }
0x2003   : > { %v12005_v30 = vsel %vm640_vm3, %v12003_v9, %v12004_v3  ;;  %19785 = vmatprep.subr.bf16.mxu0 %v20446_v16  ;;  %v12236_v57 = vsel %vm952_vm6, %v12234_v11, %v12235_v5  ;;  %v12161_v18 = vsel %vm849_vm5, %v12159_v12, %v12160_v4  ;;  %v12320_v0 = vsel %vm655_vm0, %v12318_v13, %v12319_v8  ;;  %v12495_v3 = vld [vmem:[%s26367_s10 + $0x28] sm:$0xff]  ;;  %v12410_v4 = vld [vmem:[%s26366_s9 + $0x30] sm:$0xff]  ;;  %v12411_v5 = vld [vmem:[%s26366_s9 + $0x38] sm:$0xff] }
0x2004   : > { %17887 = vmatmul.mubr.msk.f32.vlgmr.msra.gmra.mrb[132].mxu1 %vm1614_vm10, %v12005_v30  ;;  %v19837_v8 = vpack.c.bf16 %v12495_v3, %v12494_v61  ;;  %v12496_v9 = vld [vmem:[%s26367_s10 + $0x30] sm:$0xff]  ;;  %v12497_v11 = vld [vmem:[%s26367_s10 + $0x38] sm:$0xff]  ;;  %v19816_v12 = vpack.c.bf16 %v12411_v5, %v12410_v4  ;;  %v12499_v30 = vld [vmem:[%s26367_s10 + $0x48] sm:$0xff]  ;;  %v19854_v61 = vpack.c.bf16 %v15674_v54, %v15672_v53 }
0x2005   : > { %19772 = vmatpush3.bf16.msra.mxu1 %v19771_v24  ;;  %17928 = vmatprep.mubr.msk.f32.mxu1 %vm20447_vm9, %v20444_v7  ;;  %v12409_v24 = vld [vmem:[%s26366_s9 + $0x28] sm:$0xff]  ;;  %v19840_v13 = vpack.c.bf16 %v12497_v11, %v12496_v9  ;;  %v19843_v62 = vpack.c.bf16 %v12499_v30, %v12498_v47  ;;  %v15673_v3 = vld [vmem:[%s26408_s29 + $0x90] sm:$0xff]  ;;  %v15678_v5 = vld [vmem:[%s26408_s29 + $0xb8] sm:$0xf] }
0x2006   : > { %19787 = vmatpush3.bf16.msra.mxu0 %v19786_v14  ;;  %19773 = vmatprep.subr.bf16.mxu1 %v20446_v16  ;;  %v19813_v2 = vpack.c.bf16 %v12409_v24, %v12408_v22  ;;  %v12412_v14 = vld [vmem:[%s26366_s9 + $0x40] sm:$0xff]  ;;  %v15676_v4 = vld [vmem:[%s26408_s29 + $0xa8] sm:$0xff]  ;;  %v12749_v30 = vld [vmem:[%s26408_s29 + $0x18] sm:$0xff] }
0x2007   : > { %19788 = vmatprep.subr.bf16.mxu0 %v20446_v16  ;;  %v19819_v29 = vpack.c.bf16 %v12413_v15, %v12412_v14  ;;  %v12577_v24 = vld [vmem:[%s26368_s11] sm:$0xf]  ;;  %v25443_v15 = vld [vmem:[%s20647_s27 + $0xe8] sm:$0xff]  ;;  %v15665_v54 = vld [vmem:[%s26408_s29 + $0x50] sm:$0xff] }
0x2008   : > { %v15675_v11 = vld [vmem:[%s26408_s29 + $0xa0] sm:$0xff]  ;;  %v12747_v47 = vld [vmem:[%s26408_s29 + $0x8] sm:$0xff] }
0x2009   : > { %19775 = vmatpush3.bf16.msra.mxu1 %v19774_v31  ;;  %v12501_v31 = vld [vmem:[%s26367_s10 + $0x58] sm:$0xff]  ;;  %v25440_v14 = vld [vmem:[%s20647_s27 + $0xe0] sm:$0xff] }
0x200a   : > { %19790 = vmatpush3.bf16.msra.mxu0 %v19789_v32  ;;  %19776 = vmatprep.subr.bf16.mxu1 %v20446_v16  ;;  %v15663_v53 = vld [vmem:[%s26408_s29 + $0x40] sm:$0xff] }
0x200b   : > { %19791 = vmatprep.subr.bf16.mxu0 %v20446_v16 }
0x200d   : > { %19778 = vmatpush3.bf16.msra.mxu1 %v19777_v41  ;;  %v19825_v41 = vpack.c.bf16 %v12417_v37, %v12416_v35  ;;  %v12753_v35 = vld [vmem:[%s26408_s29 + $0x38] sm:$0xf] }
0x200e   : > { %19793 = vmatpush3.bf16.msra.mxu0 %v19792_v42  ;;  %19779 = vmatprep.subr.bf16.mxu1 %v20446_v16  ;;  %v12503_v42 = vld [vmem:[%s26367_s10 + $0x68] sm:$0xff] }
0x200f   : > { %17947 = vmatprep.subr.mxu0 %v20444_v7  ;;  %v19849_v26 = vpack.c.bf16 %v12503_v42, %v12502_v39  ;;  %v25477_v42 = vld [vmem:[%s20647_s27 + $0xf8] sm:$0xf] }
0x2010   : > { %v13196_v10 = vrot.slane %v25477_v42, 4 }
0x2011   : > { %19781 = vmatpush3.bf16.msra.mxu1 %v19780_v25  ;;  %v12419_v25 = vld [vmem:[%s26366_s9 + $0x78] sm:$0xff] }
0x2012   : > { %17948 = vmatpush3.msra.mxu0 %v15623_v28  ;;  %17926 = vmatprep.subr.mxu1 %v20444_v7  ;;  %v19828_v28 = vpack.c.bf16 %v12419_v25, %v12418_v27  ;;  %v12750_v27 = vld [vmem:[%s26408_s29 + $0x20] sm:$0xff]  ;;  %v12752_v25 = vld [vmem:[%s26408_s29 + $0x30] sm:$0xf] }
0x2013   : > { %17950 = vmatmul.mubr.msk.f32.vlgmr.msra.gmra.mrb[138].mxu0 %vm1614_vm10, %v12236_v57  ;;  %19806 = vmatprep.subr.bf16.mxu0 %v20446_v16  ;;  %v12414_v57 = vld [vmem:[%s26366_s9 + $0x50] sm:$0xff] }
0x2014   : > { %18005 = vmatprep.mubr.msk.f32.mxu0 %vm20447_vm9, %v20444_v7  ;;  %19808 = vmatpush3.bf16.msra.mxu0 %v19807_v49 }
0x2015   : > { %17927 = vmatpush3.msra.mxu1 %v15643_v17  ;;  %19809 = vmatprep.subr.bf16.mxu0 %v20446_v16  ;;  %v19852_v17 = vpack.c.bf16 %v12505_v21, %v12504_v20  ;;  %v15692_v20 = vld [vmem:[%s26408_s29 + $0xd8] sm:$0xff] }
0x2016   : > { %17929 = vmatmul.mubr.msk.f32.vlgmr.msra.gmra.mrb[134].mxu1 %vm1614_vm10, %v12161_v18  ;;  %19794 = vmatprep.subr.bf16.mxu1 %v20446_v16  ;;  %v12415_v18 = vld [vmem:[%s26366_s9 + $0x58] sm:$0xff] }
0x2017   : > { %19796 = vmatpush3.bf16.msra.mxu1 %v19795_v19  ;;  %17970 = vmatprep.mubr.msk.f32.mxu1 %vm20447_vm9, %v20444_v7  ;;  %v19822_v32 = vpack.c.bf16 %v12415_v18, %v12414_v57  ;;  %v12775_v57 = vrot.slane %v25443_v15, 2  ;;  %v25458_v18 = vld [vmem:[%s20647_s27 + $0xf0] sm:$0xff]  ;;  %s26419_s27 = sld [smem:[#allocation19_spill]] }
0x2018   : > { %19797 = vmatprep.subr.bf16.mxu1 %v20446_v16  ;;  %19811 = vmatpush3.bf16.msra.mxu0 %v19810_v56  ;;  %v12777_v39 = vrot.slane %v25458_v18, 2 }
0x2019   : > { %19812 = vmatprep.subr.bf16.mxu0 %v20446_v16 }
0x201a   : > { %v12778_v21 = vsel %vm640_vm3, %v12775_v57, %v12777_v39 }
0x201b   : > { %19799 = vmatpush3.bf16.msra.mxu1 %v19798_v50 }
0x201c   : > { %19800 = vmatprep.subr.bf16.mxu1 %v20446_v16  ;;  %19814 = vmatpush3.bf16.msra.mxu0 %v19813_v2  ;;  %v15671_v2 = vld [vmem:[%s26408_s29 + $0x80] sm:$0xff] }
0x201d   : > { %19815 = vmatprep.subr.bf16.mxu0 %v20446_v16  ;;  %v19856_v9 = vpack.c.bf16 %v15673_v3, %v15671_v2  ;;  %v15669_v2 = vld [vmem:[%s26408_s29 + $0x70] sm:$0xf]  ;;  %v15708_v3 = vld [vmem:[%s26408_s29 + $0x108] sm:$0xff] }
0x201f   : > { %19802 = vmatpush3.bf16.msra.mxu1 %v19801_v36 }
0x2020   : > { %19803 = vmatprep.subr.bf16.mxu1 %v20446_v16  ;;  %19817 = vmatpush3.bf16.msra.mxu0 %v19816_v12  ;;  %v19858_v12 = vpack.c.bf16 %v15678_v5, %v15676_v4  ;;  %v15710_v4 = vld [vmem:[%s26408_s29 + $0x118] sm:$0xff] }
0x2021   : > { %19818 = vmatprep.subr.bf16.mxu0 %v20446_v16 }
0x2023   : > { %19805 = vmatpush3.bf16.msra.mxu1 %v19804_v43 }
0x2024   : > { %17968 = vmatprep.subr.mxu1 %v20444_v7  ;;  %19820 = vmatpush3.bf16.msra.mxu0 %v19819_v29 }
0x2025   : > { %19821 = vmatprep.subr.bf16.mxu0 %v20446_v16 }
0x2027   : > { %17969 = vmatpush3.msra.mxu1 %v15654_v44 }
0x2028   : > { %17971 = vmatmul.mubr.msk.f32.vlgmr.msra.gmra.mrb[136].mxu1 %vm1614_vm10, %v12320_v0  ;;  %19830 = vmatprep.subr.bf16.mxu1 %v20446_v16  ;;  %v12500_v0 = vld [vmem:[%s26367_s10 + $0x50] sm:$0xff] }
0x2029   : > { %18040 = vmatprep.mubr.msk.f32.mxu1 %vm20447_vm9, %v20444_v7  ;;  %19832 = vmatpush3.bf16.msra.mxu1 %v19831_v52  ;;  %v19846_v33 = vpack.c.bf16 %v12501_v31, %v12500_v0  ;;  %v19864_v0 = vpack.c.bf16 %v12749_v30, %v12747_v47  ;;  %v12746_v31 = vld [vmem:[%s26408_s29] sm:$0xff]  ;;  %v13082_v47 = vrot.slane %v25443_v15, 1 }
0x202a   : > { %19833 = vmatprep.subr.bf16.mxu1 %v20446_v16  ;;  %19823 = vmatpush3.bf16.msra.mxu0 %v19822_v32  ;;  %v12748_v32 = vld [vmem:[%s26408_s29 + $0x10] sm:$0xff]  ;;  %v15707_v30 = vld [vmem:[%s26408_s29 + $0x100] sm:$0xff] }
0x202b   : > { %19824 = vmatprep.subr.bf16.mxu0 %v20446_v16 }
0x202d   : > { %19835 = vmatpush3.bf16.msra.mxu1 %v19834_v60 }
0x202e   : > { %19836 = vmatprep.subr.bf16.mxu1 %v20446_v16  ;;  %19826 = vmatpush3.bf16.msra.mxu0 %v19825_v41  ;;  %v19866_v41 = vpack.c.bf16 %v12748_v32, %v12746_v31  ;;  %v13084_v31 = vrot.slane %v25458_v18, 1 }
0x202f   : > { %19827 = vmatprep.subr.bf16.mxu0 %v20446_v16 }
0x2031   : > { %19838 = vmatpush3.bf16.msra.mxu1 %v19837_v8  ;;  %v12651_v8 = vld [vmem:[%s26369_s12] sm:$0xf] }
0x2032   : > { %19839 = vmatprep.subr.bf16.mxu1 %v20446_v16  ;;  %19829 = vmatpush3.bf16.msra.mxu0 %v19828_v28  ;;  %v15690_v28 = vld [vmem:[%s26408_s29 + $0xc8] sm:$0xff] }
0x2033   : > { %18043 = vmatprep.subr.mxu0 %v20444_v7 }
0x2035   : > { %19841 = vmatpush3.bf16.msra.mxu1 %v19840_v13  ;;  %v15677_v13 = vld [vmem:[%s26408_s29 + $0xb0] sm:$0xf] }
0x2036   : > { %19842 = vmatprep.subr.bf16.mxu1 %v20446_v16  ;;  %v19861_v29 = vpack.c.bf16 %v15677_v13, %v15675_v11  ;;  %v19894_v11 = vpack.c.bf16 %v15710_v4, %v15708_v3  ;;  %v13081_v13 = vrot.slane %v25440_v14, 1 }
0x2039   : > { %19844 = vmatpush3.bf16.msra.mxu1 %v19843_v62  ;;  %v12774_v62 = vrot.slane %v25440_v14, 2 }
0x203a   : > { %19845 = vmatprep.subr.bf16.mxu1 %v20446_v16 }
0x203b   : > { %v12776_v37 = vsel %vm640_vm3, %v12774_v62, %v12775_v57  ;;  %v15712_v62 = vld [vmem:[%s26408_s29 + $0x128] sm:$0xff]  ;;  %v15714_v57 = vld [vmem:[%s26408_s29 + $0x138] sm:$0xf] }
0x203d   : > { %19847 = vmatpush3.bf16.msra.mxu1 %v19846_v33  ;;  %v12751_v33 = vld [vmem:[%s26408_s29 + $0x28] sm:$0xff] }
0x203e   : > { %19848 = vmatprep.subr.bf16.mxu1 %v20446_v16 }
0x2041   : > { %19850 = vmatpush3.bf16.msra.mxu1 %v19849_v26  ;;  %v19868_v26 = vpack.c.bf16 %v12753_v35, %v12751_v33  ;;  %v19898_v33 = vpack.c.bf16 %v15714_v57, %v15712_v62  ;;  %v15711_v35 = vld [vmem:[%s26408_s29 + $0x120] sm:$0xff]  ;;  %v13437_v57 = vld [vmem:[%s26415_s4 + $0x8] sm:$0xff] }
0x2042   : > { %19851 = vmatprep.subr.bf16.mxu1 %v20446_v16  ;;  %v13436_v62 = vld [vmem:[%s26415_s4] sm:$0xff] }
0x2045   : > { %19853 = vmatpush3.bf16.msra.mxu1 %v19852_v17  ;;  %v12779_v17 = vrot.slane %v25477_v42, 2 }
0x2046   : > { %19904 = vmatprep.subr.bf16.mxu1 %v20446_v16 }
0x20d4   : > { %v12146_v19 = vpop.f32.mrb[136].mxu0 }
0x20d5   : > { %v17909_v23 = vpop.f32.mrb[137].mxu0 }
0x20d6   : > { %v19874_v23 = vpack.c.bf16 %v15692_v20, %v15690_v28  ;;  %v13192_v28 = vrot.slane %v25443_v15, 4 }
0x20d7   : > { %v12074_v40 = vpop.f32.mrb[132].mxu1 }
0x20d8   : > { %v12147_v50 = vadd.f32 %v12146_v19, %v12074_v40  ;;  %v17888_v38 = vpop.f32.mrb[133].mxu1  ;;  %v19871_v19 = vpack.c.bf16 %v12752_v25, %v12750_v27  ;;  %v12780_v40 = vsel %vm640_vm3, %v12777_v39, %v12779_v17  ;;  %v13085_v39 = vsel %vm952_vm6, %v13082_v47, %v13084_v31 }
0x20d9   : > { %v15691_v38 = vld [vmem:[%s26408_s29 + $0xd0] sm:$0xff]  ;;  %v13191_v25 = vrot.slane %v25440_v14, 4 }
0x20db   : > { %v13193_v20 = vsel %vm655_vm0, %v13191_v25, %v13192_v28 }
0x20e6   : > { %v12305_v6 = vpop.f32.mrb[138].mxu0 }
0x20e7   : > { %v17951_v36 = vpop.f32.mrb[139].mxu0 }
0x20e8   : > { %v15696_v36 = vld [vmem:[%s26408_s29 + $0xf8] sm:$0xf] }
0x20e9   : > { %v12230_v58 = vpop.f32.mrb[134].mxu1 }
0x20ea   : > { %v12306_v34 = vadd.f32 %v12305_v6, %v12230_v58  ;;  %v17930_v43 = vpop.f32.mrb[135].mxu1  ;;  %v15694_v6 = vld [vmem:[%s26408_s29 + $0xe8] sm:$0xff] }
0x20eb   : > { %v15693_v43 = vld [vmem:[%s26408_s29 + $0xe0] sm:$0xff] }
0x20fb   : > { %v12389_v44 = vpop.f32.mrb[136].mxu1 }
0x20fc   : > { %v12393_v45 = vadd.f32 %v12389_v44, %v12147_v50  ;;  %v17972_v46 = vpop.f32.mrb[137].mxu1  ;;  %v15689_v50 = vld [vmem:[%s26408_s29 + $0xc0] sm:$0xff]  ;;  %v15695_v44 = vld [vmem:[%s26408_s29 + $0xf0] sm:$0xf] }
0x20fd   : > { %v19876_v58 = vpack.c.bf16 %v15691_v38, %v15689_v50  ;;  %v15666_v46 = vld [vmem:[%s26408_s29 + $0x58] sm:$0xff]  ;;  %v13333_v50 = vld [vmem:[%s26413_s19 + $0x20] sm:$0xff]  ;;  %v13334_v38 = vld [vmem:[%s26413_s19 + $0x28] sm:$0xff] }
0x20fe   : > { %v12394_v49 = vadd.f32 %v12393_v45, %v12306_v34  ;;  %v19878_v34 = vpack.c.bf16 %v15696_v36, %v15694_v6  ;;  %v15664_v45 = vld [vmem:[%s26408_s29 + $0x48] sm:$0xff]  ;;  %v19911_v6 = vpack.c.bf16 %v13334_v38, %v13333_v50  ;;  %v13335_v36 = vld [vmem:[%s26413_s19 + $0x30] sm:$0xff]  ;;  %v13444_v50 = vld [vmem:[%s26415_s4 + $0x40] sm:$0xff] }
0x20ff   : > { %v13445_v38 = vld [vmem:[%s26415_s4 + $0x48] sm:$0xff] }
0x2100   : > { %v12402_v51 = vadd.f32 %v15656_v48, %v12394_v49  ;;  %v19881_v48 = vpack.c.bf16 %v15695_v44, %v15693_v43  ;;  %v19884_v49 = vpack.c.bf16 %v15666_v46, %v15664_v45  ;;  %v13337_v43 = vld [vmem:[%s26413_s19 + $0x40] sm:$0xff]  ;;  %v13338_v44 = vld [vmem:[%s26413_s19 + $0x48] sm:$0xff]  ;;  %v13339_v46 = vld [vmem:[%s26413_s19 + $0x50] sm:$0xff] }
0x2101   : > { %v19917_v45 = vpack.c.bf16 %v13338_v44, %v13337_v43  ;;  %v13448_v43 = vld [vmem:[%s26415_s4 + $0x60] sm:$0xff]  ;;  %v13449_v44 = vld [vmem:[%s26415_s4 + $0x68] sm:$0xff] }
0x2102   : > { %v12403_v52 = vmax.f32 %v12402_v51, 0.0  ;;  %v12979_v51 = vrot.slane %v25440_v14, 3 }
0x2104   : > { %18006 = vmatmul.mubr.f32.vlgmr.msra.gmra.mrb[140].mxu0 %v12403_v52  ;;  %18041 = vmatmul.mubr.f32.vlgmr.msra.gmra.mrb[138].mxu1 %v12403_v52  ;;  %v12980_v52 = vrot.slane %v25443_v15, 3 }
0x2105   : > { %18045 = vmatprep.mubr.msk.f32.mxu0 %vm20447_vm9, %v20444_v7 }
0x21d7   : > { %v12486_v55 = vpop.f32.mrb[140].mxu0  ;;  %v12572_v56 = vpop.f32.mrb[138].mxu1 }
0x21d8   : > { %v12576_v59 = vmax.f32 %v12486_v55, %v12572_v56  ;;  %v18007_v60 = vpop.f32.mrb[141].mxu0  ;;  %v18042_v22 = vpop.f32.mrb[139].mxu1  ;;  %v15668_v55 = vld [vmem:[%s26408_s29 + $0x68] sm:$0xff]  ;;  %v15670_v56 = vld [vmem:[%s26408_s29 + $0x78] sm:$0xf] }
0x21d9   : > { %v12982_v60 = vrot.slane %v25458_v18, 3  ;;  %v19886_v22 = vpack.c.bf16 %v15665_v54, %v15663_v53  ;;  %v13343_v54 = vld [vmem:[%s26413_s19 + $0x70] sm:$0xff] }
0x21da   : > { %18044 = vmatpush3.msra.mxu0 %v12576_v59 }
0x21db   : > { %18046 = vmatmul.mubr.msk.f32.vlgmr.msra.gmra.mrb[142].mxu0 %vm2189_vm11, %v12577_v24  ;;  %18048 = vmatprep.subr.mxu0 %v20444_v7  ;;  %v19888_v24 = vpack.c.bf16 %v15670_v56, %v15668_v55  ;;  %v12983_v5 = vsel %vm849_vm5, %v12980_v52, %v12982_v60  ;;  %v13344_v55 = vld [vmem:[%s26413_s19 + $0x78] sm:$0xff] }
0x21dc   : > { %18049 = vmatpush3.msra.mxu0 %v12576_v59  ;;  %18050 = vmatprep.mubr.msk.f32.mxu0 %vm20447_vm9, %v20444_v7  ;;  %v12981_v59 = vsel %vm849_vm5, %v12979_v51, %v12980_v52  ;;  %v13341_v51 = vld [vmem:[%s26413_s19 + $0x60] sm:$0xff]  ;;  %v13342_v52 = vld [vmem:[%s26413_s19 + $0x68] sm:$0xff]  ;;  %v19926_v56 = vpack.c.bf16 %v13344_v55, %v13343_v54 }
0x21dd   : > { %19855 = vmatprep.subr.bf16.mxu0 %v19854_v61  ;;  %v15667_v61 = vld [vmem:[%s26408_s29 + $0x60] sm:$0xff]  ;;  %v19923_v53 = vpack.c.bf16 %v13342_v52, %v13341_v51  ;;  %v13453_v52 = vld [vmem:[%s26415_s4 + $0x88] sm:$0xff] }
0x21de   : > { %v13452_v51 = vld [vmem:[%s26415_s4 + $0x80] sm:$0xff] }
0x21df   : > { %18051 = vmatmul.mubr.msk.f32.vlgmr.msra.gmra.mrb[144].mxu0 %vm2189_vm11, %v12651_v8  ;;  %v12984_v8 = vrot.slane %v25477_v42, 3 }
0x21e0   : > { %19857 = vmatpush1.bf16.msra.mxu0 %v19856_v9  ;;  %12857 = vmatprep.mubr.f32.mxu0 %v20444_v7  ;;  %v19891_v9 = vpack.c.bf16 %v15669_v2, %v15667_v61 }
0x21e1   : > { %19860 = vmatprep.subr.msk.bf16.mxu0 %vm20619_vm2, %v19858_v12  ;;  %v12985_v12 = vsel %vm849_vm5, %v12982_v60, %v12984_v8  ;;  %v13346_v60 = vld [vmem:[%s26413_s19 + $0x88] sm:$0xff] }
0x21e4   : > { %19863 = vmatpush1.bf16.msk.msra.mxu0 %vm20619_vm2, %v19861_v29  ;;  %v15709_v29 = vld [vmem:[%s26408_s29 + $0x110] sm:$0xff] }
0x21e5   : > { %19865 = vmatprep.subr.bf16.mxu0 %v19864_v0  ;;  %v13083_v0 = vsel %vm952_vm6, %v13081_v13, %v13082_v47  ;;  %v19896_v32 = vpack.c.bf16 %v15709_v29, %v15707_v30 }
0x21e7   : > { %15681 = vmatmul.mubr.msk.f32.vlgmr.msra.gmra.mrb[146].mxu0 %vm648_vm4, %v12776_v37  ;;  %v15713_v37 = vld [vmem:[%s26408_s29 + $0x130] sm:$0xf] }
0x21e8   : > { %12863 = vmatprep.mubr.f32.mxu0 %v20444_v7  ;;  %19867 = vmatpush1.bf16.msra.mxu0 %v19866_v41  ;;  %v13086_v41 = vrot.slane %v25477_v42, 1  ;;  %v13331_v42 = vld [vmem:[%s26413_s19 + $0x10] sm:$0xff] }
0x21e9   : > { %19870 = vmatprep.subr.msk.bf16.mxu0 %vm20619_vm2, %v19868_v26  ;;  %v19901_v26 = vpack.c.bf16 %v15713_v37, %v15711_v35  ;;  %v13438_v37 = vld [vmem:[%s26415_s4 + $0x10] sm:$0xff] }
0x21ea   : > { %v13087_v27 = vsel %vm952_vm6, %v13084_v31, %v13086_v41 }
0x21eb   : > { %15682 = vmatmul.mubr.msk.f32.gmra.mrb[148].mxu0 %vm648_vm4, %v12778_v21  ;;  %v13194_v21 = vrot.slane %v25458_v18, 4 }
0x21ec   : > { %12869 = vmatprep.mubr.f32.mxu0 %v20444_v7  ;;  %19873 = vmatpush1.bf16.msk.msra.mxu0 %vm20619_vm2, %v19871_v19 }
0x21ed   : > { %19875 = vmatprep.subr.bf16.mxu0 %v19874_v23  ;;  %v13195_v17 = vsel %vm655_vm0, %v13192_v28, %v13194_v21  ;;  %v13332_v23 = vld [vmem:[%s26413_s19 + $0x18] sm:$0xff] }
0x21ef   : > { %15683 = vmatmul.mubr.msk.f32.gmra.mrb[150].mxu0 %vm648_vm4, %v12780_v40  ;;  %v19908_v40 = vpack.c.bf16 %v13332_v23, %v13331_v42  ;;  %v13443_v23 = vld [vmem:[%s26415_s4 + $0x38] sm:$0xff] }
0x21f0   : > { %12952 = vmatprep.mubr.f32.mxu0 %v20444_v7 }
0x21f3   : > { %15686 = vmatmul.mubr.msk.f32.vlgmr.msra.gmra.mrb[146].mxu0 %vm648_vm4, %v25440_v14  ;;  %v13197_v14 = vsel %vm655_vm0, %v13194_v21, %v13196_v10  ;;  %v13441_v10 = vld [vmem:[%s26415_s4 + $0x28] sm:$0xff] }
0x21f4   : > { %12958 = vmatprep.mubr.f32.mxu0 %v20444_v7  ;;  %19877 = vmatpush1.bf16.msra.mxu0 %v19876_v58  ;;  %v13336_v58 = vld [vmem:[%s26413_s19 + $0x38] sm:$0xff] }
0x21f5   : > { %19880 = vmatprep.subr.msk.bf16.mxu0 %vm20619_vm2, %v19878_v34  ;;  %v19914_v34 = vpack.c.bf16 %v13336_v58, %v13335_v36  ;;  %v13446_v36 = vld [vmem:[%s26415_s4 + $0x50] sm:$0xff]  ;;  %v13447_v58 = vld [vmem:[%s26415_s4 + $0x58] sm:$0xff] }
0x21f7   : > { %15687 = vmatmul.mubr.msk.f32.gmra.mrb[148].mxu0 %vm648_vm4, %v25443_v15  ;;  %v13329_v15 = vld [vmem:[%s26413_s19] sm:$0xff] }
0x21f8   : > { %12964 = vmatprep.mubr.f32.mxu0 %v20444_v7  ;;  %19883 = vmatpush1.bf16.msk.msra.mxu0 %vm20619_vm2, %v19881_v48  ;;  %v13340_v48 = vld [vmem:[%s26413_s19 + $0x58] sm:$0xff] }
0x21f9   : > { %19885 = vmatprep.subr.bf16.mxu0 %v19884_v49  ;;  %v19920_v49 = vpack.c.bf16 %v13340_v48, %v13339_v46  ;;  %v13450_v46 = vld [vmem:[%s26415_s4 + $0x70] sm:$0xff]  ;;  %v13451_v48 = vld [vmem:[%s26415_s4 + $0x78] sm:$0xff] }
0x21fb   : > { %15688 = vmatmul.mubr.msk.f32.gmra.mrb[150].mxu0 %vm648_vm4, %v25458_v18  ;;  %v13330_v18 = vld [vmem:[%s26413_s19 + $0x8] sm:$0xff] }
0x21fc   : > { %13062 = vmatprep.mubr.f32.mxu0 %v20444_v7  ;;  %v19905_v19 = vpack.c.bf16 %v13330_v18, %v13329_v15 }
0x21fe   : > { %19906 = vmatpush1.bf16.msra.mxu1 %v19905_v19  ;;  %v13442_v19 = vld [vmem:[%s26415_s4 + $0x30] sm:$0xff] }
0x21ff   : > { %15699 = vmatmul.mubr.msk.f32.vlgmr.msra.gmra.mrb[146].mxu0 %vm648_vm4, %v12981_v59  ;;  %19907 = vmatprep.subr.bf16.mxu1 %v20446_v16  ;;  %v13345_v59 = vld [vmem:[%s26413_s19 + $0x80] sm:$0xff] }
0x2200   : > { %13068 = vmatprep.mubr.f32.mxu0 %v20444_v7  ;;  %19887 = vmatpush1.bf16.msra.mxu0 %v19886_v22  ;;  %v19929_v22 = vpack.c.bf16 %v13346_v60, %v13345_v59  ;;  %v13705_v59 = vld [vmem:[%s26364_s7] sm:$0xff]  ;;  %v13706_v60 = vld [vmem:[%s26364_s7 + $0x8] sm:$0xff] }
0x2201   : > { %19890 = vmatprep.subr.msk.bf16.mxu0 %vm20619_vm2, %v19888_v24 }
0x2202   : > { %19909 = vmatpush1.bf16.msra.mxu1 %v19908_v40  ;;  %v19941_v40 = vpack.c.bf16 %v13443_v23, %v13442_v19  ;;  %v15746_v19 = vld [vmem:[%s26364_s7 + $0xc8] sm:$0xff] }
0x2203   : > { %15700 = vmatmul.mubr.msk.f32.gmra.mrb[148].mxu0 %vm648_vm4, %v12983_v5  ;;  %19910 = vmatprep.subr.bf16.mxu1 %v20446_v16 }
0x2204   : > { %13074 = vmatprep.mubr.f32.mxu0 %v20444_v7  ;;  %19893 = vmatpush1.bf16.msk.msra.mxu0 %vm20619_vm2, %v19891_v9 }
0x2205   : > { %19895 = vmatprep.subr.bf16.mxu0 %v19894_v11  ;;  %v13305_v11 = vld [vmem:[%s26414_s25] sm:$0x3] }
0x2206   : > { %19912 = vmatpush1.bf16.msra.mxu1 %v19911_v6  ;;  %v13314_v13 = vrot.slane %v13305_v11, %v20891_v1  ;;  %v19944_v6 = vpack.c.bf16 %v13445_v38, %v13444_v50  ;;  %v15747_v50 = vld [vmem:[%s26364_s7 + $0xd0] sm:$0xff] }
0x2207   : > { %15701 = vmatmul.mubr.msk.f32.gmra.mrb[150].mxu0 %vm648_vm4, %v12985_v12  ;;  %19913 = vmatprep.subr.bf16.mxu1 %v20446_v16  ;;  %v13310_v12 = vrot.slane %v13305_v11, %v20886_v63 }
0x2208   : > { %13164 = vmatprep.mubr.f32.mxu0 %v20444_v7 }
0x220a   : > { %19915 = vmatpush1.bf16.msra.mxu1 %v19914_v34  ;;  %v19947_v34 = vpack.c.bf16 %v13447_v58, %v13446_v36  ;;  %v15730_v36 = vld [vmem:[%s26364_s7 + $0x48] sm:$0xff]  ;;  %v15731_v58 = vld [vmem:[%s26364_s7 + $0x50] sm:$0xff] }
0x220b   : > { %15704 = vmatmul.mubr.msk.f32.vlgmr.msra.gmra.mrb[146].mxu0 %vm648_vm4, %v13083_v0  ;;  %19916 = vmatprep.subr.bf16.mxu1 %v20446_v16 }
0x220c   : > { %13170 = vmatprep.mubr.f32.mxu0 %v20444_v7  ;;  %19897 = vmatpush1.bf16.msra.mxu0 %v19896_v32 }
0x220d   : > { %19900 = vmatprep.subr.msk.bf16.mxu0 %vm20619_vm2, %v19898_v33  ;;  %v19932_v33 = vpack.c.bf16 %v13437_v57, %v13436_v62 }
0x220e   : > { %19918 = vmatpush1.bf16.msra.mxu1 %v19917_v45  ;;  %v19950_v45 = vpack.c.bf16 %v13449_v44, %v13448_v43  ;;  %v15751_v43 = vld [vmem:[%s26364_s7 + $0xe0] sm:$0xff] }
0x220f   : > { %15705 = vmatmul.mubr.msk.f32.gmra.mrb[148].mxu0 %vm648_vm4, %v13085_v39  ;;  %19919 = vmatprep.subr.bf16.mxu1 %v20446_v16  ;;  %v13439_v39 = vld [vmem:[%s26415_s4 + $0x18] sm:$0xff] }
0x2210   : > { %13176 = vmatprep.mubr.f32.mxu0 %v20444_v7  ;;  %19903 = vmatpush1.bf16.msk.msra.mxu0 %vm20619_vm2, %v19901_v26  ;;  %v19935_v25 = vpack.c.bf16 %v13439_v39, %v13438_v37  ;;  %v13620_v37 = vld [vmem:[%s26363_s6] sm:$0xff]  ;;  %v15739_v39 = vld [vmem:[%s26364_s7 + $0x90] sm:$0xff] }
0x2212   : > { %19921 = vmatpush1.bf16.msra.mxu1 %v19920_v49  ;;  %v19953_v49 = vpack.c.bf16 %v13451_v48, %v13450_v46  ;;  %v20003_v48 = vpack.c.bf16 %v15731_v58, %v15730_v36  ;;  %v14138_v36 = vld [vmem:[%s26366_s9 + $0x18] sm:$0xff]  ;;  %v14223_v58 = vld [vmem:[%s26367_s10 + $0x10] sm:$0xff] }
0x2213   : > { %15706 = vmatmul.mubr.msk.f32.gmra.mrb[150].mxu0 %vm648_vm4, %v13087_v27  ;;  %19922 = vmatprep.subr.bf16.mxu1 %v20446_v16 }
0x2214   : > { %13274 = vmatprep.mubr.f32.mxu0 %v20444_v7 }
0x2216   : > { %19924 = vmatpush1.bf16.msra.mxu1 %v19923_v53  ;;  %v19956_v53 = vpack.c.bf16 %v13453_v52, %v13452_v51  ;;  %v15732_v52 = vld [vmem:[%s26364_s7 + $0x58] sm:$0xff] }
0x2217   : > { %15717 = vmatmul.mubr.msk.f32.vlgmr.msra.gmra.mrb[146].mxu0 %vm648_vm4, %v13193_v20  ;;  %19925 = vmatprep.subr.bf16.mxu1 %v20446_v16 }
0x2218   : > { %13280 = vmatprep.mubr.f32.mxu0 %v20444_v7 }
0x221a   : > { %19927 = vmatpush1.bf16.msra.mxu1 %v19926_v56  ;;  %v13537_v56 = vld [vmem:[%s26416_s5] sm:$0xff] }
0x221b   : > { %15718 = vmatmul.mubr.msk.f32.gmra.mrb[148].mxu0 %vm648_vm4, %v13195_v17  ;;  %19928 = vmatprep.subr.bf16.mxu1 %v20446_v16  ;;  %v13440_v17 = vld [vmem:[%s26415_s4 + $0x20] sm:$0xff]  ;;  %s26315_s4 = scalar_lea.hbm %s26420_s28, %s15781_s26 }
0x221c   : > { %13286 = vmatprep.mubr.f32.mxu0 %v20444_v7  ;;  %v19938_v18 = vpack.c.bf16 %v13441_v10, %v13440_v17  ;;  %v15744_v17 = vld [vmem:[%s26364_s7 + $0xb8] sm:$0xff] }
0x221e   : > { %19930 = vmatpush1.bf16.msra.mxu1 %v19929_v22  ;;  %v19979_v22 = vpack.c.bf16 %v13706_v60, %v13705_v59 }
0x221f   : > { %15719 = vmatmul.mubr.msk.f32.gmra.mrb[150].mxu0 %vm648_vm4, %v13197_v14  ;;  %19931 = vmatprep.subr.bf16.mxu1 %v20446_v16 }
0x2220   : > { %18059 = vmatprep.mubr.msk.f32.mxu0 %vm1413_vm8, %v13537_v56 }
0x22ae   : > { %v12647_v24 = vpop.f32.mrb[142].mxu0 }
0x22af   : > { %v18047_v61 = vpop.f32.mrb[143].mxu0 }
0x22b0   : > { %v13708_v61 = vld [vmem:[%s26364_s7 + $0x18] sm:$0xff] }
0x22b2   : > { %v12721_v2 = vpop.f32.mrb[144].mxu0 }
0x22b3   : > { %v12725_v3 = vmax.f32 %v12647_v24, %v12721_v2  ;;  %v18052_v4 = vpop.f32.mrb[145].mxu0  ;;  %v13707_v24 = vld [vmem:[%s26364_s7 + $0x10] sm:$0xff] }
0x22b4   : > { %v19982_v2 = vpack.c.bf16 %v13708_v61, %v13707_v24  ;;  %v13710_v4 = vld [vmem:[%s26364_s7 + $0x28] sm:$0xff] }
0x22b5   : > { %12726 = vst.msk [vmem:[#allocation2 + $0x6] sm:$0x1] %vm2338_vm12, %v12725_v3  ;;  %v12736_v5 = vrot.slane %v12725_v3, 3  ;;  %v12733_v8 = vrot.slane %v12725_v3, 2  ;;  %v12728_v9 = vrot.slane %v12725_v3, 1  ;;  %v13709_v3 = vld [vmem:[%s26364_s7 + $0x20] sm:$0xff] }
0x22b7   : > { %12737 = vrot.lane.b32.xlu0 %v12736_v5, %s26417_s21  ;;  %12735 = vst.msk [vmem:[#allocation2 + $0xe] sm:$0x1] %vm2338_vm12, %v12733_v8  ;;  %v19985_v5 = vpack.c.bf16 %v13710_v4, %v13709_v3  ;;  %v15752_v3 = vld [vmem:[%s26364_s7 + $0xe8] sm:$0xff]  ;;  %v15753_v4 = vld [vmem:[%s26364_s7 + $0xf0] sm:$0xff] }
0x22bb   : > { %12729 = vrot.lane.b32.xlu0 %v12728_v9, %s26417_s21 }
0x22ea   : > { %v13276_v47 = vpop.f32.mrb[146].mxu0 }
0x22eb   : > { %v25701_v30 = vadd.f32 %v13310_v12, %v13276_v47  ;;  %v13278_v29 = vpop.f32.mrb[147].mxu0 }
0x22ec   : > { %v13318_v0 = vadd.f32 %v13314_v13, %v13278_v29 }
0x22ed   : > { %v13323_v63 = vmax.f32 %v25701_v30, 0.0 }
0x22ee   : > { %v13324_v31 = vmax.f32 %v13318_v0, 0.0  ;;  %v13282_v32 = vpop.f32.mrb[148].mxu0 }
0x22ef   : > { %v13319_v35 = vadd.f32 %v13310_v12, %v13282_v32  ;;  %v13284_v1 = vpop.f32.mrb[149].mxu0 }
0x22f0   : > { %v13320_v41 = vadd.f32 %v13314_v13, %v13284_v1  ;;  %15720 = vmatprep.mubr.msk.f32.mxu1 %vm1220_vm7, %v13324_v31  ;;  %v13538_v1 = vld [vmem:[%s26416_s5 + $0x8] sm:$0xf]  ;;  %s14778_s5 = scalar_lea.sflag [#allocation4], %s596_s3 }
0x22f1   : > { %13421 = vmatmul.mubr.f32.vlgmr.msra.gmra.mrb[140].mxu1 %v13323_v63  ;;  %v13325_v28 = vmax.f32 %v13319_v35, 0.0 }
0x22f2   : > { %v13326_v26 = vmax.f32 %v13320_v41, 0.0  ;;  %19933 = vmatpush1.bf16.msra.mxu1 %v19932_v33  ;;  %v13288_v27 = vpop.f32.mrb[150].mxu0  ;;  %v15740_v41 = vld [vmem:[%s26364_s7 + $0x98] sm:$0xff] }
0x22f3   : > { %v13321_v20 = vadd.f32 %v13310_v12, %v13288_v27  ;;  %v13290_v21 = vpop.f32.mrb[151].mxu0  ;;  %19934 = vmatprep.subr.bf16.mxu1 %v20446_v16  ;;  %v19967_v27 = vpack.c.bf16 %v15740_v41, %v15739_v39  ;;  %v15762_v39 = vld [vmem:[%s26364_s7 + $0x128] sm:$0xff]  ;;  %v15758_v41 = vld [vmem:[%s26364_s7 + $0x118] sm:$0xff] }
0x22f4   : > { %v13322_v14 = vadd.f32 %v13314_v13, %v13290_v21  ;;  %15721 = vmatprep.mubr.msk.f32.mxu1 %vm1220_vm7, %v13326_v26  ;;  %v15743_v21 = vld [vmem:[%s26364_s7 + $0xb0] sm:$0xff] }
0x22f5   : > { %13426 = vmatmul.mubr.f32.gmra.mrb[142].mxu1 %v13325_v28  ;;  %v13327_v42 = vmax.f32 %v13321_v20, 0.0  ;;  %v19973_v10 = vpack.c.bf16 %v15744_v17, %v15743_v21  ;;  %v15766_v21 = vld [vmem:[%s26364_s7 + $0x148] sm:$0xff] }
0x22f6   : > { %v13328_v15 = vmax.f32 %v13322_v14, 0.0  ;;  %19936 = vmatpush1.bf16.msra.mxu1 %v19935_v25  ;;  %v15741_v25 = vld [vmem:[%s26364_s7 + $0xa0] sm:$0xff]  ;;  %v13711_v14 = vld [vmem:[%s26364_s7 + $0x30] sm:$0xff] }
0x22f7   : > { %19937 = vmatprep.subr.bf16.mxu1 %v20446_v16 }
0x22f8   : > { %15722 = vmatprep.mubr.msk.f32.mxu1 %vm1220_vm7, %v13328_v15 }
0x22f9   : > { %13431 = vmatmul.mubr.f32.gmra.mrb[144].mxu1 %v13327_v42 }
0x22fa   : > { %19939 = vmatpush1.bf16.msra.mxu1 %v19938_v18  ;;  %15723 = vmatprep.mubr.msk.f32.mxu1 %vm1220_vm7, %v13324_v31 }
0x22fb   : > { %19940 = vmatprep.subr.bf16.mxu1 %v20446_v16 }
0x22fe   : > { %19942 = vmatpush1.bf16.msra.mxu1 %v19941_v40  ;;  %v13713_v40 = vld [vmem:[%s26364_s7 + $0x40] sm:$0xff] }
0x22ff   : > { %19943 = vmatprep.subr.bf16.mxu1 %v20446_v16 }
0x2302   : > { %19945 = vmatpush1.bf16.msra.mxu1 %v19944_v6 }
0x2303   : > { %19946 = vmatprep.subr.bf16.mxu1 %v20446_v16 }
0x2306   : > { %19948 = vmatpush1.bf16.msra.mxu1 %v19947_v34  ;;  %v15750_v34 = vld [vmem:[%s26364_s7 + $0xd8] sm:$0xff] }
0x2307   : > { %19949 = vmatprep.subr.bf16.mxu1 %v20446_v16  ;;  %v19991_v51 = vpack.c.bf16 %v15751_v43, %v15750_v34  ;;  %v14224_v43 = vld [vmem:[%s26367_s10 + $0x18] sm:$0xff] }
0x230a   : > { %19951 = vmatpush1.bf16.msra.mxu1 %v19950_v45 }
0x230b   : > { %19952 = vmatprep.subr.bf16.mxu1 %v20446_v16 }
0x230e   : > { %19954 = vmatpush1.bf16.msra.mxu1 %v19953_v49 }
0x230f   : > { %19955 = vmatprep.subr.bf16.mxu1 %v20446_v16 }
0x2312   : > { %19957 = vmatpush1.bf16.msra.mxu1 %v19956_v53  ;;  %v15733_v53 = vld [vmem:[%s26364_s7 + $0x60] sm:$0xff] }
0x2313   : > { %19978 = vmatprep.subr.bf16.mxu1 %v20446_v16 }
0x2315   : > { %13519 = vmatmul.mubr.f32.vlgmr.msra.gmra.mrb[146].mxu1 %v13323_v63 }
0x2316   : > { %15724 = vmatprep.mubr.msk.f32.mxu1 %vm1220_vm7, %v13326_v26  ;;  %19980 = vmatpush3.bf16.msra.mxu1 %v19979_v22  ;;  %v13621_v26 = vld [vmem:[%s26363_s6 + $0x8] sm:$0xf] }
0x2317   : > { %19981 = vmatprep.subr.bf16.mxu1 %v20446_v16 }
0x2319   : > { %13524 = vmatmul.mubr.f32.gmra.mrb[148].mxu1 %v13325_v28  ;;  %v15742_v28 = vld [vmem:[%s26364_s7 + $0xa8] sm:$0xff] }
0x231a   : > { %15725 = vmatprep.mubr.msk.f32.mxu1 %vm1220_vm7, %v13328_v15  ;;  %19983 = vmatpush3.bf16.msra.mxu1 %v19982_v2  ;;  %v19970_v20 = vpack.c.bf16 %v15742_v28, %v15741_v25  ;;  %v13712_v15 = vld [vmem:[%s26364_s7 + $0x38] sm:$0xff]  ;;  %v20006_v2 = vpack.c.bf16 %v15733_v53, %v15732_v52  ;;  %v14141_v52 = vld [vmem:[%s26366_s9 + $0x30] sm:$0xff] }
0x231b   : > { %19984 = vmatprep.subr.bf16.mxu1 %v20446_v16  ;;  %v19988_v18 = vpack.c.bf16 %v13712_v15, %v13711_v14  ;;  %v15764_v25 = vld [vmem:[%s26364_s7 + $0x138] sm:$0xff] }
0x231c   : > { %v15768_v14 = vld [vmem:[%s26364_s7 + $0x158] sm:$0xff] }
0x231d   : > { %13529 = vmatmul.mubr.f32.gmra.mrb[150].mxu1 %v13327_v42  ;;  %v15745_v42 = vld [vmem:[%s26364_s7 + $0xc0] sm:$0xff]  ;;  %v14142_v53 = vld [vmem:[%s26366_s9 + $0x38] sm:$0xff] }
0x231e   : > { %18110 = vmatprep.mubr.msk.f32.mxu1 %vm20447_vm9, %v20444_v7  ;;  %19986 = vmatpush3.bf16.msra.mxu1 %v19985_v5  ;;  %v19976_v23 = vpack.c.bf16 %v15746_v19, %v15745_v42  ;;  %v14135_v42 = vld [vmem:[%s26366_s9] sm:$0xff]  ;;  %v14136_v19 = vld [vmem:[%s26366_s9 + $0x8] sm:$0xff] }
0x231f   : > { %19987 = vmatprep.subr.bf16.mxu1 %v20446_v16 }
0x2322   : > { %19989 = vmatpush3.bf16.msra.mxu1 %v19988_v18  ;;  %v15769_v18 = vld [vmem:[%s26364_s7 + $0x160] sm:$0xff] }
0x2323   : > { %18108 = vmatprep.subr.mxu1 %v20444_v7 }
0x2326   : > { %18109 = vmatpush3.msra.mxu1 %v13713_v40  ;;  %v20027_v40 = vpack.c.bf16 %v14136_v19, %v14135_v42 }
0x2327   : > { %20002 = vmatprep.subr.bf16.mxu1 %v20446_v16 }
0x2329   : > { %v12738_v54 = vpop.permute.xlu0 %12737 }
0x232a   : > { %12740 = vst.msk [vmem:[#allocation2 + $0xe] sm:$0x1] %vm2345_vm13, %v12738_v54 }
0x232d   : > { %v12730_v55 = vpop.permute.xlu0 %12729 }
0x232e   : > { %12732 = vst.msk [vmem:[#allocation2 + $0x6] sm:$0x1] %vm2345_vm13, %v12730_v55 }
0x23c4   : > { %v13422_v8 = vpop.f32.mrb[140].mxu1 }
0x23c5   : > { %v13424_v9 = vpop.f32.mrb[141].mxu1 }
0x23c6   : > { %v15735_v9 = vld [vmem:[%s26364_s7 + $0x70] sm:$0xff] }
0x23c8   : > { %v13427_v11 = vpop.f32.mrb[142].mxu1 }
0x23c9   : > { %v13429_v12 = vpop.f32.mrb[143].mxu1 }
0x23cc   : > { %v13432_v13 = vpop.f32.mrb[144].mxu1 }
0x23cd   : > { %v13434_v47 = vpop.f32.mrb[145].mxu1 }
0x23ce   : > { %v19994_v47 = vpack.c.bf16 %v15753_v4, %v15752_v3 }
0x23e8   : > { %v13520_v30 = vpop.f32.mrb[146].mxu1 }
0x23e9   : > { %v13534_v29 = vmax.f32 %v13422_v8, %v13520_v30  ;;  %v13522_v62 = vpop.f32.mrb[147].mxu1  ;;  %v15734_v8 = vld [vmem:[%s26364_s7 + $0x68] sm:$0xff] }
0x23ea   : > { %v20009_v30 = vpack.c.bf16 %v15735_v9, %v15734_v8  ;;  %v15755_v62 = vld [vmem:[%s26364_s7 + $0x100] sm:$0xff]  ;;  %v14146_v8 = vld [vmem:[%s26366_s9 + $0x58] sm:$0xff]  ;;  %v14231_v9 = vld [vmem:[%s26367_s10 + $0x50] sm:$0xff] }
0x23ec   : > { %v13525_v57 = vpop.f32.mrb[148].mxu1 }
0x23ed   : > { %v13535_v0 = vmax.f32 %v13427_v11, %v13525_v57  ;;  %v13527_v31 = vpop.f32.mrb[149].mxu1  ;;  %v15736_v57 = vld [vmem:[%s26364_s7 + $0x78] sm:$0xff] }
0x23ef   : > { %v19958_v32 = vpack.c.bf16 %v13535_v0, %v13534_v29  ;;  %v15754_v29 = vld [vmem:[%s26364_s7 + $0xf8] sm:$0xff]  ;;  %v15737_v0 = vld [vmem:[%s26364_s7 + $0x80] sm:$0xff] }
0x23f0   : > { %v13530_v33 = vpop.f32.mrb[150].mxu1  ;;  %v19997_v31 = vpack.c.bf16 %v15755_v62, %v15754_v29  ;;  %v14233_v29 = vld [vmem:[%s26367_s10 + $0x60] sm:$0xff] }
0x23f1   : > { %v13536_v63 = vmax.f32 %v13432_v13, %v13530_v33  ;;  %v13532_v35 = vpop.f32.mrb[151].mxu1  ;;  %19959 = vmatprep.subr.bf16.mxu0 %v19958_v32  ;;  %v15756_v33 = vld [vmem:[%s26364_s7 + $0x108] sm:$0xff] }
0x23f2   : > { %19961 = vmatpush3.bf16.msra.mxu0 %v19958_v32 }
0x23f3   : > { %18057 = vmatprep.subr.mxu0 %v13536_v63 }
0x23f6   : > { %18058 = vmatpush3.msra.mxu0 %v13536_v63 }
0x23f7   : > { %19963 = vmatprep.subr.bf16.mxu0 %v19958_v32  ;;  %18060 = vmatmul.mubr.msk.f32.vlgmr.msra.gmra.mrb[152].mxu0 %vm1413_vm8, %v13538_v1  ;;  %v15738_v1 = vld [vmem:[%s26364_s7 + $0x88] sm:$0xff] }
0x23f8   : > { %19965 = vmatpush3.bf16.msra.mxu0 %v19958_v32  ;;  %18068 = vmatprep.mubr.msk.f32.mxu0 %vm1413_vm8, %v13620_v37  ;;  %v20012_v32 = vpack.c.bf16 %v15737_v0, %v15736_v57  ;;  %v15761_v37 = vld [vmem:[%s26364_s7 + $0x120] sm:$0xff]  ;;  %v14234_v57 = vld [vmem:[%s26367_s10 + $0x68] sm:$0xff] }
0x23f9   : > { %18066 = vmatprep.subr.mxu0 %v13536_v63  ;;  %v20069_v0 = vpack.c.bf16 %v14234_v57, %v14233_v29  ;;  %v14483_v29 = vld [vmem:[%s26370_s13 + $0x48] sm:$0xff]  ;;  %v14500_v57 = vld [vmem:[%s26370_s13 + $0xd0] sm:$0xff] }
0x23fc   : > { %18067 = vmatpush3.msra.mxu0 %v13536_v63  ;;  %v15757_v63 = vld [vmem:[%s26364_s7 + $0x110] sm:$0xff] }
0x23fd   : > { %18069 = vmatmul.mubr.msk.f32.vlgmr.msra.gmra.mrb[154].mxu0 %vm1413_vm8, %v13621_v26  ;;  %19966 = vmatprep.subr.bf16.mxu0 %v20446_v16  ;;  %v20000_v35 = vpack.c.bf16 %v15757_v63, %v15756_v33  ;;  %v20015_v26 = vpack.c.bf16 %v15762_v39, %v15761_v37  ;;  %v14235_v63 = vld [vmem:[%s26367_s10 + $0x70] sm:$0xff] }
0x23fe   : > { %19968 = vmatpush3.bf16.msra.mxu0 %v19967_v27  ;;  %18089 = vmatprep.mubr.msk.f32.mxu0 %vm20447_vm9, %v20444_v7  ;;  %v15763_v27 = vld [vmem:[%s26364_s7 + $0x130] sm:$0xff] }
0x23ff   : > { %19969 = vmatprep.subr.bf16.mxu0 %v20446_v16  ;;  %v20018_v28 = vpack.c.bf16 %v15764_v25, %v15763_v27 }
0x2402   : > { %19971 = vmatpush3.bf16.msra.mxu0 %v19970_v20  ;;  %v15765_v20 = vld [vmem:[%s26364_s7 + $0x140] sm:$0xff] }
0x2403   : > { %19972 = vmatprep.subr.bf16.mxu0 %v20446_v16  ;;  %v20021_v17 = vpack.c.bf16 %v15766_v21, %v15765_v20 }
0x2406   : > { %19974 = vmatpush3.bf16.msra.mxu0 %v19973_v10  ;;  %v15767_v10 = vld [vmem:[%s26364_s7 + $0x150] sm:$0xff] }
0x2407   : > { %19975 = vmatprep.subr.bf16.mxu0 %v20446_v16  ;;  %v20024_v15 = vpack.c.bf16 %v15768_v14, %v15767_v10 }
0x240a   : > { %19977 = vmatpush3.bf16.msra.mxu0 %v19976_v23  ;;  %v14221_v23 = vld [vmem:[%s26367_s10] sm:$0xff] }
0x240b   : > { %18087 = vmatprep.subr.mxu0 %v20444_v7 }
0x240e   : > { %18088 = vmatpush3.msra.mxu0 %v15747_v50  ;;  %v14222_v50 = vld [vmem:[%s26367_s10 + $0x8] sm:$0xff] }
0x240f   : > { %19990 = vmatprep.subr.bf16.mxu0 %v20446_v16 }
0x24ca   : > { %v18061_v38 = vpop.f32.mrb[152].mxu0 }
0x24cb   : > { %v13611_v6 = vpop.f32.mrb[153].mxu0 }
0x24d0   : > { %v18070_v44 = vpop.f32.mrb[154].mxu0 }
0x24d1   : > { %v13704_v45 = vmax.f32 %v18061_v38, %v18070_v44  ;;  %v13694_v46 = vpop.f32.mrb[155].mxu0  ;;  %v20051_v38 = vpack.c.bf16 %v14222_v50, %v14221_v23  ;;  %v20054_v44 = vpack.c.bf16 %v14224_v43, %v14223_v58  ;;  %v14308_v58 = vld [vmem:[%s26368_s11] sm:$0xf] }
0x24d2   : > { %v13703_v49 = vmax.f32 %v13611_v6, %v13694_v46  ;;  %v14137_v6 = vld [vmem:[%s26366_s9 + $0x10] sm:$0xff]  ;;  %v14140_v46 = vld [vmem:[%s26366_s9 + $0x28] sm:$0xff]  ;;  %v14490_v43 = vld [vmem:[%s26370_s13 + $0x80] sm:$0xff] }
0x24d3   : > { %v13735_v54 = vrot.slane %v13704_v45, 2  ;;  %v13891_v55 = vrot.slane %v13704_v45, 3  ;;  %v13966_v56 = vrot.slane %v13704_v45, 1  ;;  %v14050_v59 = vrot.slane %v13704_v45, 4  ;;  %v14139_v45 = vld [vmem:[%s26366_s9 + $0x20] sm:$0xff] }
0x24d4   : > { %18111 = vmatmul.mubr.msk.f32.vlgmr.msra.gmra.mrb[152].mxu1 %vm1614_vm10, %v13703_v49  ;;  %v13734_v60 = vrot.slane %v13703_v49, 2  ;;  %v13965_v22 = vrot.slane %v13703_v49, 1  ;;  %v13890_v24 = vrot.slane %v13703_v49, 3  ;;  %v14049_v61 = vrot.slane %v13703_v49, 4 }
0x24d5   : > { %20004 = vmatpush3.bf16.msra.mxu1 %v20003_v48  ;;  %18152 = vmatprep.mubr.msk.f32.mxu1 %vm20447_vm9, %v20444_v7  ;;  %v20030_v34 = vpack.c.bf16 %v14138_v36, %v14137_v6  ;;  %v14225_v48 = vld [vmem:[%s26367_s10 + $0x20] sm:$0xff]  ;;  %v20033_v49 = vpack.c.bf16 %v14140_v46, %v14139_v45 }
0x24d6   : > { %v13736_v5 = vsel %vm640_vm3, %v13734_v60, %v13735_v54  ;;  %20005 = vmatprep.subr.bf16.mxu1 %v20446_v16  ;;  %v13967_v11 = vsel %vm952_vm6, %v13965_v22, %v13966_v56  ;;  %v13892_v12 = vsel %vm849_vm5, %v13890_v24, %v13891_v55  ;;  %v14051_v13 = vsel %vm655_vm0, %v14049_v61, %v14050_v59  ;;  %v14227_v55 = vld [vmem:[%s26367_s10 + $0x30] sm:$0xff]  ;;  %v14228_v56 = vld [vmem:[%s26367_s10 + $0x38] sm:$0xff]  ;;  %v14143_v22 = vld [vmem:[%s26366_s9 + $0x40] sm:$0xff] }
0x24d7   : > { %18090 = vmatmul.mubr.msk.f32.vlgmr.msra.gmra.mrb[156].mxu0 %vm1614_vm10, %v13736_v5  ;;  %v20036_v59 = vpack.c.bf16 %v14142_v53, %v14141_v52  ;;  %v20060_v60 = vpack.c.bf16 %v14228_v56, %v14227_v55  ;;  %v14144_v24 = vld [vmem:[%s26366_s9 + $0x48] sm:$0xff]  ;;  %v14229_v61 = vld [vmem:[%s26367_s10 + $0x40] sm:$0xff]  ;;  %v14145_v5 = vld [vmem:[%s26366_s9 + $0x50] sm:$0xff] }
0x24d8   : > { %19992 = vmatpush3.bf16.msra.mxu0 %v19991_v51  ;;  %18131 = vmatprep.mubr.msk.f32.mxu0 %vm20447_vm9, %v20444_v7  ;;  %v14226_v51 = vld [vmem:[%s26367_s10 + $0x28] sm:$0xff]  ;;  %v20039_v3 = vpack.c.bf16 %v14144_v24, %v14143_v22  ;;  %v14474_v45 = vld [vmem:[%s26370_s13] sm:$0xff]  ;;  %v14477_v55 = vld [vmem:[%s26370_s13 + $0x18] sm:$0xff] }
0x24d9   : > { %20007 = vmatpush3.bf16.msra.mxu1 %v20006_v2  ;;  %19993 = vmatprep.subr.bf16.mxu0 %v20446_v16  ;;  %v20057_v54 = vpack.c.bf16 %v14226_v51, %v14225_v48  ;;  %v14230_v2 = vld [vmem:[%s26367_s10 + $0x48] sm:$0xff]  ;;  %v14493_v51 = vld [vmem:[%s26370_s13 + $0x98] sm:$0xff]  ;;  %v14494_v56 = vld [vmem:[%s26370_s13 + $0xa0] sm:$0xff] }
0x24da   : > { %20008 = vmatprep.subr.bf16.mxu1 %v20446_v16  ;;  %v20063_v4 = vpack.c.bf16 %v14230_v2, %v14229_v61  ;;  %v14475_v48 = vld [vmem:[%s26370_s13 + $0x8] sm:$0xff]  ;;  %v14478_v24 = vld [vmem:[%s26370_s13 + $0x20] sm:$0xff]  ;;  %v14496_v2 = vld [vmem:[%s26370_s13 + $0xb0] sm:$0xff] }
0x24db   : > { %v20076_v52 = vpack.c.bf16 %v14475_v48, %v14474_v45  ;;  %v14479_v61 = vld [vmem:[%s26370_s13 + $0x28] sm:$0xff]  ;;  %v14591_v48 = vld [vmem:[%s26372_s15 + $0x38] sm:$0xff] }
0x24dc   : > { %19995 = vmatpush3.bf16.msra.mxu0 %v19994_v47  ;;  %v14147_v47 = vld [vmem:[%s26366_s9 + $0x60] sm:$0xff] }
0x24dd   : > { %20010 = vmatpush3.bf16.msra.mxu1 %v20009_v30  ;;  %19996 = vmatprep.subr.bf16.mxu0 %v20446_v16  ;;  %v14148_v30 = vld [vmem:[%s26366_s9 + $0x68] sm:$0xff] }
0x24de   : > { %20011 = vmatprep.subr.bf16.mxu1 %v20446_v16  ;;  %v20045_v62 = vpack.c.bf16 %v14148_v30, %v14147_v47  ;;  %v14482_v30 = vld [vmem:[%s26370_s13 + $0x40] sm:$0xff] }
0x24e0   : > { %19998 = vmatpush3.bf16.msra.mxu0 %v19997_v31  ;;  %v14149_v31 = vld [vmem:[%s26366_s9 + $0x70] sm:$0xff] }
0x24e1   : > { %20013 = vmatpush3.bf16.msra.mxu1 %v20012_v32  ;;  %19999 = vmatprep.subr.bf16.mxu0 %v20446_v16  ;;  %v14150_v32 = vld [vmem:[%s26366_s9 + $0x78] sm:$0xff] }
0x24e2   : > { %18150 = vmatprep.subr.mxu1 %v20444_v7  ;;  %v20048_v33 = vpack.c.bf16 %v14150_v32, %v14149_v31  ;;  %v14484_v32 = vld [vmem:[%s26370_s13 + $0x50] sm:$0xff] }
0x24e4   : > { %20001 = vmatpush3.bf16.msra.mxu0 %v20000_v35  ;;  %v14236_v35 = vld [vmem:[%s26367_s10 + $0x78] sm:$0xff] }
0x24e5   : > { %18151 = vmatpush3.msra.mxu1 %v15738_v1  ;;  %18129 = vmatprep.subr.mxu0 %v20444_v7  ;;  %v20072_v1 = vpack.c.bf16 %v14236_v35, %v14235_v63  ;;  %v14502_v35 = vld [vmem:[%s26370_s13 + $0xe0] sm:$0xff] }
0x24e6   : > { %18153 = vmatmul.mubr.msk.f32.vlgmr.msra.gmra.mrb[154].mxu1 %vm1614_vm10, %v13967_v11  ;;  %20026 = vmatprep.subr.bf16.mxu1 %v20446_v16  ;;  %v14232_v11 = vld [vmem:[%s26367_s10 + $0x58] sm:$0xff] }
0x24e7   : > { %18208 = vmatprep.mubr.msk.f32.mxu1 %vm20447_vm9, %v20444_v7  ;;  %20028 = vmatpush3.bf16.msra.mxu1 %v20027_v40 }
0x24e8   : > { %18130 = vmatpush3.msra.mxu0 %v15758_v41  ;;  %20029 = vmatprep.subr.bf16.mxu1 %v20446_v16 }
0x24e9   : > { %18132 = vmatmul.mubr.msk.f32.vlgmr.msra.gmra.mrb[158].mxu0 %vm1614_vm10, %v13892_v12  ;;  %20014 = vmatprep.subr.bf16.mxu0 %v20446_v16  ;;  %v20042_v12 = vpack.c.bf16 %v14146_v8, %v14145_v5  ;;  %v14480_v8 = vld [vmem:[%s26370_s13 + $0x30] sm:$0xff] }
0x24ea   : > { %20016 = vmatpush3.bf16.msra.mxu0 %v20015_v26  ;;  %18173 = vmatprep.mubr.msk.f32.mxu0 %vm20447_vm9, %v20444_v7 }
0x24eb   : > { %20017 = vmatprep.subr.bf16.mxu0 %v20446_v16  ;;  %20031 = vmatpush3.bf16.msra.mxu1 %v20030_v34  ;;  %v14382_v34 = vld [vmem:[%s26369_s12] sm:$0xf] }
0x24ec   : > { %20032 = vmatprep.subr.bf16.mxu1 %v20446_v16 }
0x24ee   : > { %20019 = vmatpush3.bf16.msra.mxu0 %v20018_v28 }
0x24ef   : > { %20020 = vmatprep.subr.bf16.mxu0 %v20446_v16  ;;  %20034 = vmatpush3.bf16.msra.mxu1 %v20033_v49  ;;  %v14492_v49 = vld [vmem:[%s26370_s13 + $0x90] sm:$0xff] }
0x24f0   : > { %20035 = vmatprep.subr.bf16.mxu1 %v20446_v16  ;;  %v20078_v53 = vpack.c.bf16 %v14493_v51, %v14492_v49  ;;  %v14592_v51 = vld [vmem:[%s26372_s15 + $0x40] sm:$0xff] }
0x24f2   : > { %20022 = vmatpush3.bf16.msra.mxu0 %v20021_v17 }
0x24f3   : > { %20023 = vmatprep.subr.bf16.mxu0 %v20446_v16  ;;  %20037 = vmatpush3.bf16.msra.mxu1 %v20036_v59  ;;  %v14495_v59 = vld [vmem:[%s26370_s13 + $0xa8] sm:$0xff] }
0x24f4   : > { %20038 = vmatprep.subr.bf16.mxu1 %v20446_v16  ;;  %v20082_v22 = vpack.c.bf16 %v14495_v59, %v14494_v56 }
0x24f6   : > { %20025 = vmatpush3.bf16.msra.mxu0 %v20024_v15 }
0x24f7   : > { %18171 = vmatprep.subr.mxu0 %v20444_v7  ;;  %20040 = vmatpush3.bf16.msra.mxu1 %v20039_v3  ;;  %v14497_v3 = vld [vmem:[%s26370_s13 + $0xb8] sm:$0xff] }
0x24f8   : > { %20041 = vmatprep.subr.bf16.mxu1 %v20446_v16  ;;  %v20086_v5 = vpack.c.bf16 %v14497_v3, %v14496_v2  ;;  %v14597_v2 = vld [vmem:[%s26372_s15 + $0x68] sm:$0xff] }
0x24fa   : > { %18172 = vmatpush3.msra.mxu0 %v15769_v18  ;;  %v15771_v18 = vld [vmem:[%s26365_s8] ss:$0 sm:$0xff] }
0x24fb   : > { %18174 = vmatmul.mubr.msk.f32.vlgmr.msra.gmra.mrb[160].mxu0 %vm1614_vm10, %v14051_v13  ;;  %20050 = vmatprep.subr.bf16.mxu0 %v20446_v16  ;;  %v20066_v13 = vpack.c.bf16 %v14232_v11, %v14231_v9  ;;  %v14481_v9 = vld [vmem:[%s26370_s13 + $0x38] sm:$0xff]  ;;  %v14498_v11 = vld [vmem:[%s26370_s13 + $0xc0] sm:$0xff] }
0x24fc   : > { %18243 = vmatprep.mubr.msk.f32.mxu0 %vm20447_vm9, %v20444_v7  ;;  %20052 = vmatpush3.bf16.msra.mxu0 %v20051_v38 }
0x24fd   : > { %20053 = vmatprep.subr.bf16.mxu0 %v20446_v16  ;;  %20043 = vmatpush3.bf16.msra.mxu1 %v20042_v12  ;;  %v14499_v12 = vld [vmem:[%s26370_s13 + $0xc8] sm:$0xff] }
0x24fe   : > { %20044 = vmatprep.subr.bf16.mxu1 %v20446_v16  ;;  %v20090_v47 = vpack.c.bf16 %v14499_v12, %v14498_v11  ;;  %v14684_v12 = vld [vmem:[%s26374_s17 + $0x18] sm:$0xff] }
0x2500   : > { %20055 = vmatpush3.bf16.msra.mxu0 %v20054_v44  ;;  %v14491_v44 = vld [vmem:[%s26370_s13 + $0x88] sm:$0xff] }
0x2501   : > { %20056 = vmatprep.subr.bf16.mxu0 %v20446_v16  ;;  %20046 = vmatpush3.bf16.msra.mxu1 %v20045_v62  ;;  %v20074_v46 = vpack.c.bf16 %v14491_v44, %v14490_v43  ;;  %v20092_v62 = vpack.c.bf16 %v14483_v29, %v14482_v30  ;;  %v14588_v43 = vld [vmem:[%s26372_s15 + $0x20] sm:$0xff]  ;;  %v14589_v44 = vld [vmem:[%s26372_s15 + $0x28] sm:$0xff] }
0x2502   : > { %20047 = vmatprep.subr.bf16.mxu1 %v20446_v16  ;;  %v20113_v45 = vpack.c.bf16 %v14589_v44, %v14588_v43  ;;  %v14686_v30 = vld [vmem:[%s26374_s17 + $0x28] sm:$0xff] }
0x2504   : > { %20058 = vmatpush3.bf16.msra.mxu0 %v20057_v54  ;;  %v14476_v54 = vld [vmem:[%s26370_s13 + $0x10] sm:$0xff] }
0x2505   : > { %20059 = vmatprep.subr.bf16.mxu0 %v20446_v16  ;;  %20049 = vmatpush3.bf16.msra.mxu1 %v20048_v33  ;;  %v14485_v33 = vld [vmem:[%s26370_s13 + $0x58] sm:$0xff] }
0x2506   : > { %18246 = vmatprep.subr.mxu1 %v20444_v7  ;;  %v20096_v63 = vpack.c.bf16 %v14485_v33, %v14484_v32  ;;  %v15774_v32 = vld [vmem:[%s26371_s14] ss:$0 sm:$0xff] }
0x2508   : > { %20061 = vmatpush3.bf16.msra.mxu0 %v20060_v60  ;;  %v20080_v60 = vpack.c.bf16 %v14477_v55, %v14476_v54  ;;  %v14594_v54 = vld [vmem:[%s26372_s15 + $0x50] sm:$0xff]  ;;  %v14595_v55 = vld [vmem:[%s26372_s15 + $0x58] sm:$0xff] }
0x2509   : > { %20062 = vmatprep.subr.bf16.mxu0 %v20446_v16  ;;  %v20122_v56 = vpack.c.bf16 %v14595_v55, %v14594_v54 }
0x250c   : > { %20064 = vmatpush3.bf16.msra.mxu0 %v20063_v4  ;;  %v20084_v4 = vpack.c.bf16 %v14479_v61, %v14478_v24  ;;  %v14596_v61 = vld [vmem:[%s26372_s15 + $0x60] sm:$0xff] }
0x250d   : > { %20065 = vmatprep.subr.bf16.mxu0 %v20446_v16  ;;  %v20125_v3 = vpack.c.bf16 %v14597_v2, %v14596_v61 }
0x2510   : > { %20067 = vmatpush3.bf16.msra.mxu0 %v20066_v13  ;;  %v20088_v13 = vpack.c.bf16 %v14481_v9, %v14480_v8  ;;  %v14682_v8 = vld [vmem:[%s26374_s17 + $0x8] sm:$0xff]  ;;  %v14683_v9 = vld [vmem:[%s26374_s17 + $0x10] sm:$0xff] }
0x2511   : > { %20068 = vmatprep.subr.bf16.mxu0 %v20446_v16 }
0x2514   : > { %20070 = vmatpush3.bf16.msra.mxu0 %v20069_v0  ;;  %v14501_v0 = vld [vmem:[%s26370_s13 + $0xd8] sm:$0xff] }
0x2515   : > { %20071 = vmatprep.subr.bf16.mxu0 %v20446_v16  ;;  %v20094_v31 = vpack.c.bf16 %v14501_v0, %v14500_v57  ;;  %v14688_v57 = vld [vmem:[%s26374_s17 + $0x38] sm:$0xff] }
0x2518   : > { %20073 = vmatpush3.bf16.msra.mxu0 %v20072_v1  ;;  %v14503_v1 = vld [vmem:[%s26370_s13 + $0xe8] sm:$0xff] }
0x2519   : > { %20106 = vmatprep.subr.bf16.mxu0 %v20446_v16 }
0x25a7   : > { %v13877_v37 = vpop.f32.mrb[152].mxu1 }
0x25a8   : > { %v18112_v39 = vpop.f32.mrb[153].mxu1 }
0x25a9   : > { %v14486_v39 = vld [vmem:[%s26370_s13 + $0x60] sm:$0xff] }
0x25aa   : > { %v13805_v41 = vpop.f32.mrb[156].mxu0 }
0x25ab   : > { %v13878_v26 = vadd.f32 %v13877_v37, %v13805_v41  ;;  %v18091_v27 = vpop.f32.mrb[157].mxu0  ;;  %v20098_v37 = vpack.c.bf16 %v14503_v1, %v14502_v35  ;;  %v14487_v41 = vld [vmem:[%s26370_s13 + $0x68] sm:$0xff] }
0x25b9   : > { %v14036_v25 = vpop.f32.mrb[154].mxu1 }
0x25ba   : > { %v18154_v28 = vpop.f32.mrb[155].mxu1 }
0x25bb   : > { %v14505_v28 = vld [vmem:[%s26370_s13 + $0xf8] sm:$0xff] }
0x25bc   : > { %v13961_v20 = vpop.f32.mrb[158].mxu0 }
0x25bd   : > { %v14037_v21 = vadd.f32 %v14036_v25, %v13961_v20  ;;  %v18133_v17 = vpop.f32.mrb[159].mxu0  ;;  %v14504_v25 = vld [vmem:[%s26370_s13 + $0xf0] sm:$0xff] }
0x25be   : > { %v14488_v17 = vld [vmem:[%s26370_s13 + $0x70] sm:$0xff] }
0x25ce   : > { %v14120_v10 = vpop.f32.mrb[160].mxu0 }
0x25cf   : > { %v14124_v14 = vadd.f32 %v14120_v10, %v13878_v26  ;;  %v18175_v15 = vpop.f32.mrb[161].mxu0  ;;  %v20100_v26 = vpack.c.bf16 %v14487_v41, %v14486_v39  ;;  %v14489_v10 = vld [vmem:[%s26370_s13 + $0x78] sm:$0xff]  ;;  %v14691_v41 = vld [vmem:[%s26374_s17 + $0x50] sm:$0xf] }
0x25d1   : > { %v14125_v42 = vadd.f32 %v14124_v14, %v14037_v21  ;;  %v20102_v21 = vpack.c.bf16 %v14505_v28, %v14504_v25  ;;  %v20104_v14 = vpack.c.bf16 %v14489_v10, %v14488_v17 }
0x25d3   : > { %v14133_v19 = vadd.f32 %v15771_v18, %v14125_v42 }
0x25d5   : > { %v14134_v23 = vmax.f32 %v14133_v19, 0.0 }
0x25d7   : > { %18209 = vmatmul.mubr.f32.vlgmr.msra.gmra.mrb[156].mxu1 %v14134_v23  ;;  %18244 = vmatmul.mubr.f32.vlgmr.msra.gmra.mrb[162].mxu0 %v14134_v23 }
0x25d8   : > { %18248 = vmatprep.mubr.msk.f32.mxu1 %vm20447_vm9, %v20444_v7  ;;  %18286 = vmatprep.mubr.msk.f32.mxu0 %vm20447_vm9, %v20444_v7 }
0x26aa   : > { %v14217_v40 = vpop.f32.mrb[156].mxu1  ;;  %v14303_v50 = vpop.f32.mrb[162].mxu0 }
0x26ab   : > { %v14307_v38 = vmax.f32 %v14217_v40, %v14303_v50  ;;  %v18210_v6 = vpop.f32.mrb[157].mxu1  ;;  %v18245_v36 = vpop.f32.mrb[163].mxu0  ;;  %v14584_v40 = vld [vmem:[%s26372_s15] sm:$0xff]  ;;  %v14585_v50 = vld [vmem:[%s26372_s15 + $0x8] sm:$0xff] }
0x26ac   : > { %v20107_v6 = vpack.c.bf16 %v14585_v50, %v14584_v40  ;;  %v14587_v36 = vld [vmem:[%s26372_s15 + $0x18] sm:$0xff] }
0x26ad   : > { %18247 = vmatpush3.msra.mxu1 %v14307_v38 }
0x26ae   : > { %18249 = vmatmul.mubr.msk.f32.vlgmr.msra.gmra.mrb[158].mxu1 %vm2189_vm11, %v14308_v58  ;;  %18251 = vmatprep.subr.mxu1 %v20444_v7 }
0x26af   : > { %18252 = vmatpush3.msra.mxu1 %v14307_v38  ;;  %18253 = vmatprep.mubr.msk.f32.mxu1 %vm20447_vm9, %v20444_v7  ;;  %v14586_v38 = vld [vmem:[%s26372_s15 + $0x10] sm:$0xff] }
0x26b0   : > { %20075 = vmatprep.subr.bf16.mxu1 %v20074_v46  ;;  %20108 = vmatpush3.bf16.msra.mxu0 %v20107_v6  ;;  %v14590_v46 = vld [vmem:[%s26372_s15 + $0x30] sm:$0xff] }
0x26b1   : > { %20109 = vmatprep.subr.bf16.mxu0 %v20446_v16  ;;  %v20116_v49 = vpack.c.bf16 %v14591_v48, %v14590_v46 }
0x26b2   : > { %18254 = vmatmul.mubr.msk.f32.vlgmr.msra.gmra.mrb[160].mxu1 %vm2189_vm11, %v14382_v34  ;;  %v20110_v34 = vpack.c.bf16 %v14587_v36, %v14586_v38 }
0x26b3   : > { %20077 = vmatpush3.bf16.msra.mxu1 %v20076_v52  ;;  %v14593_v52 = vld [vmem:[%s26372_s15 + $0x48] sm:$0xff] }
0x26b4   : > { %20079 = vmatprep.subr.bf16.mxu1 %v20078_v53  ;;  %20111 = vmatpush3.bf16.msra.mxu0 %v20110_v34  ;;  %v20119_v53 = vpack.c.bf16 %v14593_v52, %v14592_v51 }
0x26b5   : > { %20112 = vmatprep.subr.bf16.mxu0 %v20446_v16 }
0x26b7   : > { %20081 = vmatpush3.bf16.msra.mxu1 %v20080_v60 }
0x26b8   : > { %20083 = vmatprep.subr.bf16.mxu1 %v20082_v22  ;;  %20114 = vmatpush3.bf16.msra.mxu0 %v20113_v45 }
0x26b9   : > { %20115 = vmatprep.subr.bf16.mxu0 %v20446_v16 }
0x26bb   : > { %20085 = vmatpush3.bf16.msra.mxu1 %v20084_v4  ;;  %v14598_v4 = vld [vmem:[%s26372_s15 + $0x70] sm:$0xff] }
0x26bc   : > { %20087 = vmatprep.subr.bf16.mxu1 %v20086_v5  ;;  %20117 = vmatpush3.bf16.msra.mxu0 %v20116_v49  ;;  %v14681_v5 = vld [vmem:[%s26374_s17] sm:$0xff] }
0x26bd   : > { %20118 = vmatprep.subr.bf16.mxu0 %v20446_v16  ;;  %v20128_v11 = vpack.c.bf16 %v14682_v8, %v14681_v5 }
0x26bf   : > { %20089 = vmatpush3.bf16.msra.mxu1 %v20088_v13  ;;  %v20131_v13 = vpack.c.bf16 %v14684_v12, %v14683_v9 }
0x26c0   : > { %20091 = vmatprep.subr.bf16.mxu1 %v20090_v47  ;;  %20120 = vmatpush3.bf16.msra.mxu0 %v20119_v53  ;;  %v14685_v47 = vld [vmem:[%s26374_s17 + $0x20] sm:$0xff] }
0x26c1   : > { %20121 = vmatprep.subr.bf16.mxu0 %v20446_v16  ;;  %v20134_v29 = vpack.c.bf16 %v14686_v30, %v14685_v47 }
0x26c3   : > { %20093 = vmatpush3.bf16.msra.mxu1 %v20092_v62  ;;  %v14687_v62 = vld [vmem:[%s26374_s17 + $0x30] sm:$0xff] }
0x26c4   : > { %20095 = vmatprep.subr.bf16.mxu1 %v20094_v31  ;;  %20123 = vmatpush3.bf16.msra.mxu0 %v20122_v56  ;;  %v20137_v0 = vpack.c.bf16 %v14688_v57, %v14687_v62 }
0x26c5   : > { %20124 = vmatprep.subr.bf16.mxu0 %v20446_v16 }
0x26c7   : > { %20097 = vmatpush3.bf16.msra.mxu1 %v20096_v63 }
0x26c8   : > { %20099 = vmatprep.subr.bf16.mxu1 %v20098_v37  ;;  %20126 = vmatpush3.bf16.msra.mxu0 %v20125_v3  ;;  %v14689_v37 = vld [vmem:[%s26374_s17 + $0x40] sm:$0xff] }
0x26c9   : > { %18284 = vmatprep.subr.mxu0 %v20444_v7 }
0x26cb   : > { %20101 = vmatpush3.bf16.msra.mxu1 %v20100_v26  ;;  %v15775_v26 = vld [vmem:[%s26373_s16] ss:$0 sm:$0xff] }
0x26cc   : > { %20103 = vmatprep.subr.bf16.mxu1 %v20102_v21  ;;  %18285 = vmatpush3.msra.mxu0 %v14598_v4 }
0x26cf   : > { %20105 = vmatpush3.bf16.msra.mxu1 %v20104_v14 }
0x26d0   : > { %20127 = vmatprep.subr.bf16.mxu1 %v20446_v16 }
0x2781   : > { %v14378_v27 = vpop.f32.mrb[158].mxu1 }
0x2782   : > { %v18250_v20 = vpop.f32.mrb[159].mxu1 }
0x2785   : > { %v14452_v15 = vpop.f32.mrb[160].mxu1 }
0x2786   : > { %v14456_v18 = vmax.f32 %v14378_v27, %v14452_v15  ;;  %v18255_v42 = vpop.f32.mrb[161].mxu1 }
0x2788   : > { %14457 = vst.msk [vmem:[#allocation2 + $0x7] sm:$0x1] %vm2338_vm12, %v14456_v18  ;;  %v14467_v19 = vrot.slane %v14456_v18, 3  ;;  %v14464_v23 = vrot.slane %v14456_v18, 2  ;;  %v14459_v58 = vrot.slane %v14456_v18, 1 }
0x278a   : > { %14468 = vrot.lane.b32.xlu1 %v14467_v19, %s26417_s21  ;;  %14466 = vst.msk [vmem:[#allocation2 + $0xf] sm:$0x1] %vm2338_vm12, %v14464_v23 }
0x278e   : > { %14460 = vrot.lane.b32.xlu1 %v14459_v58, %s26417_s21 }
0x27fc   : > { %v14469_v59 = vpop.permute.xlu1 %14468 }
0x27fd   : > { %14471 = vst.msk [vmem:[#allocation2 + $0xf] sm:$0x1] %vm2345_vm13, %v14469_v59 }
0x2800   : > { %v14461_v60 = vpop.permute.xlu1 %14460 }
0x2801   : > { %14463 = vst.msk [vmem:[#allocation2 + $0x7] sm:$0x1] %vm2345_vm13, %v14461_v60 }
0x2804   : > { %v14473_v22 = vld [vmem:[#allocation2 + $0x8] sm:$0xff] }
0x2805   : > { %14577 = vmatprep.mubr.f32.mxu1 %v14473_v22 }
0x2808   : > { %v14472_v24 = vld [vmem:[#allocation2] sm:$0xff] }
0x2809   : > { %14578 = vmatmul.mubr.f32.vlgmr.msra.gmra.mrb[162].mxu1 %v14472_v24 }
0x280a   : > { %18311 = vmatprep.mubr.msk.f32.mxu1 %vm20447_vm9, %v20444_v7  ;;  %20129 = vmatpush3.bf16.msra.mxu1 %v20128_v11 }
0x280b   : > { %20130 = vmatprep.subr.bf16.mxu1 %v20446_v16 }
0x280e   : > { %20132 = vmatpush3.bf16.msra.mxu1 %v20131_v13 }
0x280f   : > { %20133 = vmatprep.subr.bf16.mxu1 %v20446_v16 }
0x2812   : > { %20135 = vmatpush3.bf16.msra.mxu1 %v20134_v29 }
0x2813   : > { %20136 = vmatprep.subr.bf16.mxu1 %v20446_v16 }
0x2816   : > { %20138 = vmatpush3.bf16.msra.mxu1 %v20137_v0 }
0x2817   : > { %20139 = vmatprep.subr.bf16.mxu1 %v20446_v16  ;;  %v14690_v16 = vld [vmem:[%s26374_s17 + $0x48] sm:$0xff] }
0x2818   : > { %v20140_v39 = vpack.c.bf16 %v14690_v16, %v14689_v37 }
0x281a   : > { %20141 = vmatpush3.bf16.msra.mxu1 %v20140_v39 }
0x281b   : > { %18309 = vmatprep.subr.mxu1 %v20444_v7  ;;  %v15777_v7 = vld [vmem:[%s26419_s27] ss:$0 sm:$0xff] }
0x281e   : > { %18310 = vmatpush3.msk.msra.mxu1 %vm655_vm0, %v14691_v41 }
0x28dc   : > { %v16601_v31 = vpop.f32.mrb[162].mxu1 }
0x28dd   : > { %v16602_v33 = vpop.f32.mrb[163].mxu1 }
0x28de   : > { %v16603_v63 = vadd.f32 %v16602_v33, %v16601_v31 }
0x28e0   : > { %v14580_v35 = vadd.f32 %v16603_v63, %v15774_v32 }
0x28e2   : > { %v14583_v1 = vmax.f32 %v14580_v35, 0.0 }
0x28e4   : > { %18287 = vmatmul.mubr.msk.f32.vlgmr.msra.gmra.mrb[164].mxu0 %vm14606_vm14, %v14583_v1 }
0x29b7   : > { %v14676_v27 = vpop.f32.mrb[164].mxu0 }
0x29b8   : > { %v14677_v25 = vadd.f32 %v15775_v26, %v14676_v27  ;;  %v18288_v28 = vpop.f32.mrb[165].mxu0 }
0x29ba   : > { %v14680_v20 = vmax.f32 %v14677_v25, 0.0 }
0x29bc   : > { %18312 = vmatmul.mubr.msk.f32.vlgmr.msra.gmra.mrb[164].mxu1 %vm14699_vm15, %v14680_v20 }
0x2a8f   : > { %v14772_v21 = vpop.f32.mrb[164].mxu1 }
0x2a90   : > { %v14773_v17 = vadd.f32 %v15777_v7, %v14772_v21  ;;  %v18313_v10 = vpop.f32.mrb[165].mxu1 }
0x2a92   : > { %14776 = vst [vmem:[%s598_s22] sm:$0xff] %v14773_v17 }
0x2a93   : > { %20393 = shalt.err (!%p20390_p3)
}
0x2a94   : > { %s20394_s3 = scalar_lea.hbm %s26315_s4, 128  ;;  %s20398_s22 = scalar_lea.hbm %s26420_s28, 256 }
0x2a95   : > { %p20395_p4 = scmp.ne.s32.totalorder %s26315_s4, %s20394_s3  ;;  %p20399_p9 = scmp.lt.u32.totalorder %s26315_s4, %s26420_s28 }
0x2a96   : > { %p20400_p10 = scmp.lt.u32.totalorder %s20398_s22, %s20394_s3  ;;  %p20402_p12 = scmp.lt.u32.totalorder %s20394_s3, %s26315_s4 }
0x2a97   : > { %p20396_p7 = pnand %p20395_p4, %p20588_p5 }
0x2a98   : > { %p20401_p11 = por %p20400_p10, %p20399_p9 }
0x2a99   : > { %p20397_p8 = pneg %p20396_p7 }
0x2a9a   : > { %p20403_p13 = por %p20402_p12, %p20401_p11 }
0x2a9c   : > { %p20404_p0 = pnand %p20403_p13, %p20397_p8 }
0x2a9e   : > { %20407 = shalt.err (!%p20404_p0)
}
0x2a9f   : > { %20334 = dma.vmem_to_hbm [thread:$0]  (%p20588_p5), %s26317_s18, 128, %s26315_s4, %s14778_s5  }
0x2aa0 PF: > { %s26421_s23 = sld [smem:[#allocation8_spill]]  ;;  %s26422_s1 = sld [smem:[#allocation6_spill]] }
0x2aa6   : > { %p20340_p1 = scmp.ge.s32.totalorder %s26421_s23, 2  ;;  %s14803_s24 = sand.u32 1, %s26422_s1  }
0x2aa7   : > { %s14804_s27 = scalar_lea.sflag [#allocation4], %s14803_s24 }
0x2aa8   : > { %p20337_p2 = pnand %p20340_p1, %p20592_p6 }
0x2aaa   : > { %20425 = dma.done.wait (!%p20337_p2), %s14804_s27, 128  }
0x2aab   : > { %20427 = vsyncadd (!%p20337_p2), %s14804_s27, 4294967168  ;;  %s26424_s21 = sld [smem:[#allocation9_spill]]  ;;  %s26425_s3 = sld [smem:[#allocation7_spill]] }
0x2aac   : > { %s26426_s20 = sld [smem:[#allocation10_spill]]  ;;  %s26427_s0 = smov %s20434_s30 }
0x2ab1   : > { %p29_p3 = scmp.ge.s32.totalorder %s26424_s21, 4   ;;  %s26428_s30 = smov %s26425_s3 }
0x2ab3   :  { %31 = sbr.rel (!%p29_p3) target bundleno = 12 (0xc), region = 146 }
0x2aba   :  { %14809 = vsyncpa [#allocation4], 1 }
0x2abb   :  { %14811 = vsyncpa [#allocation4 + $0x1], 1 }

</bundles_post_ra>
